<compile_context>
chip_gen: v5e
topology: v5e:2x2
jax: 0.10.0
libtpu: 0.0.40
codegen_flags: <defaults>
</compile_context>

<pallas_src>
import functools

import jax
import jax.numpy as jnp
from jax.experimental import pallas as pl
from jax.experimental.pallas import tpu as pltpu

FILTERS = 16          # F
BLOCKS = 5
C_IN = 4
C144 = 9 * FILTERS    # 144
EPS = 1e-5            # BatchNorm eps (PyTorch default)
OUT_PAD = 128         # lane-dense output width: 81 policy logits + value + zero pad
VAL_COL = 81          # output column carrying the value


# ----------------------------------------------------------------------------
# Pallas kernel: the whole trunk + policy/value heads as matmuls / elementwise.
# ----------------------------------------------------------------------------
def _utttnet_kernel(
    x9_in_ref, x3_in_ref, emb9_ref, emb3_ref,
    w9_ref, wc1_ref, w3_ref, wg3_ref, wc3_ref, wea_ref, web_ref,
    b9_ref, bc1_ref, b3_ref, bg3_ref, bc3_ref,
    s_tr_ref, b_tr_ref,
    pv1_ref, bpv_ref, p2_ref, v2_ref, bv2_ref, vl_ref, bvl_ref,
    out_ref,
    *, tn: int,
):
    F = FILTERS

    def mm(a, w):
        # bf16 x bf16 operands, f32 accumulation on the MXU.
        return jnp.dot(a, w, preferred_element_type=jnp.float32)

    def act(t, bias):
        # bias-add + ReLU on the f32 MXU output; carried onward in bf16.
        return jnp.maximum(t + bias, 0.0).astype(jnp.bfloat16)

    def rows_to_cols(z):
        # (9*tn, c) rows=(cell, n-in-tile) -> (tn, 9*c) cols=(cell, c).
        # tn % 16 == 0 keeps the row slices sublane-tile aligned even in bf16;
        # only the lane concat is a real relayout.
        return jnp.concatenate([z[k * tn:(k + 1) * tn, :] for k in range(9)], axis=1)

    # --- input embedding: cat([x, in_conv(x)], dim=1) as one matmul per stream ---
    x9 = mm(x9_in_ref[...], emb9_ref[...]).astype(jnp.bfloat16)   # (9tn, 144)
    x3 = mm(x3_in_ref[...], emb3_ref[...]).astype(jnp.bfloat16)   # (tn, 144)
    x1 = None  # zeros; materialized lazily at block 0.
               # TODO(synk): x1 init unspecified in the inconsistent reference.

    # --- trunk: 5 StridedBlocks (unrolled) --------------------------------------
    for b in range(BLOCKS):
        # conv9 stage 1 (grouped 3x3 s3 + PixelShuffle + BN + ReLU) fused with
        # conv9to3 (3x3 s3 + BN + ReLU).  Fused 160-wide layout: cols
        # [0:128)+[144:160) = conv9 main, cols [128:144) = conv9to3 side, so the
        # side slice is lane-tile aligned and f9 feeds the next matmul unsliced
        # (its K rows 128:144 are zero in wc1).
        f9 = act(mm(x9, w9_ref[b]), b9_ref[b])                    # (9tn, 160)
        x9 = x9 + act(mm(f9, wc1_ref[b]), bc1_ref[b])             # 1x1 "Conv1d" + residual
        side9 = f9[:, 128:128 + F]                                # conv9to3 out (9tn, 16)

        # conv3 first 1x1 on cat([x3, x3c]) fused with conv3to1(x3): a single
        # (tn,288)x(288,160) matmul; the per-cell -> per-sample relayout of the
        # conv9to3 output is folded into the same lane concat.
        x3cat = jnp.concatenate(
            [x3] + [side9[k * tn:(k + 1) * tn, :] for k in range(9)], axis=1)
        h3 = act(mm(x3cat, w3_ref[b]), b3_ref[b])                 # (tn, 160)
        x1c = h3[:, 128:128 + F]                                  # conv3to1 out (tn, 16)
        h3b = act(mm(h3, wg3_ref[b]), bg3_ref[b])                 # grouped 3x3 + shuffle
        x3 = x3 + act(mm(h3b, wc3_ref[b]), bc3_ref[b])            # last 1x1 + residual

        # compress1 on cat([x1, x1c]) (no BN / ReLU); tiny 16-wide stream, kept f32.
        # (x1 never reaches the heads; kept for fidelity, DCE-able.)
        x1_d = jnp.dot(x1c.astype(jnp.float32), web_ref[b],
                       preferred_element_type=jnp.float32)
        if b == 0:
            x1 = x1_d                                             # x1 starts at zeros
        else:
            x1 = x1 + x1_d + jnp.dot(x1, wea_ref[b],
                                     preferred_element_type=jnp.float32)

    # trunk trailing BatchNorm + ReLU (applied to the 9x9 stream), bf16.
    x9 = jnp.maximum(x9 * s_tr_ref[...] + b_tr_ref[...], 0.0)

    # --- heads: policy 1x1 fused with value1 stride-3 conv (shared x9 LHS) ------
    fh = act(mm(x9, pv1_ref[...]), bpv_ref[...])                  # (9tn, 160)

    # policy: per-pixel 1x1 -> 81 logits -> log_softmax (f32).
    logits = rows_to_cols(mm(fh, p2_ref[...]))                    # (tn, 81) f32
    m = jnp.max(logits, axis=1, keepdims=True)
    s = logits - m
    logp = s - jnp.log(jnp.sum(jnp.exp(s), axis=1, keepdims=True))

    # value: 3x3 conv on the 3x3 coarse map -> Linear(16, 1) -> tanh (f32).
    v3 = rows_to_cols(fh[:, 128:128 + F])                         # (tn, 144) bf16
    vh = jnp.maximum(mm(v3, v2_ref[...]) + bv2_ref[...], 0.0)     # (tn, 16) f32
    v = jnp.tanh(jnp.sum(vh * vl_ref[...], axis=1, keepdims=True) + bvl_ref[...])

    # single lane-dense (tn, 128) store: [81 log-probs | value | zero pad]
    out_ref[...] = jnp.concatenate(
        [logp, v, jnp.zeros((tn, OUT_PAD - VAL_COL - 1), jnp.float32)], axis=1)


# ----------------------------------------------------------------------------
# Plain-JAX glue: deterministic parameter construction + layout plumbing.
# ----------------------------------------------------------------------------
def _normal(key, shape, scale=0.1):
    return scale * jax.random.normal(key, shape, dtype=jnp.float32)


def _bn_folded(key):
    """Deterministic inference-mode BatchNorm: (scale, bias) to fold."""
    k1, k2, k3, k4 = jax.random.split(key, 4)
    gamma = jax.random.uniform(k1, (FILTERS,), jnp.float32, 0.5, 1.5)
    beta = _normal(k2, (FILTERS,))
    mean = _normal(k3, (FILTERS,))
    var = jax.random.uniform(k4, (FILTERS,), jnp.float32, 0.5, 1.5)
    s = gamma / jnp.sqrt(var + EPS)
    return s, beta - mean * s


def _blockdiag9(m):
    return jnp.kron(jnp.eye(9, dtype=jnp.float32), m)


def _conv1x1_matrix(w):               # (Fout, Fin, 1, 1) -> (Fin, Fout)
    return w[:, :, 0, 0].T


def _cellconv3x3_matrix(w):           # (Fout, Fin, 3, 3) -> (9*Fin, Fout)
    fo, fi = w.shape[0], w.shape[1]
    return w.reshape(fo, fi, 9).transpose(2, 1, 0).reshape(9 * fi, fo)


def _grouped3x3_shuffle_matrix(wg):   # (9F, 1, 3, 3) grouped conv + PixelShuffle(3)
    F = FILTERS
    wg_r = wg.reshape(F, 9, 9)        # [out_channel, shuffle_pos, kernel_pos]
    a = jnp.einsum('osw,io->wiso', wg_r, jnp.eye(F, dtype=jnp.float32))
    return a.reshape(9 * F, 9 * F)    # rows (kernel_pos, ci), cols (shuffle_pos, co)


def _fuse_cols160(main, side):
    # (.., 144) main + (.., 16) side -> (.., 160) with the side at cols [128:144)
    # so its slice starts lane-tile aligned inside the kernel.
    return jnp.concatenate([main[..., :128], side, main[..., 128:]], axis=-1)


def _pad_rows160(w):
    # (144, n) -> (160, n): zero rows where the fused layout carries the side
    # output, so the full 160-wide activation feeds this matmul without slicing.
    z = jnp.zeros((FILTERS, w.shape[1]), w.dtype)
    return jnp.concatenate([w[:128], z, w[128:]], axis=0)


def _make_embed(key):
    """cat([identity(4 planes), in_conv(x)]) as a (36, 144) matrix."""
    win = _normal(key, (FILTERS - 4, 4, 1, 1))
    m = jnp.concatenate([jnp.eye(4, dtype=jnp.float32), win[:, :, 0, 0].T], axis=1)
    return _blockdiag9(m)             # (9*4, 9*F)


def _make_block_params(key):
    F = FILTERS
    ks = jax.random.split(key, 15)
    wg9 = _normal(ks[0], (9 * F, 1, 3, 3)); s1, b1 = _bn_folded(ks[1])
    wc1 = _normal(ks[2], (F, F, 1));        s2, b2 = _bn_folded(ks[3])
    w93 = _normal(ks[4], (F, F, 3, 3));     s93, b93 = _bn_folded(ks[5])
    w3a = _normal(ks[6], (F, 2 * F, 1, 1)); s3a, b3a = _bn_folded(ks[7])
    wg3 = _normal(ks[8], (9 * F, 1, 3, 3)); s3b, b3b = _bn_folded(ks[9])
    w3c = _normal(ks[10], (F, F, 1, 1));    s3c, b3c = _bn_folded(ks[11])
    w31 = _normal(ks[12], (F, F, 3, 3));    s31, b31 = _bn_folded(ks[13])
    wcmp = _normal(ks[14], (F, 2 * F, 1, 1))

    A_g9 = _grouped3x3_shuffle_matrix(wg9) * jnp.tile(s1, 9)[None, :]     # (144,144)
    B93 = _cellconv3x3_matrix(w93) * s93[None, :]                         # (144,16)
    A_c1 = _blockdiag9(wc1[:, :, 0].T) * jnp.tile(s2, 9)[None, :]         # (144,144)
    m3 = _conv1x1_matrix(w3a)                                             # (32,16)
    C3a = _blockdiag9(m3[:F, :]) * jnp.tile(s3a, 9)[None, :]              # (144,144)
    C3b = _blockdiag9(m3[F:, :]) * jnp.tile(s3a, 9)[None, :]              # (144,144)
    G3 = _grouped3x3_shuffle_matrix(wg3) * jnp.tile(s3b, 9)[None, :]      # (144,144)
    C3c = _blockdiag9(_conv1x1_matrix(w3c)) * jnp.tile(s3c, 9)[None, :]   # (144,144)
    D31 = _cellconv3x3_matrix(w31) * s31[None, :]                         # (144,16)
    mc = _conv1x1_matrix(wcmp)                                            # (32,16)

    return dict(
        # fused [conv9 | conv9to3] and [conv3-1x1 on cat(x3, x3c) | conv3to1(x3)]
        W9=_fuse_cols160(A_g9, B93),                                      # (144,160)
        W3=jnp.concatenate(
            [_fuse_cols160(C3a, D31),
             _fuse_cols160(C3b, jnp.zeros((C144, F), jnp.float32))], axis=0),  # (288,160)
        # downstream weights consume the full fused 160-wide tensor (zero K rows)
        WC1=_pad_rows160(A_c1),                                           # (160,144)
        WG3=_pad_rows160(G3),                                             # (160,144)
        WC3=C3c,                                                          # (144,144)
        WEA=mc[:F, :], WEB=mc[F:, :],                                     # (16,16) each
        B9=_fuse_cols160(jnp.tile(b1, 9)[None, :], b93[None, :]),         # (1,160)
        B3=_fuse_cols160(jnp.tile(b3a, 9)[None, :], b31[None, :]),        # (1,160)
        BC1=jnp.tile(b2, 9)[None, :],                                     # (1,144)
        BG3=jnp.tile(b3b, 9)[None, :],
        BC3=jnp.tile(b3c, 9)[None, :],
    )


def _make_head_params(key):
    F = FILTERS
    ks = jax.random.split(key, 10)
    s_tr, b_tr = _bn_folded(ks[0])                                        # trailing BN
    wp1 = _normal(ks[1], (F, F, 1, 1)); sp, bp = _bn_folded(ks[2])
    wp2 = _normal(ks[3], (1, F, 1, 1))
    wv1 = _normal(ks[4], (F, F, 3, 3)); sv1, bv1 = _bn_folded(ks[5])
    wv2 = _normal(ks[6], (F, F, 3, 3))
    bv2 = _normal(ks[7], (F,))
    wl = _normal(ks[8], (1, F))
    bl = _normal(ks[9], (1,))
    P1 = _blockdiag9(_conv1x1_matrix(wp1)) * jnp.tile(sp, 9)[None, :]     # (144,144)
    V1 = _cellconv3x3_matrix(wv1) * sv1[None, :]                          # (144,16)
    P2 = jnp.kron(jnp.eye(9, dtype=jnp.float32), wp2[0, :, 0, 0][:, None])  # (144,9)
    return dict(
        s_tr=jnp.tile(s_tr, 9)[None, :].astype(jnp.bfloat16),
        b_tr=jnp.tile(b_tr, 9)[None, :].astype(jnp.bfloat16),
        PV1=_fuse_cols160(P1, V1).astype(jnp.bfloat16),                   # (144,160)
        bpv=_fuse_cols160(jnp.tile(bp, 9)[None, :], bv1[None, :]),        # (1,160) f32
        P2=_pad_rows160(P2).astype(jnp.bfloat16),                         # (160,9)
        V2=_cellconv3x3_matrix(wv2).astype(jnp.bfloat16),                 # (144,16)
        bv2=bv2[None, :],                                                 # (1,16) f32
        vl=wl,                                                            # (1,16) f32
        bvl=bl[None, :],                                                  # (1,1) f32
    )


def init_params(key):
    keys = jax.random.split(key, BLOCKS + 3)
    blk = [_make_block_params(keys[2 + i]) for i in range(BLOCKS)]

    def wstack(name):      # MXU weights: bf16
        return jnp.stack([p[name] for p in blk]).astype(jnp.bfloat16)

    def fstack(name):      # biases added to f32 MXU outputs / tiny x1 stream: f32
        return jnp.stack([p[name] for p in blk])

    params = dict(
        emb9=_make_embed(keys[0]).astype(jnp.bfloat16),
        emb3=_make_embed(keys[1]).astype(jnp.bfloat16),
        W9=wstack("W9"), WC1=wstack("WC1"), W3=wstack("W3"),
        WG3=wstack("WG3"), WC3=wstack("WC3"),
        WEA=fstack("WEA"), WEB=fstack("WEB"),
        B9=fstack("B9"), BC1=fstack("BC1"), B3=fstack("B3"),
        BG3=fstack("BG3"), BC3=fstack("BC3"),
    )
    params.update(_make_head_params(keys[2 + BLOCKS]))
    return params


def _round_up(a, m):
    return (a + m - 1) // m * m


def _vmem_limit_bytes():
    # ~3/4 of physical VMEM (v5e/v6e: 128 MiB, v7x: 64 MiB); conservative fallback.
    try:
        cap = int(pltpu.get_tpu_info().vmem_capacity_bytes)
        return min(cap * 3 // 4, 80 * 1024 * 1024)
    except Exception:
        return 40 * 1024 * 1024


def utttnet_forward(x, params, *, batch_tile=256):
    """x: (N, 4, 9, 9) float32 (NCHW).  Returns (log-policy (N,9,9), value (N,1))."""
    N = x.shape[0]
    # Tile: multiple of 16 rows (bf16 sublane tile) and at most half the padded
    # batch, so there are >=2 grid steps whenever possible (both v7x TCs busy).
    half = _round_up(max(1, (N + 1) // 2), 16)
    tn = max(16, min(batch_tile, half))
    n_pad = _round_up(N, tn)
    n_tiles = n_pad // tn

    xb = x.astype(jnp.bfloat16)                    # cast before the relayout
    if n_pad != N:
        xb = jnp.pad(xb, ((0, n_pad - N), (0, 0), (0, 0), (0, 0)))

    # 9x9 board -> rows (tile, cell bh*3+bw, sample-in-tile), cols (within pos, ch).
    x9_in = (xb.reshape(n_tiles, tn, C_IN, 3, 3, 3, 3)
               .transpose(0, 3, 5, 1, 4, 6, 2)
               .reshape(9 * n_pad, 9 * C_IN))
    # coarse 3x3 stride-3 view -> rows sample, cols (coarse pos, channel).
    x3_in = xb[:, :, ::3, ::3].transpose(0, 2, 3, 1).reshape(n_pad, 9 * C_IN)

    inputs = (
        x9_in, x3_in, params["emb9"], params["emb3"],
        params["W9"], params["WC1"], params["W3"], params["WG3"], params["WC3"],
        params["WEA"], params["WEB"],
        params["B9"], params["BC1"], params["B3"], params["BG3"], params["BC3"],
        params["s_tr"], params["b_tr"],
        params["PV1"], params["bpv"], params["P2"],
        params["V2"], params["bv2"], params["vl"], params["bvl"],
    )

    def resident(a):   # weights/biases: same block every grid step -> stay in VMEM
        nd = a.ndim
        return pl.BlockSpec(a.shape, lambda i: (0,) * nd)

    in_specs = [
        pl.BlockSpec((9 * tn, 9 * C_IN), lambda i: (i, 0)),   # x9_in (batch-tiled)
        pl.BlockSpec((tn, 9 * C_IN), lambda i: (i, 0)),       # x3_in (batch-tiled)
    ] + [resident(a) for a in inputs[2:]]

    out = pl.pallas_call(
        functools.partial(_utttnet_kernel, tn=tn),
        grid=(n_tiles,),
        out_shape=jax.ShapeDtypeStruct((n_pad, OUT_PAD), jnp.float32),
        in_specs=in_specs,
        out_specs=pl.BlockSpec((tn, OUT_PAD), lambda i: (i, 0)),
        compiler_params=pltpu.CompilerParams(
            dimension_semantics=("parallel",),
            vmem_limit_bytes=_vmem_limit_bytes()),
    )(*inputs)

    # drop lane/batch padding; (cell, within) column order -> torch raster (h, w).
    p = (out[:N, :81].reshape(N, 3, 3, 3, 3)
         .transpose(0, 1, 3, 2, 4).reshape(N, 9, 9))
    v = out[:N, VAL_COL:VAL_COL + 1]
    return p, v


if __name__ == "__main__":
    key = jax.random.PRNGKey(0)
    k_x, k_p = jax.random.split(key)
    N = 2
    x = jax.random.normal(k_x, (N, C_IN, 9, 9), dtype=jnp.float32)
    params = init_params(k_p)

    p, v = jax.jit(lambda xx: utttnet_forward(xx, params))(x)
    jax.block_until_ready((p, v))

    assert p.shape == (N, 9, 9) and v.shape == (N, 1)
    assert bool(jnp.all(jnp.isfinite(p))) and bool(jnp.all(jnp.isfinite(v)))
    # log_softmax rows must exponentiate-sum to 1; tanh output must be in [-1, 1]
    probs_sum = jnp.sum(jnp.exp(p), axis=(1, 2))
    assert bool(jnp.all(jnp.abs(probs_sum - 1.0) < 1e-3))
    assert bool(jnp.all(jnp.abs(v) <= 1.0))
    print("KERNEL_OK")
</pallas_src>

<mosaic_0001>
module attributes {stable_mosaic.version = 11 : i64} {
  func.func @_utttnet_kernel(%arg0: i32, %arg1: memref<144x36xbf16, #tpu.memory_space<vmem>>, %arg2: memref<16x36xbf16, #tpu.memory_space<vmem>>, %arg3: memref<36x144xbf16, #tpu.memory_space<vmem>>, %arg4: memref<36x144xbf16, #tpu.memory_space<vmem>>, %arg5: memref<5x144x160xbf16, #tpu.memory_space<vmem>>, %arg6: memref<5x160x144xbf16, #tpu.memory_space<vmem>>, %arg7: memref<5x288x160xbf16, #tpu.memory_space<vmem>>, %arg8: memref<5x160x144xbf16, #tpu.memory_space<vmem>>, %arg9: memref<5x144x144xbf16, #tpu.memory_space<vmem>>, %arg10: memref<5x16x16xf32, #tpu.memory_space<vmem>>, %arg11: memref<5x16x16xf32, #tpu.memory_space<vmem>>, %arg12: memref<5x1x160xf32, #tpu.memory_space<vmem>>, %arg13: memref<5x1x144xf32, #tpu.memory_space<vmem>>, %arg14: memref<5x1x160xf32, #tpu.memory_space<vmem>>, %arg15: memref<5x1x144xf32, #tpu.memory_space<vmem>>, %arg16: memref<5x1x144xf32, #tpu.memory_space<vmem>>, %arg17: memref<1x144xbf16, #tpu.memory_space<vmem>>, %arg18: memref<1x144xbf16, #tpu.memory_space<vmem>>, %arg19: memref<144x160xbf16, #tpu.memory_space<vmem>>, %arg20: memref<1x160xf32, #tpu.memory_space<vmem>>, %arg21: memref<160x9xbf16, #tpu.memory_space<vmem>>, %arg22: memref<144x16xbf16, #tpu.memory_space<vmem>>, %arg23: memref<1x16xf32, #tpu.memory_space<vmem>>, %arg24: memref<1x16xf32, #tpu.memory_space<vmem>>, %arg25: memref<1x1xf32, #tpu.memory_space<vmem>>, %arg26: memref<16x128xf32, #tpu.memory_space<vmem>>) attributes {dimension_semantics = [#tpu.dimension_semantics<parallel>], iteration_bounds = array<i64: 1>, scalar_prefetch = 0 : i64, scratch_operands = 0 : i64, tpu.core_type = #tpu.core_type<tc>, window_params = [{transform_indices = @transform_0, window_bounds = array<i64: 144, 36>}, {transform_indices = @transform_1, window_bounds = array<i64: 16, 36>}, {pipeline_mode = #tpu.pipeline_mode<synchronous>, transform_indices = @transform_2, window_bounds = array<i64: 36, 144>}, {pipeline_mode = #tpu.pipeline_mode<synchronous>, transform_indices = @transform_3, window_bounds = array<i64: 36, 144>}, {pipeline_mode = #tpu.pipeline_mode<synchronous>, transform_indices = @transform_4, window_bounds = array<i64: 5, 144, 160>}, {pipeline_mode = #tpu.pipeline_mode<synchronous>, transform_indices = @transform_5, window_bounds = array<i64: 5, 160, 144>}, {pipeline_mode = #tpu.pipeline_mode<synchronous>, transform_indices = @transform_6, window_bounds = array<i64: 5, 288, 160>}, {pipeline_mode = #tpu.pipeline_mode<synchronous>, transform_indices = @transform_7, window_bounds = array<i64: 5, 160, 144>}, {pipeline_mode = #tpu.pipeline_mode<synchronous>, transform_indices = @transform_8, window_bounds = array<i64: 5, 144, 144>}, {pipeline_mode = #tpu.pipeline_mode<synchronous>, transform_indices = @transform_9, window_bounds = array<i64: 5, 16, 16>}, {pipeline_mode = #tpu.pipeline_mode<synchronous>, transform_indices = @transform_10, window_bounds = array<i64: 5, 16, 16>}, {pipeline_mode = #tpu.pipeline_mode<synchronous>, transform_indices = @transform_11, window_bounds = array<i64: 5, 1, 160>}, {pipeline_mode = #tpu.pipeline_mode<synchronous>, transform_indices = @transform_12, window_bounds = array<i64: 5, 1, 144>}, {pipeline_mode = #tpu.pipeline_mode<synchronous>, transform_indices = @transform_13, window_bounds = array<i64: 5, 1, 160>}, {pipeline_mode = #tpu.pipeline_mode<synchronous>, transform_indices = @transform_14, window_bounds = array<i64: 5, 1, 144>}, {pipeline_mode = #tpu.pipeline_mode<synchronous>, transform_indices = @transform_15, window_bounds = array<i64: 5, 1, 144>}, {pipeline_mode = #tpu.pipeline_mode<synchronous>, transform_indices = @transform_16, window_bounds = array<i64: 1, 144>}, {pipeline_mode = #tpu.pipeline_mode<synchronous>, transform_indices = @transform_17, window_bounds = array<i64: 1, 144>}, {pipeline_mode = #tpu.pipeline_mode<synchronous>, transform_indices = @transform_18, window_bounds = array<i64: 144, 160>}, {pipeline_mode = #tpu.pipeline_mode<synchronous>, transform_indices = @transform_19, window_bounds = array<i64: 1, 160>}, {pipeline_mode = #tpu.pipeline_mode<synchronous>, transform_indices = @transform_20, window_bounds = array<i64: 160, 9>}, {pipeline_mode = #tpu.pipeline_mode<synchronous>, transform_indices = @transform_21, window_bounds = array<i64: 144, 16>}, {pipeline_mode = #tpu.pipeline_mode<synchronous>, transform_indices = @transform_22, window_bounds = array<i64: 1, 16>}, {pipeline_mode = #tpu.pipeline_mode<synchronous>, transform_indices = @transform_23, window_bounds = array<i64: 1, 16>}, {pipeline_mode = #tpu.pipeline_mode<synchronous>, transform_indices = @transform_24, window_bounds = array<i64: 1, 1>}, {transform_indices = @transform_25, window_bounds = array<i64: 16, 128>}]} {
    %c0 = arith.constant 0 : index
    %c0_0 = arith.constant 0 : index
    %0 = vector.load %arg1[%c0, %c0_0] : memref<144x36xbf16, #tpu.memory_space<vmem>>, vector<144x36xbf16>
    %c0_1 = arith.constant 0 : index
    %c0_2 = arith.constant 0 : index
    %1 = vector.load %arg3[%c0_1, %c0_2] : memref<36x144xbf16, #tpu.memory_space<vmem>>, vector<36x144xbf16>
    %cst = arith.constant dense<0.000000e+00> : vector<144x144xf32>
    %2 = tpu.matmul %0, %1, %cst {dimension_numbers = #tpu.dot_dimension_numbers<[1], [0], [0], [1], [0, 0, 1, 1], [], []>} : vector<144x36xbf16>, vector<36x144xbf16>, vector<144x144xf32> -> vector<144x144xf32>
    %3 = arith.truncf %2 : vector<144x144xf32> to vector<144x144xbf16>
    %c0_3 = arith.constant 0 : index
    %c0_4 = arith.constant 0 : index
    %c0_5 = arith.constant 0 : index
    %4 = vector.load %arg5[%c0_3, %c0_4, %c0_5] : memref<5x144x160xbf16, #tpu.memory_space<vmem>>, vector<1x144x160xbf16>
    %5 = vector.shape_cast %4 : vector<1x144x160xbf16> to vector<144x160xbf16>
    %cst_6 = arith.constant dense<0.000000e+00> : vector<144x160xf32>
    %6 = tpu.matmul %3, %5, %cst_6 {dimension_numbers = #tpu.dot_dimension_numbers<[1], [0], [0], [1], [0, 0, 1, 1], [], []>} : vector<144x144xbf16>, vector<144x160xbf16>, vector<144x160xf32> -> vector<144x160xf32>
    %c0_7 = arith.constant 0 : index
    %c0_8 = arith.constant 0 : index
    %c0_9 = arith.constant 0 : index
    %7 = vector.load %arg12[%c0_7, %c0_8, %c0_9] : memref<5x1x160xf32, #tpu.memory_space<vmem>>, vector<1x1x160xf32>
    %8 = vector.shape_cast %7 : vector<1x1x160xf32> to vector<1x160xf32>
    %9 = vector.broadcast %8 : vector<1x160xf32> to vector<144x160xf32>
    %10 = arith.addf %6, %9 : vector<144x160xf32>
    %cst_10 = arith.constant 0.000000e+00 : f32
    %11 = vector.broadcast %cst_10 : f32 to vector<144x160xf32>
    %12 = arith.maximumf %10, %11 : vector<144x160xf32>
    %13 = arith.truncf %12 : vector<144x160xf32> to vector<144x160xbf16>
    %c0_11 = arith.constant 0 : index
    %c0_12 = arith.constant 0 : index
    %c0_13 = arith.constant 0 : index
    %14 = vector.load %arg6[%c0_11, %c0_12, %c0_13] : memref<5x160x144xbf16, #tpu.memory_space<vmem>>, vector<1x160x144xbf16>
    %15 = vector.shape_cast %14 : vector<1x160x144xbf16> to vector<160x144xbf16>
    %cst_14 = arith.constant dense<0.000000e+00> : vector<144x144xf32>
    %16 = tpu.matmul %13, %15, %cst_14 {dimension_numbers = #tpu.dot_dimension_numbers<[1], [0], [0], [1], [0, 0, 1, 1], [], []>} : vector<144x160xbf16>, vector<160x144xbf16>, vector<144x144xf32> -> vector<144x144xf32>
    %c0_15 = arith.constant 0 : index
    %c0_16 = arith.constant 0 : index
    %c0_17 = arith.constant 0 : index
    %17 = vector.load %arg13[%c0_15, %c0_16, %c0_17] : memref<5x1x144xf32, #tpu.memory_space<vmem>>, vector<1x1x144xf32>
    %18 = vector.shape_cast %17 : vector<1x1x144xf32> to vector<1x144xf32>
    %19 = vector.broadcast %18 : vector<1x144xf32> to vector<144x144xf32>
    %20 = arith.addf %16, %19 : vector<144x144xf32>
    %cst_18 = arith.constant 0.000000e+00 : f32
    %21 = vector.broadcast %cst_18 : f32 to vector<144x144xf32>
    %22 = arith.maximumf %20, %21 : vector<144x144xf32>
    %23 = arith.truncf %22 : vector<144x144xf32> to vector<144x144xbf16>
    %24 = arith.addf %3, %23 : vector<144x144xbf16>
    %c1 = arith.constant 1 : index
    %c0_19 = arith.constant 0 : index
    %c0_20 = arith.constant 0 : index
    %25 = vector.load %arg5[%c1, %c0_19, %c0_20] : memref<5x144x160xbf16, #tpu.memory_space<vmem>>, vector<1x144x160xbf16>
    %26 = vector.shape_cast %25 : vector<1x144x160xbf16> to vector<144x160xbf16>
    %cst_21 = arith.constant dense<0.000000e+00> : vector<144x160xf32>
    %27 = tpu.matmul %24, %26, %cst_21 {dimension_numbers = #tpu.dot_dimension_numbers<[1], [0], [0], [1], [0, 0, 1, 1], [], []>} : vector<144x144xbf16>, vector<144x160xbf16>, vector<144x160xf32> -> vector<144x160xf32>
    %c1_22 = arith.constant 1 : index
    %c0_23 = arith.constant 0 : index
    %c0_24 = arith.constant 0 : index
    %28 = vector.load %arg12[%c1_22, %c0_23, %c0_24] : memref<5x1x160xf32, #tpu.memory_space<vmem>>, vector<1x1x160xf32>
    %29 = vector.shape_cast %28 : vector<1x1x160xf32> to vector<1x160xf32>
    %30 = vector.broadcast %29 : vector<1x160xf32> to vector<144x160xf32>
    %31 = arith.addf %27, %30 : vector<144x160xf32>
    %cst_25 = arith.constant 0.000000e+00 : f32
    %32 = vector.broadcast %cst_25 : f32 to vector<144x160xf32>
    %33 = arith.maximumf %31, %32 : vector<144x160xf32>
    %34 = arith.truncf %33 : vector<144x160xf32> to vector<144x160xbf16>
    %c1_26 = arith.constant 1 : index
    %c0_27 = arith.constant 0 : index
    %c0_28 = arith.constant 0 : index
    %35 = vector.load %arg6[%c1_26, %c0_27, %c0_28] : memref<5x160x144xbf16, #tpu.memory_space<vmem>>, vector<1x160x144xbf16>
    %36 = vector.shape_cast %35 : vector<1x160x144xbf16> to vector<160x144xbf16>
    %cst_29 = arith.constant dense<0.000000e+00> : vector<144x144xf32>
    %37 = tpu.matmul %34, %36, %cst_29 {dimension_numbers = #tpu.dot_dimension_numbers<[1], [0], [0], [1], [0, 0, 1, 1], [], []>} : vector<144x160xbf16>, vector<160x144xbf16>, vector<144x144xf32> -> vector<144x144xf32>
    %c1_30 = arith.constant 1 : index
    %c0_31 = arith.constant 0 : index
    %c0_32 = arith.constant 0 : index
    %38 = vector.load %arg13[%c1_30, %c0_31, %c0_32] : memref<5x1x144xf32, #tpu.memory_space<vmem>>, vector<1x1x144xf32>
    %39 = vector.shape_cast %38 : vector<1x1x144xf32> to vector<1x144xf32>
    %40 = vector.broadcast %39 : vector<1x144xf32> to vector<144x144xf32>
    %41 = arith.addf %37, %40 : vector<144x144xf32>
    %cst_33 = arith.constant 0.000000e+00 : f32
    %42 = vector.broadcast %cst_33 : f32 to vector<144x144xf32>
    %43 = arith.maximumf %41, %42 : vector<144x144xf32>
    %44 = arith.truncf %43 : vector<144x144xf32> to vector<144x144xbf16>
    %45 = arith.addf %24, %44 : vector<144x144xbf16>
    %c2 = arith.constant 2 : index
    %c0_34 = arith.constant 0 : index
    %c0_35 = arith.constant 0 : index
    %46 = vector.load %arg5[%c2, %c0_34, %c0_35] : memref<5x144x160xbf16, #tpu.memory_space<vmem>>, vector<1x144x160xbf16>
    %47 = vector.shape_cast %46 : vector<1x144x160xbf16> to vector<144x160xbf16>
    %cst_36 = arith.constant dense<0.000000e+00> : vector<144x160xf32>
    %48 = tpu.matmul %45, %47, %cst_36 {dimension_numbers = #tpu.dot_dimension_numbers<[1], [0], [0], [1], [0, 0, 1, 1], [], []>} : vector<144x144xbf16>, vector<144x160xbf16>, vector<144x160xf32> -> vector<144x160xf32>
    %c2_37 = arith.constant 2 : index
    %c0_38 = arith.constant 0 : index
    %c0_39 = arith.constant 0 : index
    %49 = vector.load %arg12[%c2_37, %c0_38, %c0_39] : memref<5x1x160xf32, #tpu.memory_space<vmem>>, vector<1x1x160xf32>
    %50 = vector.shape_cast %49 : vector<1x1x160xf32> to vector<1x160xf32>
    %51 = vector.broadcast %50 : vector<1x160xf32> to vector<144x160xf32>
    %52 = arith.addf %48, %51 : vector<144x160xf32>
    %cst_40 = arith.constant 0.000000e+00 : f32
    %53 = vector.broadcast %cst_40 : f32 to vector<144x160xf32>
    %54 = arith.maximumf %52, %53 : vector<144x160xf32>
    %55 = arith.truncf %54 : vector<144x160xf32> to vector<144x160xbf16>
    %c2_41 = arith.constant 2 : index
    %c0_42 = arith.constant 0 : index
    %c0_43 = arith.constant 0 : index
    %56 = vector.load %arg6[%c2_41, %c0_42, %c0_43] : memref<5x160x144xbf16, #tpu.memory_space<vmem>>, vector<1x160x144xbf16>
    %57 = vector.shape_cast %56 : vector<1x160x144xbf16> to vector<160x144xbf16>
    %cst_44 = arith.constant dense<0.000000e+00> : vector<144x144xf32>
    %58 = tpu.matmul %55, %57, %cst_44 {dimension_numbers = #tpu.dot_dimension_numbers<[1], [0], [0], [1], [0, 0, 1, 1], [], []>} : vector<144x160xbf16>, vector<160x144xbf16>, vector<144x144xf32> -> vector<144x144xf32>
    %c2_45 = arith.constant 2 : index
    %c0_46 = arith.constant 0 : index
    %c0_47 = arith.constant 0 : index
    %59 = vector.load %arg13[%c2_45, %c0_46, %c0_47] : memref<5x1x144xf32, #tpu.memory_space<vmem>>, vector<1x1x144xf32>
    %60 = vector.shape_cast %59 : vector<1x1x144xf32> to vector<1x144xf32>
    %61 = vector.broadcast %60 : vector<1x144xf32> to vector<144x144xf32>
    %62 = arith.addf %58, %61 : vector<144x144xf32>
    %cst_48 = arith.constant 0.000000e+00 : f32
    %63 = vector.broadcast %cst_48 : f32 to vector<144x144xf32>
    %64 = arith.maximumf %62, %63 : vector<144x144xf32>
    %65 = arith.truncf %64 : vector<144x144xf32> to vector<144x144xbf16>
    %66 = arith.addf %45, %65 : vector<144x144xbf16>
    %c3 = arith.constant 3 : index
    %c0_49 = arith.constant 0 : index
    %c0_50 = arith.constant 0 : index
    %67 = vector.load %arg5[%c3, %c0_49, %c0_50] : memref<5x144x160xbf16, #tpu.memory_space<vmem>>, vector<1x144x160xbf16>
    %68 = vector.shape_cast %67 : vector<1x144x160xbf16> to vector<144x160xbf16>
    %cst_51 = arith.constant dense<0.000000e+00> : vector<144x160xf32>
    %69 = tpu.matmul %66, %68, %cst_51 {dimension_numbers = #tpu.dot_dimension_numbers<[1], [0], [0], [1], [0, 0, 1, 1], [], []>} : vector<144x144xbf16>, vector<144x160xbf16>, vector<144x160xf32> -> vector<144x160xf32>
    %c3_52 = arith.constant 3 : index
    %c0_53 = arith.constant 0 : index
    %c0_54 = arith.constant 0 : index
    %70 = vector.load %arg12[%c3_52, %c0_53, %c0_54] : memref<5x1x160xf32, #tpu.memory_space<vmem>>, vector<1x1x160xf32>
    %71 = vector.shape_cast %70 : vector<1x1x160xf32> to vector<1x160xf32>
    %72 = vector.broadcast %71 : vector<1x160xf32> to vector<144x160xf32>
    %73 = arith.addf %69, %72 : vector<144x160xf32>
    %cst_55 = arith.constant 0.000000e+00 : f32
    %74 = vector.broadcast %cst_55 : f32 to vector<144x160xf32>
    %75 = arith.maximumf %73, %74 : vector<144x160xf32>
    %76 = arith.truncf %75 : vector<144x160xf32> to vector<144x160xbf16>
    %c3_56 = arith.constant 3 : index
    %c0_57 = arith.constant 0 : index
    %c0_58 = arith.constant 0 : index
    %77 = vector.load %arg6[%c3_56, %c0_57, %c0_58] : memref<5x160x144xbf16, #tpu.memory_space<vmem>>, vector<1x160x144xbf16>
    %78 = vector.shape_cast %77 : vector<1x160x144xbf16> to vector<160x144xbf16>
    %cst_59 = arith.constant dense<0.000000e+00> : vector<144x144xf32>
    %79 = tpu.matmul %76, %78, %cst_59 {dimension_numbers = #tpu.dot_dimension_numbers<[1], [0], [0], [1], [0, 0, 1, 1], [], []>} : vector<144x160xbf16>, vector<160x144xbf16>, vector<144x144xf32> -> vector<144x144xf32>
    %c3_60 = arith.constant 3 : index
    %c0_61 = arith.constant 0 : index
    %c0_62 = arith.constant 0 : index
    %80 = vector.load %arg13[%c3_60, %c0_61, %c0_62] : memref<5x1x144xf32, #tpu.memory_space<vmem>>, vector<1x1x144xf32>
    %81 = vector.shape_cast %80 : vector<1x1x144xf32> to vector<1x144xf32>
    %82 = vector.broadcast %81 : vector<1x144xf32> to vector<144x144xf32>
    %83 = arith.addf %79, %82 : vector<144x144xf32>
    %cst_63 = arith.constant 0.000000e+00 : f32
    %84 = vector.broadcast %cst_63 : f32 to vector<144x144xf32>
    %85 = arith.maximumf %83, %84 : vector<144x144xf32>
    %86 = arith.truncf %85 : vector<144x144xf32> to vector<144x144xbf16>
    %87 = arith.addf %66, %86 : vector<144x144xbf16>
    %c4 = arith.constant 4 : index
    %c0_64 = arith.constant 0 : index
    %c0_65 = arith.constant 0 : index
    %88 = vector.load %arg5[%c4, %c0_64, %c0_65] : memref<5x144x160xbf16, #tpu.memory_space<vmem>>, vector<1x144x160xbf16>
    %89 = vector.shape_cast %88 : vector<1x144x160xbf16> to vector<144x160xbf16>
    %cst_66 = arith.constant dense<0.000000e+00> : vector<144x160xf32>
    %90 = tpu.matmul %87, %89, %cst_66 {dimension_numbers = #tpu.dot_dimension_numbers<[1], [0], [0], [1], [0, 0, 1, 1], [], []>} : vector<144x144xbf16>, vector<144x160xbf16>, vector<144x160xf32> -> vector<144x160xf32>
    %c4_67 = arith.constant 4 : index
    %c0_68 = arith.constant 0 : index
    %c0_69 = arith.constant 0 : index
    %91 = vector.load %arg12[%c4_67, %c0_68, %c0_69] : memref<5x1x160xf32, #tpu.memory_space<vmem>>, vector<1x1x160xf32>
    %92 = vector.shape_cast %91 : vector<1x1x160xf32> to vector<1x160xf32>
    %93 = vector.broadcast %92 : vector<1x160xf32> to vector<144x160xf32>
    %94 = arith.addf %90, %93 : vector<144x160xf32>
    %cst_70 = arith.constant 0.000000e+00 : f32
    %95 = vector.broadcast %cst_70 : f32 to vector<144x160xf32>
    %96 = arith.maximumf %94, %95 : vector<144x160xf32>
    %97 = arith.truncf %96 : vector<144x160xf32> to vector<144x160xbf16>
    %c4_71 = arith.constant 4 : index
    %c0_72 = arith.constant 0 : index
    %c0_73 = arith.constant 0 : index
    %98 = vector.load %arg6[%c4_71, %c0_72, %c0_73] : memref<5x160x144xbf16, #tpu.memory_space<vmem>>, vector<1x160x144xbf16>
    %99 = vector.shape_cast %98 : vector<1x160x144xbf16> to vector<160x144xbf16>
    %cst_74 = arith.constant dense<0.000000e+00> : vector<144x144xf32>
    %100 = tpu.matmul %97, %99, %cst_74 {dimension_numbers = #tpu.dot_dimension_numbers<[1], [0], [0], [1], [0, 0, 1, 1], [], []>} : vector<144x160xbf16>, vector<160x144xbf16>, vector<144x144xf32> -> vector<144x144xf32>
    %c4_75 = arith.constant 4 : index
    %c0_76 = arith.constant 0 : index
    %c0_77 = arith.constant 0 : index
    %101 = vector.load %arg13[%c4_75, %c0_76, %c0_77] : memref<5x1x144xf32, #tpu.memory_space<vmem>>, vector<1x1x144xf32>
    %102 = vector.shape_cast %101 : vector<1x1x144xf32> to vector<1x144xf32>
    %103 = vector.broadcast %102 : vector<1x144xf32> to vector<144x144xf32>
    %104 = arith.addf %100, %103 : vector<144x144xf32>
    %cst_78 = arith.constant 0.000000e+00 : f32
    %105 = vector.broadcast %cst_78 : f32 to vector<144x144xf32>
    %106 = arith.maximumf %104, %105 : vector<144x144xf32>
    %107 = arith.truncf %106 : vector<144x144xf32> to vector<144x144xbf16>
    %108 = arith.addf %87, %107 : vector<144x144xbf16>
    %c0_79 = arith.constant 0 : index
    %c0_80 = arith.constant 0 : index
    %109 = vector.load %arg17[%c0_79, %c0_80] : memref<1x144xbf16, #tpu.memory_space<vmem>>, vector<1x144xbf16>
    %110 = vector.broadcast %109 : vector<1x144xbf16> to vector<144x144xbf16>
    %111 = arith.mulf %108, %110 : vector<144x144xbf16>
    %c0_81 = arith.constant 0 : index
    %c0_82 = arith.constant 0 : index
    %112 = vector.load %arg18[%c0_81, %c0_82] : memref<1x144xbf16, #tpu.memory_space<vmem>>, vector<1x144xbf16>
    %113 = vector.broadcast %112 : vector<1x144xbf16> to vector<144x144xbf16>
    %114 = arith.addf %111, %113 : vector<144x144xbf16>
    %cst_83 = arith.constant 0.000000e+00 : bf16
    %115 = vector.broadcast %cst_83 : bf16 to vector<144x144xbf16>
    %116 = arith.maximumf %114, %115 : vector<144x144xbf16>
    %c0_84 = arith.constant 0 : index
    %c0_85 = arith.constant 0 : index
    %117 = vector.load %arg19[%c0_84, %c0_85] : memref<144x160xbf16, #tpu.memory_space<vmem>>, vector<144x160xbf16>
    %cst_86 = arith.constant dense<0.000000e+00> : vector<144x160xf32>
    %118 = tpu.matmul %116, %117, %cst_86 {dimension_numbers = #tpu.dot_dimension_numbers<[1], [0], [0], [1], [0, 0, 1, 1], [], []>} : vector<144x144xbf16>, vector<144x160xbf16>, vector<144x160xf32> -> vector<144x160xf32>
    %c0_87 = arith.constant 0 : index
    %c0_88 = arith.constant 0 : index
    %119 = vector.load %arg20[%c0_87, %c0_88] : memref<1x160xf32, #tpu.memory_space<vmem>>, vector<1x160xf32>
    %120 = vector.broadcast %119 : vector<1x160xf32> to vector<144x160xf32>
    %121 = arith.addf %118, %120 : vector<144x160xf32>
    %cst_89 = arith.constant 0.000000e+00 : f32
    %122 = vector.broadcast %cst_89 : f32 to vector<144x160xf32>
    %123 = arith.maximumf %121, %122 : vector<144x160xf32>
    %124 = arith.truncf %123 : vector<144x160xf32> to vector<144x160xbf16>
    %c0_90 = arith.constant 0 : index
    %c0_91 = arith.constant 0 : index
    %125 = vector.load %arg21[%c0_90, %c0_91] : memref<160x9xbf16, #tpu.memory_space<vmem>>, vector<160x9xbf16>
    %cst_92 = arith.constant dense<0.000000e+00> : vector<144x9xf32>
    %126 = tpu.matmul %124, %125, %cst_92 {dimension_numbers = #tpu.dot_dimension_numbers<[1], [0], [0], [1], [0, 0, 1, 1], [], []>} : vector<144x160xbf16>, vector<160x9xbf16>, vector<144x9xf32> -> vector<144x9xf32>
    %127 = vector.extract_strided_slice %126 {offsets = [0, 0], sizes = [16, 9], strides = [1, 1]} : vector<144x9xf32> to vector<16x9xf32>
    %128 = vector.extract_strided_slice %126 {offsets = [16, 0], sizes = [16, 9], strides = [1, 1]} : vector<144x9xf32> to vector<16x9xf32>
    %129 = vector.extract_strided_slice %126 {offsets = [32, 0], sizes = [16, 9], strides = [1, 1]} : vector<144x9xf32> to vector<16x9xf32>
    %130 = vector.extract_strided_slice %126 {offsets = [48, 0], sizes = [16, 9], strides = [1, 1]} : vector<144x9xf32> to vector<16x9xf32>
    %131 = vector.extract_strided_slice %126 {offsets = [64, 0], sizes = [16, 9], strides = [1, 1]} : vector<144x9xf32> to vector<16x9xf32>
    %132 = vector.extract_strided_slice %126 {offsets = [80, 0], sizes = [16, 9], strides = [1, 1]} : vector<144x9xf32> to vector<16x9xf32>
    %133 = vector.extract_strided_slice %126 {offsets = [96, 0], sizes = [16, 9], strides = [1, 1]} : vector<144x9xf32> to vector<16x9xf32>
    %134 = vector.extract_strided_slice %126 {offsets = [112, 0], sizes = [16, 9], strides = [1, 1]} : vector<144x9xf32> to vector<16x9xf32>
    %135 = vector.extract_strided_slice %126 {offsets = [128, 0], sizes = [16, 9], strides = [1, 1]} : vector<144x9xf32> to vector<16x9xf32>
    %136 = tpu.concatenate %127, %128, %129, %130, %131, %132, %133, %134, %135 in 1 : vector<16x9xf32>, vector<16x9xf32>, vector<16x9xf32>, vector<16x9xf32>, vector<16x9xf32>, vector<16x9xf32>, vector<16x9xf32>, vector<16x9xf32>, vector<16x9xf32> -> vector<16x81xf32>
    %cst_93 = arith.constant dense<0xFF800000> : vector<16xf32>
    %137 = vector.multi_reduction <maximumf>, %136, %cst_93 [1] : vector<16x81xf32> to vector<16xf32>
    %138 = vector.shape_cast %137 : vector<16xf32> to vector<16x1xf32>
    %139 = vector.broadcast %138 : vector<16x1xf32> to vector<16x81xf32>
    %140 = arith.subf %136, %139 : vector<16x81xf32>
    %141 = math.exp %140 : vector<16x81xf32>
    %cst_94 = arith.constant dense<0.000000e+00> : vector<16xf32>
    %142 = vector.multi_reduction <add>, %141, %cst_94 [1] : vector<16x81xf32> to vector<16xf32>
    %143 = vector.shape_cast %142 : vector<16xf32> to vector<16x1xf32>
    %144 = math.log %143 : vector<16x1xf32>
    %145 = vector.broadcast %144 : vector<16x1xf32> to vector<16x81xf32>
    %146 = arith.subf %140, %145 : vector<16x81xf32>
    %147 = vector.extract_strided_slice %124 {offsets = [0, 128], sizes = [144, 16], strides = [1, 1]} : vector<144x160xbf16> to vector<144x16xbf16>
    %148 = vector.extract_strided_slice %147 {offsets = [0, 0], sizes = [16, 16], strides = [1, 1]} : vector<144x16xbf16> to vector<16x16xbf16>
    %149 = vector.extract_strided_slice %147 {offsets = [16, 0], sizes = [16, 16], strides = [1, 1]} : vector<144x16xbf16> to vector<16x16xbf16>
    %150 = vector.extract_strided_slice %147 {offsets = [32, 0], sizes = [16, 16], strides = [1, 1]} : vector<144x16xbf16> to vector<16x16xbf16>
    %151 = vector.extract_strided_slice %147 {offsets = [48, 0], sizes = [16, 16], strides = [1, 1]} : vector<144x16xbf16> to vector<16x16xbf16>
    %152 = vector.extract_strided_slice %147 {offsets = [64, 0], sizes = [16, 16], strides = [1, 1]} : vector<144x16xbf16> to vector<16x16xbf16>
    %153 = vector.extract_strided_slice %147 {offsets = [80, 0], sizes = [16, 16], strides = [1, 1]} : vector<144x16xbf16> to vector<16x16xbf16>
    %154 = vector.extract_strided_slice %147 {offsets = [96, 0], sizes = [16, 16], strides = [1, 1]} : vector<144x16xbf16> to vector<16x16xbf16>
    %155 = vector.extract_strided_slice %147 {offsets = [112, 0], sizes = [16, 16], strides = [1, 1]} : vector<144x16xbf16> to vector<16x16xbf16>
    %156 = vector.extract_strided_slice %147 {offsets = [128, 0], sizes = [16, 16], strides = [1, 1]} : vector<144x16xbf16> to vector<16x16xbf16>
    %157 = tpu.concatenate %148, %149, %150, %151, %152, %153, %154, %155, %156 in 1 : vector<16x16xbf16>, vector<16x16xbf16>, vector<16x16xbf16>, vector<16x16xbf16>, vector<16x16xbf16>, vector<16x16xbf16>, vector<16x16xbf16>, vector<16x16xbf16>, vector<16x16xbf16> -> vector<16x144xbf16>
    %c0_95 = arith.constant 0 : index
    %c0_96 = arith.constant 0 : index
    %158 = vector.load %arg22[%c0_95, %c0_96] : memref<144x16xbf16, #tpu.memory_space<vmem>>, vector<144x16xbf16>
    %cst_97 = arith.constant dense<0.000000e+00> : vector<16x16xf32>
    %159 = tpu.matmul %157, %158, %cst_97 {dimension_numbers = #tpu.dot_dimension_numbers<[1], [0], [0], [1], [0, 0, 1, 1], [], []>} : vector<16x144xbf16>, vector<144x16xbf16>, vector<16x16xf32> -> vector<16x16xf32>
    %c0_98 = arith.constant 0 : index
    %c0_99 = arith.constant 0 : index
    %160 = vector.load %arg23[%c0_98, %c0_99] : memref<1x16xf32, #tpu.memory_space<vmem>>, vector<1x16xf32>
    %161 = vector.broadcast %160 : vector<1x16xf32> to vector<16x16xf32>
    %162 = arith.addf %159, %161 : vector<16x16xf32>
    %cst_100 = arith.constant 0.000000e+00 : f32
    %163 = vector.broadcast %cst_100 : f32 to vector<16x16xf32>
    %164 = arith.maximumf %162, %163 : vector<16x16xf32>
    %c0_101 = arith.constant 0 : index
    %c0_102 = arith.constant 0 : index
    %165 = vector.load %arg24[%c0_101, %c0_102] : memref<1x16xf32, #tpu.memory_space<vmem>>, vector<1x16xf32>
    %166 = vector.broadcast %165 : vector<1x16xf32> to vector<16x16xf32>
    %167 = arith.mulf %164, %166 : vector<16x16xf32>
    %cst_103 = arith.constant dense<0.000000e+00> : vector<16xf32>
    %168 = vector.multi_reduction <add>, %167, %cst_103 [1] : vector<16x16xf32> to vector<16xf32>
    %169 = vector.shape_cast %168 : vector<16xf32> to vector<16x1xf32>
    %c0_104 = arith.constant 0 : index
    %c0_105 = arith.constant 0 : index
    %170 = vector.load %arg25[%c0_104, %c0_105] : memref<1x1xf32, #tpu.memory_space<vmem>>, vector<1x1xf32>
    %171 = vector.broadcast %170 : vector<1x1xf32> to vector<16x1xf32>
    %172 = arith.addf %169, %171 : vector<16x1xf32>
    %173 = math.tanh %172 : vector<16x1xf32>
    %cst_106 = arith.constant 0.000000e+00 : f32
    %174 = vector.broadcast %cst_106 : f32 to vector<16x46xf32>
    %175 = tpu.concatenate %146, %173, %174 in 1 : vector<16x81xf32>, vector<16x1xf32>, vector<16x46xf32> -> vector<16x128xf32>
    %c0_107 = arith.constant 0 : index
    %c0_108 = arith.constant 0 : index
    %176 = vector.load %arg26[%c0_107, %c0_108] : memref<16x128xf32, #tpu.memory_space<vmem>>, vector<16x128xf32>
    tpu.vector_store %arg26[%c0_107, %c0_108], %175 {strides = array<i32>} : memref<16x128xf32, #tpu.memory_space<vmem>>, vector<16x128xf32>,
    return
  }
  func.func @transform_0(%arg0: i32) -> (i32, i32) {
    %c0_i32 = arith.constant 0 : i32
    %c0_i32_0 = arith.constant 0 : i32
    return %arg0, %c0_i32 : i32, i32
  }
  func.func @transform_1(%arg0: i32) -> (i32, i32) {
    %c0_i32 = arith.constant 0 : i32
    %c0_i32_0 = arith.constant 0 : i32
    return %arg0, %c0_i32 : i32, i32
  }
  func.func @transform_2(%arg0: i32) -> (i32, i32) {
    %c0_i32 = arith.constant 0 : i32
    %c0_i32_0 = arith.constant 0 : i32
    %c0_i32_1 = arith.constant 0 : i32
    return %c0_i32, %c0_i32_0 : i32, i32
  }
  func.func @transform_3(%arg0: i32) -> (i32, i32) {
    %c0_i32 = arith.constant 0 : i32
    %c0_i32_0 = arith.constant 0 : i32
    %c0_i32_1 = arith.constant 0 : i32
    return %c0_i32, %c0_i32_0 : i32, i32
  }
  func.func @transform_4(%arg0: i32) -> (i32, i32, i32) {
    %c0_i32 = arith.constant 0 : i32
    %c0_i32_0 = arith.constant 0 : i32
    %c0_i32_1 = arith.constant 0 : i32
    %c0_i32_2 = arith.constant 0 : i32
    return %c0_i32, %c0_i32_0, %c0_i32_1 : i32, i32, i32
  }
  func.func @transform_5(%arg0: i32) -> (i32, i32, i32) {
    %c0_i32 = arith.constant 0 : i32
    %c0_i32_0 = arith.constant 0 : i32
    %c0_i32_1 = arith.constant 0 : i32
    %c0_i32_2 = arith.constant 0 : i32
    return %c0_i32, %c0_i32_0, %c0_i32_1 : i32, i32, i32
  }
  func.func @transform_6(%arg0: i32) -> (i32, i32, i32) {
    %c0_i32 = arith.constant 0 : i32
    %c0_i32_0 = arith.constant 0 : i32
    %c0_i32_1 = arith.constant 0 : i32
    %c0_i32_2 = arith.constant 0 : i32
    return %c0_i32, %c0_i32_0, %c0_i32_1 : i32, i32, i32
  }
  func.func @transform_7(%arg0: i32) -> (i32, i32, i32) {
    %c0_i32 = arith.constant 0 : i32
    %c0_i32_0 = arith.constant 0 : i32
    %c0_i32_1 = arith.constant 0 : i32
    %c0_i32_2 = arith.constant 0 : i32
    return %c0_i32, %c0_i32_0, %c0_i32_1 : i32, i32, i32
  }
  func.func @transform_8(%arg0: i32) -> (i32, i32, i32) {
    %c0_i32 = arith.constant 0 : i32
    %c0_i32_0 = arith.constant 0 : i32
    %c0_i32_1 = arith.constant 0 : i32
    %c0_i32_2 = arith.constant 0 : i32
    return %c0_i32, %c0_i32_0, %c0_i32_1 : i32, i32, i32
  }
  func.func @transform_9(%arg0: i32) -> (i32, i32, i32) {
    %c0_i32 = arith.constant 0 : i32
    %c0_i32_0 = arith.constant 0 : i32
    %c0_i32_1 = arith.constant 0 : i32
    %c0_i32_2 = arith.constant 0 : i32
    return %c0_i32, %c0_i32_0, %c0_i32_1 : i32, i32, i32
  }
  func.func @transform_10(%arg0: i32) -> (i32, i32, i32) {
    %c0_i32 = arith.constant 0 : i32
    %c0_i32_0 = arith.constant 0 : i32
    %c0_i32_1 = arith.constant 0 : i32
    %c0_i32_2 = arith.constant 0 : i32
    return %c0_i32, %c0_i32_0, %c0_i32_1 : i32, i32, i32
  }
  func.func @transform_11(%arg0: i32) -> (i32, i32, i32) {
    %c0_i32 = arith.constant 0 : i32
    %c0_i32_0 = arith.constant 0 : i32
    %c0_i32_1 = arith.constant 0 : i32
    %c0_i32_2 = arith.constant 0 : i32
    return %c0_i32, %c0_i32_0, %c0_i32_1 : i32, i32, i32
  }
  func.func @transform_12(%arg0: i32) -> (i32, i32, i32) {
    %c0_i32 = arith.constant 0 : i32
    %c0_i32_0 = arith.constant 0 : i32
    %c0_i32_1 = arith.constant 0 : i32
    %c0_i32_2 = arith.constant 0 : i32
    return %c0_i32, %c0_i32_0, %c0_i32_1 : i32, i32, i32
  }
  func.func @transform_13(%arg0: i32) -> (i32, i32, i32) {
    %c0_i32 = arith.constant 0 : i32
    %c0_i32_0 = arith.constant 0 : i32
    %c0_i32_1 = arith.constant 0 : i32
    %c0_i32_2 = arith.constant 0 : i32
    return %c0_i32, %c0_i32_0, %c0_i32_1 : i32, i32, i32
  }
  func.func @transform_14(%arg0: i32) -> (i32, i32, i32) {
    %c0_i32 = arith.constant 0 : i32
    %c0_i32_0 = arith.constant 0 : i32
    %c0_i32_1 = arith.constant 0 : i32
    %c0_i32_2 = arith.constant 0 : i32
    return %c0_i32, %c0_i32_0, %c0_i32_1 : i32, i32, i32
  }
  func.func @transform_15(%arg0: i32) -> (i32, i32, i32) {
    %c0_i32 = arith.constant 0 : i32
    %c0_i32_0 = arith.constant 0 : i32
    %c0_i32_1 = arith.constant 0 : i32
    %c0_i32_2 = arith.constant 0 : i32
    return %c0_i32, %c0_i32_0, %c0_i32_1 : i32, i32, i32
  }
  func.func @transform_16(%arg0: i32) -> (i32, i32) {
    %c0_i32 = arith.constant 0 : i32
    %c0_i32_0 = arith.constant 0 : i32
    %c0_i32_1 = arith.constant 0 : i32
    return %c0_i32, %c0_i32_0 : i32, i32
  }
  func.func @transform_17(%arg0: i32) -> (i32, i32) {
    %c0_i32 = arith.constant 0 : i32
    %c0_i32_0 = arith.constant 0 : i32
    %c0_i32_1 = arith.constant 0 : i32
    return %c0_i32, %c0_i32_0 : i32, i32
  }
  func.func @transform_18(%arg0: i32) -> (i32, i32) {
    %c0_i32 = arith.constant 0 : i32
    %c0_i32_0 = arith.constant 0 : i32
    %c0_i32_1 = arith.constant 0 : i32
    return %c0_i32, %c0_i32_0 : i32, i32
  }
  func.func @transform_19(%arg0: i32) -> (i32, i32) {
    %c0_i32 = arith.constant 0 : i32
    %c0_i32_0 = arith.constant 0 : i32
    %c0_i32_1 = arith.constant 0 : i32
    return %c0_i32, %c0_i32_0 : i32, i32
  }
  func.func @transform_20(%arg0: i32) -> (i32, i32) {
    %c0_i32 = arith.constant 0 : i32
    %c0_i32_0 = arith.constant 0 : i32
    %c0_i32_1 = arith.constant 0 : i32
    return %c0_i32, %c0_i32_0 : i32, i32
  }
  func.func @transform_21(%arg0: i32) -> (i32, i32) {
    %c0_i32 = arith.constant 0 : i32
    %c0_i32_0 = arith.constant 0 : i32
    %c0_i32_1 = arith.constant 0 : i32
    return %c0_i32, %c0_i32_0 : i32, i32
  }
  func.func @transform_22(%arg0: i32) -> (i32, i32) {
    %c0_i32 = arith.constant 0 : i32
    %c0_i32_0 = arith.constant 0 : i32
    %c0_i32_1 = arith.constant 0 : i32
    return %c0_i32, %c0_i32_0 : i32, i32
  }
  func.func @transform_23(%arg0: i32) -> (i32, i32) {
    %c0_i32 = arith.constant 0 : i32
    %c0_i32_0 = arith.constant 0 : i32
    %c0_i32_1 = arith.constant 0 : i32
    return %c0_i32, %c0_i32_0 : i32, i32
  }
  func.func @transform_24(%arg0: i32) -> (i32, i32) {
    %c0_i32 = arith.constant 0 : i32
    %c0_i32_0 = arith.constant 0 : i32
    %c0_i32_1 = arith.constant 0 : i32
    return %c0_i32, %c0_i32_0 : i32, i32
  }
  func.func @transform_25(%arg0: i32) -> (i32, i32) {
    %c0_i32 = arith.constant 0 : i32
    %c0_i32_0 = arith.constant 0 : i32
    return %arg0, %c0_i32 : i32, i32
  }
}

</mosaic_0001>

<bundles_post_ra>
// kernel: _lambda_.1
= control target key start
LH: loop header
LB: loop body
LE: loop exit
PB: predicated region body
PF: predicated region fallthrough
CT: control target
= control target key end

     0   :  { %s10596_s0 = inlined_call_operand.vmem [shape: bf16[144,36], index: 0, kind: input, shape index: {}]   ;;  %s10597_s1 = inlined_call_operand.vmem [shape: bf16[16,36], index: 1, kind: input, shape index: {}]   ;;  %s10598_s2 = inlined_call_operand.vmem [shape: bf16[36,144], index: 2, kind: input, shape index: {}]   ;;  %s10599_s3 = inlined_call_operand.vmem [shape: bf16[36,144], index: 3, kind: input, shape index: {}]   ;;  %s10600_s4 = inlined_call_operand.hbm [shape: bf16[5,144,160], index: 4, kind: input, shape index: {}]   ;;  %s10601_s5 = inlined_call_operand.hbm [shape: bf16[5,160,144], index: 5, kind: input, shape index: {}]   ;;  %s10602_s6 = inlined_call_operand.vmem [shape: bf16[5,288,160], index: 6, kind: input, shape index: {}]   ;;  %s10603_s7 = inlined_call_operand.hbm [shape: bf16[5,160,144], index: 7, kind: input, shape index: {}]   ;;  %s10604_s8 = inlined_call_operand.hbm [shape: bf16[5,144,144], index: 8, kind: input, shape index: {}]   ;;  %s10605_s9 = inlined_call_operand.vmem [shape: f32[5,16,16], index: 9, kind: input, shape index: {}]   ;;  %s10606_s10 = inlined_call_operand.vmem [shape: f32[5,16,16], index: 10, kind: input, shape index: {}]   ;;  %s10607_s11 = inlined_call_operand.hbm [shape: f32[5,1,160], index: 11, kind: input, shape index: {}]   ;;  %s10608_s12 = inlined_call_operand.hbm [shape: f32[5,1,144], index: 12, kind: input, shape index: {}]   ;;  %s10609_s13 = inlined_call_operand.vmem [shape: f32[5,1,160], index: 13, kind: input, shape index: {}]   ;;  %s10610_s14 = inlined_call_operand.vmem [shape: f32[5,1,144], index: 14, kind: input, shape index: {}]   ;;  %s10611_s15 = inlined_call_operand.vmem [shape: f32[5,1,144], index: 15, kind: input, shape index: {}]   ;;  %s10612_s16 = inlined_call_operand.hbm [shape: bf16[1,144], index: 16, kind: input, shape index: {}]   ;;  %s10613_s17 = inlined_call_operand.hbm [shape: bf16[1,144], index: 17, kind: input, shape index: {}]   ;;  %s10614_s18 = inlined_call_operand.vmem [shape: bf16[144,160], index: 18, kind: input, shape index: {}]   ;;  %s10615_s19 = inlined_call_operand.hbm [shape: f32[1,160], index: 19, kind: input, shape index: {}]   ;;  %s10616_s20 = inlined_call_operand.vmem [shape: bf16[160,9], index: 20, kind: input, shape index: {}]   ;;  %s10617_s21 = inlined_call_operand.vmem [shape: bf16[144,16], index: 21, kind: input, shape index: {}]   ;;  %s10618_s22 = inlined_call_operand.hbm [shape: f32[1,16], index: 22, kind: input, shape index: {}]   ;;  %s10619_s23 = inlined_call_operand.vmem [shape: f32[1,16], index: 23, kind: input, shape index: {}]   ;;  %s10620_s24 = inlined_call_operand.<no memory space> [shape: f32[1,1], index: 24, kind: input, shape index: {}]   ;;  %s10621_s25 = inlined_call_operand.vmem [shape: f32[16,128], index: 25, kind: output, shape index: {}]  }
   0x1   :  { %10624 = sst [smem:[#allocation25_spill]] %s10596_s0  ;;  %v30_v0 = vstv %s10620_s24 }
   0x2   :  { %10625 = sst [smem:[#allocation26_spill]] %s10598_s2  ;;  %31 = vst [vmem:[#allocation2] sm:$0x1] %v30_v0 }
   0x3   :  { %10626 = sst [smem:[#allocation27_spill]] %s10600_s4 }
   0x4   :  { %10627 = sst [smem:[#allocation28_spill]] %s10601_s5 }
   0x5   :  { %10628 = sst [smem:[#allocation29_spill]] %s10603_s7 }
   0x6   :  { %10629 = sst [smem:[#allocation30_spill]] %s10604_s8 }
   0x7   :  { %32 = vsyncpa [#allocation4], 0 }
   0x8   :  { %33 = vsyncpa [#allocation6], 0 }
   0x9   :  { %34 = vsyncpa [#allocation9], 0 }
   0xa   :  { %35 = vsyncpa [#allocation12], 0 }
   0xb   :  { %36 = vsyncpa [#allocation15], 0 }
   0xc   :  { %37 = vsyncpa [#allocation18], 0  ;;  %s10630_s0 = sld [smem:[#allocation28_spill]]  ;;  %s8732_s2 = smov [#allocation5]  }
   0xd   :  { %s65_s6 = sshll.u32 %s8732_s2, 4  ;;  %s10631_s14 = sld [smem:[#allocation30_spill]]  ;;  %s66_s6 = int_to_ptr.vmem [resolvable:$true] %s65_s6 }
   0xe   :  { %s8733_s24 = smov 128   ;;  %s8734_s8 = smov 8  }
   0xf   :  { %s8735_s15 = smov [#allocation8]   ;;  %s121_s27 = sshll.u32 %s10608_s12, 4  ;;  %s122_s27 = int_to_ptr.hbm [resolvable:$true] %s121_s27 }
  0x10   :  { %s93_s3 = sshll.u32 %s8735_s15, 4  ;;  %s8736_s4 = smov [#allocation11]   ;;  %s94_s3 = int_to_ptr.vmem [resolvable:$true] %s93_s3 }
  0x11   :  { %s123_s9 = sshll.u32 %s8736_s4, 4  ;;  %s152_s10 = sshll.u32 %s10613_s17, 4  ;;  %s124_s9 = int_to_ptr.vmem [resolvable:$true] %s123_s9  ;;  %s153_s10 = int_to_ptr.hbm [resolvable:$true] %s152_s10 }
  0x12   :  { %s63_s29 = sshll.u32 %s10630_s0, 4  ;;  %s8737_s0 = smov 32   ;;  %s64_s29 = int_to_ptr.hbm [resolvable:$true] %s63_s29 }
  0x13   :  { %s91_s30 = sshll.u32 %s10631_s14, 4  ;;  %s8739_s2 = smov [#allocation14]   ;;  %s92_s30 = int_to_ptr.hbm [resolvable:$true] %s91_s30 }
  0x14   :  { %71 = dma.hbm_to_vmem [thread:$0]  %s64_s29, 12800, %s66_s6, [#allocation6], %s8733_s24, %s8733_s24, %s8734_s8  }
  0x15   :  { %99 = dma.hbm_to_vmem [thread:$0]  %s92_s30, 11520, %s94_s3, [#allocation9], %s8733_s24, %s8733_s24, %s8734_s8  }
  0x16   :  { %s8738_s29 = smov 2   ;;  %s154_s6 = sshll.u32 %s8739_s2, 4  ;;  %s155_s6 = int_to_ptr.vmem [resolvable:$true] %s154_s6 }
  0x17   :  { %129 = dma.hbm_to_vmem [thread:$0]  %s122_s27, 160, %s124_s9, [#allocation12], %s8737_s0, %s8737_s0, %s8738_s29  }
  0x18   :  { %s10632_s12 = sld [smem:[#allocation27_spill]]  ;;  %s8740_s26 = smov [#allocation3]  }
  0x19   :  { %157 = dma.hbm_to_vmem [thread:$0]  %s153_s10, 32, %s155_s6, [#allocation15]  }
  0x1a   :  { %s10633_s3 = sld [smem:[#allocation29_spill]]  ;;  %s52_s1 = sshll.u32 %s8740_s26, 4  ;;  %s53_s1 = int_to_ptr.vmem [resolvable:$true] %s52_s1 }
  0x1b   :  { %s8741_s27 = smov [#allocation7]   ;;  %s108_s5 = sshll.u32 %s10607_s11, 4  ;;  %s109_s5 = int_to_ptr.hbm [resolvable:$true] %s108_s5 }
  0x1c   :  { %s80_s4 = sshll.u32 %s8741_s27, 4  ;;  %s141_s6 = sshll.u32 %s10612_s16, 4  ;;  %s81_s4 = int_to_ptr.vmem [resolvable:$true] %s80_s4  ;;  %s142_s6 = int_to_ptr.hbm [resolvable:$true] %s141_s6 }
  0x1d   :  { %s8742_s7 = smov [#allocation10]   ;;  %s165_s15 = sshll.u32 %s10615_s19, 4  ;;  %s166_s15 = int_to_ptr.hbm [resolvable:$true] %s165_s15 }
  0x1e   :  { %s50_s14 = sshll.u32 %s10632_s12, 4  ;;  %s110_s13 = sshll.u32 %s8742_s7, 4  ;;  %s51_s14 = int_to_ptr.hbm [resolvable:$true] %s50_s14  ;;  %s111_s13 = int_to_ptr.vmem [resolvable:$true] %s110_s13 }
  0x1f   :  { %58 = dma.hbm_to_vmem [thread:$0]  %s51_s14, 11520, %s53_s1, [#allocation4], %s8733_s24, %s8733_s24, %s8734_s8  }
  0x20   :  { %s78_s17 = sshll.u32 %s10633_s3, 4  ;;  %s8743_s12 = smov [#allocation13]   ;;  %s79_s17 = int_to_ptr.hbm [resolvable:$true] %s78_s17 }
  0x21   :  { %86 = dma.hbm_to_vmem [thread:$0]  %s79_s17, 12800, %s81_s4, [#allocation6], %s8733_s24, %s8733_s24, %s8734_s8  }
  0x22   :  { %116 = dma.hbm_to_vmem [thread:$0]  %s109_s5, 160, %s111_s13, [#allocation9], %s8737_s0, %s8737_s0, %s8738_s29  }
  0x23   :  { %s143_s11 = sshll.u32 %s8743_s12, 4  ;;  %s180_s16 = sshll.u32 %s10618_s22, 4  ;;  %s144_s11 = int_to_ptr.vmem [resolvable:$true] %s143_s11  ;;  %s181_s16 = int_to_ptr.hbm [resolvable:$true] %s180_s16 }
  0x24   :  { %146 = dma.hbm_to_vmem [thread:$0]  %s142_s6, 32, %s144_s11, [#allocation12]  }
  0x25   :  { %s8744_s3 = smov [#allocation16]   ;;  %s8745_s26 = smov [#allocation17]  }
  0x26   :  { %s167_s17 = sshll.u32 %s8744_s3, 4  ;;  %s182_s29 = sshll.u32 %s8745_s26, 4  ;;  %s168_s17 = int_to_ptr.vmem [resolvable:$true] %s167_s17  ;;  %s183_s29 = int_to_ptr.vmem [resolvable:$true] %s182_s29 }
  0x27   :  { %170 = dma.hbm_to_vmem [thread:$0]  %s166_s15, 32, %s168_s17, [#allocation15]  }
  0x28   :  { %185 = dma.hbm_to_vmem [thread:$0]  %s181_s16, 16, %s183_s29, [#allocation18]  }
  0x29   :  { %8720 = dma.done.wait [#allocation4], 11520  }
  0x2a   :  { %8721 = vsyncadd [#allocation4], 4294955776 }
  0x2b   :  { %8722 = dma.done.wait [#allocation6], 25600  }
  0x2c   :  { %8723 = vsyncadd [#allocation6], 4294941696 }
  0x2d   :  { %8724 = dma.done.wait [#allocation9], 11680  }
  0x2e   :  { %8725 = vsyncadd [#allocation9], 4294955616 }
  0x2f   :  { %8726 = dma.done.wait [#allocation12], 192  }
  0x30   :  { %8727 = vsyncadd [#allocation12], 4294967104 }
  0x31   :  { %8728 = dma.done.wait [#allocation15], 64  }
  0x32   :  { %8729 = vsyncadd [#allocation15], 4294967232 }
  0x33   :  { %8730 = dma.done.wait [#allocation18], 16  }
  0x34   :  { %8731 = vsyncadd [#allocation18], 4294967280  ;;  %s10634_s1 = sld [smem:[#allocation26_spill]]  ;;  %vm352_vm0 = vcmask 1041408   ;;  %vm324_vm1 = vcmask 293888   ;;  %vm680_vm2 = vcmask 130048  }
  0x35   :  { %s10635_s3 = sld [smem:[#allocation25_spill]]  ;;  %v7138_v25 = vld [vmem:[#allocation3 + $0x70] sm:$0xf]  ;;  %v8224_v26 = vld [vmem:[#allocation3 + $0x74] sm:$0xf0]  ;;  %vm1104_vm3 = vcmask 261120  }
  0x36   :  { %v7139_v27 = vor.u32 %v8224_v26, %v7138_v25  ;;  %v7130_v29 = vld [vmem:[#allocation3 + $0x60] sm:$0xf]  ;;  %v8222_v30 = vld [vmem:[#allocation3 + $0x64] sm:$0xf0]  ;;  %v7122_v32 = vld [vmem:[#allocation3 + $0x50] sm:$0xf] }
  0x37   :  { %v7131_v31 = vor.u32 %v8222_v30, %v7130_v29  ;;  %v8220_v33 = vld [vmem:[#allocation3 + $0x54] sm:$0xf0]  ;;  %v7114_v35 = vld [vmem:[#allocation3 + $0x40] sm:$0xf]  ;;  %v8218_v36 = vld [vmem:[#allocation3 + $0x44] sm:$0xf0] }
  0x38   :  { %708 = vmatpush.bf16.msra.mxu2 %v7139_v27  ;;  %v7123_v34 = vor.u32 %v8220_v33, %v7122_v32  ;;  %v7115_v37 = vor.u32 %v8218_v36, %v7114_v35  ;;  %v7106_v38 = vld [vmem:[#allocation3 + $0x30] sm:$0xf]  ;;  %v8216_v39 = vld [vmem:[#allocation3 + $0x34] sm:$0xf0]  ;;  %v7098_v42 = vld [vmem:[#allocation3 + $0x20] sm:$0xf] }
  0x39   :  { %v7107_v40 = vor.u32 %v8216_v39, %v7106_v38  ;;  %v8214_v43 = vld [vmem:[#allocation3 + $0x24] sm:$0xf0]  ;;  %v7090_v45 = vld [vmem:[#allocation3 + $0x10] sm:$0xf]  ;;  %v8212_v46 = vld [vmem:[#allocation3 + $0x14] sm:$0xf0] }
  0x3a   :  { %v253_v1 = vld [vmem:[%s10634_s1 + $0x20] sm:$0x33]  ;;  %v7056_v4 = vld [vmem:[%s10634_s1 + $0x10] sm:$0xf]  ;;  %v8208_v7 = vld [vmem:[%s10634_s1 + $0x14] sm:$0xf0]  ;;  %v7099_v44 = vor.u32 %v8214_v43, %v7098_v42  ;;  %v7091_v47 = vor.u32 %v8212_v46, %v7090_v45 }
  0x3b   :  { %v312_v2 = vunpack.c.l.b16 %v253_v1  ;;  %v313_v3 = vunpack.c.h.b16 %v253_v1  ;;  %v8207_v8 = vld [vmem:[%s10634_s1 + $0x14] sm:$0xf]  ;;  %v7058_v9 = vld [vmem:[%s10634_s1 + $0x18] sm:$0xf0]  ;;  %v7057_v12 = vor.u32 %v8208_v7, %v7056_v4  ;;  %v7048_v14 = vld [vmem:[%s10634_s1] sm:$0xf] }
  0x3c   :  { %v7061_v13 = vor.u32 %v8207_v8, %v7058_v9  ;;  %v8206_v15 = vld [vmem:[%s10634_s1 + $0x4] sm:$0xf0]  ;;  %v8205_v16 = vld [vmem:[%s10634_s1 + $0x4] sm:$0xf]  ;;  %v7050_v17 = vld [vmem:[%s10634_s1 + $0x8] sm:$0xf0]  ;;  %709 = vmatpush.bf16.msra.mxu2 %v7131_v31 }
  0x3d   :  { %v318_v5 = vpack.c.b16 %v312_v2, %v312_v2  ;;  %v319_v6 = vpack.c.b16 %v313_v3, %v313_v3  ;;  %v7049_v18 = vor.u32 %v8206_v15, %v7048_v14  ;;  %v7053_v19 = vor.u32 %v8205_v16, %v7050_v17  ;;  %v8196_v20 = vld [vmem:[%s10635_s3] sm:$0xff]  ;;  %v8197_v21 = vld [vmem:[%s10635_s3 + $0x8] sm:$0xff]  ;;  %v8198_v22 = vld [vmem:[%s10635_s3 + $0x10] sm:$0xff]  ;;  %s8748_s4 = smov 64   ;;  %s8749_s9 = smov 80  }
  0x3e   :  { %v8199_v23 = vld [vmem:[%s10635_s3 + $0x18] sm:$0xff]  ;;  %v8200_v24 = vld [vmem:[%s10635_s3 + $0x20] sm:$0xff]  ;;  %v8201_v28 = vld [vmem:[%s10635_s3 + $0x28] sm:$0xff]  ;;  %s8751_s13 = smov 112   ;;  %s8752_s15 = smov 9   ;;  %vm6841_vm4 = vcmask 392192  }
  0x3f   :  { %v354_v10 = vsel %vm352_vm0, %v318_v5, 0  ;;  %v357_v11 = vsel %vm352_vm0, %v319_v6, 0  ;;  %v8202_v41 = vld [vmem:[%s10635_s3 + $0x30] sm:$0xff]  ;;  %v7082_v48 = vld [vmem:[#allocation3] sm:$0xf]  ;;  %v8203_v57 = vld [vmem:[%s10635_s3 + $0x38] sm:$0xff] }
  0x40   :  { %364 = vmatpush.bf16.msra.mxu0 %v354_v10  ;;  %418 = vmatpush.bf16.msra.mxu1 %v357_v11  ;;  %v8210_v49 = vld [vmem:[#allocation3 + $0x4] sm:$0xf0]  ;;  %v7146_v50 = vld [vmem:[#allocation3 + $0x80] sm:$0xf]  ;;  %v8225_v54 = vld [vmem:[#allocation3 + $0x84] sm:$0xf] }
  0x41   :  { %710 = vmatpush.bf16.msra.mxu2 %v7123_v34  ;;  %v7083_v51 = vor.u32 %v8210_v49, %v7082_v48  ;;  %v8226_v52 = vld [vmem:[#allocation3 + $0x84] sm:$0xf0]  ;;  %v7148_v55 = vld [vmem:[#allocation3 + $0x88] sm:$0xf0]  ;;  %v8223_v58 = vld [vmem:[#allocation3 + $0x74] sm:$0xf] }
  0x42   :  { %v7147_v53 = vor.u32 %v8226_v52, %v7146_v50  ;;  %v7151_v56 = vor.u32 %v8225_v54, %v7148_v55  ;;  %v7140_v59 = vld [vmem:[#allocation3 + $0x78] sm:$0xf0]  ;;  %v8221_v0 = vld [vmem:[#allocation3 + $0x64] sm:$0xf]  ;;  %v7132_v1 = vld [vmem:[#allocation3 + $0x68] sm:$0xf0] }
  0x43   :  { %v7143_v60 = vor.u32 %v8223_v58, %v7140_v59  ;;  %v8204_v61 = vld [vmem:[%s10635_s3 + $0x40] sm:$0xff]  ;;  %v7135_v2 = vor.u32 %v8221_v0, %v7132_v1  ;;  %v8217_v30 = vld [vmem:[#allocation3 + $0x44] sm:$0xf]  ;;  %v7116_v31 = vld [vmem:[#allocation3 + $0x48] sm:$0xf0]  ;;  %s8753_s16 = smov 18  }
  0x44   :  { %365 = vmatpush.bf16.msra.mxu0 %v7057_v12  ;;  %419 = vmatpush.bf16.msra.mxu1 %v7061_v13  ;;  %v8219_v15 = vld [vmem:[#allocation3 + $0x54] sm:$0xf]  ;;  %v7124_v16 = vld [vmem:[#allocation3 + $0x58] sm:$0xf0]  ;;  %v7119_v32 = vor.u32 %v8217_v30, %v7116_v31  ;;  %s8754_s26 = smov 27   ;;  %s8755_s27 = smov 36  }
  0x45   :  { %711 = vmatpush.bf16.msra.mxu2 %v7115_v37  ;;  %769 = vmatpush.bf16.msra.mxu3 %v7147_v53  ;;  %v7127_v17 = vor.u32 %v8219_v15, %v7124_v16  ;;  %v8215_v45 = vld [vmem:[#allocation3 + $0x34] sm:$0xf]  ;;  %v7108_v46 = vld [vmem:[#allocation3 + $0x38] sm:$0xf0]  ;;  %vm6844_vm5 = vcmask 523264   ;;  %vm6847_vm6 = vcmask 654336  }
  0x46   :  { %vm6850_vm7 = vcmask 785408   ;;  %vm6853_vm8 = vcmask 916480   ;;  %vm6778_vm9 = vcmask 146432   ;;  %vm6775_vm10 = vcmask 72704  }
  0x47   :  { %vm6781_vm11 = vcmask 220160   ;;  %vm6786_vm12 = vcmask 367616   ;;  %vm6789_vm13 = vcmask 441344   ;;  %vm6795_vm14 = vcmask 588800  }
  0x48   :  { %366 = vmatpush.bf16.msra.mxu0 %v7049_v18  ;;  %420 = vmatpush.bf16.msra.mxu1 %v7053_v19  ;;  %vm6792_vm15 = vcmask 515072   ;;  %vm6798_vm0 = vcmask 662528  }
  0x49   :  { %712 = vmatpush.bf16.msra.mxu2 %v7107_v40  ;;  %816 = vmatpush.bf16.msrb.mxu3 %v7143_v60 }
  0x4b   :  { %7062 = vmatmul.msk.bf16.vlgmr.msra.gmra.mxu0 %vm324_vm1, %v8196_v20  ;;  %7071 = vmatmul.msk.bf16.vlgmr.msra.gmra.mxu1 %vm324_vm1, %v8196_v20 }
  0x4c   :  { %877 = vmatpush.bf16.msrb.mxu0 %v7151_v56 }
  0x4d   :  { %713 = vmatpush.bf16.msra.mxu2 %v7099_v44  ;;  %817 = vmatpush.bf16.msrb.mxu3 %v7135_v2 }
  0x51   :  { %714 = vmatpush.bf16.msra.mxu2 %v7091_v47  ;;  %818 = vmatpush.bf16.msrb.mxu3 %v7127_v17  ;;  %v7111_v47 = vor.u32 %v8215_v45, %v7108_v46  ;;  %v7212_v45 = vld [vmem:[#allocation5 + $0x50] sm:$0xf]  ;;  %v8238_v46 = vld [vmem:[#allocation5 + $0x54] sm:$0xf0] }
  0x55   :  { %715 = vmatpush.bf16.msra.mxu2 %v7083_v51  ;;  %819 = vmatpush.bf16.msrb.mxu3 %v7119_v32  ;;  %v7228_v32 = vld [vmem:[#allocation5 + $0x70] sm:$0xf] }
  0x59   :  { %820 = vmatpush.bf16.msrb.mxu3 %v7111_v47  ;;  %v7213_v47 = vor.u32 %v8238_v46, %v7212_v45  ;;  %v7244_v46 = vld [vmem:[#allocation5 + $0x90] sm:$0xf] }
  0x5b   :  { %7063 = vmatmul.msk.bf16.gmra.mxu0 %vm324_vm1, %v8197_v21  ;;  %7072 = vmatmul.msk.bf16.gmra.mxu1 %vm324_vm1, %v8197_v21 }
  0x6b   :  { %7064 = vmatmul.msk.bf16.gmra.mxu0 %vm324_vm1, %v8198_v22  ;;  %7073 = vmatmul.msk.bf16.gmra.mxu1 %vm324_vm1, %v8198_v22 }
  0x7b   :  { %7065 = vmatmul.msk.bf16.gmra.mxu0 %vm324_vm1, %v8199_v23  ;;  %7074 = vmatmul.msk.bf16.gmra.mxu1 %vm324_vm1, %v8199_v23 }
  0x8b   :  { %7066 = vmatmul.msk.bf16.gmra.mxu0 %vm324_vm1, %v8200_v24  ;;  %7075 = vmatmul.msk.bf16.gmra.mxu1 %vm324_vm1, %v8200_v24 }
  0x9b   :  { %7067 = vmatmul.msk.bf16.gmra.mxu0 %vm324_vm1, %v8201_v28  ;;  %7076 = vmatmul.msk.bf16.gmra.mxu1 %vm324_vm1, %v8201_v28 }
  0xab   :  { %7068 = vmatmul.msk.bf16.gmra.mxu0 %vm324_vm1, %v8202_v41  ;;  %7077 = vmatmul.msk.bf16.gmra.mxu1 %vm324_vm1, %v8202_v41 }
  0xbb   :  { %7069 = vmatmul.msk.bf16.gmra.mxu0 %vm324_vm1, %v8203_v57  ;;  %7078 = vmatmul.msk.bf16.gmra.mxu1 %vm324_vm1, %v8203_v57 }
  0xc8   :  { %v368_v62 = vpop.f32.mrf.mxu0  ;;  %v422_v63 = vpop.f32.mrf.mxu1 }
  0xc9   :  { %v9014_v3 = vpack.c.bf16 %v422_v63, %v368_v62 }
  0xcb   :  { %7070 = vmatmul.msk.bf16.gmra.mxu0 %vm324_vm1, %v8204_v61  ;;  %7079 = vmatmul.msk.bf16.gmra.mxu1 %vm324_vm1, %v8204_v61  ;;  %v527_v7 = vunpack.c.l.b16 %v9014_v3  ;;  %v528_v9 = vunpack.c.h.b16 %v9014_v3 }
  0xd0   :  { %v370_v4 = vpop.f32.mrf.mxu0  ;;  %v424_v5 = vpop.f32.mrf.mxu1 }
  0xd1   :  { %v9016_v6 = vpack.c.bf16 %v424_v5, %v370_v4  ;;  %v8213_v5 = vld [vmem:[#allocation3 + $0x24] sm:$0xf] }
  0xd3   :  { %v529_v8 = vunpack.c.l.b16 %v9016_v6  ;;  %v530_v10 = vunpack.c.h.b16 %v9016_v6 }
  0xd5   :  { %v9022_v11 = vpack.c.b16 %v529_v8, %v527_v7  ;;  %v564_v12 = vpack.c.b16 %v530_v10, %v528_v9  ;;  %v7100_v7 = vld [vmem:[#allocation3 + $0x28] sm:$0xf0] }
  0xd6   :  { %v7103_v8 = vor.u32 %v8213_v5, %v7100_v7  ;;  %v8234_v5 = vld [vmem:[#allocation5 + $0x34] sm:$0xf0] }
  0xd7   :  { %716 = vmatmul.bf16.vlgmr.msra.gmra.mxu2 %v9022_v11  ;;  %7152 = vmatmul.msk.bf16.vlgmr.msra.gmra.mxu3 %vm680_vm2, %v564_v12 }
  0xd8   :  { %v373_v13 = vpop.f32.mrf.mxu0  ;;  %v427_v14 = vpop.f32.mrf.mxu1  ;;  %821 = vmatpush.bf16.msrb.mxu3 %v7103_v8  ;;  %v7188_v8 = vld [vmem:[#allocation5 + $0x20] sm:$0xf] }
  0xd9   :  { %v9027_v18 = vpack.c.bf16 %v427_v14, %v373_v13 }
  0xdb   :  { %7161 = vmatmul.msk.bf16.vlgmr.msrb.gmra.mxu0 %vm680_vm2, %v564_v12  ;;  %v531_v22 = vunpack.c.l.b16 %v9027_v18  ;;  %v532_v24 = vunpack.c.h.b16 %v9027_v18 }
  0xe0   :  { %v375_v19 = vpop.f32.mrf.mxu0  ;;  %v429_v20 = vpop.f32.mrf.mxu1 }
  0xe1   :  { %v9029_v21 = vpack.c.bf16 %v429_v20, %v375_v19 }
  0xe3   :  { %v533_v23 = vunpack.c.l.b16 %v9029_v21  ;;  %v534_v25 = vunpack.c.h.b16 %v9029_v21 }
  0xe5   :  { %v9035_v26 = vpack.c.b16 %v533_v23, %v531_v22  ;;  %v566_v27 = vpack.c.b16 %v534_v25, %v532_v24  ;;  %v8211_v24 = vld [vmem:[#allocation3 + $0x14] sm:$0xf]  ;;  %v7092_v25 = vld [vmem:[#allocation3 + $0x18] sm:$0xf0] }
  0xe7   :  { %721 = vmatmul.bf16.gmra.mxu2 %v9035_v26  ;;  %7153 = vmatmul.msk.bf16.gmra.mxu3 %vm680_vm2, %v566_v27 }
  0xe8   :  { %v378_v28 = vpop.f32.mrf.mxu0  ;;  %v432_v29 = vpop.f32.mrf.mxu1 }
  0xe9   :  { %v9040_v33 = vpack.c.bf16 %v432_v29, %v378_v28 }
  0xeb   :  { %7162 = vmatmul.msk.bf16.gmra.mxu0 %vm680_vm2, %v566_v27  ;;  %v535_v37 = vunpack.c.l.b16 %v9040_v33  ;;  %v536_v39 = vunpack.c.h.b16 %v9040_v33  ;;  %v7095_v27 = vor.u32 %v8211_v24, %v7092_v25 }
  0xed   :  { %822 = vmatpush.bf16.msrb.mxu3 %v7095_v27 }
  0xf0   :  { %v380_v34 = vpop.f32.mrf.mxu0  ;;  %v434_v35 = vpop.f32.mrf.mxu1 }
  0xf1   :  { %v9042_v36 = vpack.c.bf16 %v434_v35, %v380_v34  ;;  %v8242_v34 = vld [vmem:[#allocation5 + $0x74] sm:$0xf0] }
  0xf2   :  { %v7229_v35 = vor.u32 %v8242_v34, %v7228_v32  ;;  %v7172_v32 = vld [vmem:[#allocation5] sm:$0xf]  ;;  %v8228_v34 = vld [vmem:[#allocation5 + $0x4] sm:$0xf0] }
  0xf3   :  { %v537_v38 = vunpack.c.l.b16 %v9042_v36  ;;  %v538_v40 = vunpack.c.h.b16 %v9042_v36 }
  0xf4   :  { %1132 = vmatpush.bf16.msrb.mxu1 %v7229_v35  ;;  %v7173_v35 = vor.u32 %v8228_v34, %v7172_v32 }
  0xf5   :  { %v9048_v41 = vpack.c.b16 %v537_v38, %v535_v37  ;;  %v568_v42 = vpack.c.b16 %v538_v40, %v536_v39  ;;  %v7220_v37 = vld [vmem:[#allocation5 + $0x60] sm:$0xf]  ;;  %v8240_v38 = vld [vmem:[#allocation5 + $0x64] sm:$0xf0] }
  0xf6   :  { %v7221_v39 = vor.u32 %v8240_v38, %v7220_v37 }
  0xf7   :  { %726 = vmatmul.bf16.gmra.mxu2 %v9048_v41  ;;  %7154 = vmatmul.msk.bf16.gmra.mxu3 %vm680_vm2, %v568_v42 }
  0xf8   :  { %v383_v43 = vpop.f32.mrf.mxu0  ;;  %v437_v44 = vpop.f32.mrf.mxu1  ;;  %1133 = vmatpush.bf16.msrb.mxu1 %v7221_v39  ;;  %v8241_v39 = vld [vmem:[#allocation5 + $0x74] sm:$0xf] }
  0xf9   :  { %v9053_v48 = vpack.c.bf16 %v437_v44, %v383_v43 }
  0xfb   :  { %7163 = vmatmul.msk.bf16.gmra.mxu0 %vm680_vm2, %v568_v42  ;;  %v539_v52 = vunpack.c.l.b16 %v9053_v48  ;;  %v540_v54 = vunpack.c.h.b16 %v9053_v48 }
  0xfc   :  { %1134 = vmatpush.bf16.msrb.mxu1 %v7213_v47  ;;  %v8246_v47 = vld [vmem:[#allocation5 + $0x94] sm:$0xf0] }
 0x100   :  { %v385_v49 = vpop.f32.mrf.mxu0  ;;  %v439_v50 = vpop.f32.mrf.mxu1 }
 0x101   :  { %v9055_v51 = vpack.c.bf16 %v439_v50, %v385_v49 }
 0x103   :  { %v541_v53 = vunpack.c.l.b16 %v9055_v51  ;;  %v542_v55 = vunpack.c.h.b16 %v9055_v51 }
 0x105   :  { %v9061_v56 = vpack.c.b16 %v541_v53, %v539_v52  ;;  %v570_v57 = vpack.c.b16 %v542_v55, %v540_v54  ;;  %v8209_v54 = vld [vmem:[#allocation3 + $0x4] sm:$0xf]  ;;  %v7084_v55 = vld [vmem:[#allocation3 + $0x8] sm:$0xf0] }
 0x107   :  { %731 = vmatmul.bf16.gmra.mxu2 %v9061_v56  ;;  %7155 = vmatmul.msk.bf16.gmra.mxu3 %vm680_vm2, %v570_v57 }
 0x108   :  { %v388_v58 = vpop.f32.mrf.mxu0  ;;  %v442_v59 = vpop.f32.mrf.mxu1 }
 0x109   :  { %v9066_v60 = vpack.c.bf16 %v442_v59, %v388_v58 }
 0x10b   :  { %7164 = vmatmul.msk.bf16.gmra.mxu0 %vm680_vm2, %v570_v57  ;;  %v543_v0 = vunpack.c.l.b16 %v9066_v60  ;;  %v544_v2 = vunpack.c.h.b16 %v9066_v60  ;;  %v7087_v57 = vor.u32 %v8209_v54, %v7084_v55  ;;  %v7246_v54 = vld [vmem:[#allocation5 + $0x98] sm:$0xf0] }
 0x10d   :  { %823 = vmatpush.bf16.msrb.mxu3 %v7087_v57 }
 0x110   :  { %v390_v61 = vpop.f32.mrf.mxu0  ;;  %v444_v62 = vpop.f32.mrf.mxu1 }
 0x111   :  { %v9068_v63 = vpack.c.bf16 %v444_v62, %v390_v61  ;;  %v7204_v61 = vld [vmem:[#allocation5 + $0x40] sm:$0xf]  ;;  %v8236_v62 = vld [vmem:[#allocation5 + $0x44] sm:$0xf0] }
 0x113   :  { %v545_v1 = vunpack.c.l.b16 %v9068_v63  ;;  %v546_v4 = vunpack.c.h.b16 %v9068_v63 }
 0x115   :  { %v9074_v9 = vpack.c.b16 %v545_v1, %v543_v0  ;;  %v572_v10 = vpack.c.b16 %v546_v4, %v544_v2  ;;  %v7205_v0 = vor.u32 %v8236_v62, %v7204_v61  ;;  %v7196_v4 = vld [vmem:[#allocation5 + $0x30] sm:$0xf] }
 0x116   :  { %v7197_v7 = vor.u32 %v8234_v5, %v7196_v4  ;;  %v9130_v4 = vld [vmem:[#allocation10] sm:$0x3] }
 0x117   :  { %736 = vmatmul.bf16.gmra.mxu2 %v9074_v9  ;;  %7156 = vmatmul.msk.bf16.gmra.mxu3 %vm680_vm2, %v572_v10 }
 0x118   :  { %v393_v12 = vpop.f32.mrf.mxu0  ;;  %v447_v13 = vpop.f32.mrf.mxu1  ;;  %1135 = vmatpush.bf16.msrb.mxu1 %v7205_v0 }
 0x119   :  { %v9079_v14 = vpack.c.bf16 %v447_v13, %v393_v12 }
 0x11b   :  { %7165 = vmatmul.msk.bf16.gmra.mxu0 %vm680_vm2, %v572_v10  ;;  %v547_v19 = vunpack.c.l.b16 %v9079_v14  ;;  %v548_v22 = vunpack.c.h.b16 %v9079_v14  ;;  %v8232_v10 = vld [vmem:[#allocation5 + $0x24] sm:$0xf0] }
 0x11c   :  { %1136 = vmatpush.bf16.msrb.mxu1 %v7197_v7  ;;  %v7189_v12 = vor.u32 %v8232_v10, %v7188_v8  ;;  %v9133_v8 = vperm.slane %v9130_v4, 0 }
 0x120   :  { %v395_v15 = vpop.f32.mrf.mxu0  ;;  %v449_v16 = vpop.f32.mrf.mxu1  ;;  %1137 = vmatpush.bf16.msrb.mxu1 %v7189_v12  ;;  %v8239_v12 = vld [vmem:[#allocation5 + $0x64] sm:$0xf] }
 0x121   :  { %v9081_v17 = vpack.c.bf16 %v449_v16, %v395_v15 }
 0x123   :  { %v549_v20 = vunpack.c.l.b16 %v9081_v17  ;;  %v550_v23 = vunpack.c.h.b16 %v9081_v17 }
 0x125   :  { %v9087_v28 = vpack.c.b16 %v549_v20, %v547_v19  ;;  %v574_v29 = vpack.c.b16 %v550_v23, %v548_v22  ;;  %v7180_v20 = vld [vmem:[#allocation5 + $0x10] sm:$0xf]  ;;  %v8230_v22 = vld [vmem:[#allocation5 + $0x14] sm:$0xf0] }
 0x126   :  { %v7181_v23 = vor.u32 %v8230_v22, %v7180_v20 }
 0x127   :  { %741 = vmatmul.bf16.gmra.mxu2 %v9087_v28  ;;  %7157 = vmatmul.msk.bf16.gmra.mxu3 %vm680_vm2, %v574_v29 }
 0x128   :  { %v398_v30 = vpop.f32.mrf.mxu0  ;;  %v452_v31 = vpop.f32.mrf.mxu1  ;;  %1138 = vmatpush.bf16.msrb.mxu1 %v7181_v23 }
 0x129   :  { %v9092_v40 = vpack.c.bf16 %v452_v31, %v398_v30 }
 0x12b   :  { %7166 = vmatmul.msk.bf16.gmra.mxu0 %vm680_vm2, %v574_v29  ;;  %v551_v49 = vunpack.c.l.b16 %v9092_v40  ;;  %v552_v52 = vunpack.c.h.b16 %v9092_v40 }
 0x12c   :  { %1139 = vmatpush.bf16.msrb.mxu1 %v7173_v35 }
 0x130   :  { %v400_v42 = vpop.f32.mrf.mxu0  ;;  %v454_v43 = vpop.f32.mrf.mxu1 }
 0x131   :  { %v9094_v44 = vpack.c.bf16 %v454_v43, %v400_v42  ;;  %v7230_v42 = vld [vmem:[#allocation5 + $0x78] sm:$0xf0] }
 0x132   :  { %v7233_v43 = vor.u32 %v8241_v39, %v7230_v42 }
 0x133   :  { %v553_v50 = vunpack.c.l.b16 %v9094_v44  ;;  %v554_v53 = vunpack.c.h.b16 %v9094_v44 }
 0x134   :  { %1240 = vmatpush.bf16.msra.mxu3 %v7233_v43 }
 0x135   :  { %v9100_v58 = vpack.c.b16 %v553_v50, %v551_v49  ;;  %v576_v59 = vpack.c.b16 %v554_v53, %v552_v52  ;;  %v7245_v52 = vor.u32 %v8246_v47, %v7244_v46  ;;  %v8245_v53 = vld [vmem:[#allocation5 + $0x94] sm:$0xf] }
 0x136   :  { %v7249_v57 = vor.u32 %v8245_v53, %v7246_v54 }
 0x137   :  { %746 = vmatmul.bf16.gmra.mxu2 %v9100_v58  ;;  %7158 = vmatmul.msk.bf16.gmra.mxu3 %vm680_vm2, %v576_v59 }
 0x138   :  { %v403_v1 = vpop.f32.mrf.mxu0  ;;  %v457_v2 = vpop.f32.mrf.mxu1  ;;  %1192 = vmatpush.bf16.msrb.mxu2 %v7245_v52  ;;  %1300 = vmatpush.bf16.msra.mxu0 %v7249_v57 }
 0x139   :  { %v9105_v13 = vpack.c.bf16 %v457_v2, %v403_v1 }
 0x13b   :  { %7167 = vmatmul.msk.bf16.gmra.mxu0 %vm680_vm2, %v576_v59  ;;  %v555_v24 = vunpack.c.l.b16 %v9105_v13  ;;  %v556_v27 = vunpack.c.h.b16 %v9105_v13 }
 0x140   :  { %v405_v15 = vpop.f32.mrf.mxu0  ;;  %v459_v16 = vpop.f32.mrf.mxu1 }
 0x141   :  { %v9107_v19 = vpack.c.bf16 %v459_v16, %v405_v15  ;;  %v7222_v15 = vld [vmem:[#allocation5 + $0x68] sm:$0xf0] }
 0x142   :  { %v7225_v16 = vor.u32 %v8239_v12, %v7222_v15 }
 0x143   :  { %v557_v25 = vunpack.c.l.b16 %v9107_v19  ;;  %v558_v29 = vunpack.c.h.b16 %v9107_v19 }
 0x144   :  { %1241 = vmatpush.bf16.msra.mxu3 %v7225_v16 }
 0x145   :  { %v9113_v30 = vpack.c.b16 %v557_v25, %v555_v24  ;;  %v578_v31 = vpack.c.b16 %v558_v29, %v556_v27 }
 0x147   :  { %751 = vmatmul.bf16.gmra.mxu2 %v9113_v30  ;;  %7159 = vmatmul.msk.bf16.gmra.mxu3 %vm680_vm2, %v578_v31 }
 0x148   :  { %v408_v37 = vpop.f32.mrf.mxu0  ;;  %v462_v38 = vpop.f32.mrf.mxu1 }
 0x149   :  { %v9118_v45 = vpack.c.bf16 %v462_v38, %v408_v37  ;;  %v8237_v37 = vld [vmem:[#allocation5 + $0x54] sm:$0xf]  ;;  %v7214_v38 = vld [vmem:[#allocation5 + $0x58] sm:$0xf0] }
 0x14a   :  { %v7217_v39 = vor.u32 %v8237_v37, %v7214_v38  ;;  %v7236_v38 = vld [vmem:[#allocation5 + $0x80] sm:$0xf] }
 0x14b   :  { %7168 = vmatmul.msk.bf16.gmra.mxu0 %vm680_vm2, %v578_v31  ;;  %v559_v59 = vunpack.c.l.b16 %v9118_v45  ;;  %v560_v62 = vunpack.c.h.b16 %v9118_v45 }
 0x14c   :  { %1242 = vmatpush.bf16.msra.mxu3 %v7217_v39  ;;  %v8244_v39 = vld [vmem:[#allocation5 + $0x84] sm:$0xf0] }
 0x150   :  { %v410_v49 = vpop.f32.mrf.mxu0  ;;  %v464_v50 = vpop.f32.mrf.mxu1 }
 0x151   :  { %v9120_v55 = vpack.c.bf16 %v464_v50, %v410_v49 }
 0x153   :  { %v561_v61 = vunpack.c.l.b16 %v9120_v55  ;;  %v562_v0 = vunpack.c.h.b16 %v9120_v55 }
 0x155   :  { %v9126_v1 = vpack.c.b16 %v561_v61, %v559_v59  ;;  %v580_v2 = vpack.c.b16 %v562_v0, %v560_v62  ;;  %v8235_v59 = vld [vmem:[#allocation5 + $0x44] sm:$0xf]  ;;  %v7206_v61 = vld [vmem:[#allocation5 + $0x48] sm:$0xf0] }
 0x156   :  { %v7209_v62 = vor.u32 %v8235_v59, %v7206_v61 }
 0x157   :  { %756 = vmatmul.bf16.gmra.mxu2 %v9126_v1  ;;  %7160 = vmatmul.msk.bf16.gmra.mxu3 %vm680_vm2, %v580_v2 }
 0x158   :  { %1243 = vmatpush.bf16.msra.mxu3 %v7209_v62 }
 0x15a   :  { %v717_v5 = vpop.f32.mrf.mxu2  ;;  %v771_v7 = vpop.f32.mrf.mxu3 }
 0x15b   :  { %7169 = vmatmul.msk.bf16.gmra.mxu0 %vm680_vm2, %v580_v2  ;;  %v718_v10 = vadd.f32 %v717_v5, %v9133_v8 }
 0x15d   :  { %v772_v23 = vadd.f32 %v771_v7, %v718_v10 }
 0x15f   :  { %v924_v27 = vmax.f32 %v772_v23, 0.0  ;;  %v8233_v23 = vld [vmem:[#allocation5 + $0x34] sm:$0xf] }
 0x162   :  { %v719_v20 = vpop.f32.mrf.mxu2  ;;  %v773_v22 = vpop.f32.mrf.mxu3 }
 0x163   :  { %v720_v24 = vadd.f32 %v719_v20, %v9133_v8 }
 0x165   :  { %v774_v25 = vadd.f32 %v773_v22, %v720_v24  ;;  %v7198_v24 = vld [vmem:[#allocation5 + $0x38] sm:$0xf0] }
 0x167   :  { %v926_v29 = vmax.f32 %v774_v25, 0.0  ;;  %824 = vmatmul.bf16.vlgmr.msrb.gmra.mxu3 %v9022_v11  ;;  %v7201_v25 = vor.u32 %v8233_v23, %v7198_v24 }
 0x169   :  { %v9139_v31 = vpack.c.bf16 %v926_v29, %v924_v27  ;;  %1244 = vmatpush.bf16.msra.mxu3 %v7201_v25 }
 0x16a   :  { %v722_v32 = vpop.f32.mrf.mxu2  ;;  %v776_v34 = vpop.f32.mrf.mxu3 }
 0x16b   :  { %1140 = vmatmul.bf16.vlgmr.msrb.gmra.mxu1 %v9139_v31  ;;  %v723_v35 = vadd.f32 %v722_v32, %v9133_v8 }
 0x16d   :  { %v777_v46 = vadd.f32 %v776_v34, %v723_v35 }
 0x16f   :  { %v928_v50 = vmax.f32 %v777_v46, 0.0  ;;  %v7238_v46 = vld [vmem:[#allocation5 + $0x88] sm:$0xf0] }
 0x172   :  { %v724_v42 = vpop.f32.mrf.mxu2  ;;  %v778_v43 = vpop.f32.mrf.mxu3 }
 0x173   :  { %v725_v47 = vadd.f32 %v724_v42, %v9133_v8  ;;  %v7237_v42 = vor.u32 %v8244_v39, %v7236_v38 }
 0x175   :  { %v779_v49 = vadd.f32 %v778_v43, %v725_v47  ;;  %v8243_v43 = vld [vmem:[#allocation5 + $0x84] sm:$0xf]  ;;  %1193 = vmatpush.bf16.msrb.mxu2 %v7237_v42 }
 0x177   :  { %v930_v11 = vmax.f32 %v779_v49, 0.0  ;;  %829 = vmatmul.bf16.gmra.mxu3 %v9035_v26  ;;  %v7241_v49 = vor.u32 %v8243_v43, %v7238_v46 }
 0x179   :  { %v9145_v52 = vpack.c.bf16 %v930_v11, %v928_v50  ;;  %1301 = vmatpush.bf16.msra.mxu0 %v7241_v49  ;;  %v879_v49 = vpop.f32.mrf.mxu0 }
 0x17a   :  { %v727_v53 = vpop.f32.mrf.mxu2  ;;  %v781_v54 = vpop.f32.mrf.mxu3 }
 0x17b   :  { %1145 = vmatmul.bf16.gmra.mxu1 %v9145_v52  ;;  %v728_v57 = vadd.f32 %v727_v53, %v9133_v8 }
 0x17d   :  { %v782_v5 = vadd.f32 %v781_v54, %v728_v57 }
 0x17f   :  { %v932_v12 = vmax.f32 %v782_v5, 0.0  ;;  %v7190_v5 = vld [vmem:[#allocation5 + $0x28] sm:$0xf0] }
 0x182   :  { %v729_v0 = vpop.f32.mrf.mxu2  ;;  %v783_v2 = vpop.f32.mrf.mxu3 }
 0x183   :  { %v730_v7 = vadd.f32 %v729_v0, %v9133_v8 }
 0x185   :  { %v784_v10 = vadd.f32 %v783_v2, %v730_v7  ;;  %v8231_v2 = vld [vmem:[#allocation5 + $0x24] sm:$0xf] }
 0x186   :  { %v7193_v7 = vor.u32 %v8231_v2, %v7190_v5 }
 0x187   :  { %v934_v26 = vmax.f32 %v784_v10, 0.0  ;;  %834 = vmatmul.bf16.gmra.mxu3 %v9048_v41 }
 0x188   :  { %1245 = vmatpush.bf16.msra.mxu3 %v7193_v7 }
 0x189   :  { %v9151_v15 = vpack.c.bf16 %v934_v26, %v932_v12 }
 0x18a   :  { %v732_v16 = vpop.f32.mrf.mxu2  ;;  %v786_v20 = vpop.f32.mrf.mxu3 }
 0x18b   :  { %1150 = vmatmul.bf16.gmra.mxu1 %v9151_v15  ;;  %v733_v22 = vadd.f32 %v732_v16, %v9133_v8 }
 0x18d   :  { %v787_v32 = vadd.f32 %v786_v20, %v733_v22 }
 0x18f   :  { %v936_v37 = vmax.f32 %v787_v32, 0.0  ;;  %v7182_v32 = vld [vmem:[#allocation5 + $0x18] sm:$0xf0] }
 0x192   :  { %v734_v27 = vpop.f32.mrf.mxu2  ;;  %v788_v29 = vpop.f32.mrf.mxu3 }
 0x193   :  { %v735_v34 = vadd.f32 %v734_v27, %v9133_v8 }
 0x195   :  { %v789_v35 = vadd.f32 %v788_v29, %v735_v34  ;;  %v8229_v29 = vld [vmem:[#allocation5 + $0x14] sm:$0xf] }
 0x196   :  { %v7185_v34 = vor.u32 %v8229_v29, %v7182_v32 }
 0x197   :  { %v938_v41 = vmax.f32 %v789_v35, 0.0  ;;  %839 = vmatmul.bf16.gmra.mxu3 %v9061_v56 }
 0x198   :  { %1246 = vmatpush.bf16.msra.mxu3 %v7185_v34 }
 0x199   :  { %v9157_v47 = vpack.c.bf16 %v938_v41, %v936_v37 }
 0x19a   :  { %v737_v50 = vpop.f32.mrf.mxu2  ;;  %v791_v11 = vpop.f32.mrf.mxu3 }
 0x19b   :  { %1155 = vmatmul.bf16.gmra.mxu1 %v9157_v47  ;;  %v738_v53 = vadd.f32 %v737_v50, %v9133_v8 }
 0x19d   :  { %v792_v59 = vadd.f32 %v791_v11, %v738_v53  ;;  %v8227_v53 = vld [vmem:[#allocation5 + $0x4] sm:$0xf] }
 0x19f   :  { %v940_v62 = vmax.f32 %v792_v59, 0.0 }
 0x1a2   :  { %v739_v54 = vpop.f32.mrf.mxu2  ;;  %v793_v57 = vpop.f32.mrf.mxu3 }
 0x1a3   :  { %v740_v56 = vadd.f32 %v739_v54, %v9133_v8  ;;  %v7174_v54 = vld [vmem:[#allocation5 + $0x8] sm:$0xf0] }
 0x1a5   :  { %v794_v61 = vadd.f32 %v793_v57, %v740_v56  ;;  %v7177_v57 = vor.u32 %v8227_v53, %v7174_v54  ;;  %v9190_v53 = vperm.slane %v9130_v4, 1 }
 0x1a7   :  { %v942_v0 = vmax.f32 %v794_v61, 0.0  ;;  %844 = vmatmul.bf16.gmra.mxu3 %v9074_v9 }
 0x1a8   :  { %1247 = vmatpush.bf16.msra.mxu3 %v7177_v57  ;;  %v8262_v57 = vld [vmem:[#allocation3 + $0x104] sm:$0xf0] }
 0x1a9   :  { %v9163_v10 = vpack.c.bf16 %v942_v0, %v940_v62  ;;  %v881_v62 = vpop.f32.mrf.mxu0 }
 0x1aa   :  { %v742_v12 = vpop.f32.mrf.mxu2  ;;  %v796_v26 = vpop.f32.mrf.mxu3 }
 0x1ab   :  { %1160 = vmatmul.bf16.gmra.mxu1 %v9163_v10  ;;  %v743_v16 = vadd.f32 %v742_v12, %v9133_v8 }
 0x1ad   :  { %v797_v23 = vadd.f32 %v796_v26, %v743_v16 }
 0x1af   :  { %v944_v27 = vmax.f32 %v797_v23, 0.0 }
 0x1b2   :  { %v744_v20 = vpop.f32.mrf.mxu2  ;;  %v798_v22 = vpop.f32.mrf.mxu3 }
 0x1b3   :  { %v745_v24 = vadd.f32 %v744_v20, %v9133_v8  ;;  %v884_v20 = vpop.f32.mrf.mxu0 }
 0x1b5   :  { %v799_v25 = vadd.f32 %v798_v22, %v745_v24 }
 0x1b7   :  { %v946_v9 = vmax.f32 %v799_v25, 0.0  ;;  %849 = vmatmul.bf16.gmra.mxu3 %v9087_v28 }
 0x1b9   :  { %v9169_v35 = vpack.c.bf16 %v946_v9, %v944_v27 }
 0x1ba   :  { %v747_v37 = vpop.f32.mrf.mxu2  ;;  %v801_v41 = vpop.f32.mrf.mxu3 }
 0x1bb   :  { %1165 = vmatmul.bf16.gmra.mxu1 %v9169_v35  ;;  %v748_v38 = vadd.f32 %v747_v37, %v9133_v8  ;;  %v886_v34 = vpop.f32.mrf.mxu0 }
 0x1bd   :  { %v802_v43 = vadd.f32 %v801_v41, %v748_v38 }
 0x1bf   :  { %v948_v28 = vmax.f32 %v802_v43, 0.0  ;;  %v8261_v43 = vld [vmem:[#allocation3 + $0x104] sm:$0xf] }
 0x1c2   :  { %v749_v39 = vpop.f32.mrf.mxu2  ;;  %v803_v42 = vpop.f32.mrf.mxu3 }
 0x1c3   :  { %v750_v46 = vadd.f32 %v749_v39, %v9133_v8  ;;  %v8264_v39 = vld [vmem:[#allocation3 + $0x114] sm:$0xf0] }
 0x1c5   :  { %v804_v50 = vadd.f32 %v803_v42, %v750_v46  ;;  %v7328_v46 = vld [vmem:[#allocation3 + $0x108] sm:$0xf0] }
 0x1c7   :  { %v950_v11 = vmax.f32 %v804_v50, 0.0  ;;  %854 = vmatmul.bf16.gmra.mxu3 %v9100_v58 }
 0x1c9   :  { %v9175_v59 = vpack.c.bf16 %v950_v11, %v948_v28  ;;  %v7331_v28 = vor.u32 %v8261_v43, %v7328_v46 }
 0x1ca   :  { %v752_v56 = vpop.f32.mrf.mxu2  ;;  %v806_v61 = vpop.f32.mrf.mxu3 }
 0x1cb   :  { %1170 = vmatmul.bf16.gmra.mxu1 %v9175_v59  ;;  %v753_v0 = vadd.f32 %v752_v56, %v9133_v8  ;;  %1860 = vmatpush.bf16.msrb.mxu3 %v7331_v28 }
 0x1cd   :  { %v807_v7 = vadd.f32 %v806_v61, %v753_v0  ;;  %v8263_v61 = vld [vmem:[#allocation3 + $0x114] sm:$0xf]  ;;  %v7336_v0 = vld [vmem:[#allocation3 + $0x118] sm:$0xf0] }
 0x1cf   :  { %v952_v58 = vmax.f32 %v807_v7, 0.0 }
 0x1d2   :  { %v754_v2 = vpop.f32.mrf.mxu2  ;;  %v808_v5 = vpop.f32.mrf.mxu3 }
 0x1d3   :  { %v755_v12 = vadd.f32 %v754_v2, %v9133_v8  ;;  %v7339_v2 = vor.u32 %v8263_v61, %v7336_v0 }
 0x1d5   :  { %v809_v26 = vadd.f32 %v808_v5, %v755_v12  ;;  %1921 = vmatpush.bf16.msrb.mxu0 %v7339_v2 }
 0x1d7   :  { %v954_v16 = vmax.f32 %v809_v26, 0.0  ;;  %859 = vmatmul.bf16.gmra.mxu3 %v9113_v30  ;;  %v7334_v30 = vld [vmem:[#allocation3 + $0x110] sm:$0xf] }
 0x1d8   :  { %v7335_v42 = vor.u32 %v8264_v39, %v7334_v30 }
 0x1d9   :  { %v9181_v22 = vpack.c.bf16 %v954_v16, %v952_v58 }
 0x1da   :  { %v757_v23 = vpop.f32.mrf.mxu2  ;;  %v811_v24 = vpop.f32.mrf.mxu3  ;;  %1813 = vmatpush.bf16.msra.mxu2 %v7335_v42 }
 0x1db   :  { %1175 = vmatmul.bf16.gmra.mxu1 %v9181_v22  ;;  %v758_v25 = vadd.f32 %v757_v23, %v9133_v8 }
 0x1dd   :  { %v812_v29 = vadd.f32 %v811_v24, %v758_v25  ;;  %v8259_v24 = vld [vmem:[#allocation3 + $0xf4] sm:$0xf]  ;;  %v7320_v25 = vld [vmem:[#allocation3 + $0xf8] sm:$0xf0] }
 0x1df   :  { %v956_v41 = vmax.f32 %v812_v29, 0.0  ;;  %v7318_v29 = vld [vmem:[#allocation3 + $0xf0] sm:$0xf] }
 0x1e2   :  { %v759_v27 = vpop.f32.mrf.mxu2  ;;  %v813_v9 = vpop.f32.mrf.mxu3 }
 0x1e3   :  { %v760_v32 = vadd.f32 %v759_v27, %v9133_v8  ;;  %v889_v8 = vpop.f32.mrf.mxu0 }
 0x1e5   :  { %v814_v37 = vadd.f32 %v813_v9, %v760_v32  ;;  %v7323_v9 = vor.u32 %v8259_v24, %v7320_v25  ;;  %v7304_v24 = vld [vmem:[#allocation3 + $0xd8] sm:$0xf0] }
 0x1e7   :  { %v958_v38 = vmax.f32 %v814_v37, 0.0  ;;  %864 = vmatmul.bf16.gmra.mxu3 %v9126_v1  ;;  %v7326_v1 = vld [vmem:[#allocation3 + $0x100] sm:$0xf] }
 0x1e8   :  { %v7327_v56 = vor.u32 %v8262_v57, %v7326_v1  ;;  %1861 = vmatpush.bf16.msrb.mxu3 %v7323_v9  ;;  %v7312_v1 = vld [vmem:[#allocation3 + $0xe8] sm:$0xf0]  ;;  %v8256_v9 = vld [vmem:[#allocation3 + $0xd4] sm:$0xf0] }
 0x1e9   :  { %v9187_v50 = vpack.c.bf16 %v958_v38, %v956_v41 }
 0x1ea   :  { %v825_v11 = vpop.f32.mrf.mxu3  ;;  %1752 = vmatpush.bf16.msra.mxu1 %v7327_v56  ;;  %v8258_v56 = vld [vmem:[#allocation3 + $0xe4] sm:$0xf0] }
 0x1eb   :  { %1180 = vmatmul.bf16.gmra.mxu1 %v9187_v50  ;;  %v826_v54 = vadd.f32 %v825_v11, %v9190_v53  ;;  %v891_v16 = vpop.f32.mrf.mxu0 }
 0x1ed   :  { %v880_v7 = vadd.f32 %v879_v49, %v826_v54  ;;  %v8257_v54 = vld [vmem:[#allocation3 + $0xe4] sm:$0xf] }
 0x1ee   :  { %v7315_v57 = vor.u32 %v8257_v54, %v7312_v1 }
 0x1ef   :  { %v925_v26 = vmax.f32 %v880_v7, 0.0 }
 0x1f0   :  { %1862 = vmatpush.bf16.msrb.mxu3 %v7315_v57 }
 0x1f2   :  { %v827_v5 = vpop.f32.mrf.mxu3 }
 0x1f3   :  { %v828_v12 = vadd.f32 %v827_v5, %v9190_v53  ;;  %v894_v37 = vpop.f32.mrf.mxu0 }
 0x1f5   :  { %v882_v4 = vadd.f32 %v881_v62, %v828_v12  ;;  %v8260_v62 = vld [vmem:[#allocation3 + $0xf4] sm:$0xf0] }
 0x1f6   :  { %v7319_v32 = vor.u32 %v8260_v62, %v7318_v29 }
 0x1f7   :  { %v927_v58 = vmax.f32 %v882_v4, 0.0  ;;  %1248 = vmatmul.bf16.vlgmr.msra.gmra.mxu3 %v9139_v31 }
 0x1f8   :  { %1753 = vmatpush.bf16.msra.mxu1 %v7319_v32 }
 0x1f9   :  { %v961_v23 = vpack.c.bf16 %v927_v58, %v925_v26 }
 0x1fa   :  { %v830_v27 = vpop.f32.mrf.mxu3 }
 0x1fb   :  { %7250 = vmatmul.msk.bf16.vlgmr.msrb.gmra.mxu2 %vm1104_vm3, %v961_v23  ;;  %7259 = vmatmul.msk.bf16.vlgmr.msra.gmra.mxu0 %vm1104_vm3, %v961_v23  ;;  %v831_v49 = vadd.f32 %v830_v27, %v9190_v53  ;;  %v896_v28 = vpop.f32.mrf.mxu0  ;;  %v8255_v23 = vld [vmem:[#allocation3 + $0xd4] sm:$0xf]  ;;  %v7302_v27 = vld [vmem:[#allocation3 + $0xd0] sm:$0xf] }
 0x1fc   :  { %v7307_v25 = vor.u32 %v8255_v23, %v7304_v24 }
 0x1fd   :  { %v885_v31 = vadd.f32 %v884_v20, %v831_v49  ;;  %v7310_v20 = vld [vmem:[#allocation3 + $0xe0] sm:$0xf]  ;;  %v7303_v49 = vor.u32 %v8256_v9, %v7302_v27  ;;  %v7286_v27 = vld [vmem:[#allocation3 + $0xb0] sm:$0xf]  ;;  %v8252_v9 = vld [vmem:[#allocation3 + $0xb4] sm:$0xf0] }
 0x1fe   :  { %v7311_v61 = vor.u32 %v8258_v56, %v7310_v20  ;;  %1863 = vmatpush.bf16.msrb.mxu3 %v7307_v25  ;;  %v7294_v56 = vld [vmem:[#allocation3 + $0xc0] sm:$0xf] }
 0x1ff   :  { %v929_v39 = vmax.f32 %v885_v31, 0.0 }
 0x200   :  { %1754 = vmatpush.bf16.msra.mxu1 %v7311_v61  ;;  %v8254_v61 = vld [vmem:[#allocation3 + $0xc4] sm:$0xf0] }
 0x202   :  { %v832_v41 = vpop.f32.mrf.mxu3 }
 0x203   :  { %v833_v38 = vadd.f32 %v832_v41, %v9190_v53  ;;  %v899_v5 = vpop.f32.mrf.mxu0 }
 0x204   :  { %1755 = vmatpush.bf16.msra.mxu1 %v7303_v49  ;;  %v7287_v49 = vor.u32 %v8252_v9, %v7286_v27 }
 0x205   :  { %v887_v30 = vadd.f32 %v886_v34, %v833_v38 }
 0x207   :  { %v931_v42 = vmax.f32 %v887_v30, 0.0  ;;  %1253 = vmatmul.bf16.gmra.mxu3 %v9145_v52 }
 0x209   :  { %v963_v43 = vpack.c.bf16 %v931_v42, %v929_v39  ;;  %v8253_v42 = vld [vmem:[#allocation3 + $0xc4] sm:$0xf] }
 0x20a   :  { %v835_v46 = vpop.f32.mrf.mxu3 }
 0x20b   :  { %7251 = vmatmul.msk.bf16.gmra.mxu2 %vm1104_vm3, %v963_v43  ;;  %7260 = vmatmul.msk.bf16.gmra.mxu0 %vm1104_vm3, %v963_v43  ;;  %v836_v11 = vadd.f32 %v835_v46, %v9190_v53  ;;  %v7296_v43 = vld [vmem:[#allocation3 + $0xc8] sm:$0xf0] }
 0x20d   :  { %v890_v0 = vadd.f32 %v889_v8, %v836_v11  ;;  %v901_v8 = vpop.f32.mrf.mxu0 }
 0x20f   :  { %v933_v7 = vmax.f32 %v890_v0, 0.0  ;;  %v7295_v0 = vor.u32 %v8254_v61, %v7294_v56 }
 0x211   :  { %1756 = vmatpush.bf16.msra.mxu1 %v7295_v0 }
 0x212   :  { %v837_v34 = vpop.f32.mrf.mxu3 }
 0x213   :  { %v838_v52 = vadd.f32 %v837_v34, %v9190_v53 }
 0x215   :  { %v892_v2 = vadd.f32 %v891_v16, %v838_v52  ;;  %v904_v38 = vpop.f32.mrf.mxu0  ;;  %1757 = vmatpush.bf16.msra.mxu1 %v7287_v49 }
 0x217   :  { %v935_v12 = vmax.f32 %v892_v2, 0.0  ;;  %1258 = vmatmul.bf16.gmra.mxu3 %v9151_v15 }
 0x219   :  { %v965_v4 = vpack.c.bf16 %v935_v12, %v933_v7  ;;  %v7288_v7 = vld [vmem:[#allocation3 + $0xb8] sm:$0xf0] }
 0x21a   :  { %v840_v26 = vpop.f32.mrf.mxu3 }
 0x21b   :  { %7252 = vmatmul.msk.bf16.gmra.mxu2 %vm1104_vm3, %v965_v4  ;;  %7261 = vmatmul.msk.bf16.gmra.mxu0 %vm1104_vm3, %v965_v4  ;;  %v841_v58 = vadd.f32 %v840_v26, %v9190_v53 }
 0x21d   :  { %v895_v29 = vadd.f32 %v894_v37, %v841_v58  ;;  %v7299_v37 = vor.u32 %v8253_v42, %v7296_v43  ;;  %v906_v54 = vpop.f32.mrf.mxu0  ;;  %v8249_v42 = vld [vmem:[#allocation3 + $0xa4] sm:$0xf]  ;;  %v7280_v43 = vld [vmem:[#allocation3 + $0xa8] sm:$0xf0] }
 0x21f   :  { %v937_v32 = vmax.f32 %v895_v29, 0.0  ;;  %1864 = vmatpush.bf16.msrb.mxu3 %v7299_v37  ;;  %v7278_v37 = vld [vmem:[#allocation3 + $0xa0] sm:$0xf] }
 0x222   :  { %v842_v16 = vpop.f32.mrf.mxu3 }
 0x223   :  { %v843_v15 = vadd.f32 %v842_v16, %v9190_v53 }
 0x225   :  { %v897_v62 = vadd.f32 %v896_v28, %v843_v15  ;;  %v909_v52 = vpop.f32.mrf.mxu0 }
 0x227   :  { %v939_v41 = vmax.f32 %v897_v62, 0.0  ;;  %1263 = vmatmul.bf16.gmra.mxu3 %v9157_v47 }
 0x229   :  { %v967_v31 = vpack.c.bf16 %v939_v41, %v937_v32 }
 0x22a   :  { %v845_v30 = vpop.f32.mrf.mxu3 }
 0x22b   :  { %7253 = vmatmul.msk.bf16.gmra.mxu2 %vm1104_vm3, %v967_v31  ;;  %7262 = vmatmul.msk.bf16.gmra.mxu0 %vm1104_vm3, %v967_v31  ;;  %v846_v39 = vadd.f32 %v845_v30, %v9190_v53  ;;  %v1141_v30 = vpop.f32.mrf.mxu1 }
 0x22d   :  { %v900_v11 = vadd.f32 %v899_v5, %v846_v39  ;;  %v8251_v5 = vld [vmem:[#allocation3 + $0xb4] sm:$0xf] }
 0x22e   :  { %v7291_v4 = vor.u32 %v8251_v5, %v7288_v7  ;;  %v8247_v7 = vld [vmem:[#allocation3 + $0x94] sm:$0xf] }
 0x22f   :  { %v941_v47 = vmax.f32 %v900_v11, 0.0  ;;  %v7283_v11 = vor.u32 %v8249_v42, %v7280_v43 }
 0x230   :  { %1865 = vmatpush.bf16.msrb.mxu3 %v7291_v4 }
 0x232   :  { %v847_v46 = vpop.f32.mrf.mxu3 }
 0x233   :  { %v848_v28 = vadd.f32 %v847_v46, %v9190_v53 }
 0x234   :  { %1866 = vmatpush.bf16.msrb.mxu3 %v7283_v11 }
 0x235   :  { %v902_v1 = vadd.f32 %v901_v8, %v848_v28  ;;  %v911_v8 = vpop.f32.mrf.mxu0  ;;  %v8250_v28 = vld [vmem:[#allocation3 + $0xa4] sm:$0xf0] }
 0x237   :  { %v943_v57 = vmax.f32 %v902_v1, 0.0  ;;  %1268 = vmatmul.bf16.gmra.mxu3 %v9163_v10 }
 0x239   :  { %v969_v20 = vpack.c.bf16 %v943_v57, %v941_v47  ;;  %v1143_v57 = vpop.f32.mrf.mxu1 }
 0x23a   :  { %v850_v34 = vpop.f32.mrf.mxu3 }
 0x23b   :  { %7254 = vmatmul.msk.bf16.gmra.mxu2 %vm1104_vm3, %v969_v20  ;;  %7263 = vmatmul.msk.bf16.gmra.mxu0 %vm1104_vm3, %v969_v20  ;;  %v851_v2 = vadd.f32 %v850_v34, %v9190_v53 }
 0x23d   :  { %v905_v26 = vadd.f32 %v904_v38, %v851_v2  ;;  %v914_v15 = vpop.f32.mrf.mxu0 }
 0x23f   :  { %v945_v23 = vmax.f32 %v905_v26, 0.0 }
 0x241   :  { %v9233_v4 = vpop.f32.mrf.mxu1 }
 0x242   :  { %v852_v12 = vpop.f32.mrf.mxu3 }
 0x243   :  { %v853_v10 = vadd.f32 %v852_v12, %v9190_v53  ;;  %v7272_v12 = vld [vmem:[#allocation3 + $0x98] sm:$0xf0] }
 0x244   :  { %v7275_v26 = vor.u32 %v8247_v7, %v7272_v12  ;;  %v1402_v12 = vunpack.c.l.bf16 %v9014_v3 }
 0x245   :  { %v907_v58 = vadd.f32 %v906_v54, %v853_v10  ;;  %v7279_v54 = vor.u32 %v8250_v28, %v7278_v37  ;;  %v916_v1 = vpop.f32.mrf.mxu0  ;;  %v8279_v28 = vld [vmem:[#allocation5 + $0x114] sm:$0xf] }
 0x246   :  { %1867 = vmatpush.bf16.msrb.mxu3 %v7275_v26  ;;  %v1403_v26 = vunpack.c.h.bf16 %v9014_v3  ;;  %v1405_v3 = vunpack.c.h.bf16 %v9016_v6 }
 0x247   :  { %v947_v24 = vmax.f32 %v907_v58, 0.0  ;;  %1273 = vmatmul.bf16.gmra.mxu3 %v9169_v35  ;;  %1758 = vmatpush.bf16.msra.mxu1 %v7279_v54  ;;  %v7418_v54 = vld [vmem:[#allocation5 + $0x118] sm:$0xf0] }
 0x249   :  { %v971_v25 = vpack.c.bf16 %v947_v24, %v945_v23  ;;  %v7270_v23 = vld [vmem:[#allocation3 + $0x90] sm:$0xf]  ;;  %v8248_v24 = vld [vmem:[#allocation3 + $0x94] sm:$0xf0]  ;;  %v9237_v49 = vpop.f32.mrf.mxu1 }
 0x24a   :  { %v855_v16 = vpop.f32.mrf.mxu3 }
 0x24b   :  { %7255 = vmatmul.msk.bf16.gmra.mxu2 %vm1104_vm3, %v971_v25  ;;  %7264 = vmatmul.msk.bf16.gmra.mxu0 %vm1104_vm3, %v971_v25  ;;  %v856_v29 = vadd.f32 %v855_v16, %v9190_v53  ;;  %v7271_v25 = vor.u32 %v8248_v24, %v7270_v23  ;;  %v998_v16 = vld [vmem:[#allocation11] sm:$0x3]  ;;  %v7416_v24 = vld [vmem:[#allocation5 + $0x110] sm:$0xf] }
 0x24d   :  { %v910_v32 = vadd.f32 %v909_v52, %v856_v29  ;;  %v919_v34 = vpop.f32.mrf.mxu0  ;;  %1759 = vmatpush.bf16.msra.mxu1 %v7271_v25 }
 0x24f   :  { %v949_v35 = vmax.f32 %v910_v32, 0.0 }
 0x251   :  { %v9248_v37 = vpop.f32.mrf.mxu1 }
 0x252   :  { %v857_v62 = vpop.f32.mrf.mxu3 }
 0x253   :  { %v858_v41 = vadd.f32 %v857_v62, %v9190_v53  ;;  %v9240_v62 = vperm.slane %v998_v16, 1 }
 0x255   :  { %v912_v31 = vadd.f32 %v911_v8, %v858_v41  ;;  %v921_v58 = vpop.f32.mrf.mxu0  ;;  %v9242_v41 = vperm.slane %v998_v16, 0  ;;  %v8283_v16 = vld [vmem:[#allocation5 + $0x134] sm:$0xf] }
 0x257   :  { %v951_v38 = vmax.f32 %v912_v31, 0.0  ;;  %1278 = vmatmul.bf16.gmra.mxu3 %v9175_v59 }
 0x259   :  { %v973_v39 = vpack.c.bf16 %v951_v38, %v949_v35  ;;  %v9254_v25 = vpop.f32.mrf.mxu1 }
 0x25a   :  { %v860_v46 = vpop.f32.mrf.mxu3 }
 0x25b   :  { %7256 = vmatmul.msk.bf16.gmra.mxu2 %vm1104_vm3, %v973_v39  ;;  %7265 = vmatmul.msk.bf16.gmra.mxu0 %vm1104_vm3, %v973_v39  ;;  %v861_v47 = vadd.f32 %v860_v46, %v9190_v53 }
 0x25d   :  { %v915_v20 = vadd.f32 %v914_v15, %v861_v47  ;;  %v7421_v47 = vor.u32 %v8279_v28, %v7418_v54 }
 0x25f   :  { %v953_v0 = vmax.f32 %v915_v20, 0.0  ;;  %v8284_v20 = vld [vmem:[#allocation5 + $0x134] sm:$0xf0]  ;;  %2285 = vmatpush.bf16.msra.mxu3 %v7421_v47 }
 0x262   :  { %v862_v59 = vpop.f32.mrf.mxu3 }
 0x263   :  { %v863_v56 = vadd.f32 %v862_v59, %v9190_v53  ;;  %v7432_v59 = vld [vmem:[#allocation5 + $0x130] sm:$0xf] }
 0x265   :  { %v917_v61 = vadd.f32 %v916_v1, %v863_v56 }
 0x267   :  { %v955_v52 = vmax.f32 %v917_v61, 0.0  ;;  %1283 = vmatmul.bf16.gmra.mxu3 %v9181_v22 }
 0x269   :  { %v975_v2 = vpack.c.bf16 %v955_v52, %v953_v0 }
 0x26a   :  { %v865_v5 = vpop.f32.mrf.mxu3 }
 0x26b   :  { %7257 = vmatmul.msk.bf16.gmra.mxu2 %vm1104_vm3, %v975_v2  ;;  %7266 = vmatmul.msk.bf16.gmra.mxu0 %vm1104_vm3, %v975_v2  ;;  %v866_v10 = vadd.f32 %v865_v5, %v9190_v53 }
 0x26d   :  { %v920_v22 = vadd.f32 %v919_v34, %v866_v10  ;;  %v7433_v34 = vor.u32 %v8284_v20, %v7432_v59  ;;  %v8277_v59 = vld [vmem:[#allocation5 + $0x104] sm:$0xf]  ;;  %v7410_v20 = vld [vmem:[#allocation5 + $0x108] sm:$0xf0] }
 0x26f   :  { %v957_v29 = vmax.f32 %v920_v22, 0.0  ;;  %2237 = vmatpush.bf16.msrb.mxu2 %v7433_v34 }
 0x272   :  { %v867_v8 = vpop.f32.mrf.mxu3 }
 0x273   :  { %v868_v27 = vadd.f32 %v867_v8, %v9190_v53  ;;  %v1142_v53 = vadd.f32 %v1141_v30, %v9242_v41  ;;  %v1144_v30 = vadd.f32 %v1143_v57, %v9242_v41  ;;  %v8280_v8 = vld [vmem:[#allocation5 + $0x114] sm:$0xf0] }
 0x275   :  { %v922_v9 = vadd.f32 %v921_v58, %v868_v27 }
 0x277   :  { %v959_v15 = vmax.f32 %v922_v9, 0.0  ;;  %1288 = vmatmul.bf16.gmra.mxu3 %v9187_v50  ;;  %v7417_v9 = vor.u32 %v8280_v8, %v7416_v24 }
 0x278   :  { %v1303_v32 = vpop.f32.mrf.mxu0 }
 0x279   :  { %v977_v31 = vpack.c.bf16 %v959_v15, %v957_v29  ;;  %v7434_v29 = vld [vmem:[#allocation5 + $0x138] sm:$0xf0]  ;;  %2177 = vmatpush.bf16.msrb.mxu1 %v7417_v9 }
 0x27a   :  { %v1249_v35 = vpop.f32.mrf.mxu3 }
 0x27b   :  { %v1250_v38 = vadd.f32 %v1249_v35, %v9240_v62  ;;  %7258 = vmatmul.msk.bf16.gmra.mxu2 %vm1104_vm3, %v977_v31  ;;  %7267 = vmatmul.msk.bf16.gmra.mxu0 %vm1104_vm3, %v977_v31  ;;  %v1404_v31 = vunpack.c.l.bf16 %v9016_v6  ;;  %v7437_v35 = vor.u32 %v8283_v16, %v7434_v29  ;;  %v7408_v16 = vld [vmem:[#allocation5 + $0x100] sm:$0xf]  ;;  %v8278_v29 = vld [vmem:[#allocation5 + $0x104] sm:$0xf0] }
 0x27d   :  { %v1304_v39 = vadd.f32 %v1303_v32, %v1250_v38  ;;  %v1147_v38 = vadd.f32 %v9233_v4, %v9242_v41  ;;  %2345 = vmatpush.bf16.msra.mxu0 %v7437_v35 }
 0x27e   :  { %v1195_v42 = vpop.f32.mrf.mxu2 }
 0x27f   :  { %v1196_v43 = vadd.f32 %v1195_v42, %v1142_v53  ;;  %v1349_v46 = vmax.f32 %v1304_v39, 0.0 }
 0x280   :  { %v1305_v50 = vpop.f32.mrf.mxu0 }
 0x281   :  { %v1348_v11 = vmax.f32 %v1196_v43, 0.0 }
 0x282   :  { %v1251_v1 = vpop.f32.mrf.mxu3 }
 0x283   :  { %v1384_v56 = vpack.c.bf16 %v1349_v46, %v1348_v11  ;;  %v1252_v61 = vadd.f32 %v1251_v1, %v9240_v62 }
 0x285   :  { %v1306_v0 = vadd.f32 %v1305_v50, %v1252_v61  ;;  %v1438_v52 = vunpack.c.l.bf16 %v1384_v56  ;;  %v1439_v2 = vunpack.c.h.bf16 %v1384_v56  ;;  %v7413_v61 = vor.u32 %v8277_v59, %v7410_v20 }
 0x286   :  { %v1197_v5 = vpop.f32.mrf.mxu2 }
 0x287   :  { %v1198_v7 = vadd.f32 %v1197_v5, %v1144_v30  ;;  %v1351_v58 = vmax.f32 %v1306_v0, 0.0  ;;  %v1474_v22 = vadd.f32 %v1438_v52, %v1402_v12  ;;  %v1475_v27 = vadd.f32 %v1439_v2, %v1403_v26  ;;  %v9269_v2 = vpop.f32.mrf.mxu1  ;;  %2286 = vmatpush.bf16.msra.mxu3 %v7413_v61  ;;  %v8275_v61 = vld [vmem:[#allocation5 + $0xf4] sm:$0xf] }
 0x288   :  { %v1308_v10 = vpop.f32.mrf.mxu0 }
 0x289   :  { %v1350_v23 = vmax.f32 %v1198_v7, 0.0  ;;  %v9261_v43 = vpack.c.bf16 %v1475_v27, %v1474_v22  ;;  %v1149_v7 = vadd.f32 %v9237_v49, %v9242_v41  ;;  %v1406_v22 = vunpack.c.l.bf16 %v9027_v18 }
 0x28a   :  { %v1254_v57 = vpop.f32.mrf.mxu3  ;;  %v1407_v27 = vunpack.c.h.bf16 %v9027_v18  ;;  %v1409_v18 = vunpack.c.h.bf16 %v9029_v21 }
 0x28b   :  { %v1385_v15 = vpack.c.bf16 %v1351_v58, %v1350_v23  ;;  %v1255_v32 = vadd.f32 %v1254_v57, %v9240_v62  ;;  %v1572_v4 = vunpack.c.l.b16 %v9261_v43  ;;  %v1573_v5 = vunpack.c.h.b16 %v9261_v43 }
 0x28d   :  { %v1440_v53 = vunpack.c.l.bf16 %v1385_v15  ;;  %v1441_v39 = vunpack.c.h.bf16 %v1385_v15  ;;  %v1309_v42 = vadd.f32 %v1308_v10, %v1255_v32 }
 0x28e   :  { %v1200_v50 = vpop.f32.mrf.mxu2 }
 0x28f   :  { %v1476_v46 = vadd.f32 %v1440_v53, %v1404_v31  ;;  %v1477_v11 = vadd.f32 %v1441_v39, %v1405_v3  ;;  %v1201_v28 = vadd.f32 %v1200_v50, %v1147_v38  ;;  %v1353_v47 = vmax.f32 %v1309_v42, 0.0 }
 0x290   :  { %v1310_v54 = vpop.f32.mrf.mxu0  ;;  %v7409_v3 = vor.u32 %v8278_v29, %v7408_v16  ;;  %v1408_v53 = vunpack.c.l.bf16 %v9029_v21  ;;  %v1152_v39 = vadd.f32 %v9248_v37, %v9242_v41 }
 0x291   :  { %v9263_v1 = vpack.c.bf16 %v1477_v11, %v1476_v46  ;;  %v1352_v6 = vmax.f32 %v1201_v28, 0.0  ;;  %v9283_v11 = vpop.f32.mrf.mxu1 }
 0x292   :  { %v1256_v56 = vpop.f32.mrf.mxu3  ;;  %2178 = vmatpush.bf16.msrb.mxu1 %v7409_v3 }
 0x293   :  { %v1575_v34 = vunpack.c.h.b16 %v9263_v1  ;;  %v1386_v30 = vpack.c.bf16 %v1353_v47, %v1352_v6  ;;  %v1257_v0 = vadd.f32 %v1256_v56, %v9240_v62  ;;  %v1574_v52 = vunpack.c.l.b16 %v9263_v1 }
 0x295   :  { %v1311_v12 = vadd.f32 %v1310_v54, %v1257_v0  ;;  %v1608_v26 = vpack.c.b16 %v1574_v52, %v1572_v4  ;;  %v1442_v10 = vunpack.c.l.bf16 %v1386_v30  ;;  %v1443_v58 = vunpack.c.h.bf16 %v1386_v30 }
 0x296   :  { %v1202_v23 = vpop.f32.mrf.mxu2  ;;  %v1609_v24 = vpack.c.b16 %v1575_v34, %v1573_v5  ;;  %v7402_v34 = vld [vmem:[#allocation5 + $0xf8] sm:$0xf0] }
 0x297   :  { %v1203_v8 = vadd.f32 %v1202_v23, %v1149_v7  ;;  %1760 = vmatmul.bf16.vlgmr.msra.gmra.mxu1 %v1608_v26  ;;  %1868 = vmatmul.bf16.vlgmr.msrb.gmra.mxu3 %v1608_v26  ;;  %v1355_v9 = vmax.f32 %v1311_v12, 0.0  ;;  %v1478_v15 = vadd.f32 %v1442_v10, %v1406_v22  ;;  %v1479_v32 = vadd.f32 %v1443_v58, %v1407_v27 }
 0x298   :  { %7340 = vmatmul.msk.bf16.vlgmr.msra.gmra.mxu2 %vm680_vm2, %v1609_v24  ;;  %7349 = vmatmul.msk.bf16.vlgmr.msrb.gmra.mxu0 %vm680_vm2, %v1609_v24  ;;  %v1313_v57 = vpop.f32.mrf.mxu0  ;;  %v7405_v0 = vor.u32 %v8275_v61, %v7402_v34  ;;  %v1154_v10 = vadd.f32 %v9254_v25, %v9242_v41 }
 0x299   :  { %v1354_v49 = vmax.f32 %v1203_v8, 0.0  ;;  %v9285_v28 = vpack.c.bf16 %v1479_v32, %v1478_v15  ;;  %v9298_v16 = vpop.f32.mrf.mxu1  ;;  %v7400_v32 = vld [vmem:[#allocation5 + $0xf0] sm:$0xf] }
 0x29a   :  { %v1259_v31 = vpop.f32.mrf.mxu3  ;;  %2287 = vmatpush.bf16.msra.mxu3 %v7405_v0 }
 0x29b   :  { %v1387_v35 = vpack.c.bf16 %v1355_v9, %v1354_v49  ;;  %v1260_v38 = vadd.f32 %v1259_v31, %v9240_v62  ;;  %v1576_v37 = vunpack.c.l.b16 %v9285_v28  ;;  %v1577_v26 = vunpack.c.h.b16 %v9285_v28  ;;  %v8276_v31 = vld [vmem:[#allocation5 + $0xf4] sm:$0xf0] }
 0x29c   :  { %v1410_v9 = vunpack.c.l.bf16 %v9040_v33  ;;  %v1411_v49 = vunpack.c.h.bf16 %v9040_v33  ;;  %v1412_v33 = vunpack.c.l.bf16 %v9042_v36 }
 0x29d   :  { %v1444_v42 = vunpack.c.l.bf16 %v1387_v35  ;;  %v1445_v50 = vunpack.c.h.bf16 %v1387_v35  ;;  %v1314_v46 = vadd.f32 %v1313_v57, %v1260_v38 }
 0x29e   :  { %v1205_v54 = vpop.f32.mrf.mxu2 }
 0x29f   :  { %v1480_v47 = vadd.f32 %v1444_v42, %v1408_v53  ;;  %v1481_v6 = vadd.f32 %v1445_v50, %v1409_v18  ;;  %v1206_v59 = vadd.f32 %v1205_v54, %v1152_v39  ;;  %v1357_v4 = vmax.f32 %v1314_v46, 0.0 }
 0x2a0   :  { %v1315_v20 = vpop.f32.mrf.mxu0  ;;  %v7401_v53 = vor.u32 %v8276_v31, %v7400_v32  ;;  %v1413_v42 = vunpack.c.h.bf16 %v9042_v36  ;;  %v1157_v50 = vadd.f32 %v9269_v2, %v9242_v41  ;;  %v7394_v32 = vld [vmem:[#allocation5 + $0xe8] sm:$0xf0] }
 0x2a1   :  { %v9287_v56 = vpack.c.bf16 %v1481_v6, %v1480_v47  ;;  %v1356_v21 = vmax.f32 %v1206_v59, 0.0  ;;  %v1163_v0 = vpop.f32.mrf.mxu1 }
 0x2a2   :  { %v1261_v30 = vpop.f32.mrf.mxu3  ;;  %2179 = vmatpush.bf16.msrb.mxu1 %v7401_v53  ;;  %v7392_v53 = vld [vmem:[#allocation5 + $0xe0] sm:$0xf] }
 0x2a3   :  { %v1388_v52 = vpack.c.bf16 %v1357_v4, %v1356_v21  ;;  %v1262_v5 = vadd.f32 %v1261_v30, %v9240_v62  ;;  %v1578_v7 = vunpack.c.l.b16 %v9287_v56  ;;  %v1579_v12 = vunpack.c.h.b16 %v9287_v56 }
 0x2a5   :  { %v1316_v58 = vadd.f32 %v1315_v20, %v1262_v5  ;;  %v1610_v23 = vpack.c.b16 %v1578_v7, %v1576_v37  ;;  %v1446_v24 = vunpack.c.l.bf16 %v1388_v52  ;;  %v1447_v8 = vunpack.c.h.bf16 %v1388_v52 }
 0x2a6   :  { %v1207_v22 = vpop.f32.mrf.mxu2  ;;  %v1611_v27 = vpack.c.b16 %v1579_v12, %v1577_v26 }
 0x2a7   :  { %v1208_v57 = vadd.f32 %v1207_v22, %v1154_v10  ;;  %1765 = vmatmul.bf16.gmra.mxu1 %v1610_v23  ;;  %1873 = vmatmul.bf16.gmra.mxu3 %v1610_v23  ;;  %v1359_v29 = vmax.f32 %v1316_v58, 0.0  ;;  %v1482_v3 = vadd.f32 %v1446_v24, %v1410_v9  ;;  %v1483_v35 = vadd.f32 %v1447_v8, %v1411_v49 }
 0x2a8   :  { %7341 = vmatmul.msk.bf16.gmra.mxu2 %vm680_vm2, %v1611_v27  ;;  %7350 = vmatmul.msk.bf16.gmra.mxu0 %vm680_vm2, %v1611_v27  ;;  %v1318_v25 = vpop.f32.mrf.mxu0  ;;  %v1159_v10 = vadd.f32 %v9283_v11, %v9242_v41  ;;  %v1414_v9 = vunpack.c.l.bf16 %v9053_v48  ;;  %v1415_v49 = vunpack.c.h.bf16 %v9053_v48  ;;  %v1416_v48 = vunpack.c.l.bf16 %v9055_v51 }
 0x2a9   :  { %v1358_v15 = vmax.f32 %v1208_v57, 0.0  ;;  %v9307_v6 = vpack.c.bf16 %v1483_v35, %v1482_v3 }
 0x2aa   :  { %v1264_v38 = vpop.f32.mrf.mxu3 }
 0x2ab   :  { %v1389_v18 = vpack.c.bf16 %v1359_v29, %v1358_v15  ;;  %v1265_v39 = vadd.f32 %v1264_v38, %v9240_v62  ;;  %v1580_v52 = vunpack.c.l.b16 %v9307_v6  ;;  %v1581_v26 = vunpack.c.h.b16 %v9307_v6  ;;  %v8273_v15 = vld [vmem:[#allocation5 + $0xe4] sm:$0xf] }
 0x2ac   :  { %v7397_v38 = vor.u32 %v8273_v15, %v7394_v32 }
 0x2ad   :  { %v1448_v46 = vunpack.c.l.bf16 %v1389_v18  ;;  %v1449_v54 = vunpack.c.h.bf16 %v1389_v18  ;;  %v1319_v47 = vadd.f32 %v1318_v25, %v1265_v39  ;;  %v8274_v18 = vld [vmem:[#allocation5 + $0xe4] sm:$0xf0] }
 0x2ae   :  { %v1210_v59 = vpop.f32.mrf.mxu2  ;;  %2288 = vmatpush.bf16.msra.mxu3 %v7397_v38 }
 0x2af   :  { %v1484_v20 = vadd.f32 %v1448_v46, %v1412_v33  ;;  %v1485_v4 = vadd.f32 %v1449_v54, %v1413_v42  ;;  %v1211_v21 = vadd.f32 %v1210_v59, %v1157_v50  ;;  %v1361_v30 = vmax.f32 %v1319_v47, 0.0  ;;  %v1166_v50 = vpop.f32.mrf.mxu1 }
 0x2b0   :  { %v1320_v61 = vpop.f32.mrf.mxu0  ;;  %v1417_v42 = vunpack.c.h.bf16 %v9055_v51  ;;  %v7393_v46 = vor.u32 %v8274_v18, %v7392_v53  ;;  %v1162_v54 = vadd.f32 %v9298_v16, %v9242_v41 }
 0x2b1   :  { %v9309_v34 = vpack.c.bf16 %v1485_v4, %v1484_v20  ;;  %v1360_v37 = vmax.f32 %v1211_v21, 0.0 }
 0x2b2   :  { %v1266_v36 = vpop.f32.mrf.mxu3  ;;  %2180 = vmatpush.bf16.msrb.mxu1 %v7393_v46  ;;  %v1421_v46 = vunpack.c.h.bf16 %v9068_v63 }
 0x2b3   :  { %v1390_v5 = vpack.c.bf16 %v1361_v30, %v1360_v37  ;;  %v1267_v2 = vadd.f32 %v1266_v36, %v9240_v62  ;;  %v1582_v7 = vunpack.c.l.b16 %v9309_v34  ;;  %v1583_v12 = vunpack.c.h.b16 %v9309_v34 }
 0x2b5   :  { %v1321_v58 = vadd.f32 %v1320_v61, %v1267_v2  ;;  %v1612_v23 = vpack.c.b16 %v1582_v7, %v1580_v52  ;;  %v1450_v24 = vunpack.c.l.bf16 %v1390_v5  ;;  %v1451_v8 = vunpack.c.h.bf16 %v1390_v5 }
 0x2b6   :  { %v1212_v22 = vpop.f32.mrf.mxu2  ;;  %v1613_v27 = vpack.c.b16 %v1583_v12, %v1581_v26 }
 0x2b7   :  { %v1213_v57 = vadd.f32 %v1212_v22, %v1159_v10  ;;  %1770 = vmatmul.bf16.gmra.mxu1 %v1612_v23  ;;  %1878 = vmatmul.bf16.gmra.mxu3 %v1612_v23  ;;  %v1363_v29 = vmax.f32 %v1321_v58, 0.0  ;;  %v1486_v31 = vadd.f32 %v1450_v24, %v1414_v9  ;;  %v1487_v3 = vadd.f32 %v1451_v8, %v1415_v49  ;;  %v1168_v22 = vpop.f32.mrf.mxu1 }
 0x2b8   :  { %7342 = vmatmul.msk.bf16.gmra.mxu2 %vm680_vm2, %v1613_v27  ;;  %7351 = vmatmul.msk.bf16.gmra.mxu0 %vm680_vm2, %v1613_v27  ;;  %v1323_v25 = vpop.f32.mrf.mxu0  ;;  %v1164_v23 = vadd.f32 %v1163_v0, %v9242_v41 }
 0x2b9   :  { %v1362_v11 = vmax.f32 %v1213_v57, 0.0  ;;  %v9327_v4 = vpack.c.bf16 %v1487_v3, %v1486_v31  ;;  %v8271_v31 = vld [vmem:[#allocation5 + $0xd4] sm:$0xf]  ;;  %v7386_v3 = vld [vmem:[#allocation5 + $0xd8] sm:$0xf0] }
 0x2ba   :  { %v1269_v35 = vpop.f32.mrf.mxu3  ;;  %v7389_v18 = vor.u32 %v8271_v31, %v7386_v3 }
 0x2bb   :  { %v1391_v39 = vpack.c.bf16 %v1363_v29, %v1362_v11  ;;  %v1270_v33 = vadd.f32 %v1269_v35, %v9240_v62  ;;  %v1584_v7 = vunpack.c.l.b16 %v9327_v4  ;;  %v1585_v58 = vunpack.c.h.b16 %v9327_v4 }
 0x2bc   :  { %v1418_v29 = vunpack.c.l.bf16 %v9066_v60  ;;  %v1419_v11 = vunpack.c.h.bf16 %v9066_v60  ;;  %v1420_v60 = vunpack.c.l.bf16 %v9068_v63  ;;  %2289 = vmatpush.bf16.msra.mxu3 %v7389_v18 }
 0x2bd   :  { %v1452_v47 = vunpack.c.l.bf16 %v1391_v39  ;;  %v1453_v59 = vunpack.c.h.bf16 %v1391_v39  ;;  %v1324_v20 = vadd.f32 %v1323_v25, %v1270_v33  ;;  %v7424_v39 = vld [vmem:[#allocation5 + $0x120] sm:$0xf]  ;;  %v8282_v33 = vld [vmem:[#allocation5 + $0x124] sm:$0xf0] }
 0x2be   :  { %v1215_v21 = vpop.f32.mrf.mxu2 }
 0x2bf   :  { %v1488_v61 = vadd.f32 %v1452_v47, %v1416_v48  ;;  %v1489_v30 = vadd.f32 %v1453_v59, %v1417_v42  ;;  %v1216_v37 = vadd.f32 %v1215_v21, %v1162_v54  ;;  %v1365_v51 = vmax.f32 %v1324_v20, 0.0 }
 0x2c0   :  { %v1325_v36 = vpop.f32.mrf.mxu0  ;;  %v7425_v54 = vor.u32 %v8282_v33, %v7424_v39  ;;  %v1167_v47 = vadd.f32 %v1166_v50, %v9242_v41  ;;  %v8269_v33 = vld [vmem:[#allocation5 + $0xc4] sm:$0xf] }
 0x2c1   :  { %v9329_v52 = vpack.c.bf16 %v1489_v30, %v1488_v61  ;;  %v1364_v5 = vmax.f32 %v1216_v37, 0.0 }
 0x2c2   :  { %v1271_v2 = vpop.f32.mrf.mxu3  ;;  %2238 = vmatpush.bf16.msrb.mxu2 %v7425_v54 }
 0x2c3   :  { %v1392_v12 = vpack.c.bf16 %v1365_v51, %v1364_v5  ;;  %v1272_v16 = vadd.f32 %v1271_v2, %v9240_v62  ;;  %v1586_v26 = vunpack.c.l.b16 %v9329_v52  ;;  %v1587_v10 = vunpack.c.h.b16 %v9329_v52  ;;  %v1171_v5 = vpop.f32.mrf.mxu1 }
 0x2c5   :  { %v1326_v24 = vadd.f32 %v1325_v36, %v1272_v16  ;;  %v1614_v8 = vpack.c.b16 %v1586_v26, %v1584_v7  ;;  %v1454_v27 = vunpack.c.l.bf16 %v1392_v12  ;;  %v1455_v57 = vunpack.c.h.bf16 %v1392_v12  ;;  %v7384_v16 = vld [vmem:[#allocation5 + $0xd0] sm:$0xf]  ;;  %v8272_v26 = vld [vmem:[#allocation5 + $0xd4] sm:$0xf0] }
 0x2c6   :  { %v1217_v9 = vpop.f32.mrf.mxu2  ;;  %v1615_v49 = vpack.c.b16 %v1587_v10, %v1585_v58  ;;  %v7385_v58 = vor.u32 %v8272_v26, %v7384_v16 }
 0x2c7   :  { %v1218_v25 = vadd.f32 %v1217_v9, %v1164_v23  ;;  %1775 = vmatmul.bf16.gmra.mxu1 %v1614_v8  ;;  %1883 = vmatmul.bf16.gmra.mxu3 %v1614_v8  ;;  %v1367_v0 = vmax.f32 %v1326_v24, 0.0  ;;  %v1490_v35 = vadd.f32 %v1454_v27, %v1418_v29  ;;  %v1491_v38 = vadd.f32 %v1455_v57, %v1419_v11  ;;  %v8281_v23 = vld [vmem:[#allocation5 + $0x124] sm:$0xf]  ;;  %v7426_v24 = vld [vmem:[#allocation5 + $0x128] sm:$0xf0] }
 0x2c8   :  { %7343 = vmatmul.msk.bf16.gmra.mxu2 %vm680_vm2, %v1615_v49  ;;  %7352 = vmatmul.msk.bf16.gmra.mxu0 %vm680_vm2, %v1615_v49  ;;  %v1328_v15 = vpop.f32.mrf.mxu0  ;;  %v1169_v29 = vadd.f32 %v1168_v22, %v9242_v41 }
 0x2c9   :  { %v1366_v32 = vmax.f32 %v1218_v25, 0.0  ;;  %v9345_v61 = vpack.c.bf16 %v1491_v38, %v1490_v35  ;;  %2181 = vmatpush.bf16.msrb.mxu1 %v7385_v58  ;;  %v7429_v25 = vor.u32 %v8281_v23, %v7426_v24  ;;  %v1422_v38 = vunpack.c.l.bf16 %v9079_v14  ;;  %v7376_v24 = vld [vmem:[#allocation5 + $0xc0] sm:$0xf] }
 0x2ca   :  { %v1274_v53 = vpop.f32.mrf.mxu3 }
 0x2cb   :  { %v1393_v48 = vpack.c.bf16 %v1367_v0, %v1366_v32  ;;  %v1275_v42 = vadd.f32 %v1274_v53, %v9240_v62  ;;  %v1588_v50 = vunpack.c.l.b16 %v9345_v61  ;;  %v1589_v49 = vunpack.c.h.b16 %v9345_v61  ;;  %2346 = vmatpush.bf16.msra.mxu0 %v7429_v25 }
 0x2cc   :  { %v1423_v53 = vunpack.c.h.bf16 %v9079_v14  ;;  %v1425_v14 = vunpack.c.h.bf16 %v9081_v17 }
 0x2cd   :  { %v1456_v59 = vunpack.c.l.bf16 %v1393_v48  ;;  %v1457_v20 = vunpack.c.h.bf16 %v1393_v48  ;;  %v1329_v21 = vadd.f32 %v1328_v15, %v1275_v42  ;;  %v7378_v48 = vld [vmem:[#allocation5 + $0xc8] sm:$0xf0]  ;;  %v1173_v42 = vpop.f32.mrf.mxu1 }
 0x2ce   :  { %v1220_v30 = vpop.f32.mrf.mxu2 }
 0x2cf   :  { %v1492_v37 = vadd.f32 %v1456_v59, %v1420_v60  ;;  %v1493_v36 = vadd.f32 %v1457_v20, %v1421_v46  ;;  %v1221_v51 = vadd.f32 %v1220_v30, %v1167_v47  ;;  %v1369_v12 = vmax.f32 %v1329_v21, 0.0 }
 0x2d0   :  { %v1330_v2 = vpop.f32.mrf.mxu0  ;;  %v7381_v47 = vor.u32 %v8269_v33, %v7378_v48  ;;  %v1424_v21 = vunpack.c.l.bf16 %v9081_v17  ;;  %v1172_v30 = vadd.f32 %v1171_v5, %v9242_v41 }
 0x2d1   :  { %v9347_v7 = vpack.c.bf16 %v1493_v36, %v1492_v37  ;;  %v1368_v63 = vmax.f32 %v1221_v51, 0.0 }
 0x2d2   :  { %v1276_v10 = vpop.f32.mrf.mxu3  ;;  %2290 = vmatpush.bf16.msra.mxu3 %v7381_v47 }
 0x2d3   :  { %v1394_v8 = vpack.c.bf16 %v1369_v12, %v1368_v63  ;;  %v1277_v27 = vadd.f32 %v1276_v10, %v9240_v62  ;;  %v1590_v57 = vunpack.c.l.b16 %v9347_v7  ;;  %v1591_v9 = vunpack.c.h.b16 %v9347_v7 }
 0x2d5   :  { %v1331_v11 = vadd.f32 %v1330_v2, %v1277_v27  ;;  %v1616_v15 = vpack.c.b16 %v1590_v57, %v1588_v50  ;;  %v1458_v0 = vunpack.c.l.bf16 %v1394_v8  ;;  %v1459_v32 = vunpack.c.h.bf16 %v1394_v8  ;;  %v8270_v8 = vld [vmem:[#allocation5 + $0xc4] sm:$0xf0] }
 0x2d6   :  { %v1222_v31 = vpop.f32.mrf.mxu2  ;;  %v1617_v3 = vpack.c.b16 %v1591_v9, %v1589_v49  ;;  %v7377_v5 = vor.u32 %v8270_v8, %v7376_v24 }
 0x2d7   :  { %v1223_v35 = vadd.f32 %v1222_v31, %v1169_v29  ;;  %1780 = vmatmul.bf16.gmra.mxu1 %v1616_v15  ;;  %1888 = vmatmul.bf16.gmra.mxu3 %v1616_v15  ;;  %v1371_v22 = vmax.f32 %v1331_v11, 0.0  ;;  %v1494_v60 = vadd.f32 %v1458_v0, %v1422_v38  ;;  %v1495_v46 = vadd.f32 %v1459_v32, %v1423_v53  ;;  %v1176_v29 = vpop.f32.mrf.mxu1 }
 0x2d8   :  { %7344 = vmatmul.msk.bf16.gmra.mxu2 %vm680_vm2, %v1617_v3  ;;  %7353 = vmatmul.msk.bf16.gmra.mxu0 %vm680_vm2, %v1617_v3  ;;  %v1333_v18 = vpop.f32.mrf.mxu0  ;;  %v1174_v15 = vadd.f32 %v1173_v42, %v9242_v41  ;;  %v8267_v42 = vld [vmem:[#allocation5 + $0xb4] sm:$0xf] }
 0x2d9   :  { %v1370_v39 = vmax.f32 %v1223_v35, 0.0  ;;  %v9363_v2 = vpack.c.bf16 %v1495_v46, %v1494_v60  ;;  %2182 = vmatpush.bf16.msrb.mxu1 %v7377_v5  ;;  %v7370_v60 = vld [vmem:[#allocation5 + $0xb8] sm:$0xf0] }
 0x2da   :  { %v1279_v54 = vpop.f32.mrf.mxu3 }
 0x2db   :  { %v1395_v59 = vpack.c.bf16 %v1371_v22, %v1370_v39  ;;  %v1280_v20 = vadd.f32 %v1279_v54, %v9240_v62  ;;  %v1592_v27 = vunpack.c.l.b16 %v9363_v2  ;;  %v1593_v11 = vunpack.c.h.b16 %v9363_v2 }
 0x2dc   :  { %v1427_v22 = vunpack.c.h.bf16 %v9092_v40 }
 0x2dd   :  { %v1460_v37 = vunpack.c.l.bf16 %v1395_v59  ;;  %v1461_v36 = vunpack.c.h.bf16 %v1395_v59  ;;  %v1334_v51 = vadd.f32 %v1333_v18, %v1280_v20  ;;  %v1426_v18 = vunpack.c.l.bf16 %v9092_v40 }
 0x2de   :  { %v1225_v12 = vpop.f32.mrf.mxu2  ;;  %v7373_v59 = vor.u32 %v8267_v42, %v7370_v60  ;;  %v1429_v40 = vunpack.c.h.bf16 %v9094_v44  ;;  %v7362_v42 = vld [vmem:[#allocation5 + $0xa8] sm:$0xf0] }
 0x2df   :  { %v1496_v63 = vadd.f32 %v1460_v37, %v1424_v21  ;;  %v1497_v16 = vadd.f32 %v1461_v36, %v1425_v14  ;;  %v1226_v26 = vadd.f32 %v1225_v12, %v1172_v30  ;;  %v1373_v58 = vmax.f32 %v1334_v51, 0.0  ;;  %v1178_v12 = vpop.f32.mrf.mxu1 }
 0x2e0   :  { %v1335_v10 = vpop.f32.mrf.mxu0  ;;  %v1428_v14 = vunpack.c.l.bf16 %v9094_v44  ;;  %2291 = vmatpush.bf16.msra.mxu3 %v7373_v59  ;;  %v1177_v30 = vadd.f32 %v1176_v29, %v9242_v41  ;;  %v8268_v44 = vld [vmem:[#allocation5 + $0xb4] sm:$0xf0] }
 0x2e1   :  { %v9365_v50 = vpack.c.bf16 %v1497_v16, %v1496_v63  ;;  %v1372_v23 = vmax.f32 %v1226_v26, 0.0 }
 0x2e2   :  { %v1281_v17 = vpop.f32.mrf.mxu3 }
 0x2e3   :  { %v1396_v57 = vpack.c.bf16 %v1373_v58, %v1372_v23  ;;  %v1282_v9 = vadd.f32 %v1281_v17, %v9240_v62  ;;  %v1594_v49 = vunpack.c.l.b16 %v9365_v50  ;;  %v1595_v25 = vunpack.c.h.b16 %v9365_v50 }
 0x2e5   :  { %v1336_v0 = vadd.f32 %v1335_v10, %v1282_v9  ;;  %v1618_v32 = vpack.c.b16 %v1594_v49, %v1592_v27  ;;  %v1462_v31 = vunpack.c.l.bf16 %v1396_v57  ;;  %v1463_v3 = vunpack.c.h.bf16 %v1396_v57  ;;  %v7368_v27 = vld [vmem:[#allocation5 + $0xb0] sm:$0xf] }
 0x2e6   :  { %v1227_v35 = vpop.f32.mrf.mxu2  ;;  %v1619_v38 = vpack.c.b16 %v1595_v25, %v1593_v11  ;;  %v7369_v9 = vor.u32 %v8268_v44, %v7368_v27 }
 0x2e7   :  { %v1228_v53 = vadd.f32 %v1227_v35, %v1174_v15  ;;  %1785 = vmatmul.bf16.gmra.mxu1 %v1618_v32  ;;  %1893 = vmatmul.bf16.gmra.mxu3 %v1618_v32  ;;  %v1375_v33 = vmax.f32 %v1336_v0, 0.0  ;;  %v1498_v46 = vadd.f32 %v1462_v31, %v1426_v18  ;;  %v1499_v54 = vadd.f32 %v1463_v3, %v1427_v22 }
 0x2e8   :  { %7345 = vmatmul.msk.bf16.gmra.mxu2 %vm680_vm2, %v1619_v38  ;;  %7354 = vmatmul.msk.bf16.gmra.mxu0 %vm680_vm2, %v1619_v38  ;;  %v1338_v39 = vpop.f32.mrf.mxu0  ;;  %v1179_v0 = vadd.f32 %v1178_v12, %v9242_v41  ;;  %v1430_v22 = vunpack.c.l.bf16 %v9105_v13 }
 0x2e9   :  { %v1374_v48 = vmax.f32 %v1228_v53, 0.0  ;;  %v9381_v63 = vpack.c.bf16 %v1499_v54, %v1498_v46  ;;  %2183 = vmatpush.bf16.msrb.mxu1 %v7369_v9 }
 0x2ea   :  { %v1284_v47 = vpop.f32.mrf.mxu3 }
 0x2eb   :  { %v1397_v20 = vpack.c.bf16 %v1375_v33, %v1374_v48  ;;  %v1285_v21 = vadd.f32 %v1284_v47, %v9240_v62  ;;  %v1596_v57 = vunpack.c.l.b16 %v9381_v63  ;;  %v1597_v15 = vunpack.c.h.b16 %v9381_v63  ;;  %v1181_v33 = vpop.f32.mrf.mxu1  ;;  %v8265_v48 = vld [vmem:[#allocation5 + $0xa4] sm:$0xf] }
 0x2ec   :  { %v7365_v54 = vor.u32 %v8265_v48, %v7362_v42 }
 0x2ed   :  { %v1464_v37 = vunpack.c.l.bf16 %v1397_v20  ;;  %v1465_v36 = vunpack.c.h.bf16 %v1397_v20  ;;  %v1339_v51 = vadd.f32 %v1338_v39, %v1285_v21  ;;  %v1431_v39 = vunpack.c.h.bf16 %v9105_v13 }
 0x2ee   :  { %v1230_v16 = vpop.f32.mrf.mxu2  ;;  %2292 = vmatpush.bf16.msra.mxu3 %v7365_v54  ;;  %v1432_v13 = vunpack.c.l.bf16 %v9107_v19  ;;  %v1436_v54 = vunpack.c.l.bf16 %v9120_v55 }
 0x2ef   :  { %v1500_v26 = vadd.f32 %v1464_v37, %v1428_v14  ;;  %v1501_v10 = vadd.f32 %v1465_v36, %v1429_v40  ;;  %v1231_v58 = vadd.f32 %v1230_v16, %v1177_v30  ;;  %v1377_v8 = vmax.f32 %v1339_v51, 0.0 }
 0x2f0   :  { %v1340_v23 = vpop.f32.mrf.mxu0  ;;  %v1433_v30 = vunpack.c.h.bf16 %v9107_v19  ;;  %v1182_v37 = vadd.f32 %v1181_v33, %v9242_v41  ;;  %v1435_v33 = vunpack.c.h.bf16 %v9118_v45 }
 0x2f1   :  { %v9383_v24 = vpack.c.bf16 %v1501_v10, %v1500_v26  ;;  %v1376_v17 = vmax.f32 %v1231_v58, 0.0 }
 0x2f2   :  { %v1286_v5 = vpop.f32.mrf.mxu3 }
 0x2f3   :  { %v1398_v49 = vpack.c.bf16 %v1377_v8, %v1376_v17  ;;  %v1287_v25 = vadd.f32 %v1286_v5, %v9240_v62  ;;  %v1598_v29 = vunpack.c.l.b16 %v9383_v24  ;;  %v1599_v11 = vunpack.c.h.b16 %v9383_v24  ;;  %v7360_v8 = vld [vmem:[#allocation5 + $0xa0] sm:$0xf]  ;;  %v8266_v17 = vld [vmem:[#allocation5 + $0xa4] sm:$0xf0]  ;;  %v1183_v9 = vpop.f32.mrf.mxu1 }
 0x2f4   :  { %v7361_v27 = vor.u32 %v8266_v17, %v7360_v8  ;;  %v8299_v8 = vld [vmem:[#allocation3 + $0x194] sm:$0xf] }
 0x2f5   :  { %v1341_v32 = vadd.f32 %v1340_v23, %v1287_v25  ;;  %v1620_v31 = vpack.c.b16 %v1598_v29, %v1596_v57  ;;  %v1466_v3 = vunpack.c.l.bf16 %v1398_v49  ;;  %v1467_v35 = vunpack.c.h.bf16 %v1398_v49 }
 0x2f6   :  { %v1232_v38 = vpop.f32.mrf.mxu2  ;;  %v1621_v53 = vpack.c.b16 %v1599_v11, %v1597_v15  ;;  %2184 = vmatpush.bf16.msrb.mxu1 %v7361_v27 }
 0x2f7   :  { %v1233_v18 = vadd.f32 %v1232_v38, %v1179_v0  ;;  %1790 = vmatmul.bf16.gmra.mxu1 %v1620_v31  ;;  %1898 = vmatmul.bf16.gmra.mxu3 %v1620_v31  ;;  %v1379_v60 = vmax.f32 %v1341_v32, 0.0  ;;  %v1502_v47 = vadd.f32 %v1466_v3, %v1430_v22  ;;  %v1503_v59 = vadd.f32 %v1467_v35, %v1431_v39 }
 0x2f8   :  { %7346 = vmatmul.msk.bf16.gmra.mxu2 %vm680_vm2, %v1621_v53  ;;  %7355 = vmatmul.msk.bf16.gmra.mxu0 %vm680_vm2, %v1621_v53  ;;  %v1343_v20 = vpop.f32.mrf.mxu0  ;;  %v1184_v31 = vadd.f32 %v1183_v9, %v9242_v41 }
 0x2f9   :  { %v1378_v46 = vmax.f32 %v1233_v18, 0.0  ;;  %v9399_v16 = vpack.c.bf16 %v1503_v59, %v1502_v47  ;;  %v1437_v47 = vunpack.c.h.bf16 %v9120_v55 }
 0x2fa   :  { %v1289_v21 = vpop.f32.mrf.mxu3 }
 0x2fb   :  { %v1399_v14 = vpack.c.bf16 %v1379_v60, %v1378_v46  ;;  %v1290_v40 = vadd.f32 %v1289_v21, %v9240_v62  ;;  %v1600_v49 = vunpack.c.l.b16 %v9399_v16  ;;  %v1601_v32 = vunpack.c.h.b16 %v9399_v16 }
 0x2fd   :  { %v1468_v36 = vunpack.c.l.bf16 %v1399_v14  ;;  %v1469_v51 = vunpack.c.h.bf16 %v1399_v14  ;;  %v1344_v12 = vadd.f32 %v1343_v20, %v1290_v40 }
 0x2fe   :  { %v1235_v26 = vpop.f32.mrf.mxu2 }
 0x2ff   :  { %v1504_v10 = vadd.f32 %v1468_v36, %v1432_v13  ;;  %v1505_v58 = vadd.f32 %v1469_v51, %v1433_v30  ;;  %v1236_v23 = vadd.f32 %v1235_v26, %v1182_v37  ;;  %v1381_v5 = vmax.f32 %v1344_v12, 0.0 }
 0x300   :  { %v1345_v0 = vpop.f32.mrf.mxu0 }
 0x301   :  { %v9401_v44 = vpack.c.bf16 %v1505_v58, %v1504_v10  ;;  %v1380_v57 = vmax.f32 %v1236_v23, 0.0  ;;  %v1548_v10 = vld [vmem:[#allocation10 + $0x2] sm:$0x3]  ;;  %v8302_v23 = vld [vmem:[#allocation3 + $0x1a4] sm:$0xf0] }
 0x302   :  { %v1291_v19 = vpop.f32.mrf.mxu3  ;;  %v7522_v58 = vld [vmem:[#allocation3 + $0x1a0] sm:$0xf]  ;;  %v9425_v9 = vperm.slane %v1548_v10, 1 }
 0x303   :  { %v1400_v25 = vpack.c.bf16 %v1381_v5, %v1380_v57  ;;  %v1292_v29 = vadd.f32 %v1291_v19, %v9240_v62  ;;  %v1602_v11 = vunpack.c.l.b16 %v9401_v44  ;;  %v1603_v15 = vunpack.c.h.b16 %v9401_v44  ;;  %v7516_v5 = vld [vmem:[#allocation3 + $0x198] sm:$0xf0] }
 0x304   :  { %v1434_v62 = vunpack.c.l.bf16 %v9118_v45  ;;  %v7523_v27 = vor.u32 %v8302_v23, %v7522_v58  ;;  %v7519_v19 = vor.u32 %v8299_v8, %v7516_v5 }
 0x305   :  { %v1346_v3 = vadd.f32 %v1345_v0, %v1292_v29  ;;  %v1622_v35 = vpack.c.b16 %v1602_v11, %v1600_v49  ;;  %v1623_v53 = vpack.c.b16 %v1603_v15, %v1601_v32  ;;  %v1470_v18 = vunpack.c.l.bf16 %v1400_v25  ;;  %v7514_v15 = vld [vmem:[#allocation3 + $0x190] sm:$0xf]  ;;  %v8300_v0 = vld [vmem:[#allocation3 + $0x194] sm:$0xf0] }
 0x306   :  { %v1237_v38 = vpop.f32.mrf.mxu2  ;;  %v1471_v22 = vunpack.c.h.bf16 %v1400_v25  ;;  %v9427_v49 = vperm.slane %v1548_v10, 0  ;;  %2858 = vmatpush.bf16.msra.mxu2 %v7523_v27  ;;  %2905 = vmatpush.bf16.msrb.mxu3 %v7519_v19  ;;  %v8298_v10 = vld [vmem:[#allocation3 + $0x184] sm:$0xf0] }
 0x307   :  { %v1238_v39 = vadd.f32 %v1237_v38, %v1184_v31  ;;  %1795 = vmatmul.bf16.gmra.mxu1 %v1622_v35  ;;  %1903 = vmatmul.bf16.gmra.mxu3 %v1622_v35  ;;  %v1383_v48 = vmax.f32 %v1346_v3, 0.0  ;;  %v1506_v41 = vadd.f32 %v1470_v18, %v1434_v62  ;;  %v7515_v31 = vor.u32 %v8300_v0, %v7514_v15  ;;  %v8301_v3 = vld [vmem:[#allocation3 + $0x1a4] sm:$0xf]  ;;  %v7524_v35 = vld [vmem:[#allocation3 + $0x1a8] sm:$0xf0] }
 0x308   :  { %7347 = vmatmul.msk.bf16.gmra.mxu2 %vm680_vm2, %v1623_v53  ;;  %7356 = vmatmul.msk.bf16.gmra.mxu0 %vm680_vm2, %v1623_v53  ;;  %v1507_v60 = vadd.f32 %v1471_v22, %v1435_v33  ;;  %v7527_v38 = vor.u32 %v8301_v3, %v7524_v35 }
 0x309   :  { %v1382_v42 = vmax.f32 %v1238_v39, 0.0  ;;  %2797 = vmatpush.bf16.msra.mxu1 %v7515_v31 }
 0x30a   :  { %v9415_v21 = vpack.c.bf16 %v1507_v60, %v1506_v41  ;;  %2966 = vmatpush.bf16.msrb.mxu0 %v7527_v38 }
 0x30b   :  { %v1401_v46 = vpack.c.bf16 %v1383_v48, %v1382_v42 }
 0x30c   :  { %v1604_v30 = vunpack.c.l.b16 %v9415_v21  ;;  %v1605_v37 = vunpack.c.h.b16 %v9415_v21 }
 0x30d   :  { %v1472_v59 = vunpack.c.l.bf16 %v1401_v46  ;;  %v1473_v20 = vunpack.c.h.bf16 %v1401_v46 }
 0x30f   :  { %v1508_v14 = vadd.f32 %v1472_v59, %v1436_v54  ;;  %v1509_v40 = vadd.f32 %v1473_v20, %v1437_v47 }
 0x311   :  { %v9417_v13 = vpack.c.bf16 %v1509_v40, %v1508_v14 }
 0x313   :  { %v1606_v45 = vunpack.c.l.b16 %v9417_v13  ;;  %v1607_v36 = vunpack.c.h.b16 %v9417_v13 }
 0x314   :  { %v1761_v51 = vpop.f32.mrf.mxu1 }
 0x315   :  { %v1923_v12 = vpop.f32.mrf.mxu0  ;;  %v1624_v26 = vpack.c.b16 %v1606_v45, %v1604_v30  ;;  %v1625_v55 = vpack.c.b16 %v1607_v36, %v1605_v37  ;;  %v1762_v32 = vadd.f32 %v1761_v51, %v9427_v49  ;;  %v8297_v30 = vld [vmem:[#allocation3 + $0x184] sm:$0xf]  ;;  %v7508_v45 = vld [vmem:[#allocation3 + $0x188] sm:$0xf0] }
 0x316   :  { %v7511_v36 = vor.u32 %v8297_v30, %v7508_v45 }
 0x317   :  { %1800 = vmatmul.bf16.gmra.mxu1 %v1624_v26  ;;  %1908 = vmatmul.bf16.gmra.mxu3 %v1624_v26 }
 0x318   :  { %7348 = vmatmul.msk.bf16.gmra.mxu2 %vm680_vm2, %v1625_v55  ;;  %7357 = vmatmul.msk.bf16.gmra.mxu0 %vm680_vm2, %v1625_v55  ;;  %v7506_v55 = vld [vmem:[#allocation3 + $0x180] sm:$0xf] }
 0x319   :  { %2906 = vmatpush.bf16.msrb.mxu3 %v7511_v36  ;;  %v7507_v23 = vor.u32 %v8298_v10, %v7506_v55 }
 0x31a   :  { %v1869_v17 = vpop.f32.mrf.mxu3 }
 0x31b   :  { %v1815_v57 = vpop.f32.mrf.mxu2  ;;  %v1870_v11 = vadd.f32 %v1869_v17, %v9425_v9  ;;  %2798 = vmatpush.bf16.msra.mxu1 %v7507_v23 }
 0x31c   :  { %v1763_v25 = vpop.f32.mrf.mxu1  ;;  %v1816_v53 = vadd.f32 %v1815_v57, %v1762_v32 }
 0x31d   :  { %v1925_v29 = vpop.f32.mrf.mxu0  ;;  %v1764_v18 = vadd.f32 %v1763_v25, %v9427_v49  ;;  %v1924_v39 = vadd.f32 %v1923_v12, %v1870_v11 }
 0x31e   :  { %v1968_v46 = vmax.f32 %v1816_v53, 0.0 }
 0x31f   :  { %v1969_v47 = vmax.f32 %v1924_v39, 0.0 }
 0x322   :  { %v1871_v22 = vpop.f32.mrf.mxu3 }
 0x323   :  { %v1817_v62 = vpop.f32.mrf.mxu2  ;;  %v1872_v33 = vadd.f32 %v1871_v22, %v9425_v9 }
 0x324   :  { %v1818_v48 = vadd.f32 %v1817_v62, %v1764_v18  ;;  %v1766_v42 = vpop.f32.mrf.mxu1 }
 0x325   :  { %v1926_v41 = vadd.f32 %v1925_v29, %v1872_v33  ;;  %v1928_v60 = vpop.f32.mrf.mxu0  ;;  %v1767_v58 = vadd.f32 %v1766_v42, %v9427_v49  ;;  %v8295_v33 = vld [vmem:[#allocation3 + $0x174] sm:$0xf] }
 0x326   :  { %v1970_v54 = vmax.f32 %v1818_v48, 0.0  ;;  %v7500_v48 = vld [vmem:[#allocation3 + $0x178] sm:$0xf0] }
 0x327   :  { %v1971_v59 = vmax.f32 %v1926_v41, 0.0  ;;  %v7503_v41 = vor.u32 %v8295_v33, %v7500_v48 }
 0x328   :  { %v2004_v20 = vpack.c.bf16 %v1970_v54, %v1968_v46  ;;  %v8296_v46 = vld [vmem:[#allocation3 + $0x174] sm:$0xf0] }
 0x329   :  { %v2005_v14 = vpack.c.bf16 %v1971_v59, %v1969_v47  ;;  %2907 = vmatpush.bf16.msrb.mxu3 %v7503_v41 }
 0x32a   :  { %2185 = vmatmul.bf16.vlgmr.msrb.gmra.mxu1 %v2004_v20  ;;  %2293 = vmatmul.bf16.vlgmr.msra.gmra.mxu3 %v2004_v20  ;;  %v1874_v40 = vpop.f32.mrf.mxu3 }
 0x32b   :  { %v1820_v37 = vpop.f32.mrf.mxu2  ;;  %7438 = vmatmul.msk.bf16.vlgmr.msrb.gmra.mxu2 %vm1104_vm3, %v2005_v14  ;;  %7447 = vmatmul.msk.bf16.vlgmr.msra.gmra.mxu0 %vm1104_vm3, %v2005_v14  ;;  %v1875_v26 = vadd.f32 %v1874_v40, %v9425_v9 }
 0x32c   :  { %v1768_v51 = vpop.f32.mrf.mxu1  ;;  %v1821_v8 = vadd.f32 %v1820_v37, %v1767_v58 }
 0x32d   :  { %v1930_v12 = vpop.f32.mrf.mxu0  ;;  %v1769_v17 = vadd.f32 %v1768_v51, %v9427_v49  ;;  %v1929_v5 = vadd.f32 %v1928_v60, %v1875_v26  ;;  %v7498_v60 = vld [vmem:[#allocation3 + $0x170] sm:$0xf] }
 0x32e   :  { %v1972_v0 = vmax.f32 %v1821_v8, 0.0  ;;  %v7499_v54 = vor.u32 %v8296_v46, %v7498_v60 }
 0x32f   :  { %v1973_v31 = vmax.f32 %v1929_v5, 0.0 }
 0x330   :  { %2799 = vmatpush.bf16.msra.mxu1 %v7499_v54 }
 0x332   :  { %v1876_v27 = vpop.f32.mrf.mxu3 }
 0x333   :  { %v1822_v57 = vpop.f32.mrf.mxu2  ;;  %v1877_v19 = vadd.f32 %v1876_v27, %v9425_v9 }
 0x334   :  { %v1823_v25 = vadd.f32 %v1822_v57, %v1769_v17  ;;  %v1771_v29 = vpop.f32.mrf.mxu1 }
 0x335   :  { %v1931_v11 = vadd.f32 %v1930_v12, %v1877_v19  ;;  %v1933_v15 = vpop.f32.mrf.mxu0  ;;  %v1772_v42 = vadd.f32 %v1771_v29, %v9427_v49  ;;  %v8293_v19 = vld [vmem:[#allocation3 + $0x164] sm:$0xf] }
 0x336   :  { %v1974_v32 = vmax.f32 %v1823_v25, 0.0  ;;  %v7492_v25 = vld [vmem:[#allocation3 + $0x168] sm:$0xf0] }
 0x337   :  { %v1975_v3 = vmax.f32 %v1931_v11, 0.0  ;;  %v7495_v11 = vor.u32 %v8293_v19, %v7492_v25 }
 0x338   :  { %v2006_v35 = vpack.c.bf16 %v1974_v32, %v1972_v0  ;;  %v8294_v0 = vld [vmem:[#allocation3 + $0x164] sm:$0xf0] }
 0x339   :  { %v2007_v38 = vpack.c.bf16 %v1975_v3, %v1973_v31  ;;  %2908 = vmatpush.bf16.msrb.mxu3 %v7495_v11 }
 0x33a   :  { %2190 = vmatmul.bf16.gmra.mxu1 %v2006_v35  ;;  %2298 = vmatmul.bf16.gmra.mxu3 %v2006_v35  ;;  %v1879_v53 = vpop.f32.mrf.mxu3 }
 0x33b   :  { %v1825_v18 = vpop.f32.mrf.mxu2  ;;  %7439 = vmatmul.msk.bf16.gmra.mxu2 %vm1104_vm3, %v2007_v38  ;;  %7448 = vmatmul.msk.bf16.gmra.mxu0 %vm1104_vm3, %v2007_v38  ;;  %v1880_v62 = vadd.f32 %v1879_v53, %v9425_v9 }
 0x33c   :  { %v1773_v22 = vpop.f32.mrf.mxu1  ;;  %v1826_v47 = vadd.f32 %v1825_v18, %v1772_v42 }
 0x33d   :  { %v1935_v39 = vpop.f32.mrf.mxu0  ;;  %v1774_v59 = vadd.f32 %v1773_v22, %v9427_v49  ;;  %v1934_v14 = vadd.f32 %v1933_v15, %v1880_v62  ;;  %v7490_v15 = vld [vmem:[#allocation3 + $0x160] sm:$0xf] }
 0x33e   :  { %v1976_v12 = vmax.f32 %v1826_v47, 0.0  ;;  %v7491_v32 = vor.u32 %v8294_v0, %v7490_v15  ;;  %v7482_v15 = vld [vmem:[#allocation3 + $0x150] sm:$0xf]  ;;  %v8292_v0 = vld [vmem:[#allocation3 + $0x154] sm:$0xf0] }
 0x33f   :  { %v1977_v55 = vmax.f32 %v1934_v14, 0.0 }
 0x340   :  { %2800 = vmatpush.bf16.msra.mxu1 %v7491_v32 }
 0x342   :  { %v1881_v20 = vpop.f32.mrf.mxu3 }
 0x343   :  { %v1827_v40 = vpop.f32.mrf.mxu2  ;;  %v1882_v30 = vadd.f32 %v1881_v20, %v9425_v9 }
 0x344   :  { %v1828_v45 = vadd.f32 %v1827_v40, %v1774_v59  ;;  %v1776_v37 = vpop.f32.mrf.mxu1 }
 0x345   :  { %v1936_v36 = vadd.f32 %v1935_v39, %v1882_v30  ;;  %v1938_v51 = vpop.f32.mrf.mxu0  ;;  %v1777_v29 = vadd.f32 %v1776_v37, %v9427_v49  ;;  %v8291_v30 = vld [vmem:[#allocation3 + $0x154] sm:$0xf] }
 0x346   :  { %v1978_v26 = vmax.f32 %v1828_v45, 0.0  ;;  %v7484_v45 = vld [vmem:[#allocation3 + $0x158] sm:$0xf0] }
 0x347   :  { %v1979_v10 = vmax.f32 %v1936_v36, 0.0  ;;  %v7487_v36 = vor.u32 %v8291_v30, %v7484_v45 }
 0x348   :  { %v2008_v58 = vpack.c.bf16 %v1978_v26, %v1976_v12 }
 0x349   :  { %v2009_v23 = vpack.c.bf16 %v1979_v10, %v1977_v55  ;;  %2909 = vmatpush.bf16.msrb.mxu3 %v7487_v36 }
 0x34a   :  { %2195 = vmatmul.bf16.gmra.mxu1 %v2008_v58  ;;  %2303 = vmatmul.bf16.gmra.mxu3 %v2008_v58  ;;  %v1884_v8 = vpop.f32.mrf.mxu3 }
 0x34b   :  { %v1830_v17 = vpop.f32.mrf.mxu2  ;;  %7440 = vmatmul.msk.bf16.gmra.mxu2 %vm1104_vm3, %v2009_v23  ;;  %7449 = vmatmul.msk.bf16.gmra.mxu0 %vm1104_vm3, %v2009_v23  ;;  %v1885_v57 = vadd.f32 %v1884_v8, %v9425_v9 }
 0x34c   :  { %v1778_v27 = vpop.f32.mrf.mxu1  ;;  %v1831_v31 = vadd.f32 %v1830_v17, %v1777_v29 }
 0x34d   :  { %v1940_v5 = vpop.f32.mrf.mxu0  ;;  %v1779_v3 = vadd.f32 %v1778_v27, %v9427_v49  ;;  %v1939_v38 = vadd.f32 %v1938_v51, %v1885_v57 }
 0x34e   :  { %v1980_v48 = vmax.f32 %v1831_v31, 0.0  ;;  %v7483_v31 = vor.u32 %v8292_v0, %v7482_v15 }
 0x34f   :  { %v1981_v41 = vmax.f32 %v1939_v38, 0.0 }
 0x350   :  { %2801 = vmatpush.bf16.msra.mxu1 %v7483_v31 }
 0x352   :  { %v1886_v35 = vpop.f32.mrf.mxu3 }
 0x353   :  { %v1832_v53 = vpop.f32.mrf.mxu2  ;;  %v1887_v18 = vadd.f32 %v1886_v35, %v9425_v9 }
 0x354   :  { %v1833_v22 = vadd.f32 %v1832_v53, %v1779_v3  ;;  %v1781_v39 = vpop.f32.mrf.mxu1 }
 0x355   :  { %v1941_v62 = vadd.f32 %v1940_v5, %v1887_v18  ;;  %v1943_v33 = vpop.f32.mrf.mxu0  ;;  %v1782_v37 = vadd.f32 %v1781_v39, %v9427_v49  ;;  %v8289_v18 = vld [vmem:[#allocation3 + $0x144] sm:$0xf] }
 0x356   :  { %v1982_v42 = vmax.f32 %v1833_v22, 0.0  ;;  %v7476_v22 = vld [vmem:[#allocation3 + $0x148] sm:$0xf0] }
 0x357   :  { %v1983_v60 = vmax.f32 %v1941_v62, 0.0  ;;  %v7479_v62 = vor.u32 %v8289_v18, %v7476_v22  ;;  %v8287_v22 = vld [vmem:[#allocation3 + $0x134] sm:$0xf] }
 0x358   :  { %v2010_v46 = vpack.c.bf16 %v1982_v42, %v1980_v48 }
 0x359   :  { %v2011_v54 = vpack.c.bf16 %v1983_v60, %v1981_v41  ;;  %2910 = vmatpush.bf16.msrb.mxu3 %v7479_v62  ;;  %v7466_v62 = vld [vmem:[#allocation3 + $0x130] sm:$0xf] }
 0x35a   :  { %2200 = vmatmul.bf16.gmra.mxu1 %v2010_v46  ;;  %2308 = vmatmul.bf16.gmra.mxu3 %v2010_v46  ;;  %v1889_v47 = vpop.f32.mrf.mxu3 }
 0x35b   :  { %v1835_v59 = vpop.f32.mrf.mxu2  ;;  %7441 = vmatmul.msk.bf16.gmra.mxu2 %vm1104_vm3, %v2011_v54  ;;  %7450 = vmatmul.msk.bf16.gmra.mxu0 %vm1104_vm3, %v2011_v54  ;;  %v1890_v40 = vadd.f32 %v1889_v47, %v9425_v9 }
 0x35c   :  { %v1783_v20 = vpop.f32.mrf.mxu1  ;;  %v1836_v51 = vadd.f32 %v1835_v59, %v1782_v37 }
 0x35d   :  { %v1945_v14 = vpop.f32.mrf.mxu0  ;;  %v1784_v12 = vadd.f32 %v1783_v20, %v9427_v49  ;;  %v1944_v55 = vadd.f32 %v1943_v33, %v1890_v40 }
 0x35e   :  { %v1984_v5 = vmax.f32 %v1836_v51, 0.0  ;;  %v7474_v51 = vld [vmem:[#allocation3 + $0x140] sm:$0xf] }
 0x35f   :  { %v1985_v19 = vmax.f32 %v1944_v55, 0.0 }
 0x362   :  { %v1891_v26 = vpop.f32.mrf.mxu3 }
 0x363   :  { %v1837_v10 = vpop.f32.mrf.mxu2  ;;  %v1892_v58 = vadd.f32 %v1891_v26, %v9425_v9 }
 0x364   :  { %v1838_v23 = vadd.f32 %v1837_v10, %v1784_v12  ;;  %v1786_v8 = vpop.f32.mrf.mxu1  ;;  %v8290_v12 = vld [vmem:[#allocation3 + $0x144] sm:$0xf0] }
 0x365   :  { %v1946_v17 = vadd.f32 %v1945_v14, %v1892_v58  ;;  %v1948_v27 = vpop.f32.mrf.mxu0  ;;  %v1787_v39 = vadd.f32 %v1786_v8, %v9427_v49  ;;  %v7475_v55 = vor.u32 %v8290_v12, %v7474_v51 }
 0x366   :  { %v1986_v57 = vmax.f32 %v1838_v23, 0.0 }
 0x367   :  { %v1987_v25 = vmax.f32 %v1946_v17, 0.0  ;;  %2802 = vmatpush.bf16.msra.mxu1 %v7475_v55 }
 0x368   :  { %v2012_v29 = vpack.c.bf16 %v1986_v57, %v1984_v5 }
 0x369   :  { %v2013_v11 = vpack.c.bf16 %v1987_v25, %v1985_v19 }
 0x36a   :  { %2205 = vmatmul.bf16.gmra.mxu1 %v2012_v29  ;;  %2313 = vmatmul.bf16.gmra.mxu3 %v2012_v29  ;;  %v1894_v32 = vpop.f32.mrf.mxu3 }
 0x36b   :  { %v1840_v3 = vpop.f32.mrf.mxu2  ;;  %7442 = vmatmul.msk.bf16.gmra.mxu2 %vm1104_vm3, %v2013_v11  ;;  %7451 = vmatmul.msk.bf16.gmra.mxu0 %vm1104_vm3, %v2013_v11  ;;  %v1895_v53 = vadd.f32 %v1894_v32, %v9425_v9 }
 0x36c   :  { %v1788_v35 = vpop.f32.mrf.mxu1  ;;  %v1841_v33 = vadd.f32 %v1840_v3, %v1787_v39  ;;  %v7468_v39 = vld [vmem:[#allocation3 + $0x138] sm:$0xf0] }
 0x36d   :  { %v1950_v38 = vpop.f32.mrf.mxu0  ;;  %v1789_v48 = vadd.f32 %v1788_v35, %v9427_v49  ;;  %v1949_v41 = vadd.f32 %v1948_v27, %v1895_v53 }
 0x36e   :  { %v1988_v14 = vmax.f32 %v1841_v33, 0.0 }
 0x36f   :  { %v1989_v30 = vmax.f32 %v1949_v41, 0.0 }
 0x372   :  { %v1896_v42 = vpop.f32.mrf.mxu3 }
 0x373   :  { %v1842_v60 = vpop.f32.mrf.mxu2  ;;  %v1897_v46 = vadd.f32 %v1896_v42, %v9425_v9  ;;  %v8288_v42 = vld [vmem:[#allocation3 + $0x134] sm:$0xf0] }
 0x374   :  { %v1843_v54 = vadd.f32 %v1842_v60, %v1789_v48  ;;  %v1791_v47 = vpop.f32.mrf.mxu1  ;;  %v7471_v48 = vor.u32 %v8287_v22, %v7468_v39  ;;  %v7467_v60 = vor.u32 %v8288_v42, %v7466_v62 }
 0x375   :  { %v1951_v59 = vadd.f32 %v1950_v38, %v1897_v46  ;;  %v1953_v20 = vpop.f32.mrf.mxu0  ;;  %v1792_v17 = vadd.f32 %v1791_v47, %v9427_v49 }
 0x376   :  { %v1990_v40 = vmax.f32 %v1843_v54, 0.0  ;;  %2911 = vmatpush.bf16.msrb.mxu3 %v7471_v48  ;;  %2803 = vmatpush.bf16.msra.mxu1 %v7467_v60 }
 0x377   :  { %v1991_v45 = vmax.f32 %v1951_v59, 0.0 }
 0x378   :  { %v2014_v37 = vpack.c.bf16 %v1990_v40, %v1988_v14 }
 0x379   :  { %v2015_v36 = vpack.c.bf16 %v1991_v45, %v1989_v30 }
 0x37a   :  { %2210 = vmatmul.bf16.gmra.mxu1 %v2014_v37  ;;  %2318 = vmatmul.bf16.gmra.mxu3 %v2014_v37  ;;  %v1899_v26 = vpop.f32.mrf.mxu3 }
 0x37b   :  { %v1845_v10 = vpop.f32.mrf.mxu2  ;;  %7443 = vmatmul.msk.bf16.gmra.mxu2 %vm1104_vm3, %v2015_v36  ;;  %7452 = vmatmul.msk.bf16.gmra.mxu0 %vm1104_vm3, %v2015_v36  ;;  %v1900_v8 = vadd.f32 %v1899_v26, %v9425_v9 }
 0x37c   :  { %v1793_v58 = vpop.f32.mrf.mxu1  ;;  %v1846_v27 = vadd.f32 %v1845_v10, %v1792_v17 }
 0x37d   :  { %v1955_v23 = vpop.f32.mrf.mxu0  ;;  %v1794_v5 = vadd.f32 %v1793_v58, %v9427_v49  ;;  %v1954_v19 = vadd.f32 %v1953_v20, %v1900_v8 }
 0x37e   :  { %v1992_v31 = vmax.f32 %v1846_v27, 0.0 }
 0x37f   :  { %v1993_v35 = vmax.f32 %v1954_v19, 0.0  ;;  %v7460_v19 = vld [vmem:[#allocation3 + $0x128] sm:$0xf0] }
 0x382   :  { %v1901_v57 = vpop.f32.mrf.mxu3 }
 0x383   :  { %v1847_v25 = vpop.f32.mrf.mxu2  ;;  %v1902_v29 = vadd.f32 %v1901_v57, %v9425_v9  ;;  %v8285_v57 = vld [vmem:[#allocation3 + $0x124] sm:$0xf] }
 0x384   :  { %v1848_v11 = vadd.f32 %v1847_v25, %v1794_v5  ;;  %v1796_v15 = vpop.f32.mrf.mxu1  ;;  %v7463_v25 = vor.u32 %v8285_v57, %v7460_v19 }
 0x385   :  { %v1956_v0 = vadd.f32 %v1955_v23, %v1902_v29  ;;  %v1958_v32 = vpop.f32.mrf.mxu0  ;;  %v1797_v59 = vadd.f32 %v1796_v15, %v9427_v49 }
 0x386   :  { %v1994_v3 = vmax.f32 %v1848_v11, 0.0  ;;  %2912 = vmatpush.bf16.msrb.mxu3 %v7463_v25 }
 0x387   :  { %v1995_v38 = vmax.f32 %v1956_v0, 0.0 }
 0x388   :  { %v2016_v53 = vpack.c.bf16 %v1994_v3, %v1992_v31 }
 0x389   :  { %v2017_v18 = vpack.c.bf16 %v1995_v38, %v1993_v35  ;;  %v7458_v35 = vld [vmem:[#allocation3 + $0x120] sm:$0xf]  ;;  %v8286_v38 = vld [vmem:[#allocation3 + $0x124] sm:$0xf0] }
 0x38a   :  { %2215 = vmatmul.bf16.gmra.mxu1 %v2016_v53  ;;  %2323 = vmatmul.bf16.gmra.mxu3 %v2016_v53  ;;  %v1904_v33 = vpop.f32.mrf.mxu3  ;;  %v7459_v39 = vor.u32 %v8286_v38, %v7458_v35  ;;  %v2447_v38 = vunpack.c.l.bf16 %v9261_v43 }
 0x38b   :  { %v1850_v41 = vpop.f32.mrf.mxu2  ;;  %7444 = vmatmul.msk.bf16.gmra.mxu2 %vm1104_vm3, %v2017_v18  ;;  %7453 = vmatmul.msk.bf16.gmra.mxu0 %vm1104_vm3, %v2017_v18  ;;  %v1905_v47 = vadd.f32 %v1904_v33, %v9425_v9 }
 0x38c   :  { %v1798_v46 = vpop.f32.mrf.mxu1  ;;  %v1851_v20 = vadd.f32 %v1850_v41, %v1797_v59  ;;  %2804 = vmatpush.bf16.msra.mxu1 %v7459_v39  ;;  %v2044_v41 = vld [vmem:[#allocation11 + $0x2] sm:$0x3]  ;;  %v8318_v39 = vld [vmem:[#allocation5 + $0x1b4] sm:$0xf0] }
 0x38d   :  { %v1960_v54 = vpop.f32.mrf.mxu0  ;;  %v1799_v14 = vadd.f32 %v1798_v46, %v9427_v49  ;;  %v1959_v30 = vadd.f32 %v1958_v32, %v1905_v47 }
 0x38e   :  { %v1996_v26 = vmax.f32 %v1851_v20, 0.0  ;;  %v9481_v20 = vperm.slane %v2044_v41, 0 }
 0x38f   :  { %v1997_v58 = vmax.f32 %v1959_v30, 0.0 }
 0x392   :  { %v1906_v40 = vpop.f32.mrf.mxu3 }
 0x393   :  { %v1852_v45 = vpop.f32.mrf.mxu2  ;;  %v1907_v37 = vadd.f32 %v1906_v40, %v9425_v9 }
 0x394   :  { %v1853_v36 = vadd.f32 %v1852_v45, %v1799_v14  ;;  %v1801_v12 = vpop.f32.mrf.mxu1  ;;  %v9483_v14 = vperm.slane %v2044_v41, 1 }
 0x395   :  { %v1961_v51 = vadd.f32 %v1960_v54, %v1907_v37  ;;  %v1963_v10 = vpop.f32.mrf.mxu0  ;;  %v1802_v15 = vadd.f32 %v1801_v12, %v9427_v49 }
 0x396   :  { %v1998_v55 = vmax.f32 %v1853_v36, 0.0 }
 0x397   :  { %v1999_v23 = vmax.f32 %v1961_v51, 0.0 }
 0x398   :  { %v2018_v8 = vpack.c.bf16 %v1998_v55, %v1996_v26 }
 0x399   :  { %v2019_v17 = vpack.c.bf16 %v1999_v23, %v1997_v58  ;;  %v7606_v58 = vld [vmem:[#allocation5 + $0x1b8] sm:$0xf0] }
 0x39a   :  { %2220 = vmatmul.bf16.gmra.mxu1 %v2018_v8  ;;  %2328 = vmatmul.bf16.gmra.mxu3 %v2018_v8  ;;  %v1909_v27 = vpop.f32.mrf.mxu3  ;;  %v7620_v8 = vld [vmem:[#allocation5 + $0x1d0] sm:$0xf] }
 0x39b   :  { %v1855_v5 = vpop.f32.mrf.mxu2  ;;  %7445 = vmatmul.msk.bf16.gmra.mxu2 %vm1104_vm3, %v2019_v17  ;;  %7454 = vmatmul.msk.bf16.gmra.mxu0 %vm1104_vm3, %v2019_v17  ;;  %v1910_v29 = vadd.f32 %v1909_v27, %v9425_v9  ;;  %v8322_v17 = vld [vmem:[#allocation5 + $0x1d4] sm:$0xf0] }
 0x39c   :  { %v1803_v11 = vpop.f32.mrf.mxu1  ;;  %v1856_v32 = vadd.f32 %v1855_v5, %v1802_v15  ;;  %v7621_v5 = vor.u32 %v8322_v17, %v7620_v8  ;;  %v8315_v8 = vld [vmem:[#allocation5 + $0x1a4] sm:$0xf] }
 0x39d   :  { %v1965_v0 = vpop.f32.mrf.mxu0  ;;  %v1804_v31 = vadd.f32 %v1803_v11, %v9427_v49  ;;  %v1964_v53 = vadd.f32 %v1963_v10, %v1910_v29  ;;  %v8317_v10 = vld [vmem:[#allocation5 + $0x1b4] sm:$0xf] }
 0x39e   :  { %v2000_v48 = vmax.f32 %v1856_v32, 0.0  ;;  %v7609_v23 = vor.u32 %v8317_v10, %v7606_v58  ;;  %3282 = vmatpush.bf16.msrb.mxu2 %v7621_v5 }
 0x39f   :  { %v2001_v60 = vmax.f32 %v1964_v53, 0.0  ;;  %v2448_v53 = vunpack.c.h.bf16 %v9261_v43 }
 0x3a0   :  { %3330 = vmatpush.bf16.msra.mxu3 %v7609_v23 }
 0x3a2   :  { %v1911_v3 = vpop.f32.mrf.mxu3 }
 0x3a3   :  { %v1857_v18 = vpop.f32.mrf.mxu2  ;;  %v1912_v22 = vadd.f32 %v1911_v3, %v9425_v9 }
 0x3a4   :  { %v1858_v62 = vadd.f32 %v1857_v18, %v1804_v31 }
 0x3a5   :  { %v1966_v33 = vadd.f32 %v1965_v0, %v1912_v22  ;;  %v7604_v22 = vld [vmem:[#allocation5 + $0x1b0] sm:$0xf] }
 0x3a6   :  { %v2002_v42 = vmax.f32 %v1858_v62, 0.0  ;;  %v7605_v62 = vor.u32 %v8318_v39, %v7604_v22 }
 0x3a7   :  { %v2003_v46 = vmax.f32 %v1966_v33, 0.0  ;;  %v2186_v54 = vpop.f32.mrf.mxu1  ;;  %v8321_v33 = vld [vmem:[#allocation5 + $0x1d4] sm:$0xf] }
 0x3a8   :  { %v2348_v47 = vpop.f32.mrf.mxu0  ;;  %v2020_v59 = vpack.c.bf16 %v2002_v42, %v2000_v48  ;;  %v2187_v9 = vadd.f32 %v2186_v54, %v9481_v20  ;;  %v7622_v48 = vld [vmem:[#allocation5 + $0x1d8] sm:$0xf0]  ;;  %3222 = vmatpush.bf16.msrb.mxu1 %v7605_v62  ;;  %v2451_v62 = vunpack.c.l.bf16 %v9285_v28 }
 0x3a9   :  { %v2021_v49 = vpack.c.bf16 %v2003_v46, %v2001_v60  ;;  %v7625_v46 = vor.u32 %v8321_v33, %v7622_v48  ;;  %v2452_v33 = vunpack.c.h.bf16 %v9285_v28 }
 0x3aa   :  { %2225 = vmatmul.bf16.gmra.mxu1 %v2020_v59  ;;  %2333 = vmatmul.bf16.gmra.mxu3 %v2020_v59 }
 0x3ab   :  { %7446 = vmatmul.msk.bf16.gmra.mxu2 %vm1104_vm3, %v2021_v49  ;;  %7455 = vmatmul.msk.bf16.gmra.mxu0 %vm1104_vm3, %v2021_v49  ;;  %v2450_v49 = vunpack.c.h.bf16 %v9263_v1 }
 0x3ac   :  { %3390 = vmatpush.bf16.msra.mxu0 %v7625_v46 }
 0x3ad   :  { %v2294_v40 = vpop.f32.mrf.mxu3 }
 0x3ae   :  { %v2295_v30 = vadd.f32 %v2294_v40, %v9483_v14  ;;  %v2240_v45 = vpop.f32.mrf.mxu2 }
 0x3af   :  { %v2188_v37 = vpop.f32.mrf.mxu1  ;;  %v2241_v36 = vadd.f32 %v2240_v45, %v2187_v9 }
 0x3b0   :  { %v2349_v51 = vadd.f32 %v2348_v47, %v2295_v30  ;;  %v2350_v12 = vpop.f32.mrf.mxu0  ;;  %v2189_v57 = vadd.f32 %v2188_v37, %v9481_v20  ;;  %v2449_v47 = vunpack.c.l.bf16 %v9263_v1  ;;  %v7598_v1 = vld [vmem:[#allocation5 + $0x1a8] sm:$0xf0] }
 0x3b1   :  { %v2393_v26 = vmax.f32 %v2241_v36, 0.0  ;;  %v7601_v17 = vor.u32 %v8315_v8, %v7598_v1 }
 0x3b2   :  { %v2394_v55 = vmax.f32 %v2349_v51, 0.0 }
 0x3b3   :  { %3331 = vmatpush.bf16.msra.mxu3 %v7601_v17 }
 0x3b4   :  { %v2429_v27 = vpack.c.bf16 %v2394_v55, %v2393_v26 }
 0x3b5   :  { %v2296_v19 = vpop.f32.mrf.mxu3 }
 0x3b6   :  { %v2297_v25 = vadd.f32 %v2296_v19, %v9483_v14  ;;  %v2242_v29 = vpop.f32.mrf.mxu2  ;;  %v2483_v0 = vunpack.c.l.bf16 %v2429_v27  ;;  %v2484_v32 = vunpack.c.h.bf16 %v2429_v27 }
 0x3b7   :  { %v2191_v11 = vpop.f32.mrf.mxu1  ;;  %v2243_v15 = vadd.f32 %v2242_v29, %v2189_v57 }
 0x3b8   :  { %v2351_v31 = vadd.f32 %v2350_v12, %v2297_v25  ;;  %v2353_v3 = vpop.f32.mrf.mxu0  ;;  %v2519_v42 = vadd.f32 %v2483_v0, %v2447_v38  ;;  %v2520_v41 = vadd.f32 %v2484_v32, %v2448_v53  ;;  %v2192_v54 = vadd.f32 %v2191_v11, %v9481_v20 }
 0x3b9   :  { %v2395_v35 = vmax.f32 %v2243_v15, 0.0 }
 0x3ba   :  { %v2396_v18 = vmax.f32 %v2351_v31, 0.0  ;;  %v9497_v36 = vpack.c.bf16 %v2520_v41, %v2519_v42  ;;  %v7596_v42 = vld [vmem:[#allocation5 + $0x1a0] sm:$0xf]  ;;  %v8316_v41 = vld [vmem:[#allocation5 + $0x1a4] sm:$0xf0] }
 0x3bc   :  { %v2430_v60 = vpack.c.bf16 %v2396_v18, %v2395_v35  ;;  %v2617_v57 = vunpack.c.l.b16 %v9497_v36  ;;  %v2618_v25 = vunpack.c.h.b16 %v9497_v36 }
 0x3bd   :  { %v2299_v59 = vpop.f32.mrf.mxu3 }
 0x3be   :  { %v2485_v9 = vunpack.c.l.bf16 %v2430_v60  ;;  %v2486_v43 = vunpack.c.h.bf16 %v2430_v60  ;;  %v2300_v40 = vadd.f32 %v2299_v59, %v9483_v14  ;;  %v2245_v30 = vpop.f32.mrf.mxu2  ;;  %v7597_v60 = vor.u32 %v8316_v41, %v7596_v42 }
 0x3bf   :  { %v2193_v45 = vpop.f32.mrf.mxu1  ;;  %v2246_v37 = vadd.f32 %v2245_v30, %v2192_v54  ;;  %v2456_v42 = vunpack.c.h.bf16 %v9307_v6 }
 0x3c0   :  { %v2521_v51 = vadd.f32 %v2485_v9, %v2449_v47  ;;  %v2522_v12 = vadd.f32 %v2486_v43, %v2450_v49  ;;  %v2354_v26 = vadd.f32 %v2353_v3, %v2300_v40  ;;  %v2355_v55 = vpop.f32.mrf.mxu0  ;;  %v2194_v29 = vadd.f32 %v2193_v45, %v9481_v20  ;;  %3223 = vmatpush.bf16.msrb.mxu1 %v7597_v60  ;;  %v7588_v60 = vld [vmem:[#allocation5 + $0x190] sm:$0xf] }
 0x3c1   :  { %v2397_v10 = vmax.f32 %v2246_v37, 0.0  ;;  %v2453_v49 = vunpack.c.l.bf16 %v9287_v56  ;;  %v2454_v43 = vunpack.c.h.bf16 %v9287_v56 }
 0x3c2   :  { %v9499_v58 = vpack.c.bf16 %v2522_v12, %v2521_v51  ;;  %v2398_v23 = vmax.f32 %v2354_v26, 0.0 }
 0x3c4   :  { %v2620_v27 = vunpack.c.h.b16 %v9499_v58  ;;  %v2431_v5 = vpack.c.bf16 %v2398_v23, %v2397_v10  ;;  %v2619_v19 = vunpack.c.l.b16 %v9499_v58 }
 0x3c5   :  { %v2301_v11 = vpop.f32.mrf.mxu3 }
 0x3c6   :  { %v2302_v15 = vadd.f32 %v2301_v11, %v9483_v14  ;;  %v2247_v0 = vpop.f32.mrf.mxu2  ;;  %v2653_v32 = vpack.c.b16 %v2619_v19, %v2617_v57  ;;  %v2654_v35 = vpack.c.b16 %v2620_v27, %v2618_v25  ;;  %v2487_v38 = vunpack.c.l.bf16 %v2431_v5  ;;  %v8313_v27 = vld [vmem:[#allocation5 + $0x194] sm:$0xf] }
 0x3c7   :  { %v2196_v31 = vpop.f32.mrf.mxu1  ;;  %v2248_v3 = vadd.f32 %v2247_v0, %v2194_v29  ;;  %v2488_v53 = vunpack.c.h.bf16 %v2431_v5  ;;  %v7590_v5 = vld [vmem:[#allocation5 + $0x198] sm:$0xf0] }
 0x3c8   :  { %v2356_v18 = vadd.f32 %v2355_v55, %v2302_v15  ;;  %2805 = vmatmul.bf16.vlgmr.msra.gmra.mxu1 %v2653_v32  ;;  %v2358_v22 = vpop.f32.mrf.mxu0  ;;  %7528 = vmatmul.msk.bf16.vlgmr.msra.gmra.mxu2 %vm680_vm2, %v2654_v35  ;;  %v2523_v46 = vadd.f32 %v2487_v38, %v2451_v62  ;;  %v2197_v59 = vadd.f32 %v2196_v31, %v9481_v20 }
 0x3c9   :  { %v2399_v39 = vmax.f32 %v2248_v3, 0.0  ;;  %2913 = vmatmul.bf16.vlgmr.msrb.gmra.mxu3 %v2653_v32  ;;  %7537 = vmatmul.msk.bf16.vlgmr.msrb.gmra.mxu0 %vm680_vm2, %v2654_v35  ;;  %v2524_v54 = vadd.f32 %v2488_v53, %v2452_v33  ;;  %v7593_v56 = vor.u32 %v8313_v27, %v7590_v5 }
 0x3ca   :  { %v2400_v48 = vmax.f32 %v2356_v18, 0.0 }
 0x3cb   :  { %v9515_v12 = vpack.c.bf16 %v2524_v54, %v2523_v46  ;;  %3332 = vmatpush.bf16.msra.mxu3 %v7593_v56  ;;  %v8314_v46 = vld [vmem:[#allocation5 + $0x194] sm:$0xf0] }
 0x3cc   :  { %v2432_v47 = vpack.c.bf16 %v2400_v48, %v2399_v39  ;;  %v2455_v48 = vunpack.c.l.bf16 %v9307_v6  ;;  %v7589_v54 = vor.u32 %v8314_v46, %v7588_v60  ;;  %v7582_v60 = vld [vmem:[#allocation5 + $0x188] sm:$0xf0] }
 0x3cd   :  { %v2304_v9 = vpop.f32.mrf.mxu3  ;;  %v2621_v19 = vunpack.c.l.b16 %v9515_v12  ;;  %v2622_v0 = vunpack.c.h.b16 %v9515_v12 }
 0x3ce   :  { %v2489_v40 = vunpack.c.l.bf16 %v2432_v47  ;;  %v2490_v30 = vunpack.c.h.bf16 %v2432_v47  ;;  %v2305_v28 = vadd.f32 %v2304_v9, %v9483_v14  ;;  %v2250_v45 = vpop.f32.mrf.mxu2  ;;  %3224 = vmatpush.bf16.msrb.mxu1 %v7589_v54  ;;  %v7580_v54 = vld [vmem:[#allocation5 + $0x180] sm:$0xf] }
 0x3cf   :  { %v2198_v37 = vpop.f32.mrf.mxu1  ;;  %v2251_v51 = vadd.f32 %v2250_v45, %v2197_v59 }
 0x3d0   :  { %v2525_v26 = vadd.f32 %v2489_v40, %v2453_v49  ;;  %v2526_v55 = vadd.f32 %v2490_v30, %v2454_v43  ;;  %v2359_v10 = vadd.f32 %v2358_v22, %v2305_v28  ;;  %v2360_v23 = vpop.f32.mrf.mxu0  ;;  %v2199_v11 = vadd.f32 %v2198_v37, %v9481_v20 }
 0x3d1   :  { %v2401_v8 = vmax.f32 %v2251_v51, 0.0  ;;  %v2457_v43 = vunpack.c.l.bf16 %v9309_v34  ;;  %v2458_v30 = vunpack.c.h.bf16 %v9309_v34 }
 0x3d2   :  { %v9517_v1 = vpack.c.bf16 %v2526_v55, %v2525_v26  ;;  %v2402_v17 = vmax.f32 %v2359_v10, 0.0 }
 0x3d4   :  { %v2433_v57 = vpack.c.bf16 %v2402_v17, %v2401_v8  ;;  %v2623_v25 = vunpack.c.l.b16 %v9517_v1  ;;  %v2624_v29 = vunpack.c.h.b16 %v9517_v1 }
 0x3d5   :  { %v2306_v15 = vpop.f32.mrf.mxu3 }
 0x3d6   :  { %v2307_v32 = vadd.f32 %v2306_v15, %v9483_v14  ;;  %v2252_v31 = vpop.f32.mrf.mxu2  ;;  %v2655_v3 = vpack.c.b16 %v2623_v25, %v2621_v19  ;;  %v2656_v53 = vpack.c.b16 %v2624_v29, %v2622_v0  ;;  %v2491_v18 = vunpack.c.l.bf16 %v2433_v57 }
 0x3d7   :  { %v2201_v35 = vpop.f32.mrf.mxu1  ;;  %v2253_v38 = vadd.f32 %v2252_v31, %v2199_v11  ;;  %v2492_v22 = vunpack.c.h.bf16 %v2433_v57 }
 0x3d8   :  { %v2361_v39 = vadd.f32 %v2360_v23, %v2307_v32  ;;  %2810 = vmatmul.bf16.gmra.mxu1 %v2655_v3  ;;  %v2363_v62 = vpop.f32.mrf.mxu0  ;;  %7529 = vmatmul.msk.bf16.gmra.mxu2 %vm680_vm2, %v2656_v53  ;;  %v2527_v47 = vadd.f32 %v2491_v18, %v2455_v48  ;;  %v2202_v9 = vadd.f32 %v2201_v35, %v9481_v20  ;;  %v2460_v48 = vunpack.c.h.bf16 %v9327_v4 }
 0x3d9   :  { %v2403_v33 = vmax.f32 %v2253_v38, 0.0  ;;  %2918 = vmatmul.bf16.gmra.mxu3 %v2655_v3  ;;  %7538 = vmatmul.msk.bf16.gmra.mxu0 %vm680_vm2, %v2656_v53  ;;  %v2528_v59 = vadd.f32 %v2492_v22, %v2456_v42 }
 0x3da   :  { %v2404_v41 = vmax.f32 %v2361_v39, 0.0 }
 0x3db   :  { %v9533_v55 = vpack.c.bf16 %v2528_v59, %v2527_v47  ;;  %v8312_v47 = vld [vmem:[#allocation5 + $0x184] sm:$0xf0] }
 0x3dc   :  { %v2434_v49 = vpack.c.bf16 %v2404_v41, %v2403_v33  ;;  %v2459_v33 = vunpack.c.l.bf16 %v9327_v4  ;;  %v8311_v41 = vld [vmem:[#allocation5 + $0x184] sm:$0xf]  ;;  %v2462_v4 = vunpack.c.h.bf16 %v9329_v52 }
 0x3dd   :  { %v2309_v40 = vpop.f32.mrf.mxu3  ;;  %v2625_v34 = vunpack.c.l.b16 %v9533_v55  ;;  %v2626_v15 = vunpack.c.h.b16 %v9533_v55  ;;  %v7585_v46 = vor.u32 %v8311_v41, %v7582_v60 }
 0x3de   :  { %v2493_v28 = vunpack.c.l.bf16 %v2434_v49  ;;  %v2494_v45 = vunpack.c.h.bf16 %v2434_v49  ;;  %v2310_v6 = vadd.f32 %v2309_v40, %v9483_v14  ;;  %v2255_v37 = vpop.f32.mrf.mxu2 }
 0x3df   :  { %v2203_v51 = vpop.f32.mrf.mxu1  ;;  %v2256_v26 = vadd.f32 %v2255_v37, %v2202_v9  ;;  %3333 = vmatpush.bf16.msra.mxu3 %v7585_v46  ;;  %v8309_v46 = vld [vmem:[#allocation5 + $0x174] sm:$0xf] }
 0x3e0   :  { %v2529_v10 = vadd.f32 %v2493_v28, %v2457_v43  ;;  %v2530_v23 = vadd.f32 %v2494_v45, %v2458_v30  ;;  %v2364_v8 = vadd.f32 %v2363_v62, %v2310_v6  ;;  %v2365_v17 = vpop.f32.mrf.mxu0  ;;  %v2204_v29 = vadd.f32 %v2203_v51, %v9481_v20 }
 0x3e1   :  { %v2405_v27 = vmax.f32 %v2256_v26, 0.0  ;;  %v7581_v43 = vor.u32 %v8312_v47, %v7580_v54  ;;  %v2461_v30 = vunpack.c.l.bf16 %v9329_v52  ;;  %v7574_v54 = vld [vmem:[#allocation5 + $0x178] sm:$0xf0] }
 0x3e2   :  { %v9535_v5 = vpack.c.bf16 %v2530_v23, %v2529_v10  ;;  %v2406_v56 = vmax.f32 %v2364_v8, 0.0 }
 0x3e3   :  { %3225 = vmatpush.bf16.msrb.mxu1 %v7581_v43  ;;  %v8320_v43 = vld [vmem:[#allocation5 + $0x1c4] sm:$0xf0] }
 0x3e4   :  { %v2435_v57 = vpack.c.bf16 %v2406_v56, %v2405_v27  ;;  %v2627_v19 = vunpack.c.l.b16 %v9535_v5  ;;  %v2628_v25 = vunpack.c.h.b16 %v9535_v5 }
 0x3e5   :  { %v2311_v11 = vpop.f32.mrf.mxu3 }
 0x3e6   :  { %v2312_v0 = vadd.f32 %v2311_v11, %v9483_v14  ;;  %v2257_v32 = vpop.f32.mrf.mxu2  ;;  %v2657_v31 = vpack.c.b16 %v2627_v19, %v2625_v34  ;;  %v2658_v38 = vpack.c.b16 %v2628_v25, %v2626_v15  ;;  %v2495_v53 = vunpack.c.l.bf16 %v2435_v57 }
 0x3e7   :  { %v2206_v3 = vpop.f32.mrf.mxu1  ;;  %v2258_v35 = vadd.f32 %v2257_v32, %v2204_v29  ;;  %v2496_v18 = vunpack.c.h.bf16 %v2435_v57 }
 0x3e8   :  { %v2366_v22 = vadd.f32 %v2365_v17, %v2312_v0  ;;  %2815 = vmatmul.bf16.gmra.mxu1 %v2657_v31  ;;  %v2368_v39 = vpop.f32.mrf.mxu0  ;;  %7530 = vmatmul.msk.bf16.gmra.mxu2 %vm680_vm2, %v2658_v38  ;;  %v2531_v59 = vadd.f32 %v2495_v53, %v2459_v33  ;;  %v2207_v40 = vadd.f32 %v2206_v3, %v9481_v20 }
 0x3e9   :  { %v2407_v62 = vmax.f32 %v2258_v35, 0.0  ;;  %2923 = vmatmul.bf16.gmra.mxu3 %v2657_v31  ;;  %7539 = vmatmul.msk.bf16.gmra.mxu0 %vm680_vm2, %v2658_v38  ;;  %v2532_v49 = vadd.f32 %v2496_v18, %v2460_v48  ;;  %v2463_v48 = vunpack.c.l.bf16 %v9345_v61 }
 0x3ea   :  { %v2408_v42 = vmax.f32 %v2366_v22, 0.0 }
 0x3eb   :  { %v9551_v23 = vpack.c.bf16 %v2532_v49, %v2531_v59  ;;  %v7577_v49 = vor.u32 %v8309_v46, %v7574_v54 }
 0x3ec   :  { %v2436_v9 = vpack.c.bf16 %v2408_v42, %v2407_v62  ;;  %v2464_v42 = vunpack.c.h.bf16 %v9345_v61  ;;  %v2465_v61 = vunpack.c.l.bf16 %v9347_v7 }
 0x3ed   :  { %v2314_v28 = vpop.f32.mrf.mxu3  ;;  %v2629_v52 = vunpack.c.l.b16 %v9551_v23  ;;  %v2630_v32 = vunpack.c.h.b16 %v9551_v23  ;;  %3334 = vmatpush.bf16.msra.mxu3 %v7577_v49 }
 0x3ee   :  { %v2497_v45 = vunpack.c.l.bf16 %v2436_v9  ;;  %v2498_v6 = vunpack.c.h.bf16 %v2436_v9  ;;  %v2315_v37 = vadd.f32 %v2314_v28, %v9483_v14  ;;  %v2260_v51 = vpop.f32.mrf.mxu2  ;;  %v7612_v9 = vld [vmem:[#allocation5 + $0x1c0] sm:$0xf] }
 0x3ef   :  { %v2208_v26 = vpop.f32.mrf.mxu1  ;;  %v2261_v10 = vadd.f32 %v2260_v51, %v2207_v40 }
 0x3f0   :  { %v2533_v8 = vadd.f32 %v2497_v45, %v2461_v30  ;;  %v2534_v17 = vadd.f32 %v2498_v6, %v2462_v4  ;;  %v2369_v27 = vadd.f32 %v2368_v39, %v2315_v37  ;;  %v2370_v56 = vpop.f32.mrf.mxu0  ;;  %v2209_v15 = vadd.f32 %v2208_v26, %v9481_v20 }
 0x3f1   :  { %v2409_v57 = vmax.f32 %v2261_v10, 0.0  ;;  %v7613_v30 = vor.u32 %v8320_v43, %v7612_v9  ;;  %v2466_v45 = vunpack.c.h.bf16 %v9347_v7  ;;  %v8310_v7 = vld [vmem:[#allocation5 + $0x174] sm:$0xf0]  ;;  %v2467_v9 = vunpack.c.l.bf16 %v9363_v2 }
 0x3f2   :  { %v9553_v34 = vpack.c.bf16 %v2534_v17, %v2533_v8  ;;  %v2410_v19 = vmax.f32 %v2369_v27, 0.0  ;;  %v2468_v43 = vunpack.c.h.bf16 %v9363_v2 }
 0x3f3   :  { %3283 = vmatpush.bf16.msrb.mxu2 %v7613_v30  ;;  %v8307_v30 = vld [vmem:[#allocation5 + $0x164] sm:$0xf] }
 0x3f4   :  { %v2437_v25 = vpack.c.bf16 %v2410_v19, %v2409_v57  ;;  %v2631_v29 = vunpack.c.l.b16 %v9553_v34  ;;  %v2632_v11 = vunpack.c.h.b16 %v9553_v34 }
 0x3f5   :  { %v2316_v0 = vpop.f32.mrf.mxu3 }
 0x3f6   :  { %v2317_v31 = vadd.f32 %v2316_v0, %v9483_v14  ;;  %v2262_v3 = vpop.f32.mrf.mxu2  ;;  %v2659_v35 = vpack.c.b16 %v2631_v29, %v2629_v52  ;;  %v2499_v38 = vunpack.c.l.bf16 %v2437_v25  ;;  %v2500_v53 = vunpack.c.h.bf16 %v2437_v25 }
 0x3f7   :  { %v2211_v18 = vpop.f32.mrf.mxu1  ;;  %v2263_v22 = vadd.f32 %v2262_v3, %v2209_v15  ;;  %v2660_v39 = vpack.c.b16 %v2632_v11, %v2630_v32  ;;  %v7572_v11 = vld [vmem:[#allocation5 + $0x170] sm:$0xf]  ;;  %v8319_v32 = vld [vmem:[#allocation5 + $0x1c4] sm:$0xf] }
 0x3f8   :  { %v2371_v62 = vadd.f32 %v2370_v56, %v2317_v31  ;;  %2820 = vmatmul.bf16.gmra.mxu1 %v2659_v35  ;;  %v2373_v33 = vpop.f32.mrf.mxu0  ;;  %v2535_v47 = vadd.f32 %v2499_v38, %v2463_v48  ;;  %v2536_v59 = vadd.f32 %v2500_v53, %v2464_v42  ;;  %v2212_v28 = vadd.f32 %v2211_v18, %v9481_v20  ;;  %v7614_v31 = vld [vmem:[#allocation5 + $0x1c8] sm:$0xf0] }
 0x3f9   :  { %v2411_v41 = vmax.f32 %v2263_v22, 0.0  ;;  %7531 = vmatmul.msk.bf16.gmra.mxu2 %vm680_vm2, %v2660_v39  ;;  %2928 = vmatmul.bf16.gmra.mxu3 %v2659_v35  ;;  %v7573_v0 = vor.u32 %v8310_v7, %v7572_v11  ;;  %v7617_v53 = vor.u32 %v8319_v32, %v7614_v31 }
 0x3fa   :  { %v2412_v60 = vmax.f32 %v2371_v62, 0.0  ;;  %7540 = vmatmul.msk.bf16.gmra.mxu0 %vm680_vm2, %v2660_v39  ;;  %v9569_v10 = vpack.c.bf16 %v2536_v59, %v2535_v47 }
 0x3fb   :  { %3226 = vmatpush.bf16.msrb.mxu1 %v7573_v0  ;;  %3391 = vmatpush.bf16.msra.mxu0 %v7617_v53 }
 0x3fc   :  { %v2438_v40 = vpack.c.bf16 %v2412_v60, %v2411_v41  ;;  %v2633_v15 = vunpack.c.l.b16 %v9569_v10  ;;  %v2634_v39 = vunpack.c.h.b16 %v9569_v10 }
 0x3fd   :  { %v2319_v4 = vpop.f32.mrf.mxu3 }
 0x3fe   :  { %v2501_v6 = vunpack.c.l.bf16 %v2438_v40  ;;  %v2502_v37 = vunpack.c.h.bf16 %v2438_v40  ;;  %v2320_v51 = vadd.f32 %v2319_v4, %v9483_v14  ;;  %v2265_v26 = vpop.f32.mrf.mxu2 }
 0x3ff   :  { %v2213_v8 = vpop.f32.mrf.mxu1  ;;  %v2266_v17 = vadd.f32 %v2265_v26, %v2212_v28  ;;  %v7566_v28 = vld [vmem:[#allocation5 + $0x168] sm:$0xf0] }
 0x400   :  { %v2537_v27 = vadd.f32 %v2501_v6, %v2465_v61  ;;  %v2538_v56 = vadd.f32 %v2502_v37, %v2466_v45  ;;  %v2374_v57 = vadd.f32 %v2373_v33, %v2320_v51  ;;  %v2375_v19 = vpop.f32.mrf.mxu0  ;;  %v2214_v18 = vadd.f32 %v2213_v8, %v9481_v20 }
 0x401   :  { %v2413_v25 = vmax.f32 %v2266_v17, 0.0  ;;  %v7569_v61 = vor.u32 %v8307_v30, %v7566_v28  ;;  %v2469_v51 = vunpack.c.l.bf16 %v9365_v50  ;;  %v2470_v8 = vunpack.c.h.bf16 %v9365_v50 }
 0x402   :  { %v9571_v52 = vpack.c.bf16 %v2538_v56, %v2537_v27  ;;  %v2414_v29 = vmax.f32 %v2374_v57, 0.0  ;;  %v2472_v30 = vunpack.c.h.bf16 %v9381_v63 }
 0x403   :  { %3335 = vmatpush.bf16.msra.mxu3 %v7569_v61  ;;  %v8305_v61 = vld [vmem:[#allocation5 + $0x154] sm:$0xf] }
 0x404   :  { %v2439_v3 = vpack.c.bf16 %v2414_v29, %v2413_v25  ;;  %v2635_v35 = vunpack.c.l.b16 %v9571_v52  ;;  %v2636_v38 = vunpack.c.h.b16 %v9571_v52 }
 0x405   :  { %v2321_v22 = vpop.f32.mrf.mxu3 }
 0x406   :  { %v2322_v62 = vadd.f32 %v2321_v22, %v9483_v14  ;;  %v2267_v33 = vpop.f32.mrf.mxu2  ;;  %v2661_v48 = vpack.c.b16 %v2635_v35, %v2633_v15  ;;  %v2662_v60 = vpack.c.b16 %v2636_v38, %v2634_v39  ;;  %v2503_v46 = vunpack.c.l.bf16 %v2439_v3  ;;  %v8308_v35 = vld [vmem:[#allocation5 + $0x164] sm:$0xf0] }
 0x407   :  { %v2216_v42 = vpop.f32.mrf.mxu1  ;;  %v2268_v41 = vadd.f32 %v2267_v33, %v2214_v18  ;;  %v2504_v54 = vunpack.c.h.bf16 %v2439_v3  ;;  %v7564_v3 = vld [vmem:[#allocation5 + $0x160] sm:$0xf] }
 0x408   :  { %v2376_v47 = vadd.f32 %v2375_v19, %v2322_v62  ;;  %2825 = vmatmul.bf16.gmra.mxu1 %v2661_v48  ;;  %v2378_v59 = vpop.f32.mrf.mxu0  ;;  %v2539_v4 = vadd.f32 %v2503_v46, %v2467_v9  ;;  %v2217_v37 = vadd.f32 %v2216_v42, %v9481_v20  ;;  %v7565_v50 = vor.u32 %v8308_v35, %v7564_v3 }
 0x409   :  { %v2415_v49 = vmax.f32 %v2268_v41, 0.0  ;;  %7532 = vmatmul.msk.bf16.gmra.mxu2 %vm680_vm2, %v2662_v60  ;;  %2933 = vmatmul.bf16.gmra.mxu3 %v2661_v48  ;;  %v2540_v45 = vadd.f32 %v2504_v54, %v2468_v43 }
 0x40a   :  { %v2416_v40 = vmax.f32 %v2376_v47, 0.0  ;;  %7541 = vmatmul.msk.bf16.gmra.mxu0 %vm680_vm2, %v2662_v60  ;;  %3227 = vmatpush.bf16.msrb.mxu1 %v7565_v50  ;;  %v7556_v50 = vld [vmem:[#allocation5 + $0x150] sm:$0xf] }
 0x40b   :  { %v9587_v25 = vpack.c.bf16 %v2540_v45, %v2539_v4  ;;  %v7558_v4 = vld [vmem:[#allocation5 + $0x158] sm:$0xf0] }
 0x40c   :  { %v2440_v6 = vpack.c.bf16 %v2416_v40, %v2415_v49  ;;  %v2471_v40 = vunpack.c.l.bf16 %v9381_v63  ;;  %v7561_v45 = vor.u32 %v8305_v61, %v7558_v4  ;;  %v8303_v4 = vld [vmem:[#allocation5 + $0x144] sm:$0xf] }
 0x40d   :  { %v2324_v26 = vpop.f32.mrf.mxu3  ;;  %v2637_v53 = vunpack.c.l.b16 %v9587_v25  ;;  %v2638_v33 = vunpack.c.h.b16 %v9587_v25 }
 0x40e   :  { %v2505_v17 = vunpack.c.l.bf16 %v2440_v6  ;;  %v2506_v27 = vunpack.c.h.bf16 %v2440_v6  ;;  %v2325_v2 = vadd.f32 %v2324_v26, %v9483_v14  ;;  %v2270_v56 = vpop.f32.mrf.mxu2  ;;  %3336 = vmatpush.bf16.msra.mxu3 %v7561_v45  ;;  %v7550_v45 = vld [vmem:[#allocation5 + $0x148] sm:$0xf0] }
 0x40f   :  { %v2218_v57 = vpop.f32.mrf.mxu1  ;;  %v2271_v19 = vadd.f32 %v2270_v56, %v2217_v37 }
 0x410   :  { %v2541_v29 = vadd.f32 %v2505_v17, %v2469_v51  ;;  %v2542_v11 = vadd.f32 %v2506_v27, %v2470_v8  ;;  %v2379_v7 = vadd.f32 %v2378_v59, %v2325_v2  ;;  %v2380_v15 = vpop.f32.mrf.mxu0  ;;  %v2219_v39 = vadd.f32 %v2218_v57, %v9481_v20 }
 0x411   :  { %v2417_v0 = vmax.f32 %v2271_v19, 0.0  ;;  %v2473_v8 = vunpack.c.l.bf16 %v9383_v24  ;;  %v2474_v27 = vunpack.c.h.bf16 %v9383_v24 }
 0x412   :  { %v9589_v32 = vpack.c.bf16 %v2542_v11, %v2541_v29  ;;  %v2418_v31 = vmax.f32 %v2379_v7, 0.0 }
 0x414   :  { %v2441_v38 = vpack.c.bf16 %v2418_v31, %v2417_v0  ;;  %v2639_v18 = vunpack.c.l.b16 %v9589_v32  ;;  %v2640_v22 = vunpack.c.h.b16 %v9589_v32 }
 0x415   :  { %v2326_v62 = vpop.f32.mrf.mxu3 }
 0x416   :  { %v2327_v48 = vadd.f32 %v2326_v62, %v9483_v14  ;;  %v2272_v42 = vpop.f32.mrf.mxu2  ;;  %v2663_v41 = vpack.c.b16 %v2639_v18, %v2637_v53  ;;  %v2664_v54 = vpack.c.b16 %v2640_v22, %v2638_v33  ;;  %v2507_v47 = vunpack.c.l.bf16 %v2441_v38 }
 0x417   :  { %v2221_v60 = vpop.f32.mrf.mxu1  ;;  %v2273_v46 = vadd.f32 %v2272_v42, %v2219_v39  ;;  %v2508_v59 = vunpack.c.h.bf16 %v2441_v38  ;;  %v8306_v38 = vld [vmem:[#allocation5 + $0x154] sm:$0xf0] }
 0x418   :  { %v2381_v49 = vadd.f32 %v2380_v15, %v2327_v48  ;;  %2830 = vmatmul.bf16.gmra.mxu1 %v2663_v41  ;;  %v2383_v43 = vpop.f32.mrf.mxu0  ;;  %v2543_v6 = vadd.f32 %v2507_v47, %v2471_v40  ;;  %v2222_v26 = vadd.f32 %v2221_v60, %v9481_v20  ;;  %v7557_v24 = vor.u32 %v8306_v38, %v7556_v50  ;;  %v7548_v50 = vld [vmem:[#allocation5 + $0x140] sm:$0xf]  ;;  %v8304_v38 = vld [vmem:[#allocation5 + $0x144] sm:$0xf0] }
 0x419   :  { %v2419_v9 = vmax.f32 %v2273_v46, 0.0  ;;  %7533 = vmatmul.msk.bf16.gmra.mxu2 %vm680_vm2, %v2664_v54  ;;  %2938 = vmatmul.bf16.gmra.mxu3 %v2663_v41  ;;  %v2544_v37 = vadd.f32 %v2508_v59, %v2472_v30  ;;  %v2475_v30 = vunpack.c.l.bf16 %v9399_v16 }
 0x41a   :  { %v2420_v28 = vmax.f32 %v2381_v49, 0.0  ;;  %7542 = vmatmul.msk.bf16.gmra.mxu0 %vm680_vm2, %v2664_v54  ;;  %3228 = vmatpush.bf16.msrb.mxu1 %v7557_v24 }
 0x41b   :  { %v9605_v11 = vpack.c.bf16 %v2544_v37, %v2543_v6  ;;  %v7553_v6 = vor.u32 %v8303_v4, %v7550_v45 }
 0x41c   :  { %v2442_v51 = vpack.c.bf16 %v2420_v28, %v2419_v9  ;;  %v2476_v28 = vunpack.c.h.bf16 %v9399_v16 }
 0x41d   :  { %v2329_v17 = vpop.f32.mrf.mxu3  ;;  %v2641_v22 = vunpack.c.l.b16 %v9605_v11  ;;  %v2642_v42 = vunpack.c.h.b16 %v9605_v11  ;;  %3337 = vmatpush.bf16.msra.mxu3 %v7553_v6  ;;  %v2481_v6 = vunpack.c.l.bf16 %v9417_v13 }
 0x41e   :  { %v2509_v2 = vunpack.c.l.bf16 %v2442_v51  ;;  %v2510_v56 = vunpack.c.h.bf16 %v2442_v51  ;;  %v2330_v63 = vadd.f32 %v2329_v17, %v9483_v14  ;;  %v2275_v57 = vpop.f32.mrf.mxu2  ;;  %v2477_v17 = vunpack.c.l.bf16 %v9401_v44 }
 0x41f   :  { %v2223_v19 = vpop.f32.mrf.mxu1  ;;  %v2276_v29 = vadd.f32 %v2275_v57, %v2222_v26 }
 0x420   :  { %v2545_v7 = vadd.f32 %v2509_v2, %v2473_v8  ;;  %v2546_v15 = vadd.f32 %v2510_v56, %v2474_v27  ;;  %v2384_v0 = vadd.f32 %v2383_v43, %v2330_v63  ;;  %v2385_v53 = vpop.f32.mrf.mxu0  ;;  %v2224_v33 = vadd.f32 %v2223_v19, %v9481_v20 }
 0x421   :  { %v2421_v31 = vmax.f32 %v2276_v29, 0.0  ;;  %v2478_v56 = vunpack.c.h.bf16 %v9401_v44 }
 0x422   :  { %v9607_v3 = vpack.c.bf16 %v2546_v15, %v2545_v7  ;;  %v2422_v35 = vmax.f32 %v2384_v0, 0.0 }
 0x424   :  { %v2443_v18 = vpack.c.bf16 %v2422_v35, %v2421_v31  ;;  %v2643_v39 = vunpack.c.l.b16 %v9607_v3  ;;  %v2644_v62 = vunpack.c.h.b16 %v9607_v3 }
 0x425   :  { %v2331_v48 = vpop.f32.mrf.mxu3 }
 0x426   :  { %v2332_v41 = vadd.f32 %v2331_v48, %v9483_v14  ;;  %v2277_v60 = vpop.f32.mrf.mxu2  ;;  %v2665_v46 = vpack.c.b16 %v2643_v39, %v2641_v22  ;;  %v2666_v47 = vpack.c.b16 %v2644_v62, %v2642_v42  ;;  %v2511_v59 = vunpack.c.l.bf16 %v2443_v18 }
 0x427   :  { %v2278_v54 = vadd.f32 %v2277_v60, %v2224_v33  ;;  %v2512_v49 = vunpack.c.h.bf16 %v2443_v18  ;;  %v2226_v43 = vpop.f32.mrf.mxu1  ;;  %v7549_v22 = vor.u32 %v8304_v38, %v7548_v50 }
 0x428   :  { %v2386_v9 = vadd.f32 %v2385_v53, %v2332_v41  ;;  %2835 = vmatmul.bf16.gmra.mxu1 %v2665_v46  ;;  %v2547_v37 = vadd.f32 %v2511_v59, %v2475_v30  ;;  %v2227_v8 = vadd.f32 %v2226_v43, %v9481_v20  ;;  %v2388_v27 = vpop.f32.mrf.mxu0 }
 0x429   :  { %v2423_v40 = vmax.f32 %v2278_v54, 0.0  ;;  %7534 = vmatmul.msk.bf16.gmra.mxu2 %vm680_vm2, %v2666_v47  ;;  %2943 = vmatmul.bf16.gmra.mxu3 %v2665_v46  ;;  %v2548_v51 = vadd.f32 %v2512_v49, %v2476_v28  ;;  %v2480_v28 = vunpack.c.h.bf16 %v9415_v21 }
 0x42a   :  { %v2424_v61 = vmax.f32 %v2386_v9, 0.0  ;;  %7543 = vmatmul.msk.bf16.gmra.mxu0 %vm680_vm2, %v2666_v47  ;;  %3229 = vmatpush.bf16.msrb.mxu1 %v7549_v22 }
 0x42b   :  { %v9623_v7 = vpack.c.bf16 %v2548_v51, %v2547_v37  ;;  %v2482_v37 = vunpack.c.h.bf16 %v9417_v13 }
 0x42c   :  { %v2444_v26 = vpack.c.bf16 %v2424_v61, %v2423_v40 }
 0x42d   :  { %v2334_v2 = vpop.f32.mrf.mxu3  ;;  %v2645_v39 = vunpack.c.l.b16 %v9623_v7  ;;  %v2646_v41 = vunpack.c.h.b16 %v9623_v7 }
 0x42e   :  { %v2513_v63 = vunpack.c.l.bf16 %v2444_v26  ;;  %v2514_v16 = vunpack.c.h.bf16 %v2444_v26  ;;  %v2335_v57 = vadd.f32 %v2334_v2, %v9483_v14  ;;  %v2280_v19 = vpop.f32.mrf.mxu2 }
 0x42f   :  { %v2281_v29 = vadd.f32 %v2280_v19, %v2227_v8  ;;  %v2228_v18 = vpop.f32.mrf.mxu1 }
 0x430   :  { %v2549_v15 = vadd.f32 %v2513_v63, %v2477_v17  ;;  %v2550_v0 = vadd.f32 %v2514_v16, %v2478_v56  ;;  %v2389_v31 = vadd.f32 %v2388_v27, %v2335_v57  ;;  %v2229_v48 = vadd.f32 %v2228_v18, %v9481_v20  ;;  %v2390_v47 = vpop.f32.mrf.mxu0  ;;  %v7704_v18 = vld [vmem:[#allocation3 + $0x228] sm:$0xf0] }
 0x431   :  { %v2425_v35 = vmax.f32 %v2281_v29, 0.0  ;;  %v2479_v20 = vunpack.c.l.bf16 %v9415_v21 }
 0x432   :  { %v9625_v53 = vpack.c.bf16 %v2550_v0, %v2549_v15  ;;  %v2426_v24 = vmax.f32 %v2389_v31, 0.0  ;;  %v2593_v15 = vld [vmem:[#allocation10 + $0x4] sm:$0x3]  ;;  %v7710_v0 = vld [vmem:[#allocation3 + $0x230] sm:$0xf] }
 0x433   :  { %v8340_v31 = vld [vmem:[#allocation3 + $0x234] sm:$0xf0]  ;;  %v9649_v22 = vperm.slane %v2593_v15, 0 }
 0x434   :  { %v2445_v44 = vpack.c.bf16 %v2426_v24, %v2425_v35  ;;  %v2647_v62 = vunpack.c.l.b16 %v9625_v53  ;;  %v2648_v33 = vunpack.c.h.b16 %v9625_v53  ;;  %v8337_v35 = vld [vmem:[#allocation3 + $0x224] sm:$0xf]  ;;  %v7711_v24 = vor.u32 %v8340_v31, %v7710_v0  ;;  %v8336_v0 = vld [vmem:[#allocation3 + $0x214] sm:$0xf0] }
 0x435   :  { %v2336_v42 = vpop.f32.mrf.mxu3 }
 0x436   :  { %v2337_v60 = vadd.f32 %v2336_v42, %v9483_v14  ;;  %v2282_v46 = vpop.f32.mrf.mxu2  ;;  %v2667_v54 = vpack.c.b16 %v2647_v62, %v2645_v39  ;;  %v2668_v49 = vpack.c.b16 %v2648_v33, %v2646_v41  ;;  %v2515_v9 = vunpack.c.l.bf16 %v2445_v44  ;;  %3903 = vmatpush.bf16.msra.mxu2 %v7711_v24  ;;  %v7702_v41 = vld [vmem:[#allocation3 + $0x220] sm:$0xf] }
 0x437   :  { %v2283_v59 = vadd.f32 %v2282_v46, %v2229_v48  ;;  %v2516_v43 = vunpack.c.h.bf16 %v2445_v44  ;;  %v9651_v44 = vperm.slane %v2593_v15, 1  ;;  %v7707_v62 = vor.u32 %v8337_v35, %v7704_v18  ;;  %v7694_v15 = vld [vmem:[#allocation3 + $0x210] sm:$0xf] }
 0x438   :  { %v2391_v40 = vadd.f32 %v2390_v47, %v2337_v60  ;;  %2840 = vmatmul.bf16.gmra.mxu1 %v2667_v54  ;;  %v2551_v14 = vadd.f32 %v2515_v9, %v2479_v20  ;;  %v8338_v60 = vld [vmem:[#allocation3 + $0x224] sm:$0xf0]  ;;  %v7712_v47 = vld [vmem:[#allocation3 + $0x238] sm:$0xf0]  ;;  %v7695_v31 = vor.u32 %v8336_v0, %v7694_v15 }
 0x439   :  { %v2427_v30 = vmax.f32 %v2283_v59, 0.0  ;;  %7535 = vmatmul.msk.bf16.gmra.mxu2 %vm680_vm2, %v2668_v49  ;;  %2948 = vmatmul.bf16.gmra.mxu3 %v2667_v54  ;;  %v2552_v4 = vadd.f32 %v2516_v43, %v2480_v28  ;;  %v7703_v46 = vor.u32 %v8338_v60, %v7702_v41  ;;  %v8339_v54 = vld [vmem:[#allocation3 + $0x234] sm:$0xf] }
 0x43a   :  { %v2428_v61 = vmax.f32 %v2391_v40, 0.0  ;;  %7544 = vmatmul.msk.bf16.gmra.mxu0 %vm680_vm2, %v2668_v49  ;;  %3950 = vmatpush.bf16.msrb.mxu3 %v7707_v62  ;;  %v7715_v9 = vor.u32 %v8339_v54, %v7712_v47 }
 0x43b   :  { %v9639_v8 = vpack.c.bf16 %v2552_v4, %v2551_v14  ;;  %3842 = vmatpush.bf16.msra.mxu1 %v7703_v46 }
 0x43c   :  { %v2446_v45 = vpack.c.bf16 %v2428_v61, %v2427_v30  ;;  %4011 = vmatpush.bf16.msrb.mxu0 %v7715_v9 }
 0x43d   :  { %v2649_v21 = vunpack.c.l.b16 %v9639_v8  ;;  %v2650_v63 = vunpack.c.h.b16 %v9639_v8 }
 0x43e   :  { %v2517_v51 = vunpack.c.l.bf16 %v2446_v45  ;;  %v2518_v26 = vunpack.c.h.bf16 %v2446_v45 }
 0x43f   :  { %3843 = vmatpush.bf16.msra.mxu1 %v7695_v31 }
 0x440   :  { %v2553_v17 = vadd.f32 %v2517_v51, %v2481_v6  ;;  %v2554_v27 = vadd.f32 %v2518_v26, %v2482_v37 }
 0x442   :  { %v9641_v2 = vpack.c.bf16 %v2554_v27, %v2553_v17  ;;  %v8335_v27 = vld [vmem:[#allocation3 + $0x214] sm:$0xf] }
 0x444   :  { %v2651_v56 = vunpack.c.l.b16 %v9641_v2  ;;  %v2652_v16 = vunpack.c.h.b16 %v9641_v2 }
 0x445   :  { %v2806_v57 = vpop.f32.mrf.mxu1 }
 0x446   :  { %v2669_v19 = vpack.c.b16 %v2651_v56, %v2649_v21  ;;  %v2670_v29 = vpack.c.b16 %v2652_v16, %v2650_v63  ;;  %v2968_v13 = vpop.f32.mrf.mxu0  ;;  %v2807_v48 = vadd.f32 %v2806_v57, %v9649_v22  ;;  %v7696_v21 = vld [vmem:[#allocation3 + $0x218] sm:$0xf0] }
 0x447   :  { %v7699_v16 = vor.u32 %v8335_v27, %v7696_v21 }
 0x448   :  { %2845 = vmatmul.bf16.gmra.mxu1 %v2669_v19 }
 0x449   :  { %7536 = vmatmul.msk.bf16.gmra.mxu2 %vm680_vm2, %v2670_v29  ;;  %2953 = vmatmul.bf16.gmra.mxu3 %v2669_v19 }
 0x44a   :  { %7545 = vmatmul.msk.bf16.gmra.mxu0 %vm680_vm2, %v2670_v29  ;;  %3951 = vmatpush.bf16.msrb.mxu3 %v7699_v16 }
 0x44b   :  { %v2860_v50 = vpop.f32.mrf.mxu2 }
 0x44c   :  { %v2914_v38 = vpop.f32.mrf.mxu3  ;;  %v2861_v59 = vadd.f32 %v2860_v50, %v2807_v48 }
 0x44d   :  { %v2808_v39 = vpop.f32.mrf.mxu1  ;;  %v2915_v42 = vadd.f32 %v2914_v38, %v9651_v44 }
 0x44e   :  { %v2970_v33 = vpop.f32.mrf.mxu0  ;;  %v2809_v49 = vadd.f32 %v2808_v39, %v9649_v22  ;;  %v3013_v14 = vmax.f32 %v2861_v59, 0.0 }
 0x44f   :  { %v2969_v30 = vadd.f32 %v2968_v13, %v2915_v42 }
 0x451   :  { %v3014_v37 = vmax.f32 %v2969_v30, 0.0 }
 0x453   :  { %v2862_v43 = vpop.f32.mrf.mxu2 }
 0x454   :  { %v2916_v40 = vpop.f32.mrf.mxu3  ;;  %v2863_v20 = vadd.f32 %v2862_v43, %v2809_v49 }
 0x455   :  { %v2917_v28 = vadd.f32 %v2916_v40, %v9651_v44  ;;  %v2811_v61 = vpop.f32.mrf.mxu1 }
 0x456   :  { %v3015_v4 = vmax.f32 %v2863_v20, 0.0  ;;  %v2973_v6 = vpop.f32.mrf.mxu0  ;;  %v2812_v29 = vadd.f32 %v2811_v61, %v9649_v22  ;;  %v7688_v61 = vld [vmem:[#allocation3 + $0x208] sm:$0xf0] }
 0x457   :  { %v2971_v45 = vadd.f32 %v2970_v33, %v2917_v28  ;;  %v8333_v28 = vld [vmem:[#allocation3 + $0x204] sm:$0xf] }
 0x458   :  { %v3049_v51 = vpack.c.bf16 %v3015_v4, %v3013_v14  ;;  %v7691_v14 = vor.u32 %v8333_v28, %v7688_v61  ;;  %v7686_v4 = vld [vmem:[#allocation3 + $0x200] sm:$0xf] }
 0x459   :  { %v3016_v26 = vmax.f32 %v2971_v45, 0.0  ;;  %v8334_v45 = vld [vmem:[#allocation3 + $0x204] sm:$0xf0] }
 0x45a   :  { %3230 = vmatmul.bf16.vlgmr.msrb.gmra.mxu1 %v3049_v51  ;;  %3338 = vmatmul.bf16.vlgmr.msra.gmra.mxu3 %v3049_v51  ;;  %v7687_v51 = vor.u32 %v8334_v45, %v7686_v4 }
 0x45b   :  { %v3050_v17 = vpack.c.bf16 %v3016_v26, %v3014_v37  ;;  %v2865_v56 = vpop.f32.mrf.mxu2  ;;  %3952 = vmatpush.bf16.msrb.mxu3 %v7691_v14 }
 0x45c   :  { %v2919_v63 = vpop.f32.mrf.mxu3  ;;  %v2866_v35 = vadd.f32 %v2865_v56, %v2812_v29  ;;  %3844 = vmatpush.bf16.msra.mxu1 %v7687_v51 }
 0x45d   :  { %7626 = vmatmul.msk.bf16.vlgmr.msrb.gmra.mxu2 %vm1104_vm3, %v3050_v17  ;;  %7635 = vmatmul.msk.bf16.vlgmr.msra.gmra.mxu0 %vm1104_vm3, %v3050_v17  ;;  %v2813_v57 = vpop.f32.mrf.mxu1  ;;  %v2920_v13 = vadd.f32 %v2919_v63, %v9651_v44 }
 0x45e   :  { %v2975_v19 = vpop.f32.mrf.mxu0  ;;  %v2814_v50 = vadd.f32 %v2813_v57, %v9649_v22  ;;  %v3017_v48 = vmax.f32 %v2866_v35, 0.0 }
 0x45f   :  { %v2974_v18 = vadd.f32 %v2973_v6, %v2920_v13 }
 0x461   :  { %v3018_v46 = vmax.f32 %v2974_v18, 0.0 }
 0x463   :  { %v2867_v38 = vpop.f32.mrf.mxu2 }
 0x464   :  { %v2921_v24 = vpop.f32.mrf.mxu3  ;;  %v2868_v39 = vadd.f32 %v2867_v38, %v2814_v50 }
 0x465   :  { %v2922_v62 = vadd.f32 %v2921_v24, %v9651_v44  ;;  %v2816_v33 = vpop.f32.mrf.mxu1 }
 0x466   :  { %v3019_v42 = vmax.f32 %v2868_v39, 0.0  ;;  %v2978_v60 = vpop.f32.mrf.mxu0  ;;  %v2817_v30 = vadd.f32 %v2816_v33, %v9649_v22  ;;  %v7680_v33 = vld [vmem:[#allocation3 + $0x1f8] sm:$0xf0] }
 0x467   :  { %v2976_v41 = vadd.f32 %v2975_v19, %v2922_v62  ;;  %v8331_v62 = vld [vmem:[#allocation3 + $0x1f4] sm:$0xf] }
 0x468   :  { %v3051_v47 = vpack.c.bf16 %v3019_v42, %v3017_v48  ;;  %v7683_v48 = vor.u32 %v8331_v62, %v7680_v33  ;;  %v7678_v42 = vld [vmem:[#allocation3 + $0x1f0] sm:$0xf] }
 0x469   :  { %v3020_v54 = vmax.f32 %v2976_v41, 0.0  ;;  %v8332_v41 = vld [vmem:[#allocation3 + $0x1f4] sm:$0xf0] }
 0x46a   :  { %3235 = vmatmul.bf16.gmra.mxu1 %v3051_v47  ;;  %3343 = vmatmul.bf16.gmra.mxu3 %v3051_v47 }
 0x46b   :  { %v3052_v59 = vpack.c.bf16 %v3020_v54, %v3018_v46  ;;  %v2870_v49 = vpop.f32.mrf.mxu2  ;;  %v7679_v54 = vor.u32 %v8332_v41, %v7678_v42  ;;  %3953 = vmatpush.bf16.msrb.mxu3 %v7683_v48  ;;  %v7670_v42 = vld [vmem:[#allocation3 + $0x1e0] sm:$0xf]  ;;  %v8330_v41 = vld [vmem:[#allocation3 + $0x1e4] sm:$0xf0] }
 0x46c   :  { %v2924_v9 = vpop.f32.mrf.mxu3  ;;  %v2871_v6 = vadd.f32 %v2870_v49, %v2817_v30 }
 0x46d   :  { %7627 = vmatmul.msk.bf16.gmra.mxu2 %vm1104_vm3, %v3052_v59  ;;  %7636 = vmatmul.msk.bf16.gmra.mxu0 %vm1104_vm3, %v3052_v59  ;;  %v2818_v43 = vpop.f32.mrf.mxu1  ;;  %v2925_v20 = vadd.f32 %v2924_v9, %v9651_v44 }
 0x46e   :  { %v2980_v40 = vpop.f32.mrf.mxu0  ;;  %v2819_v37 = vadd.f32 %v2818_v43, %v9649_v22  ;;  %v3021_v16 = vmax.f32 %v2871_v6, 0.0  ;;  %3845 = vmatpush.bf16.msra.mxu1 %v7679_v54  ;;  %v7671_v54 = vor.u32 %v8330_v41, %v7670_v42 }
 0x46f   :  { %v2979_v27 = vadd.f32 %v2978_v60, %v2925_v20 }
 0x471   :  { %v3022_v13 = vmax.f32 %v2979_v27, 0.0 }
 0x472   :  { %3846 = vmatpush.bf16.msra.mxu1 %v7671_v54 }
 0x473   :  { %v2872_v26 = vpop.f32.mrf.mxu2 }
 0x474   :  { %v2926_v17 = vpop.f32.mrf.mxu3  ;;  %v2873_v21 = vadd.f32 %v2872_v26, %v2819_v37 }
 0x475   :  { %v2927_v56 = vadd.f32 %v2926_v17, %v9651_v44  ;;  %v2821_v63 = vpop.f32.mrf.mxu1 }
 0x476   :  { %v3023_v57 = vmax.f32 %v2873_v21, 0.0  ;;  %v2822_v18 = vadd.f32 %v2821_v63, %v9649_v22  ;;  %v7672_v63 = vld [vmem:[#allocation3 + $0x1e8] sm:$0xf0] }
 0x477   :  { %v2981_v19 = vadd.f32 %v2980_v40, %v2927_v56  ;;  %v2983_v29 = vpop.f32.mrf.mxu0  ;;  %v8329_v56 = vld [vmem:[#allocation3 + $0x1e4] sm:$0xf] }
 0x478   :  { %v3053_v0 = vpack.c.bf16 %v3023_v57, %v3021_v16  ;;  %v7675_v16 = vor.u32 %v8329_v56, %v7672_v63 }
 0x479   :  { %v3024_v15 = vmax.f32 %v2981_v19, 0.0 }
 0x47a   :  { %3240 = vmatmul.bf16.gmra.mxu1 %v3053_v0  ;;  %3348 = vmatmul.bf16.gmra.mxu3 %v3053_v0 }
 0x47b   :  { %v3054_v31 = vpack.c.bf16 %v3024_v15, %v3022_v13  ;;  %3954 = vmatpush.bf16.msrb.mxu3 %v7675_v16 }
 0x47c   :  { %v2875_v35 = vpop.f32.mrf.mxu2  ;;  %v2929_v50 = vpop.f32.mrf.mxu3 }
 0x47d   :  { %7628 = vmatmul.msk.bf16.gmra.mxu2 %vm1104_vm3, %v3054_v31  ;;  %7637 = vmatmul.msk.bf16.gmra.mxu0 %vm1104_vm3, %v3054_v31  ;;  %v2823_v38 = vpop.f32.mrf.mxu1  ;;  %v2930_v39 = vadd.f32 %v2929_v50, %v9651_v44  ;;  %v2876_v60 = vadd.f32 %v2875_v35, %v2822_v18 }
 0x47e   :  { %v2824_v46 = vadd.f32 %v2823_v38, %v9649_v22 }
 0x47f   :  { %v2985_v24 = vpop.f32.mrf.mxu0  ;;  %v2984_v49 = vadd.f32 %v2983_v29, %v2930_v39  ;;  %v3025_v30 = vmax.f32 %v2876_v60, 0.0 }
 0x481   :  { %v3026_v14 = vmax.f32 %v2984_v49, 0.0 }
 0x484   :  { %v2877_v47 = vpop.f32.mrf.mxu2  ;;  %v2931_v59 = vpop.f32.mrf.mxu3 }
 0x485   :  { %v2878_v9 = vadd.f32 %v2877_v47, %v2824_v46  ;;  %v2932_v43 = vadd.f32 %v2931_v59, %v9651_v44  ;;  %v2826_v40 = vpop.f32.mrf.mxu1 }
 0x486   :  { %v2827_v27 = vadd.f32 %v2826_v40, %v9649_v22  ;;  %v7664_v40 = vld [vmem:[#allocation3 + $0x1d8] sm:$0xf0] }
 0x487   :  { %v3027_v20 = vmax.f32 %v2878_v9, 0.0  ;;  %v2986_v28 = vadd.f32 %v2985_v24, %v2932_v43  ;;  %v2988_v61 = vpop.f32.mrf.mxu0  ;;  %v8327_v43 = vld [vmem:[#allocation3 + $0x1d4] sm:$0xf] }
 0x489   :  { %v3028_v4 = vmax.f32 %v2986_v28, 0.0  ;;  %v3055_v45 = vpack.c.bf16 %v3027_v20, %v3025_v30  ;;  %v7667_v30 = vor.u32 %v8327_v43, %v7664_v40  ;;  %v8325_v43 = vld [vmem:[#allocation3 + $0x1c4] sm:$0xf]  ;;  %v7656_v40 = vld [vmem:[#allocation3 + $0x1c8] sm:$0xf0] }
 0x48b   :  { %v3056_v6 = vpack.c.bf16 %v3028_v4, %v3026_v14  ;;  %3245 = vmatmul.bf16.gmra.mxu1 %v3055_v45  ;;  %3353 = vmatmul.bf16.gmra.mxu3 %v3055_v45 }
 0x48c   :  { %v2880_v37 = vpop.f32.mrf.mxu2  ;;  %v2934_v51 = vpop.f32.mrf.mxu3  ;;  %3955 = vmatpush.bf16.msrb.mxu3 %v7667_v30  ;;  %v7654_v30 = vld [vmem:[#allocation3 + $0x1c0] sm:$0xf] }
 0x48d   :  { %7629 = vmatmul.msk.bf16.gmra.mxu2 %vm1104_vm3, %v3056_v6  ;;  %7638 = vmatmul.msk.bf16.gmra.mxu0 %vm1104_vm3, %v3056_v6  ;;  %v2828_v26 = vpop.f32.mrf.mxu1  ;;  %v2935_v21 = vadd.f32 %v2934_v51, %v9651_v44  ;;  %v2881_v57 = vadd.f32 %v2880_v37, %v2827_v27 }
 0x48e   :  { %v2829_v19 = vadd.f32 %v2828_v26, %v9649_v22 }
 0x48f   :  { %v2990_v17 = vpop.f32.mrf.mxu0  ;;  %v2989_v15 = vadd.f32 %v2988_v61, %v2935_v21  ;;  %v3029_v50 = vmax.f32 %v2881_v57, 0.0  ;;  %v7662_v57 = vld [vmem:[#allocation3 + $0x1d0] sm:$0xf] }
 0x491   :  { %v3030_v39 = vmax.f32 %v2989_v15, 0.0 }
 0x494   :  { %v2882_v29 = vpop.f32.mrf.mxu2  ;;  %v2936_v13 = vpop.f32.mrf.mxu3 }
 0x495   :  { %v2883_v0 = vadd.f32 %v2882_v29, %v2829_v19  ;;  %v2937_v31 = vadd.f32 %v2936_v13, %v9651_v44  ;;  %v2831_v35 = vpop.f32.mrf.mxu1  ;;  %v8328_v19 = vld [vmem:[#allocation3 + $0x1d4] sm:$0xf0] }
 0x496   :  { %v2832_v49 = vadd.f32 %v2831_v35, %v9649_v22  ;;  %v7663_v15 = vor.u32 %v8328_v19, %v7662_v57 }
 0x497   :  { %v3031_v38 = vmax.f32 %v2883_v0, 0.0  ;;  %v2991_v24 = vadd.f32 %v2990_v17, %v2937_v31  ;;  %v2993_v18 = vpop.f32.mrf.mxu0 }
 0x498   :  { %3847 = vmatpush.bf16.msra.mxu1 %v7663_v15 }
 0x499   :  { %v3032_v62 = vmax.f32 %v2991_v24, 0.0  ;;  %v3057_v33 = vpack.c.bf16 %v3031_v38, %v3029_v50 }
 0x49b   :  { %v3058_v48 = vpack.c.bf16 %v3032_v62, %v3030_v39  ;;  %3250 = vmatmul.bf16.gmra.mxu1 %v3057_v33  ;;  %3358 = vmatmul.bf16.gmra.mxu3 %v3057_v33 }
 0x49c   :  { %v2885_v60 = vpop.f32.mrf.mxu2  ;;  %v2939_v46 = vpop.f32.mrf.mxu3 }
 0x49d   :  { %7630 = vmatmul.msk.bf16.gmra.mxu2 %vm1104_vm3, %v3058_v48  ;;  %7639 = vmatmul.msk.bf16.gmra.mxu0 %vm1104_vm3, %v3058_v48  ;;  %v2833_v47 = vpop.f32.mrf.mxu1  ;;  %v2940_v9 = vadd.f32 %v2939_v46, %v9651_v44  ;;  %v2886_v20 = vadd.f32 %v2885_v60, %v2832_v49 }
 0x49e   :  { %v2834_v28 = vadd.f32 %v2833_v47, %v9649_v22 }
 0x49f   :  { %v2995_v59 = vpop.f32.mrf.mxu0  ;;  %v2994_v4 = vadd.f32 %v2993_v18, %v2940_v9  ;;  %v3033_v51 = vmax.f32 %v2886_v20, 0.0 }
 0x4a1   :  { %v3034_v21 = vmax.f32 %v2994_v4, 0.0 }
 0x4a4   :  { %v2887_v61 = vpop.f32.mrf.mxu2  ;;  %v2941_v14 = vpop.f32.mrf.mxu3 }
 0x4a5   :  { %v2888_v45 = vadd.f32 %v2887_v61, %v2834_v28  ;;  %v2942_v6 = vadd.f32 %v2941_v14, %v9651_v44  ;;  %v2836_v37 = vpop.f32.mrf.mxu1  ;;  %v7659_v61 = vor.u32 %v8325_v43, %v7656_v40  ;;  %v8326_v14 = vld [vmem:[#allocation3 + $0x1c4] sm:$0xf0] }
 0x4a6   :  { %v2837_v35 = vadd.f32 %v2836_v37, %v9649_v22 }
 0x4a7   :  { %v3035_v26 = vmax.f32 %v2888_v45, 0.0  ;;  %v2996_v17 = vadd.f32 %v2995_v59, %v2942_v6  ;;  %v2998_v27 = vpop.f32.mrf.mxu0  ;;  %v7655_v45 = vor.u32 %v8326_v14, %v7654_v30  ;;  %3956 = vmatpush.bf16.msrb.mxu3 %v7659_v61  ;;  %v3089_v14 = vld [vmem:[#allocation11 + $0x4] sm:$0x3] }
 0x4a9   :  { %v3036_v56 = vmax.f32 %v2996_v17, 0.0  ;;  %v3059_v63 = vpack.c.bf16 %v3035_v26, %v3033_v51  ;;  %3848 = vmatpush.bf16.msra.mxu1 %v7655_v45 }
 0x4ab   :  { %v3060_v16 = vpack.c.bf16 %v3036_v56, %v3034_v21  ;;  %3255 = vmatmul.bf16.gmra.mxu1 %v3059_v63  ;;  %3363 = vmatmul.bf16.gmra.mxu3 %v3059_v63 }
 0x4ac   :  { %v2890_v29 = vpop.f32.mrf.mxu2  ;;  %v2944_v13 = vpop.f32.mrf.mxu3 }
 0x4ad   :  { %7631 = vmatmul.msk.bf16.gmra.mxu2 %vm1104_vm3, %v3060_v16  ;;  %7640 = vmatmul.msk.bf16.gmra.mxu0 %vm1104_vm3, %v3060_v16  ;;  %v2838_v0 = vpop.f32.mrf.mxu1  ;;  %v2945_v50 = vadd.f32 %v2944_v13, %v9651_v44  ;;  %v2891_v38 = vadd.f32 %v2890_v29, %v2837_v35 }
 0x4ae   :  { %v2839_v24 = vadd.f32 %v2838_v0, %v9649_v22 }
 0x4af   :  { %v3000_v31 = vpop.f32.mrf.mxu0  ;;  %v2999_v62 = vadd.f32 %v2998_v27, %v2945_v50  ;;  %v3037_v41 = vmax.f32 %v2891_v38, 0.0 }
 0x4b1   :  { %v3038_v47 = vmax.f32 %v2999_v62, 0.0 }
 0x4b4   :  { %v2892_v18 = vpop.f32.mrf.mxu2  ;;  %v2946_v39 = vpop.f32.mrf.mxu3 }
 0x4b5   :  { %v2893_v33 = vadd.f32 %v2892_v18, %v2839_v24  ;;  %v2947_v48 = vadd.f32 %v2946_v39, %v9651_v44  ;;  %v2841_v42 = vpop.f32.mrf.mxu1  ;;  %v8323_v18 = vld [vmem:[#allocation3 + $0x1b4] sm:$0xf]  ;;  %v7648_v39 = vld [vmem:[#allocation3 + $0x1b8] sm:$0xf0] }
 0x4b6   :  { %v2842_v37 = vadd.f32 %v2841_v42, %v9649_v22  ;;  %v7651_v62 = vor.u32 %v8323_v18, %v7648_v39 }
 0x4b7   :  { %v3039_v60 = vmax.f32 %v2893_v33, 0.0  ;;  %v3001_v46 = vadd.f32 %v3000_v31, %v2947_v48  ;;  %v3003_v54 = vpop.f32.mrf.mxu0 }
 0x4b8   :  { %3957 = vmatpush.bf16.msrb.mxu3 %v7651_v62 }
 0x4b9   :  { %v3040_v59 = vmax.f32 %v3001_v46, 0.0  ;;  %v3061_v49 = vpack.c.bf16 %v3039_v60, %v3037_v41 }
 0x4bb   :  { %v3062_v9 = vpack.c.bf16 %v3040_v59, %v3038_v47  ;;  %3260 = vmatmul.bf16.gmra.mxu1 %v3061_v49  ;;  %3368 = vmatmul.bf16.gmra.mxu3 %v3061_v49  ;;  %v7646_v59 = vld [vmem:[#allocation3 + $0x1b0] sm:$0xf]  ;;  %v8324_v49 = vld [vmem:[#allocation3 + $0x1b4] sm:$0xf0] }
 0x4bc   :  { %v2895_v20 = vpop.f32.mrf.mxu2  ;;  %v2949_v28 = vpop.f32.mrf.mxu3  ;;  %v7647_v30 = vor.u32 %v8324_v49, %v7646_v59  ;;  %v3493_v59 = vunpack.c.h.bf16 %v9497_v36 }
 0x4bd   :  { %7632 = vmatmul.msk.bf16.gmra.mxu2 %vm1104_vm3, %v3062_v9  ;;  %7641 = vmatmul.msk.bf16.gmra.mxu0 %vm1104_vm3, %v3062_v9  ;;  %v2843_v4 = vpop.f32.mrf.mxu1  ;;  %v2950_v51 = vadd.f32 %v2949_v28, %v9651_v44  ;;  %v2896_v26 = vadd.f32 %v2895_v20, %v2842_v37 }
 0x4be   :  { %v2844_v17 = vadd.f32 %v2843_v4, %v9649_v22  ;;  %3849 = vmatpush.bf16.msra.mxu1 %v7647_v30 }
 0x4bf   :  { %v3005_v6 = vpop.f32.mrf.mxu0  ;;  %v3004_v56 = vadd.f32 %v3003_v54, %v2950_v51  ;;  %v3041_v19 = vmax.f32 %v2896_v26, 0.0  ;;  %v9705_v26 = vperm.slane %v3089_v14, 0 }
 0x4c1   :  { %v3042_v0 = vmax.f32 %v3004_v56, 0.0 }
 0x4c4   :  { %v2897_v27 = vpop.f32.mrf.mxu2  ;;  %v2951_v21 = vpop.f32.mrf.mxu3 }
 0x4c5   :  { %v2898_v63 = vadd.f32 %v2897_v27, %v2844_v17  ;;  %v2952_v16 = vadd.f32 %v2951_v21, %v9651_v44  ;;  %v2846_v57 = vpop.f32.mrf.mxu1  ;;  %v9707_v17 = vperm.slane %v3089_v14, 1 }
 0x4c6   :  { %v2847_v48 = vadd.f32 %v2846_v57, %v9649_v22 }
 0x4c7   :  { %v3043_v29 = vmax.f32 %v2898_v63, 0.0  ;;  %v3006_v13 = vadd.f32 %v3005_v6, %v2952_v16  ;;  %v3008_v15 = vpop.f32.mrf.mxu0 }
 0x4c9   :  { %v3044_v31 = vmax.f32 %v3006_v13, 0.0  ;;  %v3063_v35 = vpack.c.bf16 %v3043_v29, %v3041_v19 }
 0x4cb   :  { %v3064_v50 = vpack.c.bf16 %v3044_v31, %v3042_v0  ;;  %3265 = vmatmul.bf16.gmra.mxu1 %v3063_v35  ;;  %3373 = vmatmul.bf16.gmra.mxu3 %v3063_v35  ;;  %v7794_v0 = vld [vmem:[#allocation5 + $0x258] sm:$0xf0]  ;;  %v7808_v31 = vld [vmem:[#allocation5 + $0x270] sm:$0xf] }
 0x4cc   :  { %v2900_v38 = vpop.f32.mrf.mxu2  ;;  %v2954_v24 = vpop.f32.mrf.mxu3 }
 0x4cd   :  { %7633 = vmatmul.msk.bf16.gmra.mxu2 %vm1104_vm3, %v3064_v50  ;;  %7642 = vmatmul.msk.bf16.gmra.mxu0 %vm1104_vm3, %v3064_v50  ;;  %v2848_v33 = vpop.f32.mrf.mxu1  ;;  %v2955_v42 = vadd.f32 %v2954_v24, %v9651_v44  ;;  %v2901_v60 = vadd.f32 %v2900_v38, %v2847_v48  ;;  %v8360_v38 = vld [vmem:[#allocation5 + $0x274] sm:$0xf0] }
 0x4ce   :  { %v2849_v46 = vadd.f32 %v2848_v33, %v9649_v22  ;;  %v7809_v18 = vor.u32 %v8360_v38, %v7808_v31 }
 0x4cf   :  { %v3010_v41 = vpop.f32.mrf.mxu0  ;;  %v3009_v9 = vadd.f32 %v3008_v15, %v2955_v42  ;;  %v3045_v20 = vmax.f32 %v2901_v60, 0.0  ;;  %v8355_v15 = vld [vmem:[#allocation5 + $0x254] sm:$0xf] }
 0x4d0   :  { %v7797_v50 = vor.u32 %v8355_v15, %v7794_v0  ;;  %4327 = vmatpush.bf16.msrb.mxu2 %v7809_v18 }
 0x4d1   :  { %v3046_v45 = vmax.f32 %v3009_v9, 0.0  ;;  %v7792_v9 = vld [vmem:[#allocation5 + $0x250] sm:$0xf] }
 0x4d2   :  { %4375 = vmatpush.bf16.msra.mxu3 %v7797_v50  ;;  %v7786_v50 = vld [vmem:[#allocation5 + $0x248] sm:$0xf0] }
 0x4d4   :  { %v2902_v54 = vpop.f32.mrf.mxu2  ;;  %v2956_v47 = vpop.f32.mrf.mxu3 }
 0x4d5   :  { %v2903_v43 = vadd.f32 %v2902_v54, %v2849_v46  ;;  %v2957_v40 = vadd.f32 %v2956_v47, %v9651_v44  ;;  %v3492_v47 = vunpack.c.l.bf16 %v9497_v36  ;;  %v3494_v36 = vunpack.c.l.bf16 %v9499_v58 }
 0x4d7   :  { %v3047_v28 = vmax.f32 %v2903_v43, 0.0  ;;  %v3011_v61 = vadd.f32 %v3010_v41, %v2957_v40  ;;  %v3231_v4 = vpop.f32.mrf.mxu1  ;;  %v8356_v43 = vld [vmem:[#allocation5 + $0x254] sm:$0xf0] }
 0x4d8   :  { %v3232_v27 = vadd.f32 %v3231_v4, %v9705_v26  ;;  %v7793_v30 = vor.u32 %v8356_v43, %v7792_v9 }
 0x4d9   :  { %v3048_v6 = vmax.f32 %v3011_v61, 0.0  ;;  %v3065_v37 = vpack.c.bf16 %v3047_v28, %v3045_v20  ;;  %v8359_v20 = vld [vmem:[#allocation5 + $0x274] sm:$0xf]  ;;  %v7810_v28 = vld [vmem:[#allocation5 + $0x278] sm:$0xf0] }
 0x4da   :  { %v3393_v51 = vpop.f32.mrf.mxu0  ;;  %v7813_v4 = vor.u32 %v8359_v20, %v7810_v28  ;;  %4267 = vmatpush.bf16.msrb.mxu1 %v7793_v30  ;;  %v7784_v30 = vld [vmem:[#allocation5 + $0x240] sm:$0xf]  ;;  %v8354_v20 = vld [vmem:[#allocation5 + $0x244] sm:$0xf0]  ;;  %v3496_v28 = vunpack.c.l.bf16 %v9515_v12 }
 0x4db   :  { %v3066_v22 = vpack.c.bf16 %v3048_v6, %v3046_v45  ;;  %3270 = vmatmul.bf16.gmra.mxu1 %v3065_v37  ;;  %3378 = vmatmul.bf16.gmra.mxu3 %v3065_v37 }
 0x4dc   :  { %4435 = vmatpush.bf16.msra.mxu0 %v7813_v4  ;;  %v7785_v4 = vor.u32 %v8354_v20, %v7784_v30  ;;  %v3500_v20 = vunpack.c.l.bf16 %v9533_v55 }
 0x4dd   :  { %7634 = vmatmul.msk.bf16.gmra.mxu2 %vm1104_vm3, %v3066_v22  ;;  %7643 = vmatmul.msk.bf16.gmra.mxu0 %vm1104_vm3, %v3066_v22  ;;  %v3339_v44 = vpop.f32.mrf.mxu3  ;;  %v3495_v22 = vunpack.c.h.bf16 %v9499_v58 }
 0x4de   :  { %v3340_v21 = vadd.f32 %v3339_v44, %v9707_v17  ;;  %4268 = vmatpush.bf16.msrb.mxu1 %v7785_v4  ;;  %v8352_v4 = vld [vmem:[#allocation5 + $0x234] sm:$0xf0] }
 0x4df   :  { %v3233_v56 = vpop.f32.mrf.mxu1 }
 0x4e0   :  { %v3285_v63 = vpop.f32.mrf.mxu2  ;;  %v3394_v16 = vadd.f32 %v3393_v51, %v3340_v21  ;;  %v3234_v62 = vadd.f32 %v3233_v56, %v9705_v26 }
 0x4e1   :  { %v3286_v57 = vadd.f32 %v3285_v63, %v3232_v27 }
 0x4e2   :  { %v3395_v19 = vpop.f32.mrf.mxu0  ;;  %v3439_v29 = vmax.f32 %v3394_v16, 0.0 }
 0x4e3   :  { %v3438_v13 = vmax.f32 %v3286_v57, 0.0 }
 0x4e5   :  { %v3474_v35 = vpack.c.bf16 %v3439_v29, %v3438_v13  ;;  %v3341_v24 = vpop.f32.mrf.mxu3 }
 0x4e6   :  { %v3342_v39 = vadd.f32 %v3341_v24, %v9707_v17 }
 0x4e7   :  { %v3236_v33 = vpop.f32.mrf.mxu1  ;;  %v3528_v42 = vunpack.c.l.bf16 %v3474_v35  ;;  %v3529_v41 = vunpack.c.h.bf16 %v3474_v35  ;;  %v8353_v35 = vld [vmem:[#allocation5 + $0x244] sm:$0xf] }
 0x4e8   :  { %v3287_v48 = vpop.f32.mrf.mxu2  ;;  %v3396_v60 = vadd.f32 %v3395_v19, %v3342_v39  ;;  %v3237_v37 = vadd.f32 %v3236_v33, %v9705_v26  ;;  %v7789_v58 = vor.u32 %v8353_v35, %v7786_v50 }
 0x4e9   :  { %v3288_v46 = vadd.f32 %v3287_v48, %v3234_v62  ;;  %v3564_v61 = vadd.f32 %v3528_v42, %v3492_v47  ;;  %v3565_v14 = vadd.f32 %v3529_v41, %v3493_v59 }
 0x4ea   :  { %v3398_v54 = vpop.f32.mrf.mxu0  ;;  %v3441_v49 = vmax.f32 %v3396_v60, 0.0  ;;  %4376 = vmatpush.bf16.msra.mxu3 %v7789_v58  ;;  %v8351_v58 = vld [vmem:[#allocation5 + $0x234] sm:$0xf] }
 0x4eb   :  { %v3440_v40 = vmax.f32 %v3288_v46, 0.0  ;;  %v9721_v63 = vpack.c.bf16 %v3565_v14, %v3564_v61  ;;  %v3497_v61 = vunpack.c.h.bf16 %v9515_v12 }
 0x4ed   :  { %v3475_v45 = vpack.c.bf16 %v3441_v49, %v3440_v40  ;;  %v3344_v6 = vpop.f32.mrf.mxu3  ;;  %v3663_v38 = vunpack.c.h.b16 %v9721_v63  ;;  %v3662_v62 = vunpack.c.l.b16 %v9721_v63 }
 0x4ee   :  { %v3345_v51 = vadd.f32 %v3344_v6, %v9707_v17 }
 0x4ef   :  { %v3530_v44 = vunpack.c.l.bf16 %v3475_v45  ;;  %v3531_v27 = vunpack.c.h.bf16 %v3475_v45  ;;  %v3238_v21 = vpop.f32.mrf.mxu1 }
 0x4f0   :  { %v3290_v56 = vpop.f32.mrf.mxu2  ;;  %v3399_v16 = vadd.f32 %v3398_v54, %v3345_v51  ;;  %v3239_v42 = vadd.f32 %v3238_v21, %v9705_v26 }
 0x4f1   :  { %v3291_v57 = vadd.f32 %v3290_v56, %v3237_v37  ;;  %v3566_v19 = vadd.f32 %v3530_v44, %v3494_v36  ;;  %v3567_v29 = vadd.f32 %v3531_v27, %v3495_v22  ;;  %v3498_v44 = vunpack.c.l.bf16 %v9517_v1 }
 0x4f2   :  { %v3400_v13 = vpop.f32.mrf.mxu0  ;;  %v3443_v15 = vmax.f32 %v3399_v16, 0.0  ;;  %v3499_v27 = vunpack.c.h.bf16 %v9517_v1 }
 0x4f3   :  { %v3442_v0 = vmax.f32 %v3291_v57, 0.0  ;;  %v9723_v31 = vpack.c.bf16 %v3567_v29, %v3566_v19 }
 0x4f5   :  { %v3665_v24 = vunpack.c.h.b16 %v9723_v31  ;;  %v3476_v18 = vpack.c.bf16 %v3443_v15, %v3442_v0  ;;  %v3346_v39 = vpop.f32.mrf.mxu3  ;;  %v3664_v33 = vunpack.c.l.b16 %v9723_v31 }
 0x4f6   :  { %v3347_v48 = vadd.f32 %v3346_v39, %v9707_v17 }
 0x4f7   :  { %v3241_v41 = vpop.f32.mrf.mxu1  ;;  %v3698_v46 = vpack.c.b16 %v3664_v33, %v3662_v62  ;;  %v3699_v54 = vpack.c.b16 %v3665_v24, %v3663_v38  ;;  %v3532_v59 = vunpack.c.l.bf16 %v3476_v18  ;;  %v3533_v49 = vunpack.c.h.bf16 %v3476_v18  ;;  %v7778_v24 = vld [vmem:[#allocation5 + $0x238] sm:$0xf0] }
 0x4f8   :  { %v3292_v60 = vpop.f32.mrf.mxu2  ;;  %v3401_v47 = vadd.f32 %v3400_v13, %v3347_v48  ;;  %v3242_v36 = vadd.f32 %v3241_v41, %v9705_v26  ;;  %v7781_v39 = vor.u32 %v8351_v58, %v7778_v24 }
 0x4f9   :  { %v3293_v9 = vadd.f32 %v3292_v60, %v3239_v42  ;;  %3850 = vmatmul.bf16.vlgmr.msra.gmra.mxu1 %v3698_v46  ;;  %7716 = vmatmul.msk.bf16.vlgmr.msra.gmra.mxu2 %vm680_vm2, %v3699_v54  ;;  %v3568_v45 = vadd.f32 %v3532_v59, %v3496_v28  ;;  %v3569_v6 = vadd.f32 %v3533_v49, %v3497_v61  ;;  %v3501_v28 = vunpack.c.h.bf16 %v9533_v55 }
 0x4fa   :  { %v3403_v43 = vpop.f32.mrf.mxu0  ;;  %v3445_v40 = vmax.f32 %v3401_v47, 0.0  ;;  %3958 = vmatmul.bf16.vlgmr.msrb.gmra.mxu3 %v3698_v46  ;;  %7725 = vmatmul.msk.bf16.vlgmr.msrb.gmra.mxu0 %vm680_vm2, %v3699_v54  ;;  %v3503_v55 = vunpack.c.h.bf16 %v9535_v5 }
 0x4fb   :  { %v3444_v14 = vmax.f32 %v3293_v9, 0.0  ;;  %v9739_v29 = vpack.c.bf16 %v3569_v6, %v3568_v45  ;;  %4377 = vmatpush.bf16.msra.mxu3 %v7781_v39 }
 0x4fd   :  { %v3477_v37 = vpack.c.bf16 %v3445_v40, %v3444_v14  ;;  %v3349_v51 = vpop.f32.mrf.mxu3  ;;  %v3666_v62 = vunpack.c.l.b16 %v9739_v29  ;;  %v3667_v48 = vunpack.c.h.b16 %v9739_v29  ;;  %v7776_v14 = vld [vmem:[#allocation5 + $0x230] sm:$0xf] }
 0x4fe   :  { %v3350_v22 = vadd.f32 %v3349_v51, %v9707_v17  ;;  %v7777_v6 = vor.u32 %v8352_v4, %v7776_v14  ;;  %v3505_v14 = vunpack.c.h.bf16 %v9551_v23 }
 0x4ff   :  { %v3534_v21 = vunpack.c.l.bf16 %v3477_v37  ;;  %v3535_v56 = vunpack.c.h.bf16 %v3477_v37  ;;  %v3243_v16 = vpop.f32.mrf.mxu1 }
 0x500   :  { %v3295_v57 = vpop.f32.mrf.mxu2  ;;  %v3404_v12 = vadd.f32 %v3403_v43, %v3350_v22  ;;  %v3244_v60 = vadd.f32 %v3243_v16, %v9705_v26  ;;  %4269 = vmatpush.bf16.msrb.mxu1 %v7777_v6  ;;  %v7768_v6 = vld [vmem:[#allocation5 + $0x220] sm:$0xf] }
 0x501   :  { %v3296_v19 = vadd.f32 %v3295_v57, %v3242_v36  ;;  %v3570_v13 = vadd.f32 %v3534_v21, %v3498_v44  ;;  %v3571_v15 = vadd.f32 %v3535_v56, %v3499_v27  ;;  %v3502_v21 = vunpack.c.l.bf16 %v9535_v5 }
 0x502   :  { %v3405_v0 = vpop.f32.mrf.mxu0  ;;  %v3447_v35 = vmax.f32 %v3404_v12, 0.0 }
 0x503   :  { %v3446_v50 = vmax.f32 %v3296_v19, 0.0  ;;  %v9741_v38 = vpack.c.bf16 %v3571_v15, %v3570_v13 }
 0x505   :  { %v3478_v18 = vpack.c.bf16 %v3447_v35, %v3446_v50  ;;  %v3351_v1 = vpop.f32.mrf.mxu3  ;;  %v3668_v33 = vunpack.c.l.b16 %v9741_v38  ;;  %v3669_v42 = vunpack.c.h.b16 %v9741_v38 }
 0x506   :  { %v3352_v41 = vadd.f32 %v3351_v1, %v9707_v17 }
 0x507   :  { %v3700_v47 = vpack.c.b16 %v3668_v33, %v3666_v62  ;;  %v3701_v59 = vpack.c.b16 %v3669_v42, %v3667_v48  ;;  %v3536_v49 = vunpack.c.l.bf16 %v3478_v18  ;;  %v3537_v9 = vunpack.c.h.bf16 %v3478_v18 }
 0x508   :  { %v3246_v46 = vpop.f32.mrf.mxu1  ;;  %v3297_v54 = vpop.f32.mrf.mxu2  ;;  %v3406_v43 = vadd.f32 %v3405_v0, %v3352_v41 }
 0x509   :  { %v3298_v40 = vadd.f32 %v3297_v54, %v3244_v60  ;;  %3855 = vmatmul.bf16.gmra.mxu1 %v3700_v47  ;;  %7717 = vmatmul.msk.bf16.gmra.mxu2 %vm680_vm2, %v3701_v59  ;;  %v3572_v37 = vadd.f32 %v3536_v49, %v3500_v20  ;;  %v3573_v51 = vadd.f32 %v3537_v9, %v3501_v28  ;;  %v8349_v20 = vld [vmem:[#allocation5 + $0x224] sm:$0xf]  ;;  %v7770_v28 = vld [vmem:[#allocation5 + $0x228] sm:$0xf0] }
 0x50a   :  { %v3408_v30 = vpop.f32.mrf.mxu0  ;;  %v3449_v61 = vmax.f32 %v3406_v43, 0.0  ;;  %3963 = vmatmul.bf16.gmra.mxu3 %v3700_v47  ;;  %7726 = vmatmul.msk.bf16.gmra.mxu0 %vm680_vm2, %v3701_v59  ;;  %v3247_v44 = vadd.f32 %v3246_v46, %v9705_v26 }
 0x50b   :  { %v3448_v45 = vmax.f32 %v3298_v40, 0.0  ;;  %v9757_v19 = vpack.c.bf16 %v3573_v51, %v3572_v37  ;;  %v8350_v37 = vld [vmem:[#allocation5 + $0x224] sm:$0xf0] }
 0x50c   :  { %v7769_v51 = vor.u32 %v8350_v37, %v7768_v6 }
 0x50d   :  { %v3479_v36 = vpack.c.bf16 %v3449_v61, %v3448_v45  ;;  %v3670_v39 = vunpack.c.l.b16 %v9757_v19  ;;  %v3671_v33 = vunpack.c.h.b16 %v9757_v19  ;;  %v3504_v61 = vunpack.c.l.bf16 %v9551_v23 }
 0x50e   :  { %v3354_v22 = vpop.f32.mrf.mxu3  ;;  %v7773_v45 = vor.u32 %v8349_v20, %v7770_v28  ;;  %4270 = vmatpush.bf16.msrb.mxu1 %v7769_v51  ;;  %v3508_v28 = vunpack.c.l.bf16 %v9569_v10  ;;  %v7800_v51 = vld [vmem:[#allocation5 + $0x260] sm:$0xf] }
 0x50f   :  { %v3355_v27 = vadd.f32 %v3354_v22, %v9707_v17  ;;  %v3538_v56 = vunpack.c.l.bf16 %v3479_v36  ;;  %v3539_v16 = vunpack.c.h.bf16 %v3479_v36 }
 0x510   :  { %v3248_v57 = vpop.f32.mrf.mxu1  ;;  %v3300_v12 = vpop.f32.mrf.mxu2  ;;  %4378 = vmatpush.bf16.msra.mxu3 %v7773_v45  ;;  %v7762_v45 = vld [vmem:[#allocation5 + $0x218] sm:$0xf0] }
 0x511   :  { %v3409_v13 = vadd.f32 %v3408_v30, %v3355_v27  ;;  %v3301_v15 = vadd.f32 %v3300_v12, %v3247_v44  ;;  %v3574_v0 = vadd.f32 %v3538_v56, %v3502_v21  ;;  %v3575_v35 = vadd.f32 %v3539_v16, %v3503_v55 }
 0x512   :  { %v3410_v50 = vpop.f32.mrf.mxu0  ;;  %v3249_v41 = vadd.f32 %v3248_v57, %v9705_v26  ;;  %v3506_v56 = vunpack.c.l.bf16 %v9553_v34  ;;  %v3507_v16 = vunpack.c.h.bf16 %v9553_v34 }
 0x513   :  { %v3451_v58 = vmax.f32 %v3409_v13, 0.0  ;;  %v3450_v24 = vmax.f32 %v3301_v15, 0.0  ;;  %v9759_v18 = vpack.c.bf16 %v3575_v35, %v3574_v0 }
 0x515   :  { %v3480_v1 = vpack.c.bf16 %v3451_v58, %v3450_v24  ;;  %v3672_v5 = vunpack.c.l.b16 %v9759_v18  ;;  %v3673_v48 = vunpack.c.h.b16 %v9759_v18 }
 0x516   :  { %v3356_v62 = vpop.f32.mrf.mxu3 }
 0x517   :  { %v3357_v42 = vadd.f32 %v3356_v62, %v9707_v17  ;;  %v3702_v54 = vpack.c.b16 %v3672_v5, %v3670_v39  ;;  %v3703_v47 = vpack.c.b16 %v3673_v48, %v3671_v33  ;;  %v3540_v49 = vunpack.c.l.bf16 %v3480_v1 }
 0x518   :  { %v3251_v60 = vpop.f32.mrf.mxu1  ;;  %v3302_v46 = vpop.f32.mrf.mxu2  ;;  %v3541_v9 = vunpack.c.h.bf16 %v3480_v1 }
 0x519   :  { %v3411_v59 = vadd.f32 %v3410_v50, %v3357_v42  ;;  %v3303_v43 = vadd.f32 %v3302_v46, %v3249_v41  ;;  %3860 = vmatmul.bf16.gmra.mxu1 %v3702_v54  ;;  %7718 = vmatmul.msk.bf16.gmra.mxu2 %vm680_vm2, %v3703_v47  ;;  %v3576_v36 = vadd.f32 %v3540_v49, %v3504_v61  ;;  %v3509_v61 = vunpack.c.h.bf16 %v9569_v10 }
 0x51a   :  { %v3413_v40 = vpop.f32.mrf.mxu0  ;;  %3968 = vmatmul.bf16.gmra.mxu3 %v3702_v54  ;;  %7727 = vmatmul.msk.bf16.gmra.mxu0 %vm680_vm2, %v3703_v47  ;;  %v3577_v22 = vadd.f32 %v3541_v9, %v3505_v14  ;;  %v3252_v21 = vadd.f32 %v3251_v60, %v9705_v26 }
 0x51b   :  { %v3453_v30 = vmax.f32 %v3411_v59, 0.0  ;;  %v3452_v4 = vmax.f32 %v3303_v43, 0.0 }
 0x51c   :  { %v9775_v35 = vpack.c.bf16 %v3577_v22, %v3576_v36  ;;  %v8358_v36 = vld [vmem:[#allocation5 + $0x264] sm:$0xf0] }
 0x51d   :  { %v3481_v44 = vpack.c.bf16 %v3453_v30, %v3452_v4  ;;  %v8347_v4 = vld [vmem:[#allocation5 + $0x214] sm:$0xf] }
 0x51e   :  { %v3359_v27 = vpop.f32.mrf.mxu3  ;;  %v3674_v48 = vunpack.c.l.b16 %v9775_v35  ;;  %v3675_v42 = vunpack.c.h.b16 %v9775_v35  ;;  %v7765_v37 = vor.u32 %v8347_v4, %v7762_v45 }
 0x51f   :  { %v3360_v55 = vadd.f32 %v3359_v27, %v9707_v17  ;;  %v3542_v23 = vunpack.c.l.bf16 %v3481_v44  ;;  %v3543_v57 = vunpack.c.h.bf16 %v3481_v44  ;;  %v7801_v27 = vor.u32 %v8358_v36, %v7800_v51 }
 0x520   :  { %v3253_v12 = vpop.f32.mrf.mxu1  ;;  %v3305_v13 = vpop.f32.mrf.mxu2  ;;  %4379 = vmatpush.bf16.msra.mxu3 %v7765_v37 }
 0x521   :  { %v3414_v15 = vadd.f32 %v3413_v40, %v3360_v55  ;;  %v3306_v0 = vadd.f32 %v3305_v13, %v3252_v21  ;;  %v3578_v50 = vadd.f32 %v3542_v23, %v3506_v56  ;;  %v3579_v58 = vadd.f32 %v3543_v57, %v3507_v16  ;;  %4328 = vmatpush.bf16.msrb.mxu2 %v7801_v27 }
 0x522   :  { %v3415_v24 = vpop.f32.mrf.mxu0  ;;  %v3254_v46 = vadd.f32 %v3253_v12, %v9705_v26  ;;  %v3510_v16 = vunpack.c.l.bf16 %v9571_v52  ;;  %v3511_v23 = vunpack.c.h.bf16 %v9571_v52  ;;  %v3512_v27 = vunpack.c.l.bf16 %v9587_v25 }
 0x523   :  { %v3455_v39 = vmax.f32 %v3414_v15, 0.0  ;;  %v3454_v1 = vmax.f32 %v3306_v0, 0.0  ;;  %v9777_v62 = vpack.c.bf16 %v3579_v58, %v3578_v50 }
 0x525   :  { %v3482_v5 = vpack.c.bf16 %v3455_v39, %v3454_v1  ;;  %v3676_v34 = vunpack.c.l.b16 %v9777_v62  ;;  %v3677_v41 = vunpack.c.h.b16 %v9777_v62 }
 0x526   :  { %v3361_v33 = vpop.f32.mrf.mxu3 }
 0x527   :  { %v3362_v60 = vadd.f32 %v3361_v33, %v9707_v17  ;;  %v3704_v59 = vpack.c.b16 %v3676_v34, %v3674_v48  ;;  %v3705_v49 = vpack.c.b16 %v3677_v41, %v3675_v42  ;;  %v3544_v9 = vunpack.c.l.bf16 %v3482_v5  ;;  %v7760_v34 = vld [vmem:[#allocation5 + $0x210] sm:$0xf]  ;;  %v8348_v42 = vld [vmem:[#allocation5 + $0x214] sm:$0xf0]  ;;  %v8357_v41 = vld [vmem:[#allocation5 + $0x264] sm:$0xf] }
 0x528   :  { %v3256_v54 = vpop.f32.mrf.mxu1  ;;  %v3307_v47 = vpop.f32.mrf.mxu2  ;;  %v3545_v43 = vunpack.c.h.bf16 %v3482_v5 }
 0x529   :  { %v3416_v40 = vadd.f32 %v3415_v24, %v3362_v60  ;;  %v3308_v30 = vadd.f32 %v3307_v47, %v3254_v46  ;;  %3865 = vmatmul.bf16.gmra.mxu1 %v3704_v59  ;;  %7719 = vmatmul.msk.bf16.gmra.mxu2 %vm680_vm2, %v3705_v49  ;;  %v3580_v22 = vadd.f32 %v3544_v9, %v3508_v28 }
 0x52a   :  { %v3418_v20 = vpop.f32.mrf.mxu0  ;;  %3973 = vmatmul.bf16.gmra.mxu3 %v3704_v59  ;;  %7728 = vmatmul.msk.bf16.gmra.mxu0 %vm680_vm2, %v3705_v49  ;;  %v3581_v44 = vadd.f32 %v3545_v43, %v3509_v61  ;;  %v3257_v56 = vadd.f32 %v3256_v54, %v9705_v26  ;;  %v7761_v46 = vor.u32 %v8348_v42, %v7760_v34  ;;  %v7802_v54 = vld [vmem:[#allocation5 + $0x268] sm:$0xf0] }
 0x52b   :  { %v3457_v14 = vmax.f32 %v3416_v40, 0.0  ;;  %v3456_v6 = vmax.f32 %v3308_v30, 0.0  ;;  %v7805_v43 = vor.u32 %v8357_v41, %v7802_v54  ;;  %v7752_v54 = vld [vmem:[#allocation5 + $0x200] sm:$0xf] }
 0x52c   :  { %v9793_v0 = vpack.c.bf16 %v3581_v44, %v3580_v22  ;;  %4271 = vmatpush.bf16.msrb.mxu1 %v7761_v46  ;;  %v8345_v22 = vld [vmem:[#allocation5 + $0x204] sm:$0xf]  ;;  %v7754_v44 = vld [vmem:[#allocation5 + $0x208] sm:$0xf0] }
 0x52d   :  { %v3483_v21 = vpack.c.bf16 %v3457_v14, %v3456_v6  ;;  %4436 = vmatpush.bf16.msra.mxu0 %v7805_v43 }
 0x52e   :  { %v3364_v55 = vpop.f32.mrf.mxu3  ;;  %v3678_v52 = vunpack.c.l.b16 %v9793_v0  ;;  %v3679_v60 = vunpack.c.h.b16 %v9793_v0 }
 0x52f   :  { %v3365_v10 = vadd.f32 %v3364_v55, %v9707_v17  ;;  %v3546_v57 = vunpack.c.l.bf16 %v3483_v21  ;;  %v3547_v12 = vunpack.c.h.bf16 %v3483_v21  ;;  %v3513_v21 = vunpack.c.h.bf16 %v9587_v25 }
 0x530   :  { %v3258_v13 = vpop.f32.mrf.mxu1  ;;  %v3310_v15 = vpop.f32.mrf.mxu2 }
 0x531   :  { %v3419_v50 = vadd.f32 %v3418_v20, %v3365_v10  ;;  %v3311_v58 = vadd.f32 %v3310_v15, %v3257_v56  ;;  %v3582_v24 = vadd.f32 %v3546_v57, %v3510_v16  ;;  %v3583_v39 = vadd.f32 %v3547_v12, %v3511_v23 }
 0x532   :  { %v3420_v1 = vpop.f32.mrf.mxu0  ;;  %v3259_v30 = vadd.f32 %v3258_v13, %v9705_v26  ;;  %v7757_v56 = vor.u32 %v8345_v22, %v7754_v44  ;;  %v3514_v15 = vunpack.c.l.bf16 %v9589_v32  ;;  %v3516_v44 = vunpack.c.l.bf16 %v9605_v11 }
 0x533   :  { %v3459_v5 = vmax.f32 %v3419_v50, 0.0  ;;  %v3458_v33 = vmax.f32 %v3311_v58, 0.0  ;;  %v9795_v48 = vpack.c.bf16 %v3583_v39, %v3582_v24  ;;  %v3515_v50 = vunpack.c.h.bf16 %v9589_v32 }
 0x534   :  { %4380 = vmatpush.bf16.msra.mxu3 %v7757_v56  ;;  %v7746_v56 = vld [vmem:[#allocation5 + $0x1f8] sm:$0xf0] }
 0x535   :  { %v3484_v47 = vpack.c.bf16 %v3459_v5, %v3458_v33  ;;  %v3680_v49 = vunpack.c.l.b16 %v9795_v48  ;;  %v3681_v9 = vunpack.c.h.b16 %v9795_v48 }
 0x536   :  { %v3366_v59 = vpop.f32.mrf.mxu3 }
 0x537   :  { %v3367_v40 = vadd.f32 %v3366_v59, %v9707_v17  ;;  %v3706_v61 = vpack.c.b16 %v3680_v49, %v3678_v52  ;;  %v3707_v14 = vpack.c.b16 %v3681_v9, %v3679_v60  ;;  %v3548_v45 = vunpack.c.l.bf16 %v3484_v47 }
 0x538   :  { %v3261_v20 = vpop.f32.mrf.mxu1  ;;  %v3312_v28 = vpop.f32.mrf.mxu2  ;;  %v3549_v6 = vunpack.c.h.bf16 %v3484_v47  ;;  %v8346_v47 = vld [vmem:[#allocation5 + $0x204] sm:$0xf0] }
 0x539   :  { %v3421_v4 = vadd.f32 %v3420_v1, %v3367_v40  ;;  %v3313_v37 = vadd.f32 %v3312_v28, %v3259_v30  ;;  %3870 = vmatmul.bf16.gmra.mxu1 %v3706_v61  ;;  %7720 = vmatmul.msk.bf16.gmra.mxu2 %vm680_vm2, %v3707_v14  ;;  %v3584_v10 = vadd.f32 %v3548_v45, %v3512_v27  ;;  %v3517_v27 = vunpack.c.h.bf16 %v9605_v11 }
 0x53a   :  { %v3423_v51 = vpop.f32.mrf.mxu0  ;;  %3978 = vmatmul.bf16.gmra.mxu3 %v3706_v61  ;;  %7729 = vmatmul.msk.bf16.gmra.mxu0 %vm680_vm2, %v3707_v14  ;;  %v3585_v16 = vadd.f32 %v3549_v6, %v3513_v21  ;;  %v3262_v12 = vadd.f32 %v3261_v20, %v9705_v26  ;;  %v7753_v49 = vor.u32 %v8346_v47, %v7752_v54  ;;  %v3519_v11 = vunpack.c.h.bf16 %v9607_v3  ;;  %v7744_v47 = vld [vmem:[#allocation5 + $0x1f0] sm:$0xf] }
 0x53b   :  { %v3461_v36 = vmax.f32 %v3421_v4, 0.0  ;;  %v3460_v55 = vmax.f32 %v3313_v37, 0.0 }
 0x53c   :  { %v9811_v33 = vpack.c.bf16 %v3585_v16, %v3584_v10  ;;  %4272 = vmatpush.bf16.msrb.mxu1 %v7753_v49 }
 0x53d   :  { %v3485_v23 = vpack.c.bf16 %v3461_v36, %v3460_v55  ;;  %v8343_v55 = vld [vmem:[#allocation5 + $0x1f4] sm:$0xf] }
 0x53e   :  { %v3369_v57 = vpop.f32.mrf.mxu3  ;;  %v3682_v9 = vunpack.c.l.b16 %v9811_v33  ;;  %v3683_v40 = vunpack.c.h.b16 %v9811_v33  ;;  %v7749_v16 = vor.u32 %v8343_v55, %v7746_v56  ;;  %v7738_v55 = vld [vmem:[#allocation5 + $0x1e8] sm:$0xf0]  ;;  %v3520_v56 = vunpack.c.l.bf16 %v9623_v7 }
 0x53f   :  { %v3370_v13 = vadd.f32 %v3369_v57, %v9707_v17  ;;  %v3550_v58 = vunpack.c.l.bf16 %v3485_v23  ;;  %v3551_v24 = vunpack.c.h.bf16 %v3485_v23 }
 0x540   :  { %v3263_v39 = vpop.f32.mrf.mxu1  ;;  %v3315_v1 = vpop.f32.mrf.mxu2  ;;  %4381 = vmatpush.bf16.msra.mxu3 %v7749_v16 }
 0x541   :  { %v3424_v25 = vadd.f32 %v3423_v51, %v3370_v13  ;;  %v3316_v5 = vadd.f32 %v3315_v1, %v3262_v12  ;;  %v3586_v34 = vadd.f32 %v3550_v58, %v3514_v15  ;;  %v3587_v42 = vadd.f32 %v3551_v24, %v3515_v50 }
 0x542   :  { %v3425_v41 = vpop.f32.mrf.mxu0  ;;  %v3264_v28 = vadd.f32 %v3263_v39, %v9705_v26  ;;  %v3518_v58 = vunpack.c.l.bf16 %v9607_v3 }
 0x543   :  { %v3463_v52 = vmax.f32 %v3424_v25, 0.0  ;;  %v3462_v60 = vmax.f32 %v3316_v5, 0.0  ;;  %v9813_v46 = vpack.c.bf16 %v3587_v42, %v3586_v34 }
 0x545   :  { %v3486_v59 = vpack.c.bf16 %v3463_v52, %v3462_v60  ;;  %v3684_v43 = vunpack.c.l.b16 %v9813_v46  ;;  %v3685_v30 = vunpack.c.h.b16 %v9813_v46 }
 0x546   :  { %v3371_v32 = vpop.f32.mrf.mxu3 }
 0x547   :  { %v3372_v20 = vadd.f32 %v3371_v32, %v9707_v17  ;;  %v3708_v4 = vpack.c.b16 %v3684_v43, %v3682_v9  ;;  %v3709_v45 = vpack.c.b16 %v3685_v30, %v3683_v40  ;;  %v3552_v6 = vunpack.c.l.bf16 %v3486_v59 }
 0x548   :  { %v3266_v61 = vpop.f32.mrf.mxu1  ;;  %v3317_v14 = vpop.f32.mrf.mxu2  ;;  %v3553_v37 = vunpack.c.h.bf16 %v3486_v59  ;;  %v8344_v59 = vld [vmem:[#allocation5 + $0x1f4] sm:$0xf0] }
 0x549   :  { %v3426_v51 = vadd.f32 %v3425_v41, %v3372_v20  ;;  %v3318_v36 = vadd.f32 %v3317_v14, %v3264_v28  ;;  %3875 = vmatmul.bf16.gmra.mxu1 %v3708_v4  ;;  %7721 = vmatmul.msk.bf16.gmra.mxu2 %vm680_vm2, %v3709_v45  ;;  %v3588_v23 = vadd.f32 %v3552_v6, %v3516_v44 }
 0x54a   :  { %v3428_v22 = vpop.f32.mrf.mxu0  ;;  %3983 = vmatmul.bf16.gmra.mxu3 %v3708_v4  ;;  %7730 = vmatmul.msk.bf16.gmra.mxu0 %vm680_vm2, %v3709_v45  ;;  %v3589_v57 = vadd.f32 %v3553_v37, %v3517_v27  ;;  %v3267_v15 = vadd.f32 %v3266_v61, %v9705_v26  ;;  %v7745_v9 = vor.u32 %v8344_v59, %v7744_v47  ;;  %v7736_v59 = vld [vmem:[#allocation5 + $0x1e0] sm:$0xf] }
 0x54b   :  { %v3465_v21 = vmax.f32 %v3426_v51, 0.0  ;;  %v3464_v10 = vmax.f32 %v3318_v36, 0.0 }
 0x54c   :  { %v9829_v5 = vpack.c.bf16 %v3589_v57, %v3588_v23  ;;  %4273 = vmatpush.bf16.msrb.mxu1 %v7745_v9 }
 0x54d   :  { %v3487_v12 = vpack.c.bf16 %v3465_v21, %v3464_v10  ;;  %v8341_v21 = vld [vmem:[#allocation5 + $0x1e4] sm:$0xf]  ;;  %v3521_v10 = vunpack.c.h.bf16 %v9623_v7 }
 0x54e   :  { %v3374_v13 = vpop.f32.mrf.mxu3  ;;  %v3686_v3 = vunpack.c.l.b16 %v9829_v5  ;;  %v3687_v20 = vunpack.c.h.b16 %v9829_v5  ;;  %v7741_v23 = vor.u32 %v8341_v21, %v7738_v55  ;;  %v3524_v21 = vunpack.c.l.bf16 %v9639_v8 }
 0x54f   :  { %v3375_v50 = vadd.f32 %v3374_v13, %v9707_v17  ;;  %v3554_v24 = vunpack.c.l.bf16 %v3487_v12  ;;  %v3555_v39 = vunpack.c.h.bf16 %v3487_v12  ;;  %v3525_v55 = vunpack.c.h.bf16 %v9639_v8 }
 0x550   :  { %v3268_v1 = vpop.f32.mrf.mxu1  ;;  %v3320_v25 = vpop.f32.mrf.mxu2  ;;  %4382 = vmatpush.bf16.msra.mxu3 %v7741_v23  ;;  %v3526_v23 = vunpack.c.l.bf16 %v9641_v2 }
 0x551   :  { %v3429_v34 = vadd.f32 %v3428_v22, %v3375_v50  ;;  %v3321_v42 = vadd.f32 %v3320_v25, %v3267_v15  ;;  %v3590_v41 = vadd.f32 %v3554_v24, %v3518_v58  ;;  %v3591_v52 = vadd.f32 %v3555_v39, %v3519_v11 }
 0x552   :  { %v3430_v32 = vpop.f32.mrf.mxu0  ;;  %v3269_v14 = vadd.f32 %v3268_v1, %v9705_v26  ;;  %v3522_v24 = vunpack.c.l.bf16 %v9625_v53  ;;  %v3523_v39 = vunpack.c.h.bf16 %v9625_v53 }
 0x553   :  { %v3467_v60 = vmax.f32 %v3429_v34, 0.0  ;;  %v3466_v54 = vmax.f32 %v3321_v42, 0.0  ;;  %v9831_v49 = vpack.c.bf16 %v3591_v52, %v3590_v41 }
 0x555   :  { %v3488_v43 = vpack.c.bf16 %v3467_v60, %v3466_v54  ;;  %v3688_v30 = vunpack.c.l.b16 %v9831_v49  ;;  %v3689_v28 = vunpack.c.h.b16 %v9831_v49 }
 0x556   :  { %v3376_v40 = vpop.f32.mrf.mxu3 }
 0x557   :  { %v3377_v61 = vadd.f32 %v3376_v40, %v9707_v17  ;;  %v3710_v45 = vpack.c.b16 %v3688_v30, %v3686_v3  ;;  %v3711_v6 = vpack.c.b16 %v3689_v28, %v3687_v20  ;;  %v3556_v51 = vunpack.c.l.bf16 %v3488_v43 }
 0x558   :  { %v3322_v4 = vpop.f32.mrf.mxu2  ;;  %v3557_v36 = vunpack.c.h.bf16 %v3488_v43  ;;  %v3271_v22 = vpop.f32.mrf.mxu1 }
 0x559   :  { %v3431_v37 = vadd.f32 %v3430_v32, %v3377_v61  ;;  %v3323_v44 = vadd.f32 %v3322_v4, %v3269_v14  ;;  %3880 = vmatmul.bf16.gmra.mxu1 %v3710_v45  ;;  %7722 = vmatmul.msk.bf16.gmra.mxu2 %vm680_vm2, %v3711_v6  ;;  %v3592_v57 = vadd.f32 %v3556_v51, %v3520_v56  ;;  %v8342_v32 = vld [vmem:[#allocation5 + $0x1e4] sm:$0xf0] }
 0x55a   :  { %3988 = vmatmul.bf16.gmra.mxu3 %v3710_v45  ;;  %7731 = vmatmul.msk.bf16.gmra.mxu0 %vm680_vm2, %v3711_v6  ;;  %v3593_v12 = vadd.f32 %v3557_v36, %v3521_v10  ;;  %v3433_v15 = vpop.f32.mrf.mxu0  ;;  %v3272_v58 = vadd.f32 %v3271_v22, %v9705_v26  ;;  %v7737_v43 = vor.u32 %v8342_v32, %v7736_v59 }
 0x55b   :  { %v3469_v27 = vmax.f32 %v3431_v37, 0.0  ;;  %v3468_v16 = vmax.f32 %v3323_v44, 0.0 }
 0x55c   :  { %v9847_v41 = vpack.c.bf16 %v3593_v12, %v3592_v57  ;;  %4274 = vmatpush.bf16.msrb.mxu1 %v7737_v43  ;;  %v3527_v57 = vunpack.c.h.bf16 %v9641_v2  ;;  %v7892_v43 = vld [vmem:[#allocation3 + $0x2b8] sm:$0xf0] }
 0x55d   :  { %v3489_v13 = vpack.c.bf16 %v3469_v27, %v3468_v16 }
 0x55e   :  { %v3379_v50 = vpop.f32.mrf.mxu3  ;;  %v3690_v53 = vunpack.c.l.b16 %v9847_v41  ;;  %v3691_v28 = vunpack.c.h.b16 %v9847_v41 }
 0x55f   :  { %v3380_v11 = vadd.f32 %v3379_v50, %v9707_v17  ;;  %v3558_v1 = vunpack.c.l.bf16 %v3489_v13  ;;  %v3559_v25 = vunpack.c.h.bf16 %v3489_v13 }
 0x560   :  { %v3325_v34 = vpop.f32.mrf.mxu2  ;;  %v3273_v3 = vpop.f32.mrf.mxu1 }
 0x561   :  { %v3434_v7 = vadd.f32 %v3433_v15, %v3380_v11  ;;  %v3326_v42 = vadd.f32 %v3325_v34, %v3272_v58  ;;  %v3594_v52 = vadd.f32 %v3558_v1, %v3522_v24  ;;  %v3595_v60 = vadd.f32 %v3559_v25, %v3523_v39 }
 0x562   :  { %v3274_v14 = vadd.f32 %v3273_v3, %v9705_v26  ;;  %v3435_v45 = vpop.f32.mrf.mxu0 }
 0x563   :  { %v3471_v54 = vmax.f32 %v3434_v7, 0.0  ;;  %v3470_v47 = vmax.f32 %v3326_v42, 0.0  ;;  %v9849_v9 = vpack.c.bf16 %v3595_v60, %v3594_v52  ;;  %v3638_v42 = vld [vmem:[#allocation10 + $0x6] sm:$0x3]  ;;  %v7898_v60 = vld [vmem:[#allocation3 + $0x2c0] sm:$0xf] }
 0x564   :  { %v9873_v59 = vperm.slane %v3638_v42, 0 }
 0x565   :  { %v3490_v40 = vpack.c.bf16 %v3471_v54, %v3470_v47  ;;  %v3692_v20 = vunpack.c.l.b16 %v9849_v9  ;;  %v3693_v61 = vunpack.c.h.b16 %v9849_v9  ;;  %v8378_v54 = vld [vmem:[#allocation3 + $0x2c4] sm:$0xf0]  ;;  %v8375_v47 = vld [vmem:[#allocation3 + $0x2b4] sm:$0xf] }
 0x566   :  { %v3381_v30 = vpop.f32.mrf.mxu3  ;;  %v7899_v3 = vor.u32 %v8378_v54, %v7898_v60 }
 0x567   :  { %v3382_v4 = vadd.f32 %v3381_v30, %v9707_v17  ;;  %v3712_v37 = vpack.c.b16 %v3692_v20, %v3690_v53  ;;  %v3713_v51 = vpack.c.b16 %v3693_v61, %v3691_v28  ;;  %v3560_v36 = vunpack.c.l.bf16 %v3490_v40 }
 0x568   :  { %v3327_v6 = vpop.f32.mrf.mxu2  ;;  %v3561_v22 = vunpack.c.h.bf16 %v3490_v40  ;;  %v9875_v40 = vperm.slane %v3638_v42, 1  ;;  %v7895_v53 = vor.u32 %v8375_v47, %v7892_v43  ;;  %4948 = vmatpush.bf16.msra.mxu2 %v7899_v3  ;;  %v7882_v42 = vld [vmem:[#allocation3 + $0x2a0] sm:$0xf] }
 0x569   :  { %v3436_v44 = vadd.f32 %v3435_v45, %v3382_v4  ;;  %v3328_v27 = vadd.f32 %v3327_v6, %v3274_v14  ;;  %3885 = vmatmul.bf16.gmra.mxu1 %v3712_v37  ;;  %7723 = vmatmul.msk.bf16.gmra.mxu2 %vm680_vm2, %v3713_v51  ;;  %v3596_v26 = vadd.f32 %v3560_v36, %v3524_v21  ;;  %v7890_v14 = vld [vmem:[#allocation3 + $0x2b0] sm:$0xf]  ;;  %v8376_v4 = vld [vmem:[#allocation3 + $0x2b4] sm:$0xf0]  ;;  %v7900_v36 = vld [vmem:[#allocation3 + $0x2c8] sm:$0xf0] }
 0x56a   :  { %3993 = vmatmul.bf16.gmra.mxu3 %v3712_v37  ;;  %7732 = vmatmul.msk.bf16.gmra.mxu0 %vm680_vm2, %v3713_v51  ;;  %v3597_v17 = vadd.f32 %v3561_v22, %v3525_v55  ;;  %v7891_v37 = vor.u32 %v8376_v4, %v7890_v14  ;;  %v8377_v51 = vld [vmem:[#allocation3 + $0x2c4] sm:$0xf] }
 0x56b   :  { %v3473_v56 = vmax.f32 %v3436_v44, 0.0  ;;  %v3472_v10 = vmax.f32 %v3328_v27, 0.0  ;;  %4995 = vmatpush.bf16.msrb.mxu3 %v7895_v53  ;;  %v7903_v44 = vor.u32 %v8377_v51, %v7900_v36 }
 0x56c   :  { %v9863_v15 = vpack.c.bf16 %v3597_v17, %v3596_v26  ;;  %4887 = vmatpush.bf16.msra.mxu1 %v7891_v37 }
 0x56d   :  { %v3491_v16 = vpack.c.bf16 %v3473_v56, %v3472_v10  ;;  %5056 = vmatpush.bf16.msrb.mxu0 %v7903_v44 }
 0x56e   :  { %v3694_v8 = vunpack.c.l.b16 %v9863_v15  ;;  %v3695_v39 = vunpack.c.h.b16 %v9863_v15 }
 0x56f   :  { %v3562_v12 = vunpack.c.l.bf16 %v3491_v16  ;;  %v3563_v13 = vunpack.c.h.bf16 %v3491_v16 }
 0x571   :  { %v3598_v50 = vadd.f32 %v3562_v12, %v3526_v23  ;;  %v3599_v58 = vadd.f32 %v3563_v13, %v3527_v57 }
 0x573   :  { %v9865_v11 = vpack.c.bf16 %v3599_v58, %v3598_v50 }
 0x575   :  { %v3696_v24 = vunpack.c.l.b16 %v9865_v11  ;;  %v3697_v1 = vunpack.c.h.b16 %v9865_v11 }
 0x576   :  { %v3851_v25 = vpop.f32.mrf.mxu1 }
 0x577   :  { %v3714_v34 = vpack.c.b16 %v3696_v24, %v3694_v8  ;;  %v3715_v7 = vpack.c.b16 %v3697_v1, %v3695_v39  ;;  %v4013_v2 = vpop.f32.mrf.mxu0  ;;  %v3852_v28 = vadd.f32 %v3851_v25, %v9873_v59  ;;  %v8373_v8 = vld [vmem:[#allocation3 + $0x2a4] sm:$0xf]  ;;  %v7884_v24 = vld [vmem:[#allocation3 + $0x2a8] sm:$0xf0] }
 0x578   :  { %v7887_v1 = vor.u32 %v8373_v8, %v7884_v24 }
 0x579   :  { %3890 = vmatmul.bf16.gmra.mxu1 %v3714_v34  ;;  %7724 = vmatmul.msk.bf16.gmra.mxu2 %vm680_vm2, %v3715_v7 }
 0x57a   :  { %3998 = vmatmul.bf16.gmra.mxu3 %v3714_v34  ;;  %7733 = vmatmul.msk.bf16.gmra.mxu0 %vm680_vm2, %v3715_v7 }
 0x57b   :  { %4996 = vmatpush.bf16.msrb.mxu3 %v7887_v1 }
 0x57c   :  { %v3905_v52 = vpop.f32.mrf.mxu2 }
 0x57d   :  { %v3959_v32 = vpop.f32.mrf.mxu3  ;;  %v3906_v45 = vadd.f32 %v3905_v52, %v3852_v28  ;;  %v8374_v52 = vld [vmem:[#allocation3 + $0x2a4] sm:$0xf0] }
 0x57e   :  { %v3853_v30 = vpop.f32.mrf.mxu1  ;;  %v3960_v61 = vadd.f32 %v3959_v32, %v9875_v40  ;;  %v7883_v47 = vor.u32 %v8374_v52, %v7882_v42 }
 0x57f   :  { %v4015_v20 = vpop.f32.mrf.mxu0  ;;  %v3854_v6 = vadd.f32 %v3853_v30, %v9873_v59  ;;  %v4058_v26 = vmax.f32 %v3906_v45, 0.0 }
 0x580   :  { %v4014_v55 = vadd.f32 %v4013_v2, %v3960_v61  ;;  %4888 = vmatpush.bf16.msra.mxu1 %v7883_v47 }
 0x582   :  { %v4059_v12 = vmax.f32 %v4014_v55, 0.0 }
 0x584   :  { %v3907_v22 = vpop.f32.mrf.mxu2 }
 0x585   :  { %v3908_v27 = vadd.f32 %v3907_v22, %v3854_v6  ;;  %v3961_v21 = vpop.f32.mrf.mxu3 }
 0x586   :  { %v3962_v56 = vadd.f32 %v3961_v21, %v9875_v40  ;;  %v3856_v10 = vpop.f32.mrf.mxu1 }
 0x587   :  { %v4060_v17 = vmax.f32 %v3908_v27, 0.0  ;;  %v4018_v16 = vpop.f32.mrf.mxu0  ;;  %v3857_v7 = vadd.f32 %v3856_v10, %v9873_v59  ;;  %v7876_v10 = vld [vmem:[#allocation3 + $0x298] sm:$0xf0] }
 0x588   :  { %v4016_v23 = vadd.f32 %v4015_v20, %v3962_v56  ;;  %v8371_v56 = vld [vmem:[#allocation3 + $0x294] sm:$0xf] }
 0x589   :  { %v4094_v57 = vpack.c.bf16 %v4060_v17, %v4058_v26 }
 0x58a   :  { %v4061_v13 = vmax.f32 %v4016_v23, 0.0  ;;  %v7874_v23 = vld [vmem:[#allocation3 + $0x290] sm:$0xf] }
 0x58b   :  { %4275 = vmatmul.bf16.vlgmr.msrb.gmra.mxu1 %v4094_v57  ;;  %4383 = vmatmul.bf16.vlgmr.msra.gmra.mxu3 %v4094_v57  ;;  %v8372_v57 = vld [vmem:[#allocation3 + $0x294] sm:$0xf0] }
 0x58c   :  { %v4095_v50 = vpack.c.bf16 %v4061_v13, %v4059_v12  ;;  %v3910_v58 = vpop.f32.mrf.mxu2  ;;  %v7875_v13 = vor.u32 %v8372_v57, %v7874_v23 }
 0x58d   :  { %v3964_v39 = vpop.f32.mrf.mxu3  ;;  %v3911_v60 = vadd.f32 %v3910_v58, %v3857_v7 }
 0x58e   :  { %7814 = vmatmul.msk.bf16.vlgmr.msrb.gmra.mxu2 %vm1104_vm3, %v4095_v50  ;;  %7823 = vmatmul.msk.bf16.vlgmr.msra.gmra.mxu0 %vm1104_vm3, %v4095_v50  ;;  %v3858_v25 = vpop.f32.mrf.mxu1  ;;  %v3965_v2 = vadd.f32 %v3964_v39, %v9875_v40 }
 0x58f   :  { %v4020_v34 = vpop.f32.mrf.mxu0  ;;  %v3859_v54 = vadd.f32 %v3858_v25, %v9873_v59  ;;  %v4062_v28 = vmax.f32 %v3911_v60, 0.0  ;;  %4889 = vmatpush.bf16.msra.mxu1 %v7875_v13 }
 0x590   :  { %v4019_v30 = vadd.f32 %v4018_v16, %v3965_v2  ;;  %v7879_v16 = vor.u32 %v8371_v56, %v7876_v10 }
 0x592   :  { %v4063_v6 = vmax.f32 %v4019_v30, 0.0  ;;  %4997 = vmatpush.bf16.msrb.mxu3 %v7879_v16 }
 0x594   :  { %v3912_v32 = vpop.f32.mrf.mxu2 }
 0x595   :  { %v3913_v3 = vadd.f32 %v3912_v32, %v3859_v54  ;;  %v3966_v43 = vpop.f32.mrf.mxu3 }
 0x596   :  { %v3967_v53 = vadd.f32 %v3966_v43, %v9875_v40  ;;  %v3861_v20 = vpop.f32.mrf.mxu1 }
 0x597   :  { %v4064_v61 = vmax.f32 %v3913_v3, 0.0  ;;  %v4023_v14 = vpop.f32.mrf.mxu0  ;;  %v3862_v21 = vadd.f32 %v3861_v20, %v9873_v59  ;;  %v7868_v20 = vld [vmem:[#allocation3 + $0x288] sm:$0xf0] }
 0x598   :  { %v4021_v4 = vadd.f32 %v4020_v34, %v3967_v53  ;;  %v8369_v53 = vld [vmem:[#allocation3 + $0x284] sm:$0xf] }
 0x599   :  { %v4096_v45 = vpack.c.bf16 %v4064_v61, %v4062_v28 }
 0x59a   :  { %v4065_v37 = vmax.f32 %v4021_v4, 0.0  ;;  %v7866_v4 = vld [vmem:[#allocation3 + $0x280] sm:$0xf] }
 0x59b   :  { %4280 = vmatmul.bf16.gmra.mxu1 %v4096_v45  ;;  %4388 = vmatmul.bf16.gmra.mxu3 %v4096_v45  ;;  %v8370_v45 = vld [vmem:[#allocation3 + $0x284] sm:$0xf0] }
 0x59c   :  { %v4097_v51 = vpack.c.bf16 %v4065_v37, %v4063_v6  ;;  %v3915_v36 = vpop.f32.mrf.mxu2  ;;  %v7867_v37 = vor.u32 %v8370_v45, %v7866_v4  ;;  %v8368_v4 = vld [vmem:[#allocation3 + $0x274] sm:$0xf0] }
 0x59d   :  { %v3969_v22 = vpop.f32.mrf.mxu3  ;;  %v3916_v26 = vadd.f32 %v3915_v36, %v3862_v21 }
 0x59e   :  { %7815 = vmatmul.msk.bf16.gmra.mxu2 %vm1104_vm3, %v4097_v51  ;;  %7824 = vmatmul.msk.bf16.gmra.mxu0 %vm1104_vm3, %v4097_v51  ;;  %v3863_v44 = vpop.f32.mrf.mxu1  ;;  %v3970_v55 = vadd.f32 %v3969_v22, %v9875_v40 }
 0x59f   :  { %v4025_v27 = vpop.f32.mrf.mxu0  ;;  %v3864_v17 = vadd.f32 %v3863_v44, %v9873_v59  ;;  %v4066_v1 = vmax.f32 %v3916_v26, 0.0  ;;  %4890 = vmatpush.bf16.msra.mxu1 %v7867_v37 }
 0x5a0   :  { %v4024_v8 = vadd.f32 %v4023_v14, %v3970_v55  ;;  %v7871_v14 = vor.u32 %v8369_v53, %v7868_v20 }
 0x5a2   :  { %v4067_v42 = vmax.f32 %v4024_v8, 0.0  ;;  %4998 = vmatpush.bf16.msrb.mxu3 %v7871_v14  ;;  %v7858_v14 = vld [vmem:[#allocation3 + $0x270] sm:$0xf] }
 0x5a4   :  { %v3917_v12 = vpop.f32.mrf.mxu2 }
 0x5a5   :  { %v3918_v50 = vadd.f32 %v3917_v12, %v3864_v17  ;;  %v3971_v58 = vpop.f32.mrf.mxu3 }
 0x5a6   :  { %v3972_v24 = vadd.f32 %v3971_v58, %v9875_v40  ;;  %v3866_v39 = vpop.f32.mrf.mxu1 }
 0x5a7   :  { %v4068_v25 = vmax.f32 %v3918_v50, 0.0  ;;  %v4028_v34 = vpop.f32.mrf.mxu0  ;;  %v3867_v43 = vadd.f32 %v3866_v39, %v9873_v59  ;;  %v7860_v39 = vld [vmem:[#allocation3 + $0x278] sm:$0xf0] }
 0x5a8   :  { %v4026_v7 = vadd.f32 %v4025_v27, %v3972_v24  ;;  %v8367_v24 = vld [vmem:[#allocation3 + $0x274] sm:$0xf] }
 0x5a9   :  { %v4098_v2 = vpack.c.bf16 %v4068_v25, %v4066_v1 }
 0x5aa   :  { %v4069_v52 = vmax.f32 %v4026_v7, 0.0 }
 0x5ab   :  { %4285 = vmatmul.bf16.gmra.mxu1 %v4098_v2  ;;  %4393 = vmatmul.bf16.gmra.mxu3 %v4098_v2 }
 0x5ac   :  { %v4099_v60 = vpack.c.bf16 %v4069_v52, %v4067_v42  ;;  %v3920_v54 = vpop.f32.mrf.mxu2 }
 0x5ad   :  { %v3974_v47 = vpop.f32.mrf.mxu3  ;;  %v3921_v28 = vadd.f32 %v3920_v54, %v3867_v43 }
 0x5ae   :  { %7816 = vmatmul.msk.bf16.gmra.mxu2 %vm1104_vm3, %v4099_v60  ;;  %7825 = vmatmul.msk.bf16.gmra.mxu0 %vm1104_vm3, %v4099_v60  ;;  %v3868_v32 = vpop.f32.mrf.mxu1  ;;  %v3975_v30 = vadd.f32 %v3974_v47, %v9875_v40 }
 0x5af   :  { %v4030_v3 = vpop.f32.mrf.mxu0  ;;  %v3869_v61 = vadd.f32 %v3868_v32, %v9873_v59  ;;  %v4070_v21 = vmax.f32 %v3921_v28, 0.0 }
 0x5b0   :  { %v4029_v22 = vadd.f32 %v4028_v34, %v3975_v30  ;;  %v7863_v34 = vor.u32 %v8367_v24, %v7860_v39 }
 0x5b2   :  { %v4071_v17 = vmax.f32 %v4029_v22, 0.0  ;;  %4999 = vmatpush.bf16.msrb.mxu3 %v7863_v34  ;;  %v7850_v34 = vld [vmem:[#allocation3 + $0x260] sm:$0xf] }
 0x5b4   :  { %v3922_v6 = vpop.f32.mrf.mxu2 }
 0x5b5   :  { %v3923_v51 = vadd.f32 %v3922_v6, %v3869_v61  ;;  %v3976_v36 = vpop.f32.mrf.mxu3  ;;  %v7859_v6 = vor.u32 %v8368_v4, %v7858_v14 }
 0x5b6   :  { %v3977_v44 = vadd.f32 %v3976_v36, %v9875_v40  ;;  %v3871_v27 = vpop.f32.mrf.mxu1 }
 0x5b7   :  { %v4072_v55 = vmax.f32 %v3923_v51, 0.0  ;;  %v4033_v56 = vpop.f32.mrf.mxu0  ;;  %v3872_v58 = vadd.f32 %v3871_v27, %v9873_v59  ;;  %4891 = vmatpush.bf16.msra.mxu1 %v7859_v6  ;;  %v7852_v27 = vld [vmem:[#allocation3 + $0x268] sm:$0xf0] }
 0x5b8   :  { %v4031_v10 = vadd.f32 %v4030_v3, %v3977_v44  ;;  %v8365_v44 = vld [vmem:[#allocation3 + $0x264] sm:$0xf] }
 0x5b9   :  { %v4100_v26 = vpack.c.bf16 %v4072_v55, %v4070_v21 }
 0x5ba   :  { %v4073_v16 = vmax.f32 %v4031_v10, 0.0 }
 0x5bb   :  { %4290 = vmatmul.bf16.gmra.mxu1 %v4100_v26  ;;  %4398 = vmatmul.bf16.gmra.mxu3 %v4100_v26 }
 0x5bc   :  { %v4101_v23 = vpack.c.bf16 %v4073_v16, %v4071_v17  ;;  %v3925_v57 = vpop.f32.mrf.mxu2 }
 0x5bd   :  { %v3979_v12 = vpop.f32.mrf.mxu3  ;;  %v3926_v1 = vadd.f32 %v3925_v57, %v3872_v58 }
 0x5be   :  { %7817 = vmatmul.msk.bf16.gmra.mxu2 %vm1104_vm3, %v4101_v23  ;;  %7826 = vmatmul.msk.bf16.gmra.mxu0 %vm1104_vm3, %v4101_v23  ;;  %v3873_v13 = vpop.f32.mrf.mxu1  ;;  %v3980_v8 = vadd.f32 %v3979_v12, %v9875_v40 }
 0x5bf   :  { %v4035_v50 = vpop.f32.mrf.mxu0  ;;  %v3874_v25 = vadd.f32 %v3873_v13, %v9873_v59  ;;  %v4074_v47 = vmax.f32 %v3926_v1, 0.0 }
 0x5c0   :  { %v4034_v52 = vadd.f32 %v4033_v56, %v3980_v8  ;;  %v7855_v56 = vor.u32 %v8365_v44, %v7852_v27  ;;  %v8363_v27 = vld [vmem:[#allocation3 + $0x254] sm:$0xf] }
 0x5c2   :  { %v4075_v53 = vmax.f32 %v4034_v52, 0.0  ;;  %5000 = vmatpush.bf16.msrb.mxu3 %v7855_v56 }
 0x5c4   :  { %v3927_v7 = vpop.f32.mrf.mxu2 }
 0x5c5   :  { %v3928_v2 = vadd.f32 %v3927_v7, %v3874_v25  ;;  %v3981_v42 = vpop.f32.mrf.mxu3  ;;  %v8366_v7 = vld [vmem:[#allocation3 + $0x264] sm:$0xf0] }
 0x5c6   :  { %v3982_v60 = vadd.f32 %v3981_v42, %v9875_v40  ;;  %v3876_v54 = vpop.f32.mrf.mxu1  ;;  %v7851_v42 = vor.u32 %v8366_v7, %v7850_v34 }
 0x5c7   :  { %v4076_v32 = vmax.f32 %v3928_v2, 0.0  ;;  %v4038_v3 = vpop.f32.mrf.mxu0  ;;  %v3877_v36 = vadd.f32 %v3876_v54, %v9873_v59 }
 0x5c8   :  { %v4036_v43 = vadd.f32 %v4035_v50, %v3982_v60  ;;  %4892 = vmatpush.bf16.msra.mxu1 %v7851_v42 }
 0x5c9   :  { %v4102_v30 = vpack.c.bf16 %v4076_v32, %v4074_v47 }
 0x5ca   :  { %v4077_v20 = vmax.f32 %v4036_v43, 0.0 }
 0x5cb   :  { %4295 = vmatmul.bf16.gmra.mxu1 %v4102_v30  ;;  %4403 = vmatmul.bf16.gmra.mxu3 %v4102_v30 }
 0x5cc   :  { %v4103_v28 = vpack.c.bf16 %v4077_v20, %v4075_v53  ;;  %v3930_v61 = vpop.f32.mrf.mxu2 }
 0x5cd   :  { %v3984_v45 = vpop.f32.mrf.mxu3  ;;  %v3931_v21 = vadd.f32 %v3930_v61, %v3877_v36 }
 0x5ce   :  { %7818 = vmatmul.msk.bf16.gmra.mxu2 %vm1104_vm3, %v4103_v28  ;;  %7827 = vmatmul.msk.bf16.gmra.mxu0 %vm1104_vm3, %v4103_v28  ;;  %v3878_v37 = vpop.f32.mrf.mxu1  ;;  %v3985_v22 = vadd.f32 %v3984_v45, %v9875_v40 }
 0x5cf   :  { %v4040_v51 = vpop.f32.mrf.mxu0  ;;  %v3879_v55 = vadd.f32 %v3878_v37, %v9873_v59  ;;  %v4078_v12 = vmax.f32 %v3931_v21, 0.0  ;;  %v7844_v21 = vld [vmem:[#allocation3 + $0x258] sm:$0xf0] }
 0x5d0   :  { %v4039_v16 = vadd.f32 %v4038_v3, %v3985_v22 }
 0x5d2   :  { %v4079_v24 = vmax.f32 %v4039_v16, 0.0 }
 0x5d4   :  { %v3932_v10 = vpop.f32.mrf.mxu2 }
 0x5d5   :  { %v3933_v26 = vadd.f32 %v3932_v10, %v3879_v55  ;;  %v3986_v17 = vpop.f32.mrf.mxu3  ;;  %v7842_v55 = vld [vmem:[#allocation3 + $0x250] sm:$0xf]  ;;  %v7847_v10 = vor.u32 %v8363_v27, %v7844_v21 }
 0x5d6   :  { %v3987_v23 = vadd.f32 %v3986_v17, %v9875_v40  ;;  %v3881_v57 = vpop.f32.mrf.mxu1 }
 0x5d7   :  { %v4080_v13 = vmax.f32 %v3933_v26, 0.0  ;;  %v4043_v50 = vpop.f32.mrf.mxu0  ;;  %v3882_v54 = vadd.f32 %v3881_v57, %v9873_v59  ;;  %v8364_v26 = vld [vmem:[#allocation3 + $0x254] sm:$0xf0]  ;;  %5001 = vmatpush.bf16.msrb.mxu3 %v7847_v10 }
 0x5d8   :  { %v4041_v58 = vadd.f32 %v4040_v51, %v3987_v23  ;;  %v7843_v16 = vor.u32 %v8364_v26, %v7842_v55 }
 0x5d9   :  { %v4104_v8 = vpack.c.bf16 %v4080_v13, %v4078_v12 }
 0x5da   :  { %v4081_v39 = vmax.f32 %v4041_v58, 0.0  ;;  %4893 = vmatpush.bf16.msra.mxu1 %v7843_v16 }
 0x5db   :  { %4300 = vmatmul.bf16.gmra.mxu1 %v4104_v8  ;;  %4408 = vmatmul.bf16.gmra.mxu3 %v4104_v8 }
 0x5dc   :  { %v4105_v1 = vpack.c.bf16 %v4081_v39, %v4079_v24  ;;  %v3935_v25 = vpop.f32.mrf.mxu2 }
 0x5dd   :  { %v3989_v2 = vpop.f32.mrf.mxu3  ;;  %v3936_v32 = vadd.f32 %v3935_v25, %v3882_v54 }
 0x5de   :  { %7819 = vmatmul.msk.bf16.gmra.mxu2 %vm1104_vm3, %v4105_v1  ;;  %7828 = vmatmul.msk.bf16.gmra.mxu0 %vm1104_vm3, %v4105_v1  ;;  %v3883_v52 = vpop.f32.mrf.mxu1  ;;  %v3990_v47 = vadd.f32 %v3989_v2, %v9875_v40 }
 0x5df   :  { %v4045_v60 = vpop.f32.mrf.mxu0  ;;  %v3884_v3 = vadd.f32 %v3883_v52, %v9873_v59  ;;  %v4082_v14 = vmax.f32 %v3936_v32, 0.0 }
 0x5e0   :  { %v4044_v20 = vadd.f32 %v4043_v50, %v3990_v47 }
 0x5e2   :  { %v4083_v51 = vmax.f32 %v4044_v20, 0.0 }
 0x5e4   :  { %v3937_v43 = vpop.f32.mrf.mxu2 }
 0x5e5   :  { %v3938_v30 = vadd.f32 %v3937_v43, %v3884_v3  ;;  %v3991_v53 = vpop.f32.mrf.mxu3  ;;  %v8361_v43 = vld [vmem:[#allocation3 + $0x244] sm:$0xf] }
 0x5e6   :  { %v3992_v28 = vadd.f32 %v3991_v53, %v9875_v40  ;;  %v3886_v61 = vpop.f32.mrf.mxu1 }
 0x5e7   :  { %v4084_v4 = vmax.f32 %v3938_v30, 0.0  ;;  %v4048_v45 = vpop.f32.mrf.mxu0  ;;  %v3887_v57 = vadd.f32 %v3886_v61, %v9873_v59  ;;  %v7836_v30 = vld [vmem:[#allocation3 + $0x248] sm:$0xf0] }
 0x5e8   :  { %v4046_v6 = vadd.f32 %v4045_v60, %v3992_v28  ;;  %v7839_v53 = vor.u32 %v8361_v43, %v7836_v30 }
 0x5e9   :  { %v4106_v37 = vpack.c.bf16 %v4084_v4, %v4082_v14 }
 0x5ea   :  { %v4085_v36 = vmax.f32 %v4046_v6, 0.0  ;;  %5002 = vmatpush.bf16.msrb.mxu3 %v7839_v53 }
 0x5eb   :  { %4305 = vmatmul.bf16.gmra.mxu1 %v4106_v37  ;;  %4413 = vmatmul.bf16.gmra.mxu3 %v4106_v37  ;;  %v7834_v37 = vld [vmem:[#allocation3 + $0x240] sm:$0xf] }
 0x5ec   :  { %v4107_v22 = vpack.c.bf16 %v4085_v36, %v4083_v51  ;;  %v3940_v44 = vpop.f32.mrf.mxu2  ;;  %v8362_v51 = vld [vmem:[#allocation3 + $0x244] sm:$0xf0] }
 0x5ed   :  { %v3994_v56 = vpop.f32.mrf.mxu3  ;;  %v3941_v13 = vadd.f32 %v3940_v44, %v3887_v57  ;;  %v7835_v44 = vor.u32 %v8362_v51, %v7834_v37  ;;  %v4538_v37 = vunpack.c.h.bf16 %v9721_v63 }
 0x5ee   :  { %7820 = vmatmul.msk.bf16.gmra.mxu2 %vm1104_vm3, %v4107_v22  ;;  %7829 = vmatmul.msk.bf16.gmra.mxu0 %vm1104_vm3, %v4107_v22  ;;  %v3888_v17 = vpop.f32.mrf.mxu1  ;;  %v3995_v12 = vadd.f32 %v3994_v56, %v9875_v40 }
 0x5ef   :  { %v4050_v23 = vpop.f32.mrf.mxu0  ;;  %v3889_v50 = vadd.f32 %v3888_v17, %v9873_v59  ;;  %v4086_v34 = vmax.f32 %v3941_v13, 0.0  ;;  %4894 = vmatpush.bf16.msra.mxu1 %v7835_v44  ;;  %v4134_v17 = vld [vmem:[#allocation11 + $0x6] sm:$0x3]  ;;  %v7980_v44 = vld [vmem:[#allocation5 + $0x2f0] sm:$0xf] }
 0x5f0   :  { %v4049_v39 = vadd.f32 %v4048_v45, %v3995_v12  ;;  %v9929_v12 = vperm.slane %v4134_v17, 1 }
 0x5f2   :  { %v4087_v60 = vmax.f32 %v4049_v39, 0.0 }
 0x5f4   :  { %v3942_v58 = vpop.f32.mrf.mxu2 }
 0x5f5   :  { %v3943_v8 = vadd.f32 %v3942_v58, %v3889_v50  ;;  %v3996_v24 = vpop.f32.mrf.mxu3  ;;  %v9931_v50 = vperm.slane %v4134_v17, 0 }
 0x5f6   :  { %v3997_v1 = vadd.f32 %v3996_v24, %v9875_v40  ;;  %v3891_v25 = vpop.f32.mrf.mxu1 }
 0x5f7   :  { %v4088_v7 = vmax.f32 %v3943_v8, 0.0  ;;  %v4053_v42 = vpop.f32.mrf.mxu0  ;;  %v3892_v28 = vadd.f32 %v3891_v25, %v9873_v59 }
 0x5f8   :  { %v4051_v2 = vadd.f32 %v4050_v23, %v3997_v1 }
 0x5f9   :  { %v4108_v52 = vpack.c.bf16 %v4088_v7, %v4086_v34 }
 0x5fa   :  { %v4089_v54 = vmax.f32 %v4051_v2, 0.0 }
 0x5fb   :  { %4310 = vmatmul.bf16.gmra.mxu1 %v4108_v52  ;;  %4418 = vmatmul.bf16.gmra.mxu3 %v4108_v52  ;;  %v7982_v52 = vld [vmem:[#allocation5 + $0x2f8] sm:$0xf0] }
 0x5fc   :  { %v4109_v47 = vpack.c.bf16 %v4089_v54, %v4087_v60  ;;  %v3945_v32 = vpop.f32.mrf.mxu2  ;;  %v7996_v54 = vld [vmem:[#allocation5 + $0x310] sm:$0xf] }
 0x5fd   :  { %v3999_v3 = vpop.f32.mrf.mxu3  ;;  %v3946_v14 = vadd.f32 %v3945_v32, %v3892_v28 }
 0x5fe   :  { %7821 = vmatmul.msk.bf16.gmra.mxu2 %vm1104_vm3, %v4109_v47  ;;  %7830 = vmatmul.msk.bf16.gmra.mxu0 %vm1104_vm3, %v4109_v47  ;;  %v3893_v20 = vpop.f32.mrf.mxu1  ;;  %v4000_v61 = vadd.f32 %v3999_v3, %v9875_v40  ;;  %v8398_v47 = vld [vmem:[#allocation5 + $0x314] sm:$0xf0] }
 0x5ff   :  { %v3894_v4 = vadd.f32 %v3893_v20, %v9873_v59  ;;  %v4055_v45 = vpop.f32.mrf.mxu0  ;;  %v4090_v55 = vmax.f32 %v3946_v14, 0.0  ;;  %v7997_v43 = vor.u32 %v8398_v47, %v7996_v54  ;;  %v8391_v54 = vld [vmem:[#allocation5 + $0x2e4] sm:$0xf]  ;;  %v7974_v47 = vld [vmem:[#allocation5 + $0x2e8] sm:$0xf0] }
 0x600   :  { %v4054_v27 = vadd.f32 %v4053_v42, %v4000_v61  ;;  %v8393_v42 = vld [vmem:[#allocation5 + $0x2f4] sm:$0xf] }
 0x601   :  { %v7985_v60 = vor.u32 %v8393_v42, %v7982_v52  ;;  %5372 = vmatpush.bf16.msrb.mxu2 %v7997_v43 }
 0x602   :  { %v4091_v23 = vmax.f32 %v4054_v27, 0.0  ;;  %v8394_v27 = vld [vmem:[#allocation5 + $0x2f4] sm:$0xf0] }
 0x603   :  { %5420 = vmatpush.bf16.msra.mxu3 %v7985_v60 }
 0x604   :  { %v3947_v6 = vpop.f32.mrf.mxu2 }
 0x605   :  { %v3948_v36 = vadd.f32 %v3947_v6, %v3894_v4  ;;  %v4001_v22 = vpop.f32.mrf.mxu3  ;;  %v4537_v6 = vunpack.c.l.bf16 %v9721_v63 }
 0x606   :  { %v4002_v21 = vadd.f32 %v4001_v22, %v9875_v40 }
 0x607   :  { %v4092_v56 = vmax.f32 %v3948_v36, 0.0 }
 0x608   :  { %v4056_v10 = vadd.f32 %v4055_v45, %v4002_v21  ;;  %v4276_v26 = vpop.f32.mrf.mxu1 }
 0x609   :  { %v4110_v16 = vpack.c.bf16 %v4092_v56, %v4090_v55  ;;  %v4277_v8 = vadd.f32 %v4276_v26, %v9931_v50  ;;  %v7981_v56 = vor.u32 %v8394_v27, %v7980_v44  ;;  %v7998_v26 = vld [vmem:[#allocation5 + $0x318] sm:$0xf0]  ;;  %v4541_v44 = vunpack.c.l.bf16 %v9739_v29 }
 0x60a   :  { %v4093_v57 = vmax.f32 %v4056_v10, 0.0  ;;  %v8397_v10 = vld [vmem:[#allocation5 + $0x314] sm:$0xf]  ;;  %v4542_v27 = vunpack.c.h.bf16 %v9739_v29 }
 0x60b   :  { %v4438_v59 = vpop.f32.mrf.mxu0  ;;  %4315 = vmatmul.bf16.gmra.mxu1 %v4110_v16  ;;  %4423 = vmatmul.bf16.gmra.mxu3 %v4110_v16 }
 0x60c   :  { %v4111_v13 = vpack.c.bf16 %v4093_v57, %v4091_v23  ;;  %v8001_v23 = vor.u32 %v8397_v10, %v7998_v26  ;;  %v4539_v57 = vunpack.c.l.bf16 %v9723_v31  ;;  %5312 = vmatpush.bf16.msrb.mxu1 %v7981_v56  ;;  %v7972_v10 = vld [vmem:[#allocation5 + $0x2e0] sm:$0xf]  ;;  %v8392_v26 = vld [vmem:[#allocation5 + $0x2e4] sm:$0xf0] }
 0x60e   :  { %7822 = vmatmul.msk.bf16.gmra.mxu2 %vm1104_vm3, %v4111_v13  ;;  %7831 = vmatmul.msk.bf16.gmra.mxu0 %vm1104_vm3, %v4111_v13  ;;  %v4384_v40 = vpop.f32.mrf.mxu3  ;;  %v4540_v13 = vunpack.c.h.bf16 %v9723_v31 }
 0x60f   :  { %v4385_v58 = vadd.f32 %v4384_v40, %v9929_v12  ;;  %5480 = vmatpush.bf16.msra.mxu0 %v8001_v23  ;;  %v7973_v23 = vor.u32 %v8392_v26, %v7972_v10 }
 0x610   :  { %v4278_v24 = vpop.f32.mrf.mxu1 }
 0x611   :  { %v4439_v39 = vadd.f32 %v4438_v59, %v4385_v58  ;;  %v4330_v1 = vpop.f32.mrf.mxu2  ;;  %v4279_v53 = vadd.f32 %v4278_v24, %v9931_v50  ;;  %5313 = vmatpush.bf16.msrb.mxu1 %v7973_v23 }
 0x612   :  { %v4331_v25 = vadd.f32 %v4330_v1, %v4277_v8 }
 0x613   :  { %v4484_v34 = vmax.f32 %v4439_v39, 0.0  ;;  %v4440_v7 = vpop.f32.mrf.mxu0 }
 0x614   :  { %v4483_v2 = vmax.f32 %v4331_v25, 0.0 }
 0x616   :  { %v4519_v32 = vpack.c.bf16 %v4484_v34, %v4483_v2  ;;  %v4386_v3 = vpop.f32.mrf.mxu3 }
 0x617   :  { %v4387_v30 = vadd.f32 %v4386_v3, %v9929_v12 }
 0x618   :  { %v4281_v20 = vpop.f32.mrf.mxu1  ;;  %v4573_v28 = vunpack.c.l.bf16 %v4519_v32  ;;  %v4574_v61 = vunpack.c.h.bf16 %v4519_v32  ;;  %v7977_v32 = vor.u32 %v8391_v54, %v7974_v47 }
 0x619   :  { %v4441_v14 = vadd.f32 %v4440_v7, %v4387_v30  ;;  %v4332_v4 = vpop.f32.mrf.mxu2  ;;  %v4282_v63 = vadd.f32 %v4281_v20, %v9931_v50 }
 0x61a   :  { %v4333_v45 = vadd.f32 %v4332_v4, %v4279_v53  ;;  %v4609_v21 = vadd.f32 %v4573_v28, %v4537_v6  ;;  %v4610_v55 = vadd.f32 %v4574_v61, %v4538_v37  ;;  %5421 = vmatpush.bf16.msra.mxu3 %v7977_v32  ;;  %v8389_v32 = vld [vmem:[#allocation5 + $0x2d4] sm:$0xf] }
 0x61b   :  { %v4486_v51 = vmax.f32 %v4441_v14, 0.0  ;;  %v4443_v36 = vpop.f32.mrf.mxu0 }
 0x61c   :  { %v4485_v22 = vmax.f32 %v4333_v45, 0.0  ;;  %v9945_v24 = vpack.c.bf16 %v4610_v55, %v4609_v21 }
 0x61e   :  { %v4520_v17 = vpack.c.bf16 %v4486_v51, %v4485_v22  ;;  %v4389_v16 = vpop.f32.mrf.mxu3  ;;  %v4708_v31 = vunpack.c.h.b16 %v9945_v24  ;;  %v4707_v53 = vunpack.c.l.b16 %v9945_v24 }
 0x61f   :  { %v4390_v59 = vadd.f32 %v4389_v16, %v9929_v12 }
 0x620   :  { %v4575_v40 = vunpack.c.l.bf16 %v4520_v17  ;;  %v4576_v58 = vunpack.c.h.bf16 %v4520_v17  ;;  %v4283_v8 = vpop.f32.mrf.mxu1 }
 0x621   :  { %v4444_v39 = vadd.f32 %v4443_v36, %v4390_v59  ;;  %v4335_v1 = vpop.f32.mrf.mxu2  ;;  %v4284_v61 = vadd.f32 %v4283_v8, %v9931_v50 }
 0x622   :  { %v4611_v25 = vadd.f32 %v4575_v40, %v4539_v57  ;;  %v4612_v34 = vadd.f32 %v4576_v58, %v4540_v13  ;;  %v4336_v7 = vadd.f32 %v4335_v1, %v4282_v63  ;;  %v4543_v63 = vunpack.c.l.bf16 %v9741_v38 }
 0x623   :  { %v4488_v2 = vmax.f32 %v4444_v39, 0.0  ;;  %v4445_v42 = vpop.f32.mrf.mxu0  ;;  %v4544_v40 = vunpack.c.h.bf16 %v9741_v38 }
 0x624   :  { %v9947_v52 = vpack.c.bf16 %v4612_v34, %v4611_v25  ;;  %v4487_v60 = vmax.f32 %v4336_v7, 0.0 }
 0x626   :  { %v4710_v3 = vunpack.c.h.b16 %v9947_v52  ;;  %v4521_v43 = vpack.c.bf16 %v4488_v2, %v4487_v60  ;;  %v4391_v30 = vpop.f32.mrf.mxu3  ;;  %v4709_v20 = vunpack.c.l.b16 %v9947_v52 }
 0x627   :  { %v4392_v28 = vadd.f32 %v4391_v30, %v9929_v12 }
 0x628   :  { %v4286_v14 = vpop.f32.mrf.mxu1  ;;  %v4743_v4 = vpack.c.b16 %v4709_v20, %v4707_v53  ;;  %v4744_v45 = vpack.c.b16 %v4710_v3, %v4708_v31  ;;  %v4577_v6 = vunpack.c.l.bf16 %v4521_v43  ;;  %v4578_v37 = vunpack.c.h.bf16 %v4521_v43  ;;  %v7966_v3 = vld [vmem:[#allocation5 + $0x2d8] sm:$0xf0] }
 0x629   :  { %v4446_v51 = vadd.f32 %v4445_v42, %v4392_v28  ;;  %v4337_v36 = vpop.f32.mrf.mxu2  ;;  %v4287_v29 = vadd.f32 %v4286_v14, %v9931_v50  ;;  %v7969_v38 = vor.u32 %v8389_v32, %v7966_v3 }
 0x62a   :  { %v4338_v22 = vadd.f32 %v4337_v36, %v4284_v61  ;;  %4895 = vmatmul.bf16.vlgmr.msra.gmra.mxu1 %v4743_v4  ;;  %7904 = vmatmul.msk.bf16.vlgmr.msra.gmra.mxu2 %vm680_vm2, %v4744_v45  ;;  %v4613_v17 = vadd.f32 %v4577_v6, %v4541_v44  ;;  %v4614_v16 = vadd.f32 %v4578_v37, %v4542_v27 }
 0x62b   :  { %v4490_v21 = vmax.f32 %v4446_v51, 0.0  ;;  %5003 = vmatmul.bf16.vlgmr.msrb.gmra.mxu3 %v4743_v4  ;;  %7913 = vmatmul.msk.bf16.vlgmr.msrb.gmra.mxu0 %vm680_vm2, %v4744_v45  ;;  %v4448_v55 = vpop.f32.mrf.mxu0 }
 0x62c   :  { %v4489_v56 = vmax.f32 %v4338_v22, 0.0  ;;  %v9963_v1 = vpack.c.bf16 %v4614_v16, %v4613_v17  ;;  %5422 = vmatpush.bf16.msra.mxu3 %v7969_v38  ;;  %v7964_v17 = vld [vmem:[#allocation5 + $0x2d0] sm:$0xf]  ;;  %v8390_v16 = vld [vmem:[#allocation5 + $0x2d4] sm:$0xf0] }
 0x62e   :  { %v4522_v57 = vpack.c.bf16 %v4490_v21, %v4489_v56  ;;  %v4394_v59 = vpop.f32.mrf.mxu3  ;;  %v4711_v43 = vunpack.c.l.b16 %v9963_v1  ;;  %v4712_v28 = vunpack.c.h.b16 %v9963_v1  ;;  %v4545_v21 = vunpack.c.l.bf16 %v9757_v19 }
 0x62f   :  { %v4395_v13 = vadd.f32 %v4394_v59, %v9929_v12  ;;  %v7965_v59 = vor.u32 %v8390_v16, %v7964_v17  ;;  %v7958_v17 = vld [vmem:[#allocation5 + $0x2c8] sm:$0xf0] }
 0x630   :  { %v4579_v58 = vunpack.c.l.bf16 %v4522_v57  ;;  %v4580_v8 = vunpack.c.h.bf16 %v4522_v57  ;;  %v4288_v39 = vpop.f32.mrf.mxu1 }
 0x631   :  { %v4449_v25 = vadd.f32 %v4448_v55, %v4395_v13  ;;  %v4340_v34 = vpop.f32.mrf.mxu2  ;;  %v4289_v4 = vadd.f32 %v4288_v39, %v9931_v50  ;;  %v4546_v55 = vunpack.c.h.bf16 %v9757_v19  ;;  %5314 = vmatpush.bf16.msrb.mxu1 %v7965_v59  ;;  %v7956_v59 = vld [vmem:[#allocation5 + $0x2c0] sm:$0xf] }
 0x632   :  { %v4615_v7 = vadd.f32 %v4579_v58, %v4543_v63  ;;  %v4616_v2 = vadd.f32 %v4580_v8, %v4544_v40  ;;  %v4341_v42 = vadd.f32 %v4340_v34, %v4287_v29  ;;  %v4547_v29 = vunpack.c.l.bf16 %v9759_v18 }
 0x633   :  { %v4492_v60 = vmax.f32 %v4449_v25, 0.0  ;;  %v4450_v54 = vpop.f32.mrf.mxu0  ;;  %v4548_v58 = vunpack.c.h.bf16 %v9759_v18 }
 0x634   :  { %v9965_v47 = vpack.c.bf16 %v4616_v2, %v4615_v7  ;;  %v4491_v31 = vmax.f32 %v4341_v42, 0.0 }
 0x636   :  { %v4523_v30 = vpack.c.bf16 %v4492_v60, %v4491_v31  ;;  %v4396_v53 = vpop.f32.mrf.mxu3  ;;  %v4713_v20 = vunpack.c.l.b16 %v9965_v47  ;;  %v4714_v61 = vunpack.c.h.b16 %v9965_v47 }
 0x637   :  { %v4397_v14 = vadd.f32 %v4396_v53, %v9929_v12 }
 0x638   :  { %v4291_v45 = vpop.f32.mrf.mxu1  ;;  %v4745_v6 = vpack.c.b16 %v4713_v20, %v4711_v43  ;;  %v4746_v37 = vpack.c.b16 %v4714_v61, %v4712_v28  ;;  %v4581_v51 = vunpack.c.l.bf16 %v4523_v30  ;;  %v4582_v36 = vunpack.c.h.bf16 %v4523_v30 }
 0x639   :  { %v4451_v22 = vadd.f32 %v4450_v54, %v4397_v14  ;;  %v4342_v44 = vpop.f32.mrf.mxu2  ;;  %v4292_v19 = vadd.f32 %v4291_v45, %v9931_v50 }
 0x63a   :  { %v4343_v27 = vadd.f32 %v4342_v44, %v4289_v4  ;;  %4900 = vmatmul.bf16.gmra.mxu1 %v4745_v6  ;;  %7905 = vmatmul.msk.bf16.gmra.mxu2 %vm680_vm2, %v4746_v37  ;;  %v4617_v23 = vadd.f32 %v4581_v51, %v4545_v21  ;;  %v4618_v57 = vadd.f32 %v4582_v36, %v4546_v55  ;;  %v4550_v21 = vunpack.c.h.bf16 %v9775_v35 }
 0x63b   :  { %v4494_v56 = vmax.f32 %v4451_v22, 0.0  ;;  %5008 = vmatmul.bf16.gmra.mxu3 %v4745_v6  ;;  %7914 = vmatmul.msk.bf16.gmra.mxu0 %vm680_vm2, %v4746_v37  ;;  %v4453_v10 = vpop.f32.mrf.mxu0 }
 0x63c   :  { %v4493_v26 = vmax.f32 %v4343_v27, 0.0  ;;  %v9981_v34 = vpack.c.bf16 %v4618_v57, %v4617_v23  ;;  %v4549_v27 = vunpack.c.l.bf16 %v9775_v35 }
 0x63e   :  { %v4524_v63 = vpack.c.bf16 %v4494_v56, %v4493_v26  ;;  %v4399_v13 = vpop.f32.mrf.mxu3  ;;  %v4715_v38 = vunpack.c.l.b16 %v9981_v34  ;;  %v4716_v20 = vunpack.c.h.b16 %v9981_v34  ;;  %v8387_v26 = vld [vmem:[#allocation5 + $0x2c4] sm:$0xf] }
 0x63f   :  { %v4400_v40 = vadd.f32 %v4399_v13, %v9929_v12  ;;  %v7961_v57 = vor.u32 %v8387_v26, %v7958_v17 }
 0x640   :  { %v4583_v8 = vunpack.c.l.bf16 %v4524_v63  ;;  %v4584_v39 = vunpack.c.h.bf16 %v4524_v63  ;;  %v4293_v25 = vpop.f32.mrf.mxu1  ;;  %v8388_v63 = vld [vmem:[#allocation5 + $0x2c4] sm:$0xf0] }
 0x641   :  { %v4454_v7 = vadd.f32 %v4453_v10, %v4400_v40  ;;  %v4345_v2 = vpop.f32.mrf.mxu2  ;;  %v4294_v14 = vadd.f32 %v4293_v25, %v9931_v50  ;;  %v7957_v40 = vor.u32 %v8388_v63, %v7956_v59  ;;  %5423 = vmatpush.bf16.msra.mxu3 %v7961_v57 }
 0x642   :  { %v4619_v42 = vadd.f32 %v4583_v8, %v4547_v29  ;;  %v4620_v60 = vadd.f32 %v4584_v39, %v4548_v58  ;;  %v4346_v54 = vadd.f32 %v4345_v2, %v4292_v19  ;;  %v4551_v19 = vunpack.c.l.bf16 %v9777_v62 }
 0x643   :  { %v4496_v31 = vmax.f32 %v4454_v7, 0.0  ;;  %v4455_v32 = vpop.f32.mrf.mxu0  ;;  %v4552_v8 = vunpack.c.h.bf16 %v9777_v62  ;;  %5315 = vmatpush.bf16.msrb.mxu1 %v7957_v40 }
 0x644   :  { %v9983_v3 = vpack.c.bf16 %v4620_v60, %v4619_v42  ;;  %v4495_v43 = vmax.f32 %v4346_v54, 0.0 }
 0x646   :  { %v4525_v30 = vpack.c.bf16 %v4496_v31, %v4495_v43  ;;  %v4401_v53 = vpop.f32.mrf.mxu3  ;;  %v4717_v18 = vunpack.c.l.b16 %v9983_v3  ;;  %v4718_v28 = vunpack.c.h.b16 %v9983_v3 }
 0x647   :  { %v4402_v61 = vadd.f32 %v4401_v53, %v9929_v12 }
 0x648   :  { %v4296_v4 = vpop.f32.mrf.mxu1  ;;  %v4747_v45 = vpack.c.b16 %v4717_v18, %v4715_v38  ;;  %v4748_v6 = vpack.c.b16 %v4718_v28, %v4716_v20  ;;  %v4585_v37 = vunpack.c.l.bf16 %v4525_v30  ;;  %v4586_v51 = vunpack.c.h.bf16 %v4525_v30 }
 0x649   :  { %v4456_v36 = vadd.f32 %v4455_v32, %v4402_v61  ;;  %v4347_v22 = vpop.f32.mrf.mxu2  ;;  %v4297_v58 = vadd.f32 %v4296_v4, %v9931_v50 }
 0x64a   :  { %v4348_v44 = vadd.f32 %v4347_v22, %v4294_v14  ;;  %4905 = vmatmul.bf16.gmra.mxu1 %v4747_v45  ;;  %7906 = vmatmul.msk.bf16.gmra.mxu2 %vm680_vm2, %v4748_v6  ;;  %v4621_v16 = vadd.f32 %v4585_v37, %v4549_v27  ;;  %v4622_v23 = vadd.f32 %v4586_v51, %v4550_v21 }
 0x64b   :  { %v4498_v55 = vmax.f32 %v4456_v36, 0.0  ;;  %5013 = vmatmul.bf16.gmra.mxu3 %v4747_v45  ;;  %7915 = vmatmul.msk.bf16.gmra.mxu0 %vm680_vm2, %v4748_v6  ;;  %v4458_v56 = vpop.f32.mrf.mxu0 }
 0x64c   :  { %v4497_v10 = vmax.f32 %v4348_v44, 0.0  ;;  %v9999_v2 = vpack.c.bf16 %v4622_v23, %v4621_v16  ;;  %v8385_v16 = vld [vmem:[#allocation5 + $0x2b4] sm:$0xf]  ;;  %v7950_v23 = vld [vmem:[#allocation5 + $0x2b8] sm:$0xf0] }
 0x64d   :  { %v7953_v63 = vor.u32 %v8385_v16, %v7950_v23 }
 0x64e   :  { %v4526_v13 = vpack.c.bf16 %v4498_v55, %v4497_v10  ;;  %v4404_v29 = vpop.f32.mrf.mxu3  ;;  %v4719_v18 = vunpack.c.l.b16 %v9999_v2  ;;  %v4720_v61 = vunpack.c.h.b16 %v9999_v2  ;;  %v4553_v55 = vunpack.c.l.bf16 %v9793_v0 }
 0x64f   :  { %v4405_v35 = vadd.f32 %v4404_v29, %v9929_v12  ;;  %v8396_v29 = vld [vmem:[#allocation5 + $0x304] sm:$0xf0]  ;;  %5424 = vmatpush.bf16.msra.mxu3 %v7953_v63  ;;  %v4558_v63 = vunpack.c.h.bf16 %v9811_v33 }
 0x650   :  { %v4587_v39 = vunpack.c.l.bf16 %v4526_v13  ;;  %v4588_v25 = vunpack.c.h.bf16 %v4526_v13  ;;  %v4298_v7 = vpop.f32.mrf.mxu1  ;;  %v7988_v13 = vld [vmem:[#allocation5 + $0x300] sm:$0xf] }
 0x651   :  { %v4459_v42 = vadd.f32 %v4458_v56, %v4405_v35  ;;  %v4350_v60 = vpop.f32.mrf.mxu2  ;;  %v4299_v45 = vadd.f32 %v4298_v7, %v9931_v50  ;;  %v4554_v56 = vunpack.c.h.bf16 %v9793_v0  ;;  %v7989_v35 = vor.u32 %v8396_v29, %v7988_v13 }
 0x652   :  { %v4623_v54 = vadd.f32 %v4587_v39, %v4551_v19  ;;  %v4624_v31 = vadd.f32 %v4588_v25, %v4552_v8  ;;  %v4351_v32 = vadd.f32 %v4350_v60, %v4297_v58  ;;  %v4555_v58 = vunpack.c.l.bf16 %v9795_v48 }
 0x653   :  { %v4500_v43 = vmax.f32 %v4459_v42, 0.0  ;;  %v4460_v38 = vpop.f32.mrf.mxu0  ;;  %v4556_v39 = vunpack.c.h.bf16 %v9795_v48  ;;  %5373 = vmatpush.bf16.msrb.mxu2 %v7989_v35  ;;  %v7942_v35 = vld [vmem:[#allocation5 + $0x2a8] sm:$0xf0] }
 0x654   :  { %v10001_v30 = vpack.c.bf16 %v4624_v31, %v4623_v54  ;;  %v4499_v53 = vmax.f32 %v4351_v32, 0.0 }
 0x656   :  { %v4527_v20 = vpack.c.bf16 %v4500_v43, %v4499_v53  ;;  %v4406_v62 = vpop.f32.mrf.mxu3  ;;  %v4721_v28 = vunpack.c.l.b16 %v10001_v30  ;;  %v4722_v14 = vunpack.c.h.b16 %v10001_v30 }
 0x657   :  { %v4407_v4 = vadd.f32 %v4406_v62, %v9929_v12 }
 0x658   :  { %v4301_v6 = vpop.f32.mrf.mxu1  ;;  %v4749_v37 = vpack.c.b16 %v4721_v28, %v4719_v18  ;;  %v4750_v51 = vpack.c.b16 %v4722_v14, %v4720_v61  ;;  %v4589_v36 = vunpack.c.l.bf16 %v4527_v20  ;;  %v4590_v22 = vunpack.c.h.bf16 %v4527_v20  ;;  %v7948_v28 = vld [vmem:[#allocation5 + $0x2b0] sm:$0xf]  ;;  %v8386_v61 = vld [vmem:[#allocation5 + $0x2b4] sm:$0xf0] }
 0x659   :  { %v4461_v44 = vadd.f32 %v4460_v38, %v4407_v4  ;;  %v4352_v27 = vpop.f32.mrf.mxu2  ;;  %v4302_v8 = vadd.f32 %v4301_v6, %v9931_v50  ;;  %v7949_v4 = vor.u32 %v8386_v61, %v7948_v28  ;;  %v7990_v6 = vld [vmem:[#allocation5 + $0x308] sm:$0xf0] }
 0x65a   :  { %v4353_v21 = vadd.f32 %v4352_v27, %v4299_v45  ;;  %4910 = vmatmul.bf16.gmra.mxu1 %v4749_v37  ;;  %7907 = vmatmul.msk.bf16.gmra.mxu2 %vm680_vm2, %v4750_v51  ;;  %v4625_v57 = vadd.f32 %v4589_v36, %v4553_v55  ;;  %v4626_v59 = vadd.f32 %v4590_v22, %v4554_v56  ;;  %v8395_v45 = vld [vmem:[#allocation5 + $0x304] sm:$0xf] }
 0x65b   :  { %v4502_v10 = vmax.f32 %v4461_v44, 0.0  ;;  %5018 = vmatmul.bf16.gmra.mxu3 %v4749_v37  ;;  %7916 = vmatmul.msk.bf16.gmra.mxu0 %vm680_vm2, %v4750_v51  ;;  %v4463_v26 = vpop.f32.mrf.mxu0  ;;  %v7993_v44 = vor.u32 %v8395_v45, %v7990_v6  ;;  %v7940_v6 = vld [vmem:[#allocation5 + $0x2a0] sm:$0xf] }
 0x65c   :  { %v4501_v17 = vmax.f32 %v4353_v21, 0.0  ;;  %v10017_v60 = vpack.c.bf16 %v4626_v59, %v4625_v57  ;;  %5316 = vmatpush.bf16.msrb.mxu1 %v7949_v4  ;;  %v4557_v59 = vunpack.c.l.bf16 %v9811_v33 }
 0x65d   :  { %5481 = vmatpush.bf16.msra.mxu0 %v7993_v44 }
 0x65e   :  { %v4528_v40 = vpack.c.bf16 %v4502_v10, %v4501_v17  ;;  %v4409_v19 = vpop.f32.mrf.mxu3  ;;  %v4723_v48 = vunpack.c.l.b16 %v10017_v60  ;;  %v4724_v14 = vunpack.c.h.b16 %v10017_v60 }
 0x65f   :  { %v4410_v0 = vadd.f32 %v4409_v19, %v9929_v12  ;;  %v8383_v19 = vld [vmem:[#allocation5 + $0x2a4] sm:$0xf] }
 0x660   :  { %v4591_v25 = vunpack.c.l.bf16 %v4528_v40  ;;  %v4592_v7 = vunpack.c.h.bf16 %v4528_v40  ;;  %v4303_v42 = vpop.f32.mrf.mxu1 }
 0x661   :  { %v4464_v54 = vadd.f32 %v4463_v26, %v4410_v0  ;;  %v4355_v31 = vpop.f32.mrf.mxu2  ;;  %v4304_v21 = vadd.f32 %v4303_v42, %v9931_v50 }
 0x662   :  { %v4627_v32 = vadd.f32 %v4591_v25, %v4555_v58  ;;  %v4628_v43 = vadd.f32 %v4592_v7, %v4556_v39  ;;  %v4356_v38 = vadd.f32 %v4355_v31, %v4302_v8  ;;  %v7945_v8 = vor.u32 %v8383_v19, %v7942_v35 }
 0x663   :  { %v4504_v53 = vmax.f32 %v4464_v54, 0.0  ;;  %v4465_v18 = vpop.f32.mrf.mxu0  ;;  %v4559_v7 = vunpack.c.l.bf16 %v9813_v46  ;;  %v4560_v54 = vunpack.c.h.bf16 %v9813_v46 }
 0x664   :  { %v10019_v20 = vpack.c.bf16 %v4628_v43, %v4627_v32  ;;  %v4503_v62 = vmax.f32 %v4356_v38, 0.0  ;;  %5425 = vmatpush.bf16.msra.mxu3 %v7945_v8 }
 0x666   :  { %v4529_v37 = vpack.c.bf16 %v4504_v53, %v4503_v62  ;;  %v4411_v51 = vpop.f32.mrf.mxu3  ;;  %v4725_v36 = vunpack.c.l.b16 %v10019_v20  ;;  %v4726_v22 = vunpack.c.h.b16 %v10019_v20 }
 0x667   :  { %v4412_v27 = vadd.f32 %v4411_v51, %v9929_v12 }
 0x668   :  { %v4306_v55 = vpop.f32.mrf.mxu1  ;;  %v4751_v56 = vpack.c.b16 %v4725_v36, %v4723_v48  ;;  %v4752_v10 = vpack.c.b16 %v4726_v22, %v4724_v14  ;;  %v4593_v26 = vunpack.c.l.bf16 %v4529_v37  ;;  %v4594_v17 = vunpack.c.h.bf16 %v4529_v37  ;;  %v8384_v37 = vld [vmem:[#allocation5 + $0x2a4] sm:$0xf0] }
 0x669   :  { %v4466_v16 = vadd.f32 %v4465_v18, %v4412_v27  ;;  %v4357_v23 = vpop.f32.mrf.mxu2  ;;  %v4307_v33 = vadd.f32 %v4306_v55, %v9931_v50  ;;  %v7941_v46 = vor.u32 %v8384_v37, %v7940_v6 }
 0x66a   :  { %v4358_v57 = vadd.f32 %v4357_v23, %v4304_v21  ;;  %4915 = vmatmul.bf16.gmra.mxu1 %v4751_v56  ;;  %7908 = vmatmul.msk.bf16.gmra.mxu2 %vm680_vm2, %v4752_v10  ;;  %v4629_v58 = vadd.f32 %v4593_v26, %v4557_v59  ;;  %v4630_v0 = vadd.f32 %v4594_v17, %v4558_v63 }
 0x66b   :  { %v4506_v13 = vmax.f32 %v4466_v16, 0.0  ;;  %5023 = vmatmul.bf16.gmra.mxu3 %v4751_v56  ;;  %7917 = vmatmul.msk.bf16.gmra.mxu0 %vm680_vm2, %v4752_v10  ;;  %v4468_v29 = vpop.f32.mrf.mxu0 }
 0x66c   :  { %v4505_v40 = vmax.f32 %v4358_v57, 0.0  ;;  %v10035_v38 = vpack.c.bf16 %v4630_v0, %v4629_v58  ;;  %5317 = vmatpush.bf16.msrb.mxu1 %v7941_v46  ;;  %v8381_v58 = vld [vmem:[#allocation5 + $0x294] sm:$0xf]  ;;  %v7934_v0 = vld [vmem:[#allocation5 + $0x298] sm:$0xf0] }
 0x66d   :  { %v7932_v46 = vld [vmem:[#allocation5 + $0x290] sm:$0xf] }
 0x66e   :  { %v4530_v39 = vpack.c.bf16 %v4506_v13, %v4505_v40  ;;  %v4414_v25 = vpop.f32.mrf.mxu3  ;;  %v4727_v51 = vunpack.c.l.b16 %v10035_v38  ;;  %v4728_v27 = vunpack.c.h.b16 %v10035_v38  ;;  %v4561_v13 = vunpack.c.l.bf16 %v9829_v5 }
 0x66f   :  { %v4415_v42 = vadd.f32 %v4414_v25, %v9929_v12  ;;  %v7937_v25 = vor.u32 %v8381_v58, %v7934_v0  ;;  %v8379_v58 = vld [vmem:[#allocation5 + $0x284] sm:$0xf]  ;;  %v7926_v0 = vld [vmem:[#allocation5 + $0x288] sm:$0xf0] }
 0x670   :  { %v4595_v31 = vunpack.c.l.bf16 %v4530_v39  ;;  %v4596_v32 = vunpack.c.h.bf16 %v4530_v39  ;;  %v4308_v43 = vpop.f32.mrf.mxu1 }
 0x671   :  { %v4469_v53 = vadd.f32 %v4468_v29, %v4415_v42  ;;  %v4360_v18 = vpop.f32.mrf.mxu2  ;;  %v4309_v56 = vadd.f32 %v4308_v43, %v9931_v50  ;;  %v4562_v29 = vunpack.c.h.bf16 %v9829_v5  ;;  %5426 = vmatpush.bf16.msra.mxu3 %v7937_v25 }
 0x672   :  { %v4631_v62 = vadd.f32 %v4595_v31, %v4559_v7  ;;  %v4632_v28 = vadd.f32 %v4596_v32, %v4560_v54  ;;  %v4361_v61 = vadd.f32 %v4360_v18, %v4307_v33  ;;  %v4563_v33 = vunpack.c.l.bf16 %v9831_v49 }
 0x673   :  { %v4508_v48 = vmax.f32 %v4469_v53, 0.0  ;;  %v4470_v14 = vpop.f32.mrf.mxu0  ;;  %v4564_v31 = vunpack.c.h.bf16 %v9831_v49 }
 0x674   :  { %v10037_v4 = vpack.c.bf16 %v4632_v28, %v4631_v62  ;;  %v4507_v45 = vmax.f32 %v4361_v61, 0.0 }
 0x676   :  { %v4531_v36 = vpack.c.bf16 %v4508_v48, %v4507_v45  ;;  %v4416_v22 = vpop.f32.mrf.mxu3  ;;  %v4729_v44 = vunpack.c.l.b16 %v10037_v4  ;;  %v4730_v21 = vunpack.c.h.b16 %v10037_v4 }
 0x677   :  { %v4417_v55 = vadd.f32 %v4416_v22, %v9929_v12 }
 0x678   :  { %v4311_v10 = vpop.f32.mrf.mxu1  ;;  %v4753_v26 = vpack.c.b16 %v4729_v44, %v4727_v51  ;;  %v4754_v17 = vpack.c.b16 %v4730_v21, %v4728_v27  ;;  %v4597_v16 = vunpack.c.l.bf16 %v4531_v36  ;;  %v4598_v23 = vunpack.c.h.bf16 %v4531_v36  ;;  %v8382_v36 = vld [vmem:[#allocation5 + $0x294] sm:$0xf0] }
 0x679   :  { %v4471_v57 = vadd.f32 %v4470_v14, %v4417_v55  ;;  %v4362_v59 = vpop.f32.mrf.mxu2  ;;  %v4312_v5 = vadd.f32 %v4311_v10, %v9931_v50  ;;  %v7933_v49 = vor.u32 %v8382_v36, %v7932_v46  ;;  %v8380_v46 = vld [vmem:[#allocation5 + $0x284] sm:$0xf0] }
 0x67a   :  { %v4363_v63 = vadd.f32 %v4362_v59, %v4309_v56  ;;  %4920 = vmatmul.bf16.gmra.mxu1 %v4753_v26  ;;  %7909 = vmatmul.msk.bf16.gmra.mxu2 %vm680_vm2, %v4754_v17  ;;  %v4633_v8 = vadd.f32 %v4597_v16, %v4561_v13  ;;  %v4634_v39 = vadd.f32 %v4598_v23, %v4562_v29  ;;  %v4565_v29 = vunpack.c.l.bf16 %v9847_v41 }
 0x67b   :  { %v4510_v40 = vmax.f32 %v4471_v57, 0.0  ;;  %5028 = vmatmul.bf16.gmra.mxu3 %v4753_v26  ;;  %7918 = vmatmul.msk.bf16.gmra.mxu0 %vm680_vm2, %v4754_v17  ;;  %v4473_v19 = vpop.f32.mrf.mxu0 }
 0x67c   :  { %v4509_v35 = vmax.f32 %v4363_v63, 0.0  ;;  %v10053_v53 = vpack.c.bf16 %v4634_v39, %v4633_v8  ;;  %5318 = vmatpush.bf16.msrb.mxu1 %v7933_v49  ;;  %v7929_v39 = vor.u32 %v8379_v58, %v7926_v0 }
 0x67e   :  { %v4532_v7 = vpack.c.bf16 %v4510_v40, %v4509_v35  ;;  %v4419_v42 = vpop.f32.mrf.mxu3  ;;  %v4731_v22 = vunpack.c.l.b16 %v10053_v53  ;;  %v4732_v55 = vunpack.c.h.b16 %v10053_v53  ;;  %v4566_v40 = vunpack.c.h.bf16 %v9847_v41  ;;  %5427 = vmatpush.bf16.msra.mxu3 %v7929_v39 }
 0x67f   :  { %v4420_v54 = vadd.f32 %v4419_v42, %v9929_v12  ;;  %v4571_v39 = vunpack.c.l.bf16 %v9865_v11 }
 0x680   :  { %v4599_v32 = vunpack.c.l.bf16 %v4532_v7  ;;  %v4600_v43 = vunpack.c.h.bf16 %v4532_v7  ;;  %v4313_v62 = vpop.f32.mrf.mxu1 }
 0x681   :  { %v4474_v18 = vadd.f32 %v4473_v19, %v4420_v54  ;;  %v4365_v28 = vpop.f32.mrf.mxu2  ;;  %v4314_v26 = vadd.f32 %v4313_v62, %v9931_v50 }
 0x682   :  { %v4635_v61 = vadd.f32 %v4599_v32, %v4563_v33  ;;  %v4636_v48 = vadd.f32 %v4600_v43, %v4564_v31  ;;  %v4366_v14 = vadd.f32 %v4365_v28, %v4312_v5  ;;  %v4567_v5 = vunpack.c.l.bf16 %v9849_v9 }
 0x683   :  { %v4512_v45 = vmax.f32 %v4474_v18, 0.0  ;;  %v4475_v51 = vpop.f32.mrf.mxu0  ;;  %v4568_v32 = vunpack.c.h.bf16 %v9849_v9 }
 0x684   :  { %v10055_v6 = vpack.c.bf16 %v4636_v48, %v4635_v61  ;;  %v4511_v37 = vmax.f32 %v4366_v14, 0.0 }
 0x686   :  { %v4533_v44 = vpack.c.bf16 %v4512_v45, %v4511_v37  ;;  %v4421_v27 = vpop.f32.mrf.mxu3  ;;  %v4733_v21 = vunpack.c.l.b16 %v10055_v6  ;;  %v4734_v56 = vunpack.c.h.b16 %v10055_v6 }
 0x687   :  { %v4422_v10 = vadd.f32 %v4421_v27, %v9929_v12 }
 0x688   :  { %v4755_v17 = vpack.c.b16 %v4733_v21, %v4731_v22  ;;  %v4756_v16 = vpack.c.b16 %v4734_v56, %v4732_v55  ;;  %v4601_v23 = vunpack.c.l.bf16 %v4533_v44  ;;  %v4602_v57 = vunpack.c.h.bf16 %v4533_v44  ;;  %v4316_v35 = vpop.f32.mrf.mxu1 }
 0x689   :  { %v4476_v59 = vadd.f32 %v4475_v51, %v4422_v10  ;;  %v4367_v63 = vpop.f32.mrf.mxu2  ;;  %v4317_v41 = vadd.f32 %v4316_v35, %v9931_v50  ;;  %v7924_v51 = vld [vmem:[#allocation5 + $0x280] sm:$0xf]  ;;  %v4569_v35 = vunpack.c.l.bf16 %v9863_v15 }
 0x68a   :  { %v4368_v13 = vadd.f32 %v4367_v63, %v4314_v26  ;;  %4925 = vmatmul.bf16.gmra.mxu1 %v4755_v17  ;;  %7910 = vmatmul.msk.bf16.gmra.mxu2 %vm680_vm2, %v4756_v16  ;;  %v4637_v25 = vadd.f32 %v4601_v23, %v4565_v29  ;;  %v4638_v7 = vadd.f32 %v4602_v57, %v4566_v40 }
 0x68b   :  { %v4514_v19 = vmax.f32 %v4476_v59, 0.0  ;;  %5033 = vmatmul.bf16.gmra.mxu3 %v4755_v17  ;;  %7919 = vmatmul.msk.bf16.gmra.mxu0 %vm680_vm2, %v4756_v16  ;;  %v4478_v33 = vpop.f32.mrf.mxu0  ;;  %v7925_v49 = vor.u32 %v8380_v46, %v7924_v51 }
 0x68c   :  { %v4513_v8 = vmax.f32 %v4368_v13, 0.0  ;;  %v10071_v62 = vpack.c.bf16 %v4638_v7, %v4637_v25  ;;  %v4572_v25 = vunpack.c.h.bf16 %v9865_v11 }
 0x68d   :  { %5319 = vmatpush.bf16.msrb.mxu1 %v7925_v49 }
 0x68e   :  { %v4534_v42 = vpack.c.bf16 %v4514_v19, %v4513_v8  ;;  %v4424_v54 = vpop.f32.mrf.mxu3  ;;  %v4735_v27 = vunpack.c.l.b16 %v10071_v62  ;;  %v4736_v56 = vunpack.c.h.b16 %v10071_v62 }
 0x68f   :  { %v4425_v31 = vadd.f32 %v4424_v54, %v9929_v12 }
 0x690   :  { %v4603_v43 = vunpack.c.l.bf16 %v4534_v42  ;;  %v4604_v18 = vunpack.c.h.bf16 %v4534_v42  ;;  %v4318_v44 = vpop.f32.mrf.mxu1 }
 0x691   :  { %v4479_v28 = vadd.f32 %v4478_v33, %v4425_v31  ;;  %v4370_v61 = vpop.f32.mrf.mxu2  ;;  %v4319_v17 = vadd.f32 %v4318_v44, %v9931_v50 }
 0x692   :  { %v4639_v48 = vadd.f32 %v4603_v43, %v4567_v5  ;;  %v4640_v14 = vadd.f32 %v4604_v18, %v4568_v32  ;;  %v4371_v45 = vadd.f32 %v4370_v61, %v4317_v41 }
 0x693   :  { %v4516_v37 = vmax.f32 %v4479_v28, 0.0  ;;  %v4480_v16 = vpop.f32.mrf.mxu0 }
 0x694   :  { %v10073_v36 = vpack.c.bf16 %v4640_v14, %v4639_v48  ;;  %v4515_v22 = vmax.f32 %v4371_v45, 0.0  ;;  %v4683_v48 = vld [vmem:[#allocation10 + $0x8] sm:$0x3] }
 0x695   :  { %v10097_v45 = vperm.slane %v4683_v48, 0  ;;  %v10099_v51 = vperm.slane %v4683_v48, 1 }
 0x696   :  { %v4535_v9 = vpack.c.bf16 %v4516_v37, %v4515_v22  ;;  %v4426_v21 = vpop.f32.mrf.mxu3  ;;  %v4737_v55 = vunpack.c.l.b16 %v10073_v36  ;;  %v4738_v10 = vunpack.c.h.b16 %v10073_v36 }
 0x697   :  { %v4427_v26 = vadd.f32 %v4426_v21, %v9929_v12  ;;  %v4570_v12 = vunpack.c.h.bf16 %v9863_v15 }
 0x698   :  { %v4757_v23 = vpack.c.b16 %v4737_v55, %v4735_v27  ;;  %v4758_v57 = vpack.c.b16 %v4738_v10, %v4736_v56  ;;  %v4605_v13 = vunpack.c.l.bf16 %v4535_v9  ;;  %v4606_v29 = vunpack.c.h.bf16 %v4535_v9  ;;  %v8413_v27 = vld [vmem:[%s10614_s18 + $0x74] sm:$0xf]  ;;  %v8080_v9 = vld [vmem:[%s10614_s18 + $0x78] sm:$0xf0] }
 0x699   :  { %v4481_v59 = vadd.f32 %v4480_v16, %v4427_v26  ;;  %v4372_v63 = vpop.f32.mrf.mxu2  ;;  %v8083_v56 = vor.u32 %v8413_v27, %v8080_v9 }
 0x69a   :  { %v4373_v40 = vadd.f32 %v4372_v63, %v4319_v17  ;;  %4930 = vmatmul.bf16.gmra.mxu1 %v4757_v23  ;;  %7911 = vmatmul.msk.bf16.gmra.mxu2 %vm680_vm2, %v4758_v57  ;;  %v4641_v58 = vadd.f32 %v4605_v13, %v4569_v35  ;;  %v4642_v0 = vadd.f32 %v4606_v29, %v4570_v12 }
 0x69b   :  { %v4518_v19 = vmax.f32 %v4481_v59, 0.0  ;;  %5038 = vmatmul.bf16.gmra.mxu3 %v4757_v23  ;;  %7920 = vmatmul.msk.bf16.gmra.mxu0 %vm680_vm2, %v4758_v57 }
 0x69c   :  { %v4517_v50 = vmax.f32 %v4373_v40, 0.0  ;;  %v10087_v33 = vpack.c.bf16 %v4642_v0, %v4641_v58  ;;  %6253 = vmatpush.bf16.msrb.mxu3 %v8083_v56  ;;  %v8086_v58 = vld [vmem:[%s10614_s18 + $0x80] sm:$0xf]  ;;  %v8416_v0 = vld [vmem:[%s10614_s18 + $0x84] sm:$0xf0] }
 0x69e   :  { %v4536_v8 = vpack.c.bf16 %v4518_v19, %v4517_v50  ;;  %v4739_v41 = vunpack.c.l.b16 %v10087_v33  ;;  %v4740_v32 = vunpack.c.h.b16 %v10087_v33 }
 0x6a0   :  { %v4607_v7 = vunpack.c.l.bf16 %v4536_v8  ;;  %v4608_v42 = vunpack.c.h.bf16 %v4536_v8  ;;  %v8078_v8 = vld [vmem:[%s10614_s18 + $0x70] sm:$0xf] }
 0x6a2   :  { %v4643_v54 = vadd.f32 %v4607_v7, %v4571_v39  ;;  %v4644_v5 = vadd.f32 %v4608_v42, %v4572_v25  ;;  %v8087_v25 = vor.u32 %v8416_v0, %v8086_v58  ;;  %v8414_v7 = vld [vmem:[%s10614_s18 + $0x74] sm:$0xf0]  ;;  %v8415_v42 = vld [vmem:[%s10614_s18 + $0x84] sm:$0xf] }
 0x6a4   :  { %v10089_v31 = vpack.c.bf16 %v4644_v5, %v4643_v54  ;;  %v8088_v54 = vld [vmem:[%s10614_s18 + $0x88] sm:$0xf0]  ;;  %6206 = vmatpush.bf16.msra.mxu2 %v8087_v25 }
 0x6a6   :  { %v4741_v15 = vunpack.c.l.b16 %v10089_v31  ;;  %v4742_v43 = vunpack.c.h.b16 %v10089_v31 }
 0x6a7   :  { %v4896_v18 = vpop.f32.mrf.mxu1 }
 0x6a8   :  { %v5058_v28 = vpop.f32.mrf.mxu0  ;;  %v4759_v61 = vpack.c.b16 %v4741_v15, %v4739_v41  ;;  %v4760_v11 = vpack.c.b16 %v4742_v43, %v4740_v32  ;;  %v4897_v49 = vadd.f32 %v4896_v18, %v10097_v45  ;;  %v8079_v41 = vor.u32 %v8414_v7, %v8078_v8 }
 0x6a9   :  { %v8091_v15 = vor.u32 %v8415_v42, %v8088_v54 }
 0x6aa   :  { %4935 = vmatmul.bf16.gmra.mxu1 %v4759_v61  ;;  %7912 = vmatmul.msk.bf16.gmra.mxu2 %vm680_vm2, %v4760_v11 }
 0x6ab   :  { %5043 = vmatmul.bf16.gmra.mxu3 %v4759_v61  ;;  %7921 = vmatmul.msk.bf16.gmra.mxu0 %vm680_vm2, %v4760_v11 }
 0x6ac   :  { %6145 = vmatpush.bf16.msra.mxu1 %v8079_v41  ;;  %6314 = vmatpush.bf16.msrb.mxu0 %v8091_v15 }
 0x6ad   :  { %v4950_v14 = vpop.f32.mrf.mxu2 }
 0x6ae   :  { %v5004_v37 = vpop.f32.mrf.mxu3  ;;  %v4951_v21 = vadd.f32 %v4950_v14, %v4897_v49 }
 0x6af   :  { %v4898_v46 = vpop.f32.mrf.mxu1  ;;  %v5005_v44 = vadd.f32 %v5004_v37, %v10099_v51 }
 0x6b0   :  { %v5060_v22 = vpop.f32.mrf.mxu0  ;;  %v4899_v55 = vadd.f32 %v4898_v46, %v10097_v45  ;;  %v5103_v59 = vmax.f32 %v4951_v21, 0.0 }
 0x6b1   :  { %v5059_v16 = vadd.f32 %v5058_v28, %v5005_v44 }
 0x6b3   :  { %v5104_v19 = vmax.f32 %v5059_v16, 0.0  ;;  %v8072_v16 = vld [vmem:[%s10614_s18 + $0x68] sm:$0xf0] }
 0x6b5   :  { %v4952_v10 = vpop.f32.mrf.mxu2 }
 0x6b6   :  { %v4953_v26 = vadd.f32 %v4952_v10, %v4899_v55  ;;  %v5006_v17 = vpop.f32.mrf.mxu3 }
 0x6b7   :  { %v5007_v23 = vadd.f32 %v5006_v17, %v10099_v51  ;;  %v4901_v57 = vpop.f32.mrf.mxu1  ;;  %v8411_v17 = vld [vmem:[%s10614_s18 + $0x64] sm:$0xf] }
 0x6b8   :  { %v5105_v63 = vmax.f32 %v4953_v26, 0.0  ;;  %v5063_v13 = vpop.f32.mrf.mxu0  ;;  %v4902_v43 = vadd.f32 %v4901_v57, %v10097_v45 }
 0x6b9   :  { %v5061_v29 = vadd.f32 %v5060_v22, %v5007_v23  ;;  %v8070_v23 = vld [vmem:[%s10614_s18 + $0x60] sm:$0xf] }
 0x6ba   :  { %v5139_v40 = vpack.c.bf16 %v5105_v63, %v5103_v59  ;;  %v8075_v59 = vor.u32 %v8411_v17, %v8072_v16  ;;  %v8412_v63 = vld [vmem:[%s10614_s18 + $0x64] sm:$0xf0] }
 0x6bb   :  { %v5106_v35 = vmax.f32 %v5061_v29, 0.0  ;;  %v8071_v29 = vor.u32 %v8412_v63, %v8070_v23 }
 0x6bc   :  { %5320 = vmatmul.bf16.vlgmr.msrb.gmra.mxu1 %v5139_v40  ;;  %5428 = vmatmul.bf16.vlgmr.msra.gmra.mxu3 %v5139_v40 }
 0x6bd   :  { %v5140_v12 = vpack.c.bf16 %v5106_v35, %v5104_v19  ;;  %v4955_v50 = vpop.f32.mrf.mxu2  ;;  %6254 = vmatpush.bf16.msrb.mxu3 %v8075_v59  ;;  %6146 = vmatpush.bf16.msra.mxu1 %v8071_v29 }
 0x6be   :  { %v5009_v39 = vpop.f32.mrf.mxu3  ;;  %v4956_v28 = vadd.f32 %v4955_v50, %v4902_v43 }
 0x6bf   :  { %8002 = vmatmul.msk.bf16.vlgmr.msrb.gmra.mxu2 %vm1104_vm3, %v5140_v12  ;;  %8011 = vmatmul.msk.bf16.vlgmr.msra.gmra.mxu0 %vm1104_vm3, %v5140_v12  ;;  %v4903_v5 = vpop.f32.mrf.mxu1  ;;  %v5010_v18 = vadd.f32 %v5009_v39, %v10099_v51 }
 0x6c0   :  { %v5065_v32 = vpop.f32.mrf.mxu0  ;;  %v4904_v61 = vadd.f32 %v4903_v5, %v10097_v45  ;;  %v5107_v49 = vmax.f32 %v4956_v28, 0.0 }
 0x6c1   :  { %v5064_v37 = vadd.f32 %v5063_v13, %v5010_v18 }
 0x6c3   :  { %v5108_v55 = vmax.f32 %v5064_v37, 0.0 }
 0x6c5   :  { %v4957_v11 = vpop.f32.mrf.mxu2 }
 0x6c6   :  { %v4958_v48 = vadd.f32 %v4957_v11, %v4904_v61  ;;  %v5011_v14 = vpop.f32.mrf.mxu3  ;;  %v8409_v61 = vld [vmem:[%s10614_s18 + $0x54] sm:$0xf]  ;;  %v8064_v11 = vld [vmem:[%s10614_s18 + $0x58] sm:$0xf0] }
 0x6c7   :  { %v5012_v46 = vadd.f32 %v5011_v14, %v10099_v51  ;;  %v4906_v22 = vpop.f32.mrf.mxu1  ;;  %v8067_v14 = vor.u32 %v8409_v61, %v8064_v11 }
 0x6c8   :  { %v5109_v44 = vmax.f32 %v4958_v48, 0.0  ;;  %v5068_v27 = vpop.f32.mrf.mxu0  ;;  %v4907_v19 = vadd.f32 %v4906_v22, %v10097_v45 }
 0x6c9   :  { %v5066_v9 = vadd.f32 %v5065_v32, %v5012_v46  ;;  %6255 = vmatpush.bf16.msrb.mxu3 %v8067_v14 }
 0x6ca   :  { %v5141_v21 = vpack.c.bf16 %v5109_v44, %v5107_v49  ;;  %v8062_v44 = vld [vmem:[%s10614_s18 + $0x50] sm:$0xf] }
 0x6cb   :  { %v5110_v56 = vmax.f32 %v5066_v9, 0.0 }
 0x6cc   :  { %5325 = vmatmul.bf16.gmra.mxu1 %v5141_v21  ;;  %5433 = vmatmul.bf16.gmra.mxu3 %v5141_v21 }
 0x6cd   :  { %v5142_v10 = vpack.c.bf16 %v5110_v56, %v5108_v55  ;;  %v4960_v26 = vpop.f32.mrf.mxu2 }
 0x6ce   :  { %v5014_v57 = vpop.f32.mrf.mxu3  ;;  %v4961_v12 = vadd.f32 %v4960_v26, %v4907_v19 }
 0x6cf   :  { %8003 = vmatmul.msk.bf16.gmra.mxu2 %vm1104_vm3, %v5142_v10  ;;  %8012 = vmatmul.msk.bf16.gmra.mxu0 %vm1104_vm3, %v5142_v10  ;;  %v4908_v13 = vpop.f32.mrf.mxu1  ;;  %v5015_v35 = vadd.f32 %v5014_v57, %v10099_v51 }
 0x6d0   :  { %v5070_v40 = vpop.f32.mrf.mxu0  ;;  %v4909_v50 = vadd.f32 %v4908_v13, %v10097_v45  ;;  %v5111_v42 = vmax.f32 %v4961_v12, 0.0 }
 0x6d1   :  { %v5069_v39 = vadd.f32 %v5068_v27, %v5015_v35  ;;  %v8410_v27 = vld [vmem:[%s10614_s18 + $0x54] sm:$0xf0] }
 0x6d2   :  { %v8063_v55 = vor.u32 %v8410_v27, %v8062_v44 }
 0x6d3   :  { %v5112_v32 = vmax.f32 %v5069_v39, 0.0 }
 0x6d4   :  { %6147 = vmatpush.bf16.msra.mxu1 %v8063_v55  ;;  %v8405_v55 = vld [vmem:[%s10614_s18 + $0x34] sm:$0xf] }
 0x6d5   :  { %v4962_v58 = vpop.f32.mrf.mxu2 }
 0x6d6   :  { %v4963_v0 = vadd.f32 %v4962_v58, %v4909_v50  ;;  %v5016_v8 = vpop.f32.mrf.mxu3  ;;  %v8407_v50 = vld [vmem:[%s10614_s18 + $0x44] sm:$0xf]  ;;  %v8056_v58 = vld [vmem:[%s10614_s18 + $0x48] sm:$0xf0] }
 0x6d7   :  { %v5017_v25 = vadd.f32 %v5016_v8, %v10099_v51  ;;  %v4911_v7 = vpop.f32.mrf.mxu1  ;;  %v8059_v8 = vor.u32 %v8407_v50, %v8056_v58 }
 0x6d8   :  { %v5113_v54 = vmax.f32 %v4963_v0, 0.0  ;;  %v5073_v5 = vpop.f32.mrf.mxu0  ;;  %v4912_v22 = vadd.f32 %v4911_v7, %v10097_v45 }
 0x6d9   :  { %v5071_v41 = vadd.f32 %v5070_v40, %v5017_v25  ;;  %6256 = vmatpush.bf16.msrb.mxu3 %v8059_v8 }
 0x6da   :  { %v5143_v15 = vpack.c.bf16 %v5113_v54, %v5111_v42  ;;  %v8054_v54 = vld [vmem:[%s10614_s18 + $0x40] sm:$0xf] }
 0x6db   :  { %v5114_v43 = vmax.f32 %v5071_v41, 0.0 }
 0x6dc   :  { %5330 = vmatmul.bf16.gmra.mxu1 %v5143_v15  ;;  %5438 = vmatmul.bf16.gmra.mxu3 %v5143_v15 }
 0x6dd   :  { %v5144_v18 = vpack.c.bf16 %v5114_v43, %v5112_v32  ;;  %v4965_v28 = vpop.f32.mrf.mxu2 }
 0x6de   :  { %v5019_v48 = vpop.f32.mrf.mxu3  ;;  %v4966_v9 = vadd.f32 %v4965_v28, %v4912_v22 }
 0x6df   :  { %8004 = vmatmul.msk.bf16.gmra.mxu2 %vm1104_vm3, %v5144_v18  ;;  %8013 = vmatmul.msk.bf16.gmra.mxu0 %vm1104_vm3, %v5144_v18  ;;  %v4913_v37 = vpop.f32.mrf.mxu1  ;;  %v5020_v49 = vadd.f32 %v5019_v48, %v10099_v51 }
 0x6e0   :  { %v5075_v46 = vpop.f32.mrf.mxu0  ;;  %v4914_v21 = vadd.f32 %v4913_v37, %v10097_v45  ;;  %v5115_v57 = vmax.f32 %v4966_v9, 0.0 }
 0x6e1   :  { %v5074_v17 = vadd.f32 %v5073_v5, %v5020_v49  ;;  %v8408_v5 = vld [vmem:[%s10614_s18 + $0x44] sm:$0xf0] }
 0x6e2   :  { %v8055_v32 = vor.u32 %v8408_v5, %v8054_v54 }
 0x6e3   :  { %v5116_v40 = vmax.f32 %v5074_v17, 0.0 }
 0x6e4   :  { %6148 = vmatpush.bf16.msra.mxu1 %v8055_v32 }
 0x6e5   :  { %v4967_v56 = vpop.f32.mrf.mxu2 }
 0x6e6   :  { %v4968_v10 = vadd.f32 %v4967_v56, %v4914_v21  ;;  %v5021_v26 = vpop.f32.mrf.mxu3  ;;  %v8048_v56 = vld [vmem:[%s10614_s18 + $0x38] sm:$0xf0] }
 0x6e7   :  { %v5022_v16 = vadd.f32 %v5021_v26, %v10099_v51  ;;  %v4916_v23 = vpop.f32.mrf.mxu1  ;;  %v8051_v26 = vor.u32 %v8405_v55, %v8048_v56 }
 0x6e8   :  { %v5117_v59 = vmax.f32 %v4968_v10, 0.0  ;;  %v5078_v63 = vpop.f32.mrf.mxu0  ;;  %v4917_v7 = vadd.f32 %v4916_v23, %v10097_v45 }
 0x6e9   :  { %v5076_v13 = vadd.f32 %v5075_v46, %v5022_v16  ;;  %6257 = vmatpush.bf16.msrb.mxu3 %v8051_v26 }
 0x6ea   :  { %v5145_v29 = vpack.c.bf16 %v5117_v59, %v5115_v57  ;;  %v8046_v59 = vld [vmem:[%s10614_s18 + $0x30] sm:$0xf] }
 0x6eb   :  { %v5118_v19 = vmax.f32 %v5076_v13, 0.0 }
 0x6ec   :  { %5335 = vmatmul.bf16.gmra.mxu1 %v5145_v29  ;;  %5443 = vmatmul.bf16.gmra.mxu3 %v5145_v29 }
 0x6ed   :  { %v5146_v35 = vpack.c.bf16 %v5118_v19, %v5116_v40  ;;  %v4970_v12 = vpop.f32.mrf.mxu2 }
 0x6ee   :  { %v5024_v0 = vpop.f32.mrf.mxu3  ;;  %v4971_v41 = vadd.f32 %v4970_v12, %v4917_v7 }
 0x6ef   :  { %8005 = vmatmul.msk.bf16.gmra.mxu2 %vm1104_vm3, %v5146_v35  ;;  %8014 = vmatmul.msk.bf16.gmra.mxu0 %vm1104_vm3, %v5146_v35  ;;  %v4918_v39 = vpop.f32.mrf.mxu1  ;;  %v5025_v42 = vadd.f32 %v5024_v0, %v10099_v51 }
 0x6f0   :  { %v5080_v25 = vpop.f32.mrf.mxu0  ;;  %v4919_v15 = vadd.f32 %v4918_v39, %v10097_v45  ;;  %v5119_v14 = vmax.f32 %v4971_v41, 0.0 }
 0x6f1   :  { %v5079_v61 = vadd.f32 %v5078_v63, %v5025_v42  ;;  %v8406_v63 = vld [vmem:[%s10614_s18 + $0x34] sm:$0xf0] }
 0x6f2   :  { %v8047_v40 = vor.u32 %v8406_v63, %v8046_v59 }
 0x6f3   :  { %v5120_v44 = vmax.f32 %v5079_v61, 0.0 }
 0x6f4   :  { %6149 = vmatpush.bf16.msra.mxu1 %v8047_v40 }
 0x6f5   :  { %v4972_v43 = vpop.f32.mrf.mxu2 }
 0x6f6   :  { %v4973_v18 = vadd.f32 %v4972_v43, %v4919_v15  ;;  %v5026_v28 = vpop.f32.mrf.mxu3 }
 0x6f7   :  { %v5027_v11 = vadd.f32 %v5026_v28, %v10099_v51  ;;  %v4921_v48 = vpop.f32.mrf.mxu1 }
 0x6f8   :  { %v5121_v37 = vmax.f32 %v4973_v18, 0.0  ;;  %v5083_v46 = vpop.f32.mrf.mxu0  ;;  %v4922_v23 = vadd.f32 %v4921_v48, %v10097_v45  ;;  %v8040_v48 = vld [vmem:[%s10614_s18 + $0x28] sm:$0xf0] }
 0x6f9   :  { %v5081_v22 = vadd.f32 %v5080_v25, %v5027_v11  ;;  %v8403_v11 = vld [vmem:[%s10614_s18 + $0x24] sm:$0xf] }
 0x6fa   :  { %v5147_v49 = vpack.c.bf16 %v5121_v37, %v5119_v14 }
 0x6fb   :  { %v5122_v27 = vmax.f32 %v5081_v22, 0.0  ;;  %v8038_v22 = vld [vmem:[%s10614_s18 + $0x20] sm:$0xf] }
 0x6fc   :  { %5340 = vmatmul.bf16.gmra.mxu1 %v5147_v49  ;;  %5448 = vmatmul.bf16.gmra.mxu3 %v5147_v49  ;;  %v8404_v49 = vld [vmem:[%s10614_s18 + $0x24] sm:$0xf0] }
 0x6fd   :  { %v5148_v9 = vpack.c.bf16 %v5122_v27, %v5120_v44  ;;  %v4975_v21 = vpop.f32.mrf.mxu2  ;;  %v8039_v27 = vor.u32 %v8404_v49, %v8038_v22 }
 0x6fe   :  { %v5029_v10 = vpop.f32.mrf.mxu3  ;;  %v4976_v13 = vadd.f32 %v4975_v21, %v4922_v23 }
 0x6ff   :  { %8006 = vmatmul.msk.bf16.gmra.mxu2 %vm1104_vm3, %v5148_v9  ;;  %8015 = vmatmul.msk.bf16.gmra.mxu0 %vm1104_vm3, %v5148_v9  ;;  %v4923_v17 = vpop.f32.mrf.mxu1  ;;  %v5030_v57 = vadd.f32 %v5029_v10, %v10099_v51 }
 0x700   :  { %v5085_v16 = vpop.f32.mrf.mxu0  ;;  %v4924_v29 = vadd.f32 %v4923_v17, %v10097_v45  ;;  %v5123_v8 = vmax.f32 %v4976_v13, 0.0  ;;  %6150 = vmatpush.bf16.msra.mxu1 %v8039_v27 }
 0x701   :  { %v5084_v50 = vadd.f32 %v5083_v46, %v5030_v57  ;;  %v8043_v46 = vor.u32 %v8403_v11, %v8040_v48  ;;  %v5811_v11 = vld [vmem:[#allocation14] sm:$0x3] }
 0x703   :  { %v5124_v54 = vmax.f32 %v5084_v50, 0.0  ;;  %6258 = vmatpush.bf16.msrb.mxu3 %v8043_v46 }
 0x705   :  { %v4977_v19 = vpop.f32.mrf.mxu2 }
 0x706   :  { %v4978_v35 = vadd.f32 %v4977_v19, %v4924_v29  ;;  %v5031_v12 = vpop.f32.mrf.mxu3 }
 0x707   :  { %v5032_v58 = vadd.f32 %v5031_v12, %v10099_v51  ;;  %v4926_v0 = vpop.f32.mrf.mxu1  ;;  %v5708_v12 = vld [vmem:[#allocation13] sm:$0x3] }
 0x708   :  { %v5125_v39 = vmax.f32 %v4978_v35, 0.0  ;;  %v5088_v25 = vpop.f32.mrf.mxu0  ;;  %v4927_v28 = vadd.f32 %v4926_v0, %v10097_v45  ;;  %5710 = vst [vmem:[#allocation1] ss:$9 sm:$0xff] %v5708_v12  ;;  %v5179_v12 = vld [vmem:[#allocation11 + $0x8] sm:$0x3] }
 0x709   :  { %v5086_v7 = vadd.f32 %v5085_v16, %v5032_v58 }
 0x70a   :  { %v5149_v42 = vpack.c.bf16 %v5125_v39, %v5123_v8  ;;  %v8401_v39 = vld [vmem:[%s10614_s18 + $0x14] sm:$0xf] }
 0x70b   :  { %v5126_v5 = vmax.f32 %v5086_v7, 0.0 }
 0x70c   :  { %5345 = vmatmul.bf16.gmra.mxu1 %v5149_v42  ;;  %5453 = vmatmul.bf16.gmra.mxu3 %v5149_v42 }
 0x70d   :  { %v5150_v41 = vpack.c.bf16 %v5126_v5, %v5124_v54  ;;  %v4980_v15 = vpop.f32.mrf.mxu2 }
 0x70e   :  { %v5034_v32 = vpop.f32.mrf.mxu3  ;;  %v4981_v14 = vadd.f32 %v4980_v15, %v4927_v28 }
 0x70f   :  { %8007 = vmatmul.msk.bf16.gmra.mxu2 %vm1104_vm3, %v5150_v41  ;;  %8016 = vmatmul.msk.bf16.gmra.mxu0 %vm1104_vm3, %v5150_v41  ;;  %v4928_v43 = vpop.f32.mrf.mxu1  ;;  %v5035_v61 = vadd.f32 %v5034_v32, %v10099_v51  ;;  %v10237_v28 = vld [vmem:[#allocation1] sm:$0xff] }
 0x710   :  { %v5090_v18 = vpop.f32.mrf.mxu0  ;;  %v4929_v37 = vadd.f32 %v4928_v43, %v10097_v45  ;;  %v5127_v26 = vmax.f32 %v4981_v14, 0.0 }
 0x711   :  { %v5089_v55 = vadd.f32 %v5088_v25, %v5035_v61  ;;  %v8032_v25 = vld [vmem:[%s10614_s18 + $0x18] sm:$0xf0]  ;;  %v10239_v61 = vld [vmem:[#allocation1 + $0x9] sm:$0xff] }
 0x712   :  { %v8035_v42 = vor.u32 %v8401_v39, %v8032_v25  ;;  %5813 = vst [vmem:[#allocation1] ss:$9 sm:$0xff] %v5811_v11  ;;  %v10255_v25 = vperm.slane %v5179_v12, 0 }
 0x713   :  { %v5128_v59 = vmax.f32 %v5089_v55, 0.0 }
 0x714   :  { %6259 = vmatpush.bf16.msrb.mxu3 %v8035_v42  ;;  %v8399_v42 = vld [vmem:[%s10614_s18 + $0x4] sm:$0xf] }
 0x715   :  { %v4982_v44 = vpop.f32.mrf.mxu2 }
 0x716   :  { %v4983_v9 = vadd.f32 %v4982_v44, %v4929_v37  ;;  %v5036_v21 = vpop.f32.mrf.mxu3 }
 0x717   :  { %v5037_v56 = vadd.f32 %v5036_v21, %v10099_v51  ;;  %v4931_v10 = vpop.f32.mrf.mxu1 }
 0x718   :  { %v5129_v17 = vmax.f32 %v4983_v9, 0.0  ;;  %v5093_v16 = vpop.f32.mrf.mxu0  ;;  %v4932_v50 = vadd.f32 %v4931_v10, %v10097_v45 }
 0x719   :  { %v5091_v23 = vadd.f32 %v5090_v18, %v5037_v56 }
 0x71a   :  { %v5151_v57 = vpack.c.bf16 %v5129_v17, %v5127_v26 }
 0x71b   :  { %v5130_v63 = vmax.f32 %v5091_v23, 0.0 }
 0x71c   :  { %5350 = vmatmul.bf16.gmra.mxu1 %v5151_v57  ;;  %5458 = vmatmul.bf16.gmra.mxu3 %v5151_v57 }
 0x71d   :  { %v5152_v13 = vpack.c.bf16 %v5130_v63, %v5128_v59  ;;  %v4985_v29 = vpop.f32.mrf.mxu2  ;;  %v8030_v63 = vld [vmem:[%s10614_s18 + $0x10] sm:$0xf] }
 0x71e   :  { %v5039_v40 = vpop.f32.mrf.mxu3  ;;  %v4986_v0 = vadd.f32 %v4985_v29, %v4932_v50 }
 0x71f   :  { %8008 = vmatmul.msk.bf16.gmra.mxu2 %vm1104_vm3, %v5152_v13  ;;  %8017 = vmatmul.msk.bf16.gmra.mxu0 %vm1104_vm3, %v5152_v13  ;;  %v4933_v19 = vpop.f32.mrf.mxu1  ;;  %v5040_v58 = vadd.f32 %v5039_v40, %v10099_v51  ;;  %v8402_v13 = vld [vmem:[%s10614_s18 + $0x14] sm:$0xf0] }
 0x720   :  { %v5095_v35 = vpop.f32.mrf.mxu0  ;;  %v4934_v8 = vadd.f32 %v4933_v19, %v10097_v45  ;;  %v5131_v43 = vmax.f32 %v4986_v0, 0.0  ;;  %v8031_v19 = vor.u32 %v8402_v13, %v8030_v63 }
 0x721   :  { %v5094_v41 = vadd.f32 %v5093_v16, %v5040_v58 }
 0x722   :  { %6151 = vmatpush.bf16.msra.mxu1 %v8031_v19 }
 0x723   :  { %v5132_v46 = vmax.f32 %v5094_v41, 0.0 }
 0x725   :  { %v4987_v7 = vpop.f32.mrf.mxu2 }
 0x726   :  { %v4988_v54 = vadd.f32 %v4987_v7, %v4934_v8  ;;  %v5041_v5 = vpop.f32.mrf.mxu3 }
 0x727   :  { %v5042_v15 = vadd.f32 %v5041_v5, %v10099_v51  ;;  %v4936_v32 = vpop.f32.mrf.mxu1  ;;  %v8022_v5 = vld [vmem:[%s10614_s18] sm:$0xf] }
 0x728   :  { %v5133_v18 = vmax.f32 %v4988_v54, 0.0  ;;  %v5098_v14 = vpop.f32.mrf.mxu0  ;;  %v4937_v21 = vadd.f32 %v4936_v32, %v10097_v45  ;;  %v8024_v54 = vld [vmem:[%s10614_s18 + $0x8] sm:$0xf0]  ;;  %v8400_v32 = vld [vmem:[%s10614_s18 + $0x4] sm:$0xf0]  ;;  %s8750_s18 = smov 96  }
 0x729   :  { %v5096_v48 = vadd.f32 %v5095_v35, %v5042_v15  ;;  %v8027_v15 = vor.u32 %v8399_v42, %v8024_v54  ;;  %v8023_v11 = vor.u32 %v8400_v32, %v8022_v5  ;;  %v5585_v5 = vunpack.c.h.bf16 %v9947_v52 }
 0x72a   :  { %v5153_v37 = vpack.c.bf16 %v5133_v18, %v5131_v43 }
 0x72b   :  { %v5134_v22 = vmax.f32 %v5096_v48, 0.0  ;;  %6260 = vmatpush.bf16.msrb.mxu3 %v8027_v15  ;;  %6152 = vmatpush.bf16.msra.mxu1 %v8023_v11 }
 0x72c   :  { %5355 = vmatmul.bf16.gmra.mxu1 %v5153_v37  ;;  %5463 = vmatmul.bf16.gmra.mxu3 %v5153_v37 }
 0x72d   :  { %v5154_v49 = vpack.c.bf16 %v5134_v22, %v5132_v46  ;;  %v4990_v44 = vpop.f32.mrf.mxu2  ;;  %v5713_v22 = vpack.i.b16 %v10237_v28, %v10237_v28 }
 0x72e   :  { %v5044_v27 = vpop.f32.mrf.mxu3  ;;  %v4991_v56 = vadd.f32 %v4990_v44, %v4937_v21 }
 0x72f   :  { %8009 = vmatmul.msk.bf16.gmra.mxu2 %vm1104_vm3, %v5154_v49  ;;  %8018 = vmatmul.msk.bf16.gmra.mxu0 %vm1104_vm3, %v5154_v49  ;;  %v4938_v9 = vpop.f32.mrf.mxu1  ;;  %v5045_v55 = vadd.f32 %v5044_v27, %v10099_v51  ;;  %v5716_v27 = vpack.i.b16 %v10239_v61, %v10239_v61 }
 0x730   :  { %v4939_v10 = vadd.f32 %v4938_v9, %v10097_v45  ;;  %v5100_v26 = vpop.f32.mrf.mxu0  ;;  %v5135_v29 = vmax.f32 %v4991_v56, 0.0  ;;  %v5583_v56 = vunpack.c.h.bf16 %v9945_v24 }
 0x731   :  { %v5099_v57 = vadd.f32 %v5098_v14, %v5045_v55  ;;  %v5582_v55 = vunpack.c.l.bf16 %v9945_v24 }
 0x733   :  { %v5136_v58 = vmax.f32 %v5099_v57, 0.0  ;;  %v5718_v57 = vperm.slane %v5716_v27, 0 }
 0x735   :  { %v4992_v17 = vpop.f32.mrf.mxu2  ;;  %v10283_v24 = vunpack.c.l.bf16 %v5718_v57  ;;  %v5587_v57 = vunpack.c.h.bf16 %v9963_v1 }
 0x736   :  { %v4993_v16 = vadd.f32 %v4992_v17, %v4939_v10  ;;  %v5046_v23 = vpop.f32.mrf.mxu3  ;;  %v5715_v10 = vperm.slane %v5713_v22, 0 }
 0x737   :  { %v5047_v59 = vadd.f32 %v5046_v23, %v10099_v51  ;;  %v10253_v51 = vperm.slane %v5179_v12, 1 }
 0x738   :  { %v5137_v40 = vmax.f32 %v4993_v16, 0.0 }
 0x739   :  { %v5101_v35 = vadd.f32 %v5100_v26, %v5047_v59  ;;  %v5321_v45 = vpop.f32.mrf.mxu1 }
 0x73a   :  { %v5155_v50 = vpack.c.bf16 %v5137_v40, %v5135_v29  ;;  %v5322_v43 = vadd.f32 %v5321_v45, %v10255_v25  ;;  %v10281_v45 = vunpack.c.l.bf16 %v5715_v10 }
 0x73b   :  { %v5138_v0 = vmax.f32 %v5101_v35, 0.0 }
 0x73c   :  { %v5483_v8 = vpop.f32.mrf.mxu0  ;;  %5360 = vmatmul.bf16.gmra.mxu1 %v5155_v50  ;;  %5468 = vmatmul.bf16.gmra.mxu3 %v5155_v50  ;;  %v5814_v50 = vld [vmem:[#allocation1] sm:$0xff] }
 0x73d   :  { %v5156_v39 = vpack.c.bf16 %v5138_v0, %v5136_v58  ;;  %v5816_v15 = vpack.i.b16 %v5814_v50, %v5814_v50 }
 0x73f   :  { %8010 = vmatmul.msk.bf16.gmra.mxu2 %vm1104_vm3, %v5156_v39  ;;  %8019 = vmatmul.msk.bf16.gmra.mxu0 %vm1104_vm3, %v5156_v39  ;;  %v5429_v7 = vpop.f32.mrf.mxu3 }
 0x740   :  { %v5430_v41 = vadd.f32 %v5429_v7, %v10253_v51  ;;  %v5584_v7 = vunpack.c.l.bf16 %v9947_v52  ;;  %v5818_v52 = vperm.slane %v5816_v15, 0 }
 0x741   :  { %v5323_v18 = vpop.f32.mrf.mxu1 }
 0x742   :  { %v5484_v48 = vadd.f32 %v5483_v8, %v5430_v41  ;;  %v5375_v14 = vpop.f32.mrf.mxu2  ;;  %v5324_v17 = vadd.f32 %v5323_v18, %v10255_v25  ;;  %v5815_v8 = vld [vmem:[#allocation1 + $0x9] sm:$0xff] }
 0x743   :  { %v5376_v37 = vadd.f32 %v5375_v14, %v5322_v43  ;;  %v5819_v14 = vpack.i.b16 %v5815_v8, %v5815_v8 }
 0x744   :  { %v5529_v46 = vmax.f32 %v5484_v48, 0.0  ;;  %v5485_v49 = vpop.f32.mrf.mxu0 }
 0x745   :  { %v5528_v44 = vmax.f32 %v5376_v37, 0.0  ;;  %v5821_v10 = vperm.slane %v5819_v14, 0  ;;  %v5588_v14 = vunpack.c.l.bf16 %v9965_v47 }
 0x747   :  { %v5564_v9 = vpack.c.bf16 %v5529_v46, %v5528_v44  ;;  %v5431_v21 = vpop.f32.mrf.mxu3 }
 0x748   :  { %v5432_v26 = vadd.f32 %v5431_v21, %v10253_v51 }
 0x749   :  { %v5618_v16 = vunpack.c.l.bf16 %v5564_v9  ;;  %v5619_v23 = vunpack.c.h.bf16 %v5564_v9  ;;  %v5326_v28 = vpop.f32.mrf.mxu1 }
 0x74a   :  { %v5486_v59 = vadd.f32 %v5485_v49, %v5432_v26  ;;  %v5377_v63 = vpop.f32.mrf.mxu2  ;;  %v5327_v54 = vadd.f32 %v5326_v28, %v10255_v25  ;;  %v5586_v26 = vunpack.c.l.bf16 %v9963_v1 }
 0x74b   :  { %v5654_v13 = vadd.f32 %v5618_v16, %v5582_v55  ;;  %v5655_v29 = vadd.f32 %v5619_v23, %v5583_v56  ;;  %v5378_v61 = vadd.f32 %v5377_v63, %v5324_v17 }
 0x74c   :  { %v5531_v40 = vmax.f32 %v5486_v59, 0.0  ;;  %v5488_v19 = vpop.f32.mrf.mxu0  ;;  %v8426_v59 = vld [vmem:[%s10616_s20 + $0x48] sm:$0xff] }
 0x74d   :  { %v5690_v35 = vpack.c.bf16 %v5655_v29, %v5654_v13  ;;  %v5530_v12 = vmax.f32 %v5378_v61, 0.0  ;;  %v10298_v61 = vunpack.c.l.bf16 %v5818_v52  ;;  %6663 = vmatpush.bf16.msrb.mxu2 %v8426_v59 }
 0x74f   :  { %v5719_v58 = vunpack.c.l.bf16 %v5690_v35  ;;  %v5720_v0 = vunpack.c.h.bf16 %v5690_v35  ;;  %v5565_v39 = vpack.c.bf16 %v5531_v40, %v5530_v12  ;;  %v5434_v42 = vpop.f32.mrf.mxu3 }
 0x750   :  { %v5435_v41 = vadd.f32 %v5434_v42, %v10253_v51 }
 0x751   :  { %v5757_v32 = vmul.f32 %v10281_v45, %v5719_v58  ;;  %v5758_v43 = vmul.f32 %v10283_v24, %v5720_v0  ;;  %v5620_v18 = vunpack.c.l.bf16 %v5565_v39  ;;  %v5621_v11 = vunpack.c.h.bf16 %v5565_v39  ;;  %v5328_v48 = vpop.f32.mrf.mxu1 }
 0x752   :  { %v5489_v37 = vadd.f32 %v5488_v19, %v5435_v41  ;;  %v5380_v46 = vpop.f32.mrf.mxu2  ;;  %v5329_v63 = vadd.f32 %v5328_v48, %v10255_v25  ;;  %v10302_v58 = vunpack.c.l.bf16 %v5821_v10 }
 0x753   :  { %v5656_v22 = vadd.f32 %v5620_v18, %v5584_v7  ;;  %v5657_v49 = vadd.f32 %v5621_v11, %v5585_v5  ;;  %v5381_v44 = vadd.f32 %v5380_v46, %v5327_v54  ;;  %v5793_v27 = vpack.c.bf16 %v5758_v43, %v5757_v32 }
 0x754   :  { %v5533_v9 = vmax.f32 %v5489_v37, 0.0  ;;  %v5490_v21 = vpop.f32.mrf.mxu0  ;;  %v5589_v37 = vunpack.c.h.bf16 %v9965_v47 }
 0x755   :  { %v5691_v55 = vpack.c.bf16 %v5657_v49, %v5656_v22  ;;  %v5532_v56 = vmax.f32 %v5381_v44, 0.0  ;;  %v5822_v29 = vunpack.c.l.bf16 %v5793_v27  ;;  %v5823_v1 = vunpack.c.h.bf16 %v5793_v27 }
 0x757   :  { %v5721_v17 = vunpack.c.l.bf16 %v5691_v55  ;;  %v5722_v16 = vunpack.c.h.bf16 %v5691_v55  ;;  %v5566_v23 = vpack.c.bf16 %v5533_v9, %v5532_v56  ;;  %v5436_v28 = vpop.f32.mrf.mxu3  ;;  %v5860_v15 = vadd.f32 %v10298_v61, %v5822_v29  ;;  %v8424_v9 = vld [vmem:[%s10616_s20 + $0x38] sm:$0xff] }
 0x758   :  { %v5437_v13 = vadd.f32 %v5436_v28, %v10253_v51  ;;  %v5861_v48 = vadd.f32 %v10302_v58, %v5823_v1  ;;  %6603 = vmatpush.bf16.msrb.mxu1 %v8424_v9 }
 0x759   :  { %v5759_v40 = vmul.f32 %v10281_v45, %v5721_v17  ;;  %v5760_v19 = vmul.f32 %v10283_v24, %v5722_v16  ;;  %v5622_v35 = vunpack.c.l.bf16 %v5566_v23  ;;  %v5623_v12 = vunpack.c.h.bf16 %v5566_v23  ;;  %v5331_v50 = vpop.f32.mrf.mxu1 }
 0x75a   :  { %v5491_v0 = vadd.f32 %v5490_v21, %v5437_v13  ;;  %v5382_v8 = vpop.f32.mrf.mxu2  ;;  %v5332_v21 = vadd.f32 %v5331_v50, %v10255_v25  ;;  %v5950_v55 = vmax.f32 %v5860_v15, 0.0  ;;  %v5951_v28 = vmax.f32 %v5861_v48, 0.0 }
 0x75b   :  { %v5794_v39 = vpack.c.bf16 %v5760_v19, %v5759_v40  ;;  %v5658_v7 = vadd.f32 %v5622_v35, %v5586_v26  ;;  %v5659_v42 = vadd.f32 %v5623_v12, %v5587_v57  ;;  %v5383_v54 = vadd.f32 %v5382_v8, %v5329_v63 }
 0x75c   :  { %v5535_v5 = vmax.f32 %v5491_v0, 0.0  ;;  %v5493_v41 = vpop.f32.mrf.mxu0  ;;  %v5591_v15 = vunpack.c.h.bf16 %v9981_v34 }
 0x75d   :  { %v5825_v32 = vunpack.c.h.bf16 %v5794_v39  ;;  %v5692_v43 = vpack.c.bf16 %v5659_v42, %v5658_v7  ;;  %v5534_v18 = vmax.f32 %v5383_v54, 0.0  ;;  %v5824_v11 = vunpack.c.l.bf16 %v5794_v39 }
 0x75e   :  { %v5590_v54 = vunpack.c.l.bf16 %v9981_v34 }
 0x75f   :  { %v5723_v46 = vunpack.c.l.bf16 %v5692_v43  ;;  %v5724_v22 = vunpack.c.h.bf16 %v5692_v43  ;;  %v5567_v49 = vpack.c.bf16 %v5535_v5, %v5534_v18  ;;  %v5439_v44 = vpop.f32.mrf.mxu3  ;;  %v5862_v27 = vadd.f32 %v10298_v61, %v5824_v11 }
 0x760   :  { %v5440_v52 = vadd.f32 %v5439_v44, %v10253_v51  ;;  %v5863_v56 = vadd.f32 %v10302_v58, %v5825_v32 }
 0x761   :  { %v5624_v10 = vunpack.c.l.bf16 %v5567_v49  ;;  %v5625_v26 = vunpack.c.h.bf16 %v5567_v49  ;;  %v5333_v47 = vpop.f32.mrf.mxu1  ;;  %v5952_v17 = vmax.f32 %v5862_v27, 0.0  ;;  %v5761_v16 = vmul.f32 %v10281_v45, %v5723_v46 }
 0x762   :  { %v5494_v23 = vadd.f32 %v5493_v41, %v5440_v52  ;;  %v5385_v57 = vpop.f32.mrf.mxu2  ;;  %v5953_v59 = vmax.f32 %v5863_v56, 0.0  ;;  %v5762_v63 = vmul.f32 %v10283_v24, %v5724_v22  ;;  %v5334_v41 = vadd.f32 %v5333_v47, %v10255_v25 }
 0x763   :  { %v5660_v13 = vadd.f32 %v5624_v10, %v5588_v14  ;;  %v5661_v29 = vadd.f32 %v5625_v26, %v5589_v37  ;;  %v5386_v40 = vadd.f32 %v5385_v57, %v5332_v21  ;;  %v5986_v19 = vpack.c.bf16 %v5952_v17, %v5950_v55 }
 0x764   :  { %v5537_v35 = vmax.f32 %v5494_v23, 0.0  ;;  %v5495_v12 = vpop.f32.mrf.mxu0  ;;  %v5987_v50 = vpack.c.bf16 %v5953_v59, %v5951_v28  ;;  %v5795_v1 = vpack.c.bf16 %v5762_v63, %v5761_v16  ;;  %v5592_v17 = vunpack.c.l.bf16 %v9983_v3 }
 0x765   :  { %v5693_v0 = vpack.c.bf16 %v5661_v29, %v5660_v13  ;;  %v5536_v8 = vmax.f32 %v5386_v40, 0.0  ;;  %6153 = vmatmul.bf16.vlgmr.msra.gmra.mxu1 %v5986_v19  ;;  %6261 = vmatmul.bf16.vlgmr.msrb.gmra.mxu3 %v5986_v19  ;;  %v5593_v16 = vunpack.c.h.bf16 %v9983_v3  ;;  %v8423_v29 = vld [vmem:[%s10616_s20 + $0x30] sm:$0xff] }
 0x766   :  { %8092 = vmatmul.msk.bf16.vlgmr.msra.gmra.mxu2 %vm680_vm2, %v5987_v50  ;;  %8101 = vmatmul.msk.bf16.vlgmr.msrb.gmra.mxu0 %vm680_vm2, %v5987_v50  ;;  %v5826_v43 = vunpack.c.l.bf16 %v5795_v1  ;;  %v5827_v49 = vunpack.c.h.bf16 %v5795_v1 }
 0x767   :  { %v5725_v39 = vunpack.c.l.bf16 %v5693_v0  ;;  %v5726_v7 = vunpack.c.h.bf16 %v5693_v0  ;;  %v5568_v42 = vpack.c.bf16 %v5537_v35, %v5536_v8  ;;  %v5441_v5 = vpop.f32.mrf.mxu3  ;;  %6604 = vmatpush.bf16.msrb.mxu1 %v8423_v29 }
 0x768   :  { %v5442_v32 = vadd.f32 %v5441_v5, %v10253_v51  ;;  %v5864_v34 = vadd.f32 %v10298_v61, %v5826_v43  ;;  %v5865_v23 = vadd.f32 %v10302_v58, %v5827_v49 }
 0x769   :  { %v5626_v18 = vunpack.c.l.bf16 %v5568_v42  ;;  %v5627_v11 = vunpack.c.h.bf16 %v5568_v42  ;;  %v5336_v48 = vpop.f32.mrf.mxu1  ;;  %v5763_v14 = vmul.f32 %v10281_v45, %v5725_v39  ;;  %v5764_v37 = vmul.f32 %v10283_v24, %v5726_v7 }
 0x76a   :  { %v5496_v46 = vadd.f32 %v5495_v12, %v5442_v32  ;;  %v5387_v22 = vpop.f32.mrf.mxu2  ;;  %v5337_v40 = vadd.f32 %v5336_v48, %v10255_v25  ;;  %v5954_v35 = vmax.f32 %v5864_v34, 0.0  ;;  %v5955_v42 = vmax.f32 %v5865_v23, 0.0 }
 0x76b   :  { %v5662_v44 = vadd.f32 %v5626_v18, %v5590_v54  ;;  %v5663_v27 = vadd.f32 %v5627_v11, %v5591_v15  ;;  %v5388_v9 = vadd.f32 %v5387_v22, %v5334_v41  ;;  %v5796_v21 = vpack.c.bf16 %v5764_v37, %v5763_v14 }
 0x76c   :  { %v5539_v52 = vmax.f32 %v5496_v46, 0.0  ;;  %v5498_v55 = vpop.f32.mrf.mxu0 }
 0x76d   :  { %v5694_v56 = vpack.c.bf16 %v5663_v27, %v5662_v44  ;;  %v5538_v10 = vmax.f32 %v5388_v9, 0.0  ;;  %v5828_v26 = vunpack.c.l.bf16 %v5796_v21  ;;  %v5829_v47 = vunpack.c.h.bf16 %v5796_v21 }
 0x76e   :  { %v5594_v27 = vunpack.c.l.bf16 %v9999_v2 }
 0x76f   :  { %v5727_v57 = vunpack.c.l.bf16 %v5694_v56  ;;  %v5728_v28 = vunpack.c.h.bf16 %v5694_v56  ;;  %v5569_v59 = vpack.c.bf16 %v5539_v52, %v5538_v10  ;;  %v5444_v63 = vpop.f32.mrf.mxu3  ;;  %v5866_v13 = vadd.f32 %v10298_v61, %v5828_v26 }
 0x770   :  { %v5445_v19 = vadd.f32 %v5444_v63, %v10253_v51  ;;  %v5867_v12 = vadd.f32 %v10302_v58, %v5829_v47  ;;  %v5595_v52 = vunpack.c.h.bf16 %v9999_v2 }
 0x771   :  { %v5628_v3 = vunpack.c.l.bf16 %v5569_v59  ;;  %v5629_v50 = vunpack.c.h.bf16 %v5569_v59  ;;  %v5338_v1 = vpop.f32.mrf.mxu1  ;;  %v5956_v0 = vmax.f32 %v5866_v13, 0.0  ;;  %v5765_v8 = vmul.f32 %v10281_v45, %v5727_v57 }
 0x772   :  { %v5499_v39 = vadd.f32 %v5498_v55, %v5445_v19  ;;  %v5390_v7 = vpop.f32.mrf.mxu2  ;;  %v5957_v54 = vmax.f32 %v5867_v12, 0.0  ;;  %v5766_v5 = vmul.f32 %v10283_v24, %v5728_v28  ;;  %v5339_v21 = vadd.f32 %v5338_v1, %v10255_v25 }
 0x773   :  { %v5664_v41 = vadd.f32 %v5628_v3, %v5592_v17  ;;  %v5665_v15 = vadd.f32 %v5629_v50, %v5593_v16  ;;  %v5391_v32 = vadd.f32 %v5390_v7, %v5337_v40  ;;  %v5988_v43 = vpack.c.bf16 %v5956_v0, %v5954_v35 }
 0x774   :  { %v5541_v18 = vmax.f32 %v5499_v39, 0.0  ;;  %v5500_v11 = vpop.f32.mrf.mxu0  ;;  %v5989_v48 = vpack.c.bf16 %v5957_v54, %v5955_v42  ;;  %v5797_v14 = vpack.c.bf16 %v5766_v5, %v5765_v8  ;;  %v5596_v50 = vunpack.c.l.bf16 %v10001_v30  ;;  %v8422_v5 = vld [vmem:[%s10616_s20 + $0x28] sm:$0xff] }
 0x775   :  { %v5695_v37 = vpack.c.bf16 %v5665_v15, %v5664_v41  ;;  %v5540_v46 = vmax.f32 %v5391_v32, 0.0  ;;  %6158 = vmatmul.bf16.gmra.mxu1 %v5988_v43  ;;  %6266 = vmatmul.bf16.gmra.mxu3 %v5988_v43  ;;  %v5597_v1 = vunpack.c.h.bf16 %v10001_v30 }
 0x776   :  { %8093 = vmatmul.msk.bf16.gmra.mxu2 %vm680_vm2, %v5989_v48  ;;  %8102 = vmatmul.msk.bf16.gmra.mxu0 %vm680_vm2, %v5989_v48  ;;  %v5830_v34 = vunpack.c.l.bf16 %v5797_v14  ;;  %v5831_v57 = vunpack.c.h.bf16 %v5797_v14 }
 0x777   :  { %v5729_v22 = vunpack.c.l.bf16 %v5695_v37  ;;  %v5730_v49 = vunpack.c.h.bf16 %v5695_v37  ;;  %v5570_v44 = vpack.c.bf16 %v5541_v18, %v5540_v46  ;;  %v5446_v9 = vpop.f32.mrf.mxu3  ;;  %6605 = vmatpush.bf16.msrb.mxu1 %v8422_v5 }
 0x778   :  { %v5447_v55 = vadd.f32 %v5446_v9, %v10253_v51  ;;  %v5868_v2 = vadd.f32 %v10298_v61, %v5830_v34  ;;  %v5869_v0 = vadd.f32 %v10302_v58, %v5831_v57  ;;  %v5598_v57 = vunpack.c.l.bf16 %v10017_v60 }
 0x779   :  { %v5630_v56 = vunpack.c.l.bf16 %v5570_v44  ;;  %v5631_v10 = vunpack.c.h.bf16 %v5570_v44  ;;  %v5341_v26 = vpop.f32.mrf.mxu1  ;;  %v5767_v47 = vmul.f32 %v10281_v45, %v5729_v22  ;;  %v5768_v17 = vmul.f32 %v10283_v24, %v5730_v49 }
 0x77a   :  { %v5501_v16 = vadd.f32 %v5500_v11, %v5447_v55  ;;  %v5392_v23 = vpop.f32.mrf.mxu2  ;;  %v5342_v41 = vadd.f32 %v5341_v26, %v10255_v25  ;;  %v5958_v32 = vmax.f32 %v5868_v2, 0.0  ;;  %v5959_v22 = vmax.f32 %v5869_v0, 0.0 }
 0x77b   :  { %v5666_v28 = vadd.f32 %v5630_v56, %v5594_v27  ;;  %v5667_v59 = vadd.f32 %v5631_v10, %v5595_v52  ;;  %v5393_v63 = vadd.f32 %v5392_v23, %v5339_v21  ;;  %v5798_v13 = vpack.c.bf16 %v5768_v17, %v5767_v47 }
 0x77c   :  { %v5543_v29 = vmax.f32 %v5501_v16, 0.0  ;;  %v5503_v40 = vpop.f32.mrf.mxu0 }
 0x77d   :  { %v5696_v19 = vpack.c.bf16 %v5667_v59, %v5666_v28  ;;  %v5542_v35 = vmax.f32 %v5393_v63, 0.0  ;;  %v5832_v12 = vunpack.c.l.bf16 %v5798_v13  ;;  %v5833_v3 = vunpack.c.h.bf16 %v5798_v13 }
 0x77e   :  { %v5599_v63 = vunpack.c.h.bf16 %v10017_v60 }
 0x77f   :  { %v5731_v8 = vunpack.c.l.bf16 %v5696_v19  ;;  %v5732_v39 = vunpack.c.h.bf16 %v5696_v19  ;;  %v5571_v7 = vpack.c.bf16 %v5543_v29, %v5542_v35  ;;  %v5449_v42 = vpop.f32.mrf.mxu3  ;;  %v5870_v54 = vadd.f32 %v10298_v61, %v5832_v12 }
 0x780   :  { %v5450_v15 = vadd.f32 %v5449_v42, %v10253_v51  ;;  %v5871_v43 = vadd.f32 %v10302_v58, %v5833_v3 }
 0x781   :  { %v5632_v30 = vunpack.c.l.bf16 %v5571_v7  ;;  %v5633_v18 = vunpack.c.h.bf16 %v5571_v7  ;;  %v5343_v11 = vpop.f32.mrf.mxu1  ;;  %v5960_v48 = vmax.f32 %v5870_v54, 0.0  ;;  %v5769_v14 = vmul.f32 %v10281_v45, %v5731_v8 }
 0x782   :  { %v5504_v37 = vadd.f32 %v5503_v40, %v5450_v15  ;;  %v5395_v46 = vpop.f32.mrf.mxu2  ;;  %v5961_v49 = vmax.f32 %v5871_v43, 0.0  ;;  %v5770_v44 = vmul.f32 %v10283_v24, %v5732_v39  ;;  %v5344_v59 = vadd.f32 %v5343_v11, %v10255_v25 }
 0x783   :  { %v5668_v27 = vadd.f32 %v5632_v30, %v5596_v50  ;;  %v5669_v9 = vadd.f32 %v5633_v18, %v5597_v1  ;;  %v5396_v21 = vadd.f32 %v5395_v46, %v5342_v41  ;;  %v5990_v52 = vpack.c.bf16 %v5960_v48, %v5958_v32 }
 0x784   :  { %v5545_v55 = vmax.f32 %v5504_v37, 0.0  ;;  %v5505_v34 = vpop.f32.mrf.mxu0  ;;  %v5991_v56 = vpack.c.bf16 %v5961_v49, %v5959_v22  ;;  %v5799_v10 = vpack.c.bf16 %v5770_v44, %v5769_v14  ;;  %v5600_v43 = vunpack.c.l.bf16 %v10019_v20  ;;  %v8421_v22 = vld [vmem:[%s10616_s20 + $0x20] sm:$0xff] }
 0x785   :  { %v5697_v26 = vpack.c.bf16 %v5669_v9, %v5668_v27  ;;  %v5544_v47 = vmax.f32 %v5396_v21, 0.0  ;;  %6163 = vmatmul.bf16.gmra.mxu1 %v5990_v52  ;;  %6271 = vmatmul.bf16.gmra.mxu3 %v5990_v52  ;;  %v5601_v30 = vunpack.c.h.bf16 %v10019_v20 }
 0x786   :  { %8094 = vmatmul.msk.bf16.gmra.mxu2 %vm680_vm2, %v5991_v56  ;;  %8103 = vmatmul.msk.bf16.gmra.mxu0 %vm680_vm2, %v5991_v56  ;;  %v5834_v29 = vunpack.c.l.bf16 %v5799_v10  ;;  %v5835_v1 = vunpack.c.h.bf16 %v5799_v10 }
 0x787   :  { %v5733_v17 = vunpack.c.l.bf16 %v5697_v26  ;;  %v5734_v16 = vunpack.c.h.bf16 %v5697_v26  ;;  %v5572_v23 = vpack.c.bf16 %v5545_v55, %v5544_v47  ;;  %v5451_v28 = vpop.f32.mrf.mxu3  ;;  %6606 = vmatpush.bf16.msrb.mxu1 %v8421_v22 }
 0x788   :  { %v5452_v13 = vadd.f32 %v5451_v28, %v10253_v51  ;;  %v5872_v60 = vadd.f32 %v10298_v61, %v5834_v29  ;;  %v5873_v18 = vadd.f32 %v10302_v58, %v5835_v1 }
 0x789   :  { %v5634_v40 = vunpack.c.l.bf16 %v5572_v23  ;;  %v5635_v2 = vunpack.c.h.bf16 %v5572_v23  ;;  %v5346_v19 = vpop.f32.mrf.mxu1  ;;  %v5771_v35 = vmul.f32 %v10281_v45, %v5733_v17  ;;  %v5772_v12 = vmul.f32 %v10283_v24, %v5734_v16 }
 0x78a   :  { %v5506_v3 = vadd.f32 %v5505_v34, %v5452_v13  ;;  %v5397_v50 = vpop.f32.mrf.mxu2  ;;  %v5347_v49 = vadd.f32 %v5346_v19, %v10255_v25  ;;  %v5962_v27 = vmax.f32 %v5872_v60, 0.0  ;;  %v5963_v26 = vmax.f32 %v5873_v18, 0.0 }
 0x78b   :  { %v5670_v0 = vadd.f32 %v5634_v40, %v5598_v57  ;;  %v5671_v8 = vadd.f32 %v5635_v2, %v5599_v63  ;;  %v5398_v39 = vadd.f32 %v5397_v50, %v5344_v59  ;;  %v5800_v7 = vpack.c.bf16 %v5772_v12, %v5771_v35 }
 0x78c   :  { %v5547_v42 = vmax.f32 %v5506_v3, 0.0  ;;  %v5508_v54 = vpop.f32.mrf.mxu0  ;;  %v5602_v3 = vunpack.c.l.bf16 %v10035_v38 }
 0x78d   :  { %v5698_v5 = vpack.c.bf16 %v5671_v8, %v5670_v0  ;;  %v5546_v41 = vmax.f32 %v5398_v39, 0.0  ;;  %v5836_v15 = vunpack.c.l.bf16 %v5800_v7  ;;  %v5837_v32 = vunpack.c.h.bf16 %v5800_v7 }
 0x78e   :  { %v5603_v0 = vunpack.c.h.bf16 %v10035_v38 }
 0x78f   :  { %v5735_v11 = vunpack.c.l.bf16 %v5698_v5  ;;  %v5736_v48 = vunpack.c.h.bf16 %v5698_v5  ;;  %v5573_v14 = vpack.c.bf16 %v5547_v42, %v5546_v41  ;;  %v5454_v37 = vpop.f32.mrf.mxu3  ;;  %v5874_v46 = vadd.f32 %v10298_v61, %v5836_v15 }
 0x790   :  { %v5455_v44 = vadd.f32 %v5454_v37, %v10253_v51  ;;  %v5875_v9 = vadd.f32 %v10302_v58, %v5837_v32 }
 0x791   :  { %v5636_v20 = vunpack.c.l.bf16 %v5573_v14  ;;  %v5637_v21 = vunpack.c.h.bf16 %v5573_v14  ;;  %v5348_v52 = vpop.f32.mrf.mxu1  ;;  %v5964_v55 = vmax.f32 %v5874_v46, 0.0  ;;  %v5773_v34 = vmul.f32 %v10281_v45, %v5735_v11 }
 0x792   :  { %v5509_v56 = vadd.f32 %v5508_v54, %v5455_v44  ;;  %v5400_v10 = vpop.f32.mrf.mxu2  ;;  %v5965_v47 = vmax.f32 %v5875_v9, 0.0  ;;  %v5774_v17 = vmul.f32 %v10283_v24, %v5736_v48  ;;  %v5349_v1 = vadd.f32 %v5348_v52, %v10255_v25 }
 0x793   :  { %v5672_v16 = vadd.f32 %v5636_v20, %v5600_v43  ;;  %v5673_v23 = vadd.f32 %v5637_v21, %v5601_v30  ;;  %v5401_v57 = vadd.f32 %v5400_v10, %v5347_v49  ;;  %v5992_v28 = vpack.c.bf16 %v5964_v55, %v5962_v27 }
 0x794   :  { %v5549_v59 = vmax.f32 %v5509_v56, 0.0  ;;  %v5510_v63 = vpop.f32.mrf.mxu0  ;;  %v5993_v13 = vpack.c.bf16 %v5965_v47, %v5963_v26  ;;  %v5801_v29 = vpack.c.bf16 %v5774_v17, %v5773_v34  ;;  %v5604_v44 = vunpack.c.l.bf16 %v10037_v4  ;;  %v8425_v56 = vld [vmem:[%s10616_s20 + $0x40] sm:$0xff] }
 0x795   :  { %v5699_v40 = vpack.c.bf16 %v5673_v23, %v5672_v16  ;;  %v5548_v2 = vmax.f32 %v5401_v57, 0.0  ;;  %6168 = vmatmul.bf16.gmra.mxu1 %v5992_v28  ;;  %6276 = vmatmul.bf16.gmra.mxu3 %v5992_v28  ;;  %v5605_v27 = vunpack.c.h.bf16 %v10037_v4 }
 0x796   :  { %8095 = vmatmul.msk.bf16.gmra.mxu2 %vm680_vm2, %v5993_v13  ;;  %8104 = vmatmul.msk.bf16.gmra.mxu0 %vm680_vm2, %v5993_v13  ;;  %v5838_v39 = vunpack.c.l.bf16 %v5801_v29  ;;  %v5839_v32 = vunpack.c.h.bf16 %v5801_v29 }
 0x797   :  { %v5737_v19 = vunpack.c.l.bf16 %v5699_v40  ;;  %v5738_v35 = vunpack.c.h.bf16 %v5699_v40  ;;  %v5574_v12 = vpack.c.bf16 %v5549_v59, %v5548_v2  ;;  %v5456_v50 = vpop.f32.mrf.mxu3  ;;  %6664 = vmatpush.bf16.msrb.mxu2 %v8425_v56 }
 0x798   :  { %v5457_v8 = vadd.f32 %v5456_v50, %v10253_v51  ;;  %v5876_v38 = vadd.f32 %v10298_v61, %v5838_v39  ;;  %v5877_v9 = vadd.f32 %v10302_v58, %v5839_v32  ;;  %v5607_v32 = vunpack.c.h.bf16 %v10053_v53 }
 0x799   :  { %v5638_v7 = vunpack.c.l.bf16 %v5574_v12  ;;  %v5639_v42 = vunpack.c.h.bf16 %v5574_v12  ;;  %v5351_v54 = vpop.f32.mrf.mxu1  ;;  %v5775_v60 = vmul.f32 %v10281_v45, %v5737_v19  ;;  %v5776_v5 = vmul.f32 %v10283_v24, %v5738_v35 }
 0x79a   :  { %v5511_v41 = vadd.f32 %v5510_v63, %v5457_v8  ;;  %v5402_v15 = vpop.f32.mrf.mxu2  ;;  %v5352_v10 = vadd.f32 %v5351_v54, %v10255_v25  ;;  %v5966_v47 = vmax.f32 %v5876_v38, 0.0  ;;  %v5967_v13 = vmax.f32 %v5877_v9, 0.0 }
 0x79b   :  { %v5674_v43 = vadd.f32 %v5638_v7, %v5602_v3  ;;  %v5675_v30 = vadd.f32 %v5639_v42, %v5603_v0  ;;  %v5403_v18 = vadd.f32 %v5402_v15, %v5349_v1  ;;  %v5802_v11 = vpack.c.bf16 %v5776_v5, %v5775_v60 }
 0x79c   :  { %v5551_v48 = vmax.f32 %v5511_v41, 0.0  ;;  %v5513_v14 = vpop.f32.mrf.mxu0  ;;  %v5606_v60 = vunpack.c.l.bf16 %v10053_v53  ;;  %v8420_v41 = vld [vmem:[%s10616_s20 + $0x18] sm:$0xff] }
 0x79d   :  { %v5700_v37 = vpack.c.bf16 %v5675_v30, %v5674_v43  ;;  %v5550_v46 = vmax.f32 %v5403_v18, 0.0  ;;  %v5840_v22 = vunpack.c.l.bf16 %v5802_v11  ;;  %v5841_v49 = vunpack.c.h.bf16 %v5802_v11  ;;  %6607 = vmatpush.bf16.msrb.mxu1 %v8420_v41 }
 0x79f   :  { %v5739_v20 = vunpack.c.l.bf16 %v5700_v37  ;;  %v5740_v21 = vunpack.c.h.bf16 %v5700_v37  ;;  %v5575_v52 = vpack.c.bf16 %v5551_v48, %v5550_v46  ;;  %v5459_v55 = vpop.f32.mrf.mxu3  ;;  %v5878_v34 = vadd.f32 %v10298_v61, %v5840_v22 }
 0x7a0   :  { %v5460_v26 = vadd.f32 %v5459_v55, %v10253_v51  ;;  %v5879_v17 = vadd.f32 %v10302_v58, %v5841_v49 }
 0x7a1   :  { %v5640_v4 = vunpack.c.l.bf16 %v5575_v52  ;;  %v5641_v16 = vunpack.c.h.bf16 %v5575_v52  ;;  %v5353_v23 = vpop.f32.mrf.mxu1  ;;  %v5968_v57 = vmax.f32 %v5878_v34, 0.0  ;;  %v5777_v28 = vmul.f32 %v10281_v45, %v5739_v20 }
 0x7a2   :  { %v5514_v59 = vadd.f32 %v5513_v14, %v5460_v26  ;;  %v5405_v63 = vpop.f32.mrf.mxu2  ;;  %v5969_v29 = vmax.f32 %v5879_v17, 0.0  ;;  %v5778_v40 = vmul.f32 %v10283_v24, %v5740_v21  ;;  %v5354_v15 = vadd.f32 %v5353_v23, %v10255_v25 }
 0x7a3   :  { %v5676_v2 = vadd.f32 %v5640_v4, %v5604_v44  ;;  %v5677_v19 = vadd.f32 %v5641_v16, %v5605_v27  ;;  %v5406_v35 = vadd.f32 %v5405_v63, %v5352_v10  ;;  %v5994_v12 = vpack.c.bf16 %v5968_v57, %v5966_v47 }
 0x7a4   :  { %v5553_v3 = vmax.f32 %v5514_v59, 0.0  ;;  %v5515_v50 = vpop.f32.mrf.mxu0  ;;  %v5995_v1 = vpack.c.bf16 %v5969_v29, %v5967_v13  ;;  %v5803_v0 = vpack.c.bf16 %v5778_v40, %v5777_v28  ;;  %v5608_v10 = vunpack.c.l.bf16 %v10055_v6 }
 0x7a5   :  { %v5701_v8 = vpack.c.bf16 %v5677_v19, %v5676_v2  ;;  %v5552_v39 = vmax.f32 %v5406_v35, 0.0  ;;  %6173 = vmatmul.bf16.gmra.mxu1 %v5994_v12  ;;  %6281 = vmatmul.bf16.gmra.mxu3 %v5994_v12  ;;  %v5609_v26 = vunpack.c.h.bf16 %v10055_v6 }
 0x7a6   :  { %8096 = vmatmul.msk.bf16.gmra.mxu2 %vm680_vm2, %v5995_v1  ;;  %8105 = vmatmul.msk.bf16.gmra.mxu0 %vm680_vm2, %v5995_v1  ;;  %v5842_v30 = vunpack.c.l.bf16 %v5803_v0  ;;  %v5843_v22 = vunpack.c.h.bf16 %v5803_v0 }
 0x7a7   :  { %v5741_v7 = vunpack.c.l.bf16 %v5701_v8  ;;  %v5742_v42 = vunpack.c.h.bf16 %v5701_v8  ;;  %v5576_v54 = vpack.c.bf16 %v5553_v3, %v5552_v39  ;;  %v5461_v5 = vpop.f32.mrf.mxu3 }
 0x7a8   :  { %v5462_v43 = vadd.f32 %v5461_v5, %v10253_v51  ;;  %v5880_v21 = vadd.f32 %v10298_v61, %v5842_v30  ;;  %v5881_v47 = vadd.f32 %v10302_v58, %v5843_v22 }
 0x7a9   :  { %v5642_v18 = vunpack.c.l.bf16 %v5576_v54  ;;  %v5643_v11 = vunpack.c.h.bf16 %v5576_v54  ;;  %v5356_v48 = vpop.f32.mrf.mxu1  ;;  %v5779_v14 = vmul.f32 %v10281_v45, %v5741_v7  ;;  %v5780_v38 = vmul.f32 %v10283_v24, %v5742_v42 }
 0x7aa   :  { %v5516_v37 = vadd.f32 %v5515_v50, %v5462_v43  ;;  %v5407_v46 = vpop.f32.mrf.mxu2  ;;  %v5357_v28 = vadd.f32 %v5356_v48, %v10255_v25  ;;  %v5970_v63 = vmax.f32 %v5880_v21, 0.0  ;;  %v5971_v3 = vmax.f32 %v5881_v47, 0.0  ;;  %v8419_v48 = vld [vmem:[%s10616_s20 + $0x10] sm:$0xff] }
 0x7ab   :  { %v5678_v49 = vadd.f32 %v5642_v18, %v5606_v60  ;;  %v5679_v44 = vadd.f32 %v5643_v11, %v5607_v32  ;;  %v5408_v27 = vadd.f32 %v5407_v46, %v5354_v15  ;;  %v5804_v9 = vpack.c.bf16 %v5780_v38, %v5779_v14  ;;  %6608 = vmatpush.bf16.msrb.mxu1 %v8419_v48 }
 0x7ac   :  { %v5555_v20 = vmax.f32 %v5516_v37, 0.0  ;;  %v5518_v53 = vpop.f32.mrf.mxu0  ;;  %v5610_v18 = vunpack.c.l.bf16 %v10071_v62  ;;  %v5611_v38 = vunpack.c.h.bf16 %v10071_v62 }
 0x7ad   :  { %v5702_v52 = vpack.c.bf16 %v5679_v44, %v5678_v49  ;;  %v5554_v55 = vmax.f32 %v5408_v27, 0.0  ;;  %v5844_v34 = vunpack.c.l.bf16 %v5804_v9  ;;  %v5845_v56 = vunpack.c.h.bf16 %v5804_v9  ;;  %v8418_v9 = vld [vmem:[%s10616_s20 + $0x8] sm:$0xff] }
 0x7af   :  { %v5743_v17 = vunpack.c.l.bf16 %v5702_v52  ;;  %v5744_v4 = vunpack.c.h.bf16 %v5702_v52  ;;  %v5577_v16 = vpack.c.bf16 %v5555_v20, %v5554_v55  ;;  %v5464_v23 = vpop.f32.mrf.mxu3  ;;  %v5882_v57 = vadd.f32 %v10298_v61, %v5844_v34  ;;  %6609 = vmatpush.bf16.msrb.mxu1 %v8418_v9 }
 0x7b0   :  { %v5465_v59 = vadd.f32 %v5464_v23, %v10253_v51  ;;  %v5883_v13 = vadd.f32 %v10302_v58, %v5845_v56  ;;  %v5612_v23 = vunpack.c.l.bf16 %v10073_v36 }
 0x7b1   :  { %v5644_v29 = vunpack.c.l.bf16 %v5577_v16  ;;  %v5645_v40 = vunpack.c.h.bf16 %v5577_v16  ;;  %v5358_v2 = vpop.f32.mrf.mxu1  ;;  %v5972_v19 = vmax.f32 %v5882_v57, 0.0  ;;  %v5781_v6 = vmul.f32 %v10281_v45, %v5743_v17 }
 0x7b2   :  { %v5519_v35 = vadd.f32 %v5518_v53, %v5465_v59  ;;  %v5410_v12 = vpop.f32.mrf.mxu2  ;;  %v5973_v50 = vmax.f32 %v5883_v13, 0.0  ;;  %v5782_v1 = vmul.f32 %v10283_v24, %v5744_v4  ;;  %v5359_v14 = vadd.f32 %v5358_v2, %v10255_v25 }
 0x7b3   :  { %v5680_v0 = vadd.f32 %v5644_v29, %v5608_v10  ;;  %v5681_v8 = vadd.f32 %v5645_v40, %v5609_v26  ;;  %v5411_v39 = vadd.f32 %v5410_v12, %v5357_v28  ;;  %v5996_v7 = vpack.c.bf16 %v5972_v19, %v5970_v63 }
 0x7b4   :  { %v5557_v42 = vmax.f32 %v5519_v35, 0.0  ;;  %v5997_v54 = vpack.c.bf16 %v5973_v50, %v5971_v3  ;;  %v5805_v60 = vpack.c.bf16 %v5782_v1, %v5781_v6  ;;  %v5520_v15 = vpop.f32.mrf.mxu0  ;;  %v5613_v57 = vunpack.c.h.bf16 %v10073_v36 }
 0x7b5   :  { %v5703_v5 = vpack.c.bf16 %v5681_v8, %v5680_v0  ;;  %v5556_v41 = vmax.f32 %v5411_v39, 0.0  ;;  %6178 = vmatmul.bf16.gmra.mxu1 %v5996_v7  ;;  %6286 = vmatmul.bf16.gmra.mxu3 %v5996_v7 }
 0x7b6   :  { %8097 = vmatmul.msk.bf16.gmra.mxu2 %vm680_vm2, %v5997_v54  ;;  %8106 = vmatmul.msk.bf16.gmra.mxu0 %vm680_vm2, %v5997_v54  ;;  %v5846_v46 = vunpack.c.l.bf16 %v5805_v60  ;;  %v5847_v21 = vunpack.c.h.bf16 %v5805_v60 }
 0x7b7   :  { %v5745_v32 = vunpack.c.l.bf16 %v5703_v5  ;;  %v5746_v43 = vunpack.c.h.bf16 %v5703_v5  ;;  %v5578_v30 = vpack.c.bf16 %v5557_v42, %v5556_v41  ;;  %v5466_v11 = vpop.f32.mrf.mxu3 }
 0x7b8   :  { %v5467_v37 = vadd.f32 %v5466_v11, %v10253_v51  ;;  %v5884_v26 = vadd.f32 %v10298_v61, %v5846_v46  ;;  %v5885_v28 = vadd.f32 %v10302_v58, %v5847_v21 }
 0x7b9   :  { %v5646_v22 = vunpack.c.l.bf16 %v5578_v30  ;;  %v5647_v49 = vunpack.c.h.bf16 %v5578_v30  ;;  %v5783_v44 = vmul.f32 %v10281_v45, %v5745_v32  ;;  %v5784_v27 = vmul.f32 %v10283_v24, %v5746_v43  ;;  %v5361_v62 = vpop.f32.mrf.mxu1 }
 0x7ba   :  { %v5521_v20 = vadd.f32 %v5520_v15, %v5467_v37  ;;  %v5412_v53 = vpop.f32.mrf.mxu2  ;;  %v5362_v19 = vadd.f32 %v5361_v62, %v10255_v25  ;;  %v5974_v35 = vmax.f32 %v5884_v26, 0.0  ;;  %v5975_v39 = vmax.f32 %v5885_v28, 0.0 }
 0x7bb   :  { %v5682_v52 = vadd.f32 %v5646_v22, %v5610_v18  ;;  %v5683_v55 = vadd.f32 %v5647_v49, %v5611_v38  ;;  %v5413_v34 = vadd.f32 %v5412_v53, %v5359_v14  ;;  %v5806_v56 = vpack.c.bf16 %v5784_v27, %v5783_v44 }
 0x7bc   :  { %v5559_v10 = vmax.f32 %v5521_v20, 0.0  ;;  %v5523_v29 = vpop.f32.mrf.mxu0  ;;  %v5614_v37 = vunpack.c.l.bf16 %v10087_v33  ;;  %v5615_v49 = vunpack.c.h.bf16 %v10087_v33 }
 0x7bd   :  { %v5704_v47 = vpack.c.bf16 %v5683_v55, %v5682_v52  ;;  %v5558_v17 = vmax.f32 %v5413_v34, 0.0  ;;  %v5848_v4 = vunpack.c.l.bf16 %v5806_v56  ;;  %v5849_v16 = vunpack.c.h.bf16 %v5806_v56 }
 0x7bf   :  { %v5747_v59 = vunpack.c.l.bf16 %v5704_v47  ;;  %v5748_v63 = vunpack.c.h.bf16 %v5704_v47  ;;  %v5579_v13 = vpack.c.bf16 %v5559_v10, %v5558_v17  ;;  %v5469_v40 = vpop.f32.mrf.mxu3  ;;  %v5886_v2 = vadd.f32 %v10298_v61, %v5848_v4 }
 0x7c0   :  { %v5470_v6 = vadd.f32 %v5469_v40, %v10253_v51  ;;  %v5887_v12 = vadd.f32 %v10302_v58, %v5849_v16 }
 0x7c1   :  { %v5648_v3 = vunpack.c.l.bf16 %v5579_v13  ;;  %v5649_v50 = vunpack.c.h.bf16 %v5579_v13  ;;  %v5976_v1 = vmax.f32 %v5886_v2, 0.0  ;;  %v5785_v36 = vmul.f32 %v10281_v45, %v5747_v59  ;;  %v5363_v18 = vpop.f32.mrf.mxu1 }
 0x7c2   :  { %v5524_v0 = vadd.f32 %v5523_v29, %v5470_v6  ;;  %v5415_v8 = vpop.f32.mrf.mxu2  ;;  %v5977_v7 = vmax.f32 %v5887_v12, 0.0  ;;  %v5786_v42 = vmul.f32 %v10283_v24, %v5748_v63  ;;  %v5364_v22 = vadd.f32 %v5363_v18, %v10255_v25 }
 0x7c3   :  { %v5684_v54 = vadd.f32 %v5648_v3, %v5612_v23  ;;  %v5685_v60 = vadd.f32 %v5649_v50, %v5613_v57  ;;  %v5416_v5 = vadd.f32 %v5415_v8, %v5362_v19  ;;  %v5998_v41 = vpack.c.bf16 %v5976_v1, %v5974_v35 }
 0x7c4   :  { %v5561_v15 = vmax.f32 %v5524_v0, 0.0  ;;  %v5999_v32 = vpack.c.bf16 %v5977_v7, %v5975_v39  ;;  %v5807_v43 = vpack.c.bf16 %v5786_v42, %v5785_v36  ;;  %v5525_v53 = vpop.f32.mrf.mxu0  ;;  %v5616_v13 = vunpack.c.l.bf16 %v10089_v31 }
 0x7c5   :  { %v5705_v30 = vpack.c.bf16 %v5685_v60, %v5684_v54  ;;  %v5560_v11 = vmax.f32 %v5416_v5, 0.0  ;;  %6183 = vmatmul.bf16.gmra.mxu1 %v5998_v41  ;;  %6291 = vmatmul.bf16.gmra.mxu3 %v5998_v41  ;;  %v5617_v29 = vunpack.c.h.bf16 %v10089_v31 }
 0x7c6   :  { %8098 = vmatmul.msk.bf16.gmra.mxu2 %vm680_vm2, %v5999_v32  ;;  %8107 = vmatmul.msk.bf16.gmra.mxu0 %vm680_vm2, %v5999_v32  ;;  %v5850_v27 = vunpack.c.l.bf16 %v5807_v43  ;;  %v5851_v34 = vunpack.c.h.bf16 %v5807_v43  ;;  %v8417_v32 = vld [vmem:[%s10616_s20] sm:$0xff]  ;;  %s8746_s20 = smov 16  }
 0x7c7   :  { %v5749_v48 = vunpack.c.l.bf16 %v5705_v30  ;;  %v5750_v14 = vunpack.c.h.bf16 %v5705_v30  ;;  %v5580_v38 = vpack.c.bf16 %v5561_v15, %v5560_v11  ;;  %v5471_v46 = vpop.f32.mrf.mxu3  ;;  %6610 = vmatpush.bf16.msrb.mxu1 %v8417_v32 }
 0x7c8   :  { %v5472_v44 = vadd.f32 %v5471_v46, %v10253_v51  ;;  %v5888_v33 = vadd.f32 %v10298_v61, %v5850_v27  ;;  %v5889_v23 = vadd.f32 %v10302_v58, %v5851_v34 }
 0x7c9   :  { %v5650_v9 = vunpack.c.l.bf16 %v5580_v38  ;;  %v5651_v20 = vunpack.c.h.bf16 %v5580_v38  ;;  %v5787_v21 = vmul.f32 %v10281_v45, %v5749_v48  ;;  %v5788_v52 = vmul.f32 %v10283_v24, %v5750_v14 }
 0x7ca   :  { %v5526_v55 = vadd.f32 %v5525_v53, %v5472_v44  ;;  %v5417_v62 = vpop.f32.mrf.mxu2  ;;  %v5978_v40 = vmax.f32 %v5888_v33, 0.0  ;;  %v5979_v3 = vmax.f32 %v5889_v23, 0.0 }
 0x7cb   :  { %v5686_v56 = vadd.f32 %v5650_v9, %v5614_v37  ;;  %v5687_v10 = vadd.f32 %v5651_v20, %v5615_v49  ;;  %v5418_v26 = vadd.f32 %v5417_v62, %v5364_v22  ;;  %v5808_v47 = vpack.c.bf16 %v5788_v52, %v5787_v21  ;;  %v6022_v9 = vld [vmem:[#allocation16] sm:$0x3] }
 0x7cc   :  { %v5563_v25 = vmax.f32 %v5526_v55, 0.0  ;;  %v10473_v20 = vperm.slane %v6022_v9, 1 }
 0x7cd   :  { %v5706_v17 = vpack.c.bf16 %v5687_v10, %v5686_v56  ;;  %v5562_v51 = vmax.f32 %v5418_v26, 0.0  ;;  %v5852_v4 = vunpack.c.l.bf16 %v5808_v47  ;;  %v5853_v16 = vunpack.c.h.bf16 %v5808_v47 }
 0x7cf   :  { %v5751_v57 = vunpack.c.l.bf16 %v5706_v17  ;;  %v5752_v28 = vunpack.c.h.bf16 %v5706_v17  ;;  %v5581_v59 = vpack.c.bf16 %v5563_v25, %v5562_v51  ;;  %v5890_v63 = vadd.f32 %v10298_v61, %v5852_v4 }
 0x7d0   :  { %v5891_v2 = vadd.f32 %v10302_v58, %v5853_v16 }
 0x7d1   :  { %v5652_v19 = vunpack.c.l.bf16 %v5581_v59  ;;  %v5653_v6 = vunpack.c.h.bf16 %v5581_v59  ;;  %v5980_v35 = vmax.f32 %v5890_v63, 0.0  ;;  %v5789_v12 = vmul.f32 %v10281_v45, %v5751_v57 }
 0x7d2   :  { %v5981_v50 = vmax.f32 %v5891_v2, 0.0  ;;  %v5790_v1 = vmul.f32 %v10283_v24, %v5752_v28 }
 0x7d3   :  { %v5688_v36 = vadd.f32 %v5652_v19, %v5616_v13  ;;  %v5689_v0 = vadd.f32 %v5653_v6, %v5617_v29  ;;  %v6000_v8 = vpack.c.bf16 %v5980_v35, %v5978_v40 }
 0x7d4   :  { %v6001_v39 = vpack.c.bf16 %v5981_v50, %v5979_v3  ;;  %v5809_v31 = vpack.c.bf16 %v5790_v1, %v5789_v12 }
 0x7d5   :  { %v5707_v7 = vpack.c.bf16 %v5689_v0, %v5688_v36  ;;  %6188 = vmatmul.bf16.gmra.mxu1 %v6000_v8  ;;  %6296 = vmatmul.bf16.gmra.mxu3 %v6000_v8 }
 0x7d6   :  { %8099 = vmatmul.msk.bf16.gmra.mxu2 %vm680_vm2, %v6001_v39  ;;  %8108 = vmatmul.msk.bf16.gmra.mxu0 %vm680_vm2, %v6001_v39  ;;  %v5854_v41 = vunpack.c.l.bf16 %v5809_v31  ;;  %v5855_v15 = vunpack.c.h.bf16 %v5809_v31 }
 0x7d7   :  { %v5753_v42 = vunpack.c.l.bf16 %v5707_v7  ;;  %v5754_v54 = vunpack.c.h.bf16 %v5707_v7 }
 0x7d8   :  { %v5892_v18 = vadd.f32 %v10298_v61, %v5854_v41  ;;  %v5893_v48 = vadd.f32 %v10302_v58, %v5855_v15 }
 0x7d9   :  { %v5791_v60 = vmul.f32 %v10281_v45, %v5753_v42  ;;  %v5792_v5 = vmul.f32 %v10283_v24, %v5754_v54 }
 0x7da   :  { %v5982_v38 = vmax.f32 %v5892_v18, 0.0  ;;  %v5983_v37 = vmax.f32 %v5893_v48, 0.0 }
 0x7db   :  { %v5810_v43 = vpack.c.bf16 %v5792_v5, %v5791_v60 }
 0x7dd   :  { %v5856_v30 = vunpack.c.l.bf16 %v5810_v43  ;;  %v5857_v11 = vunpack.c.h.bf16 %v5810_v43 }
 0x7df   :  { %v5894_v14 = vadd.f32 %v10298_v61, %v5856_v30  ;;  %v5895_v45 = vadd.f32 %v10302_v58, %v5857_v11  ;;  %v10477_v61 = vperm.slane %v6022_v9, 0 }
 0x7e1   :  { %v5984_v24 = vmax.f32 %v5894_v14, 0.0  ;;  %v5985_v46 = vmax.f32 %v5895_v45, 0.0 }
 0x7e2   :  { %v6154_v22 = vpop.f32.mrf.mxu1 }
 0x7e3   :  { %v6316_v49 = vpop.f32.mrf.mxu0  ;;  %v6002_v44 = vpack.c.bf16 %v5984_v24, %v5982_v38  ;;  %v6003_v27 = vpack.c.bf16 %v5985_v46, %v5983_v37  ;;  %v6155_v62 = vadd.f32 %v6154_v22, %v10477_v61 }
 0x7e5   :  { %6193 = vmatmul.bf16.gmra.mxu1 %v6002_v44  ;;  %6301 = vmatmul.bf16.gmra.mxu3 %v6002_v44 }
 0x7e6   :  { %8100 = vmatmul.msk.bf16.gmra.mxu2 %vm680_vm2, %v6003_v27  ;;  %8109 = vmatmul.msk.bf16.gmra.mxu0 %vm680_vm2, %v6003_v27 }
 0x7e8   :  { %v6262_v58 = vpop.f32.mrf.mxu3 }
 0x7e9   :  { %v6208_v53 = vpop.f32.mrf.mxu2  ;;  %v6263_v21 = vadd.f32 %v6262_v58, %v10473_v20 }
 0x7ea   :  { %v6156_v52 = vpop.f32.mrf.mxu1  ;;  %v6209_v56 = vadd.f32 %v6208_v53, %v6155_v62 }
 0x7eb   :  { %v6318_v55 = vpop.f32.mrf.mxu0  ;;  %v6317_v34 = vadd.f32 %v6316_v49, %v6263_v21  ;;  %v6157_v26 = vadd.f32 %v6156_v52, %v10477_v61 }
 0x7ec   :  { %v6361_v17 = vmax.f32 %v6209_v56, 0.0 }
 0x7ed   :  { %v6362_v10 = vmax.f32 %v6317_v34, 0.0 }
 0x7ef   :  { %v6397_v57 = vpack.c.bf16 %v6362_v10, %v6361_v17 }
 0x7f0   :  { %v6264_v47 = vpop.f32.mrf.mxu3 }
 0x7f1   :  { %v6210_v25 = vpop.f32.mrf.mxu2  ;;  %v6265_v33 = vadd.f32 %v6264_v47, %v10473_v20  ;;  %v6453_v13 = vunpack.c.l.b16 %v6397_v57  ;;  %v6454_v40 = vunpack.c.h.b16 %v6397_v57 }
 0x7f2   :  { %v6211_v51 = vadd.f32 %v6210_v25, %v6157_v26  ;;  %v6159_v4 = vpop.f32.mrf.mxu1 }
 0x7f3   :  { %v6319_v16 = vadd.f32 %v6318_v55, %v6265_v33  ;;  %v6321_v23 = vpop.f32.mrf.mxu0  ;;  %v6160_v36 = vadd.f32 %v6159_v4, %v10477_v61 }
 0x7f4   :  { %v6363_v28 = vmax.f32 %v6211_v51, 0.0 }
 0x7f5   :  { %v6364_v59 = vmax.f32 %v6319_v16, 0.0 }
 0x7f7   :  { %v6398_v63 = vpack.c.bf16 %v6364_v59, %v6363_v28 }
 0x7f8   :  { %v6267_v29 = vpop.f32.mrf.mxu3 }
 0x7f9   :  { %v6455_v2 = vunpack.c.l.b16 %v6398_v63  ;;  %v6456_v19 = vunpack.c.h.b16 %v6398_v63  ;;  %v6213_v6 = vpop.f32.mrf.mxu2  ;;  %v6268_v35 = vadd.f32 %v6267_v29, %v10473_v20 }
 0x7fa   :  { %v6161_v12 = vpop.f32.mrf.mxu1  ;;  %v6214_v8 = vadd.f32 %v6213_v6, %v6160_v36 }
 0x7fb   :  { %v6489_v3 = vpack.c.b16 %v6455_v2, %v6453_v13  ;;  %v10484_v50 = vpack.c.b16 %v6456_v19, %v6454_v40  ;;  %v6323_v1 = vpop.f32.mrf.mxu0  ;;  %v6322_v0 = vadd.f32 %v6321_v23, %v6268_v35  ;;  %v6162_v7 = vadd.f32 %v6161_v12, %v10477_v61 }
 0x7fc   :  { %v6365_v60 = vmax.f32 %v6214_v8, 0.0 }
 0x7fd   :  { %6611 = vmatmul.bf16.vlgmr.msrb.gmra.mxu1 %v6489_v3  ;;  %8150 = vmatmul.msk.bf16.vlgmr.msrb.gmra.mxu2 %vm1104_vm3, %v10484_v50  ;;  %v6366_v39 = vmax.f32 %v6322_v0, 0.0 }
 0x7ff   :  { %v6399_v43 = vpack.c.bf16 %v6366_v39, %v6365_v60 }
 0x800   :  { %v6269_v31 = vpop.f32.mrf.mxu3 }
 0x801   :  { %v6215_v42 = vpop.f32.mrf.mxu2  ;;  %v6270_v54 = vadd.f32 %v6269_v31, %v10473_v20  ;;  %v6458_v14 = vunpack.c.h.b16 %v6399_v43  ;;  %v6457_v37 = vunpack.c.l.b16 %v6399_v43 }
 0x802   :  { %v6216_v5 = vadd.f32 %v6215_v42, %v6162_v7  ;;  %v6164_v41 = vpop.f32.mrf.mxu1 }
 0x803   :  { %v6324_v15 = vadd.f32 %v6323_v1, %v6270_v54  ;;  %v6326_v32 = vpop.f32.mrf.mxu0  ;;  %v6165_v9 = vadd.f32 %v6164_v41, %v10477_v61 }
 0x804   :  { %v6367_v30 = vmax.f32 %v6216_v5, 0.0 }
 0x805   :  { %v6368_v18 = vmax.f32 %v6324_v15, 0.0 }
 0x807   :  { %v6400_v11 = vpack.c.bf16 %v6368_v18, %v6367_v30 }
 0x808   :  { %v6272_v48 = vpop.f32.mrf.mxu3 }
 0x809   :  { %v6218_v45 = vpop.f32.mrf.mxu2  ;;  %v6273_v38 = vadd.f32 %v6272_v48, %v10473_v20  ;;  %v6460_v24 = vunpack.c.h.b16 %v6400_v11  ;;  %v6459_v46 = vunpack.c.l.b16 %v6400_v11 }
 0x80a   :  { %v6166_v22 = vpop.f32.mrf.mxu1  ;;  %v6219_v53 = vadd.f32 %v6218_v45, %v6165_v9 }
 0x80b   :  { %v6328_v49 = vpop.f32.mrf.mxu0  ;;  %v6492_v44 = vpack.c.b16 %v6460_v24, %v6458_v14  ;;  %v6491_v27 = vpack.c.b16 %v6459_v46, %v6457_v37  ;;  %v6327_v58 = vadd.f32 %v6326_v32, %v6273_v38  ;;  %v6167_v52 = vadd.f32 %v6166_v22, %v10477_v61 }
 0x80c   :  { %v6369_v56 = vmax.f32 %v6219_v53, 0.0 }
 0x80d   :  { %6823 = vrot.lane.b32.xlu0 %v6492_v44, %s8746_s20  ;;  %6616 = vmatmul.bf16.gmra.mxu1 %v6491_v27  ;;  %v6370_v21 = vmax.f32 %v6327_v58, 0.0  ;;  %s8756_s20 = smov 45  }
 0x80e   :  { %8151 = vmatmul.msk.bf16.gmra.mxu2 %vm1104_vm3, %v6492_v44 }
 0x80f   :  { %v6401_v33 = vpack.c.bf16 %v6370_v21, %v6369_v56 }
 0x810   :  { %v6274_v55 = vpop.f32.mrf.mxu3 }
 0x811   :  { %v6220_v62 = vpop.f32.mrf.mxu2  ;;  %v6275_v34 = vadd.f32 %v6274_v55, %v10473_v20  ;;  %v6462_v23 = vunpack.c.h.b16 %v6401_v33  ;;  %v6461_v63 = vunpack.c.l.b16 %v6401_v33 }
 0x812   :  { %v6221_v10 = vadd.f32 %v6220_v62, %v6167_v52  ;;  %v6169_v26 = vpop.f32.mrf.mxu1 }
 0x813   :  { %v6329_v47 = vadd.f32 %v6328_v49, %v6275_v34  ;;  %v6331_v25 = vpop.f32.mrf.mxu0  ;;  %v6170_v6 = vadd.f32 %v6169_v26, %v10477_v61 }
 0x814   :  { %v6371_v17 = vmax.f32 %v6221_v10, 0.0 }
 0x815   :  { %v6372_v51 = vmax.f32 %v6329_v47, 0.0 }
 0x817   :  { %v6402_v4 = vpack.c.bf16 %v6372_v51, %v6371_v17 }
 0x818   :  { %v6277_v16 = vpop.f32.mrf.mxu3 }
 0x819   :  { %v6223_v57 = vpop.f32.mrf.mxu2  ;;  %v6278_v28 = vadd.f32 %v6277_v16, %v10473_v20  ;;  %v6464_v59 = vunpack.c.h.b16 %v6402_v4  ;;  %v6463_v13 = vunpack.c.l.b16 %v6402_v4 }
 0x81a   :  { %v6171_v29 = vpop.f32.mrf.mxu1  ;;  %v6224_v12 = vadd.f32 %v6223_v57, %v6170_v6 }
 0x81b   :  { %v6333_v40 = vpop.f32.mrf.mxu0  ;;  %v6494_v2 = vpack.c.b16 %v6464_v59, %v6462_v23  ;;  %v6493_v19 = vpack.c.b16 %v6463_v13, %v6461_v63  ;;  %v6332_v35 = vadd.f32 %v6331_v25, %v6278_v28  ;;  %v6172_v1 = vadd.f32 %v6171_v29, %v10477_v61 }
 0x81c   :  { %v6373_v39 = vmax.f32 %v6224_v12, 0.0 }
 0x81d   :  { %6825 = vrot.lane.b32.xlu0 %v6494_v2, %s8737_s0  ;;  %6621 = vmatmul.bf16.gmra.mxu1 %v6493_v19  ;;  %v6374_v3 = vmax.f32 %v6332_v35, 0.0  ;;  %s8747_s0 = smov 48  }
 0x81e   :  { %8152 = vmatmul.msk.bf16.gmra.mxu2 %vm1104_vm3, %v6494_v2 }
 0x81f   :  { %v6403_v60 = vpack.c.bf16 %v6374_v3, %v6373_v39 }
 0x820   :  { %v6279_v36 = vpop.f32.mrf.mxu3 }
 0x821   :  { %v6225_v0 = vpop.f32.mrf.mxu2  ;;  %v6280_v8 = vadd.f32 %v6279_v36, %v10473_v20  ;;  %v6466_v43 = vunpack.c.h.b16 %v6403_v60  ;;  %v6465_v48 = vunpack.c.l.b16 %v6403_v60 }
 0x822   :  { %v6226_v7 = vadd.f32 %v6225_v0, %v6172_v1  ;;  %v6174_v31 = vpop.f32.mrf.mxu1 }
 0x823   :  { %v6334_v42 = vadd.f32 %v6333_v40, %v6280_v8  ;;  %v6336_v54 = vpop.f32.mrf.mxu0  ;;  %v6175_v46 = vadd.f32 %v6174_v31, %v10477_v61 }
 0x824   :  { %v6375_v5 = vmax.f32 %v6226_v7, 0.0 }
 0x825   :  { %v6376_v41 = vmax.f32 %v6334_v42, 0.0 }
 0x827   :  { %v6404_v15 = vpack.c.bf16 %v6376_v41, %v6375_v5 }
 0x828   :  { %v6282_v32 = vpop.f32.mrf.mxu3 }
 0x829   :  { %v6228_v30 = vpop.f32.mrf.mxu2  ;;  %v6283_v18 = vadd.f32 %v6282_v32, %v10473_v20  ;;  %v6468_v11 = vunpack.c.h.b16 %v6404_v15  ;;  %v6467_v14 = vunpack.c.l.b16 %v6404_v15 }
 0x82a   :  { %v6176_v45 = vpop.f32.mrf.mxu1  ;;  %v6229_v49 = vadd.f32 %v6228_v30, %v6175_v46 }
 0x82b   :  { %v6338_v38 = vpop.f32.mrf.mxu0  ;;  %v6496_v24 = vpack.c.b16 %v6468_v11, %v6466_v43  ;;  %v6495_v37 = vpack.c.b16 %v6467_v14, %v6465_v48  ;;  %v6337_v22 = vadd.f32 %v6336_v54, %v6283_v18  ;;  %v6177_v27 = vadd.f32 %v6176_v45, %v10477_v61 }
 0x82c   :  { %v6377_v21 = vmax.f32 %v6229_v49, 0.0 }
 0x82d   :  { %6827 = vrot.lane.b32.xlu1 %v6496_v24, %s8747_s0  ;;  %6626 = vmatmul.bf16.gmra.mxu1 %v6495_v37  ;;  %v6378_v44 = vmax.f32 %v6337_v22, 0.0  ;;  %s8758_s0 = smov 63  }
 0x82e   :  { %8153 = vmatmul.msk.bf16.gmra.mxu2 %vm1104_vm3, %v6496_v24 }
 0x82f   :  { %v6405_v56 = vpack.c.bf16 %v6378_v44, %v6377_v21 }
 0x830   :  { %v6284_v9 = vpop.f32.mrf.mxu3 }
 0x831   :  { %v6230_v58 = vpop.f32.mrf.mxu2  ;;  %v6285_v53 = vadd.f32 %v6284_v9, %v10473_v20  ;;  %v6470_v33 = vunpack.c.h.b16 %v6405_v56  ;;  %v6469_v16 = vunpack.c.l.b16 %v6405_v56 }
 0x832   :  { %v6231_v52 = vadd.f32 %v6230_v58, %v6177_v27  ;;  %v6179_v55 = vpop.f32.mrf.mxu1 }
 0x833   :  { %v6339_v62 = vadd.f32 %v6338_v38, %v6285_v53  ;;  %v6341_v34 = vpop.f32.mrf.mxu0  ;;  %v6180_v13 = vadd.f32 %v6179_v55, %v10477_v61 }
 0x834   :  { %v6379_v10 = vmax.f32 %v6231_v52, 0.0 }
 0x835   :  { %v6380_v26 = vmax.f32 %v6339_v62, 0.0 }
 0x837   :  { %v6406_v47 = vpack.c.bf16 %v6380_v26, %v6379_v10 }
 0x838   :  { %v6287_v25 = vpop.f32.mrf.mxu3 }
 0x839   :  { %v6233_v17 = vpop.f32.mrf.mxu2  ;;  %v6288_v51 = vadd.f32 %v6287_v25, %v10473_v20  ;;  %v6472_v4 = vunpack.c.h.b16 %v6406_v47  ;;  %v6471_v23 = vunpack.c.l.b16 %v6406_v47 }
 0x83a   :  { %v6181_v57 = vpop.f32.mrf.mxu1  ;;  %v6234_v40 = vadd.f32 %v6233_v17, %v6180_v13  ;;  %v8434_v17 = vld [vmem:[%s10617_s21 + $0x38] sm:$0xff] }
 0x83b   :  { %v6343_v28 = vpop.f32.mrf.mxu0  ;;  %v6498_v59 = vpack.c.b16 %v6472_v4, %v6470_v33  ;;  %v6497_v63 = vpack.c.b16 %v6471_v23, %v6469_v16  ;;  %v6342_v29 = vadd.f32 %v6341_v34, %v6288_v51  ;;  %v6182_v19 = vadd.f32 %v6181_v57, %v10477_v61  ;;  %v8435_v51 = vld [vmem:[%s10617_s21 + $0x40] sm:$0xff]  ;;  %6935 = vmatpush.bf16.msra.mxu3 %v8434_v17 }
 0x83c   :  { %v6381_v3 = vmax.f32 %v6234_v40, 0.0  ;;  %6956 = vmatpush.bf16.msra.mxu0 %v8435_v51  ;;  %v8431_v51 = vld [vmem:[%s10617_s21 + $0x20] sm:$0xff] }
 0x83d   :  { %6829 = vrot.lane.b32.xlu1 %v6498_v59, %s8748_s4  ;;  %6631 = vmatmul.bf16.gmra.mxu1 %v6497_v63  ;;  %v6382_v2 = vmax.f32 %v6342_v29, 0.0  ;;  %s8759_s4 = smov 72  }
 0x83e   :  { %8154 = vmatmul.msk.bf16.gmra.mxu2 %vm1104_vm3, %v6498_v59 }
 0x83f   :  { %v6407_v39 = vpack.c.bf16 %v6382_v2, %v6381_v3 }
 0x840   :  { %v6289_v6 = vpop.f32.mrf.mxu3 }
 0x841   :  { %v6235_v35 = vpop.f32.mrf.mxu2  ;;  %v6290_v12 = vadd.f32 %v6289_v6, %v10473_v20  ;;  %v6474_v60 = vunpack.c.h.b16 %v6407_v39  ;;  %v6473_v32 = vunpack.c.l.b16 %v6407_v39 }
 0x842   :  { %v6236_v1 = vadd.f32 %v6235_v35, %v6182_v19  ;;  %v6184_v36 = vpop.f32.mrf.mxu1 }
 0x843   :  { %v6344_v0 = vadd.f32 %v6343_v28, %v6290_v12  ;;  %v6346_v8 = vpop.f32.mrf.mxu0  ;;  %v6185_v14 = vadd.f32 %v6184_v36, %v10477_v61  ;;  %v8433_v12 = vld [vmem:[%s10617_s21 + $0x30] sm:$0xff] }
 0x844   :  { %v6383_v7 = vmax.f32 %v6236_v1, 0.0  ;;  %6936 = vmatpush.bf16.msra.mxu3 %v8433_v12 }
 0x845   :  { %v6384_v31 = vmax.f32 %v6344_v0, 0.0 }
 0x847   :  { %v6408_v42 = vpack.c.bf16 %v6384_v31, %v6383_v7 }
 0x848   :  { %v6292_v54 = vpop.f32.mrf.mxu3 }
 0x849   :  { %v6238_v5 = vpop.f32.mrf.mxu2  ;;  %v6293_v41 = vadd.f32 %v6292_v54, %v10473_v20  ;;  %v6476_v15 = vunpack.c.h.b16 %v6408_v42  ;;  %v6475_v43 = vunpack.c.l.b16 %v6408_v42 }
 0x84a   :  { %v6186_v30 = vpop.f32.mrf.mxu1  ;;  %v6239_v38 = vadd.f32 %v6238_v5, %v6185_v14 }
 0x84b   :  { %v6348_v18 = vpop.f32.mrf.mxu0  ;;  %v6500_v11 = vpack.c.b16 %v6476_v15, %v6474_v60  ;;  %v6499_v48 = vpack.c.b16 %v6475_v43, %v6473_v32  ;;  %v6347_v45 = vadd.f32 %v6346_v8, %v6293_v41  ;;  %v6187_v37 = vadd.f32 %v6186_v30, %v10477_v61 }
 0x84c   :  { %v6385_v44 = vmax.f32 %v6239_v38, 0.0 }
 0x84d   :  { %6831 = vrot.lane.b32.xlu2 %v6500_v11, %s8749_s9  ;;  %6636 = vmatmul.bf16.gmra.mxu1 %v6499_v48  ;;  %v6386_v24 = vmax.f32 %v6347_v45, 0.0 }
 0x84e   :  { %8155 = vmatmul.msk.bf16.gmra.mxu2 %vm1104_vm3, %v6500_v11 }
 0x84f   :  { %v6409_v53 = vpack.c.bf16 %v6386_v24, %v6385_v44 }
 0x850   :  { %v6294_v46 = vpop.f32.mrf.mxu3 }
 0x851   :  { %v6240_v22 = vpop.f32.mrf.mxu2  ;;  %v6295_v49 = vadd.f32 %v6294_v46, %v10473_v20  ;;  %v6478_v56 = vunpack.c.h.b16 %v6409_v53  ;;  %v6477_v25 = vunpack.c.l.b16 %v6409_v53 }
 0x852   :  { %v6241_v27 = vadd.f32 %v6240_v22, %v6187_v37  ;;  %v6189_v9 = vpop.f32.mrf.mxu1 }
 0x853   :  { %v6349_v58 = vadd.f32 %v6348_v18, %v6295_v49  ;;  %v6351_v21 = vpop.f32.mrf.mxu0  ;;  %v6190_v57 = vadd.f32 %v6189_v9, %v10477_v61 }
 0x854   :  { %v6387_v52 = vmax.f32 %v6241_v27, 0.0  ;;  %v8432_v27 = vld [vmem:[%s10617_s21 + $0x28] sm:$0xff] }
 0x855   :  { %v6388_v55 = vmax.f32 %v6349_v58, 0.0  ;;  %6937 = vmatpush.bf16.msra.mxu3 %v8432_v27 }
 0x857   :  { %v6410_v62 = vpack.c.bf16 %v6388_v55, %v6387_v52 }
 0x858   :  { %v6297_v34 = vpop.f32.mrf.mxu3 }
 0x859   :  { %v6243_v10 = vpop.f32.mrf.mxu2  ;;  %v6298_v26 = vadd.f32 %v6297_v34, %v10473_v20  ;;  %v6480_v47 = vunpack.c.h.b16 %v6410_v62  ;;  %v6479_v33 = vunpack.c.l.b16 %v6410_v62  ;;  %6938 = vmatpush.bf16.msra.mxu3 %v8431_v51 }
 0x85a   :  { %v6191_v4 = vpop.f32.mrf.mxu1  ;;  %v6244_v59 = vadd.f32 %v6243_v10, %v6190_v57 }
 0x85b   :  { %v6502_v16 = vpack.c.b16 %v6480_v47, %v6478_v56  ;;  %v6501_v23 = vpack.c.b16 %v6479_v33, %v6477_v25  ;;  %v6352_v28 = vadd.f32 %v6351_v21, %v6298_v26  ;;  %v6353_v63 = vpop.f32.mrf.mxu0  ;;  %v6192_v29 = vadd.f32 %v6191_v4, %v10477_v61 }
 0x85c   :  { %v6389_v6 = vmax.f32 %v6244_v59, 0.0 }
 0x85d   :  { %6833 = vrot.lane.b32.xlu2 %v6502_v16, %s8750_s18  ;;  %6641 = vmatmul.bf16.gmra.mxu1 %v6501_v23  ;;  %v6390_v13 = vmax.f32 %v6352_v28, 0.0 }
 0x85e   :  { %8156 = vmatmul.msk.bf16.gmra.mxu2 %vm1104_vm3, %v6502_v16 }
 0x85f   :  { %v6411_v36 = vpack.c.bf16 %v6390_v13, %v6389_v6 }
 0x860   :  { %v6299_v40 = vpop.f32.mrf.mxu3 }
 0x861   :  { %v6245_v2 = vpop.f32.mrf.mxu2  ;;  %v6300_v19 = vadd.f32 %v6299_v40, %v10473_v20  ;;  %v6482_v42 = vunpack.c.h.b16 %v6411_v36  ;;  %v6481_v41 = vunpack.c.l.b16 %v6411_v36 }
 0x862   :  { %v6246_v35 = vadd.f32 %v6245_v2, %v6192_v29  ;;  %v6194_v1 = vpop.f32.mrf.mxu1 }
 0x863   :  { %v6354_v3 = vadd.f32 %v6353_v63, %v6300_v19  ;;  %v6356_v7 = vpop.f32.mrf.mxu0  ;;  %v6195_v30 = vadd.f32 %v6194_v1, %v10477_v61  ;;  %v8430_v63 = vld [vmem:[%s10617_s21 + $0x18] sm:$0xff] }
 0x864   :  { %v6391_v0 = vmax.f32 %v6246_v35, 0.0  ;;  %6939 = vmatpush.bf16.msra.mxu3 %v8430_v63  ;;  %v8429_v35 = vld [vmem:[%s10617_s21 + $0x10] sm:$0xff] }
 0x865   :  { %v6392_v8 = vmax.f32 %v6354_v3, 0.0 }
 0x867   :  { %v6412_v39 = vpack.c.bf16 %v6392_v8, %v6391_v0  ;;  %v8428_v0 = vld [vmem:[%s10617_s21 + $0x8] sm:$0xff] }
 0x868   :  { %v6302_v31 = vpop.f32.mrf.mxu3  ;;  %6940 = vmatpush.bf16.msra.mxu3 %v8429_v35 }
 0x869   :  { %v6248_v54 = vpop.f32.mrf.mxu2  ;;  %v6303_v60 = vadd.f32 %v6302_v31, %v10473_v20  ;;  %v6484_v5 = vunpack.c.h.b16 %v6412_v39  ;;  %v6483_v15 = vunpack.c.l.b16 %v6412_v39 }
 0x86a   :  { %v6196_v11 = vpop.f32.mrf.mxu1  ;;  %v6249_v48 = vadd.f32 %v6248_v54, %v6195_v30 }
 0x86b   :  { %v6504_v32 = vpack.c.b16 %v6484_v5, %v6482_v42  ;;  %v6503_v43 = vpack.c.b16 %v6483_v15, %v6481_v41  ;;  %v6357_v18 = vadd.f32 %v6356_v7, %v6303_v60  ;;  %v6197_v14 = vadd.f32 %v6196_v11, %v10477_v61  ;;  %v6358_v46 = vpop.f32.mrf.mxu0  ;;  %v8427_v7 = vld [vmem:[%s10617_s21] sm:$0xff]  ;;  %s8757_s21 = smov 54  }
 0x86c   :  { %v6393_v49 = vmax.f32 %v6249_v48, 0.0  ;;  %6941 = vmatpush.bf16.msra.mxu3 %v8428_v0 }
 0x86d   :  { %6835 = vrot.lane.b32.xlu0 %v6504_v32, %s8751_s13  ;;  %6646 = vmatmul.bf16.gmra.mxu1 %v6503_v43  ;;  %v6394_v38 = vmax.f32 %v6357_v18, 0.0 }
 0x86e   :  { %8157 = vmatmul.msk.bf16.gmra.mxu2 %vm1104_vm3, %v6504_v32 }
 0x86f   :  { %v6413_v9 = vpack.c.bf16 %v6394_v38, %v6393_v49 }
 0x870   :  { %v6304_v45 = vpop.f32.mrf.mxu3  ;;  %6942 = vmatpush.bf16.msra.mxu3 %v8427_v7 }
 0x871   :  { %v6250_v24 = vpop.f32.mrf.mxu2  ;;  %v6305_v37 = vadd.f32 %v6304_v45, %v10473_v20  ;;  %v6486_v52 = vunpack.c.h.b16 %v6413_v9  ;;  %v6485_v55 = vunpack.c.l.b16 %v6413_v9 }
 0x872   :  { %v6251_v22 = vadd.f32 %v6250_v24, %v6197_v14 }
 0x873   :  { %v6359_v44 = vadd.f32 %v6358_v46, %v6305_v37 }
 0x874   :  { %v6395_v58 = vmax.f32 %v6251_v22, 0.0 }
 0x875   :  { %v6396_v53 = vmax.f32 %v6359_v44, 0.0 }
 0x877   :  { %v6414_v21 = vpack.c.bf16 %v6396_v53, %v6395_v58 }
 0x879   :  { %v6488_v61 = vunpack.c.h.b16 %v6414_v21  ;;  %v6487_v62 = vunpack.c.l.b16 %v6414_v21 }
 0x87a   :  { %v6612_v34 = vpop.f32.mrf.mxu1 }
 0x87b   :  { %v6505_v56 = vpack.c.b16 %v6487_v62, %v6485_v55  ;;  %v6506_v20 = vpack.c.b16 %v6488_v61, %v6486_v52 }
 0x87d   :  { %6651 = vmatmul.bf16.gmra.mxu1 %v6505_v56  ;;  %8195 = vmatmul.msk.bf16.vlgmr.msra.gmra.mxu0 %vm680_vm2, %v6506_v20 }
 0x87e   :  { %8158 = vmatmul.msk.bf16.gmra.mxu2 %vm1104_vm3, %v6506_v20 }
 0x87f   :  { %v6824_v15 = vpop.permute.xlu0 %6823 }
 0x880   :  { %v6666_v10 = vpop.f32.mrf.mxu2  ;;  %v6838_v14 = vsel %vm680_vm2, %v10484_v50, %v6824_v15 }
 0x881   :  { %v10541_v26 = vadd.f32 %v6666_v10, %v6612_v34 }
 0x882   :  { %v6614_v47 = vpop.f32.mrf.mxu1 }
 0x888   :  { %v6668_v25 = vpop.f32.mrf.mxu2 }
 0x889   :  { %v10543_v33 = vadd.f32 %v6668_v25, %v6614_v47 }
 0x88a   :  { %v6617_v17 = vpop.f32.mrf.mxu1 }
 0x88f   :  { %v6826_v48 = vpop.permute.xlu0 %6825 }
 0x890   :  { %v6840_v38 = vsel %vm1104_vm3, %v6838_v14, %v6826_v48 }
 0x891   :  { %v6671_v4 = vpop.f32.mrf.mxu2 }
 0x892   :  { %v6672_v16 = vadd.f32 %v6671_v4, %v6617_v17  ;;  %v6619_v23 = vpop.f32.mrf.mxu1 }
 0x894   :  { %6713 = vrot.lane.b32.xlu1 %v6672_v16, %s8752_s15 }
 0x899   :  { %v6673_v57 = vpop.f32.mrf.mxu2 }
 0x89a   :  { %v6674_v28 = vadd.f32 %v6673_v57, %v6619_v23  ;;  %v6622_v59 = vpop.f32.mrf.mxu1 }
 0x89c   :  { %6715 = vrot.lane.b32.xlu2 %v6674_v28, %s8752_s15 }
 0x89f   :  { %v6828_v32 = vpop.permute.xlu1 %6827 }
 0x8a0   :  { %v6843_v37 = vsel %vm6841_vm4, %v6840_v38, %v6828_v32 }
 0x8a1   :  { %v6676_v13 = vpop.f32.mrf.mxu2 }
 0x8a2   :  { %v6677_v29 = vadd.f32 %v6676_v13, %v6622_v59  ;;  %v6624_v40 = vpop.f32.mrf.mxu1 }
 0x8a4   :  { %6721 = vrot.lane.b32.xlu0 %v6677_v29, %s8753_s16  ;;  %v8465_v29 = vld [vmem:[#allocation17] ss:$0 sm:$0xff] }
 0x8a7   :  { %v6832_v11 = vpop.permute.xlu2 %6831 }
 0x8a9   :  { %v6678_v2 = vpop.f32.mrf.mxu2 }
 0x8aa   :  { %v6679_v19 = vadd.f32 %v6678_v2, %v6624_v40  ;;  %v6627_v6 = vpop.f32.mrf.mxu1 }
 0x8ac   :  { %6723 = vrot.lane.b32.xlu1 %v6679_v19, %s8753_s16 }
 0x8af   :  { %v6830_v45 = vpop.permute.xlu1 %6829 }
 0x8b0   :  { %v6846_v49 = vsel %vm6844_vm5, %v6843_v37, %v6830_v45 }
 0x8b1   :  { %v6681_v12 = vpop.f32.mrf.mxu2  ;;  %v6849_v27 = vsel %vm6847_vm6, %v6846_v49, %v6832_v11 }
 0x8b2   :  { %v6682_v3 = vadd.f32 %v6681_v12, %v6627_v6  ;;  %v6629_v1 = vpop.f32.mrf.mxu1 }
 0x8b4   :  { %6729 = vrot.lane.b32.xlu2 %v6682_v3, %s8754_s26 }
 0x8b7   :  { %v6834_v44 = vpop.permute.xlu2 %6833 }
 0x8b8   :  { %v6852_v9 = vsel %vm6850_vm7, %v6849_v27, %v6834_v44 }
 0x8b9   :  { %v6683_v36 = vpop.f32.mrf.mxu2 }
 0x8ba   :  { %v6684_v8 = vadd.f32 %v6683_v36, %v6629_v1  ;;  %v6632_v39 = vpop.f32.mrf.mxu1  ;;  %v8466_v1 = vld [vmem:[%s10619_s23] ss:$0 sm:$0xff]  ;;  %s8760_s23 = smov 81  }
 0x8bc   :  { %6731 = vrot.lane.b32.xlu0 %v6684_v8, %s8754_s26 }
 0x8c1   :  { %v6686_v31 = vpop.f32.mrf.mxu2 }
 0x8c2   :  { %v6687_v42 = vadd.f32 %v6686_v31, %v6632_v39  ;;  %v6634_v54 = vpop.f32.mrf.mxu1 }
 0x8c4   :  { %6737 = vrot.lane.b32.xlu1 %v6687_v42, %s8755_s27 }
 0x8c9   :  { %v6688_v60 = vpop.f32.mrf.mxu2 }
 0x8ca   :  { %v6689_v5 = vadd.f32 %v6688_v60, %v6634_v54  ;;  %v6637_v41 = vpop.f32.mrf.mxu1 }
 0x8cc   :  { %6739 = vrot.lane.b32.xlu2 %v6689_v5, %s8755_s27 }
 0x8d1   :  { %v6691_v43 = vpop.f32.mrf.mxu2 }
 0x8d2   :  { %v6692_v30 = vadd.f32 %v6691_v43, %v6637_v41  ;;  %v6639_v18 = vpop.f32.mrf.mxu1 }
 0x8d4   :  { %6745 = vrot.lane.b32.xlu0 %v6692_v30, %s8756_s20 }
 0x8d9   :  { %v6693_v24 = vpop.f32.mrf.mxu2 }
 0x8da   :  { %v6694_v46 = vadd.f32 %v6693_v24, %v6639_v18  ;;  %v6642_v22 = vpop.f32.mrf.mxu1 }
 0x8dc   :  { %6747 = vrot.lane.b32.xlu1 %v6694_v46, %s8756_s20 }
 0x8df   :  { %v6836_v58 = vpop.permute.xlu0 %6835 }
 0x8e0   :  { %v6855_v53 = vsel %vm6853_vm8, %v6852_v9, %v6836_v58 }
 0x8e1   :  { %v6696_v21 = vpop.f32.mrf.mxu2  ;;  %6943 = vmatmul.bf16.vlgmr.msra.gmra.mxu3 %v6855_v53 }
 0x8e2   :  { %v6697_v50 = vadd.f32 %v6696_v21, %v6642_v22  ;;  %v6644_v52 = vpop.f32.mrf.mxu1 }
 0x8e4   :  { %6753 = vrot.lane.b32.xlu2 %v6697_v50, %s8757_s21 }
 0x8e9   :  { %v6698_v61 = vpop.f32.mrf.mxu2 }
 0x8ea   :  { %v6699_v55 = vadd.f32 %v6698_v61, %v6644_v52  ;;  %v6647_v62 = vpop.f32.mrf.mxu1  ;;  %v8467_v61 = vld [vmem:[#allocation2] ss:$0 sm:$0xff] }
 0x8ec   :  { %6755 = vrot.lane.b32.xlu0 %v6699_v55, %s8757_s21 }
 0x8f1   :  { %v6701_v34 = vpop.f32.mrf.mxu2 }
 0x8f2   :  { %v6702_v56 = vadd.f32 %v6701_v34, %v6647_v62  ;;  %v6649_v20 = vpop.f32.mrf.mxu1 }
 0x8f4   :  { %6761 = vrot.lane.b32.xlu1 %v6702_v56, %s8758_s0 }
 0x8f6   :  { %v6716_v63 = vpop.permute.xlu2 %6715 }
 0x8f7   :  { %v6777_v30 = vsel %vm6775_vm10, %v10543_v33, %v6716_v63 }
 0x8f9   :  { %v6703_v10 = vpop.f32.mrf.mxu2 }
 0x8fa   :  { %v6704_v47 = vadd.f32 %v6703_v10, %v6649_v20  ;;  %v6652_v25 = vpop.f32.mrf.mxu1  ;;  %v6958_v35 = vpop.f32.mrf.mxu0 }
 0x8fc   :  { %6763 = vrot.lane.b32.xlu2 %v6704_v47, %s8758_s0 }
 0x901   :  { %v6706_v17 = vpop.f32.mrf.mxu2 }
 0x902   :  { %v6707_v51 = vadd.f32 %v6706_v17, %v6652_v25  ;;  %v6654_v4 = vpop.f32.mrf.mxu1  ;;  %v6960_v43 = vpop.f32.mrf.mxu0 }
 0x904   :  { %6769 = vrot.lane.b32.xlu0 %v6707_v51, %s8759_s4 }
 0x906   :  { %v6714_v57 = vpop.permute.xlu1 %6713 }
 0x907   :  { %v6776_v39 = vsel %vm6775_vm10, %v10541_v26, %v6714_v57 }
 0x909   :  { %v6708_v16 = vpop.f32.mrf.mxu2 }
 0x90a   :  { %v6709_v23 = vadd.f32 %v6708_v16, %v6654_v4 }
 0x90c   :  { %6771 = vrot.lane.b32.xlu1 %v6709_v23, %s8759_s4 }
 0x90e   :  { %v6730_v2 = vpop.permute.xlu2 %6729 }
 0x916   :  { %v6722_v28 = vpop.permute.xlu0 %6721 }
 0x917   :  { %v6779_v31 = vsel %vm6778_vm9, %v6776_v39, %v6722_v28 }
 0x918   :  { %v6782_v5 = vsel %vm6781_vm11, %v6779_v31, %v6730_v2 }
 0x91e   :  { %v6724_v59 = vpop.permute.xlu1 %6723 }
 0x91f   :  { %v6780_v48 = vsel %vm6778_vm9, %v6777_v30, %v6724_v59 }
 0x926   :  { %v6740_v7 = vpop.permute.xlu2 %6739 }
 0x92e   :  { %v6732_v13 = vpop.permute.xlu0 %6731 }
 0x92f   :  { %v6783_v45 = vsel %vm6781_vm11, %v6780_v48, %v6732_v13 }
 0x930   :  { %v6785_v33 = vsel %vm324_vm1, %v6783_v45, %v6740_v7 }
 0x936   :  { %v6738_v40 = vpop.permute.xlu1 %6737 }
 0x937   :  { %v6784_v15 = vsel %vm324_vm1, %v6782_v5, %v6738_v40  ;;  %vm6995_vm1 = vcmask 670720  }
 0x93e   :  { %v6754_v18 = vpop.permute.xlu2 %6753 }
 0x946   :  { %v6746_v12 = vpop.permute.xlu0 %6745 }
 0x947   :  { %v6787_v32 = vsel %vm6786_vm12, %v6784_v15, %v6746_v12 }
 0x948   :  { %v6790_v14 = vsel %vm6789_vm13, %v6787_v32, %v6754_v18 }
 0x94e   :  { %v6748_v0 = vpop.permute.xlu1 %6747 }
 0x94f   :  { %v6788_v49 = vsel %vm6786_vm12, %v6785_v33, %v6748_v0 }
 0x956   :  { %v6764_v9 = vpop.permute.xlu2 %6763 }
 0x95e   :  { %v6756_v60 = vpop.permute.xlu0 %6755 }
 0x95f   :  { %v6791_v44 = vsel %vm6789_vm13, %v6788_v49, %v6756_v60 }
 0x960   :  { %v6794_v53 = vsel %vm6792_vm15, %v6791_v44, %v6764_v9 }
 0x964   :  { %v6944_v19 = vpop.f32.mrf.mxu3 }
 0x965   :  { %v6945_v6 = vadd.f32 %v8465_v29, %v6944_v19 }
 0x966   :  { %v6762_v26 = vpop.permute.xlu1 %6761 }
 0x967   :  { %v6959_v3 = vadd.f32 %v6958_v35, %v6945_v6  ;;  %v6793_v38 = vsel %vm6792_vm15, %v6790_v14, %v6762_v26 }
 0x969   :  { %v6963_v36 = vmax.f32 %v6959_v3, 0.0 }
 0x96b   :  { %v6969_v8 = vmul.f32 %v8466_v1, %v6963_v36 }
 0x96c   :  { %v6946_v42 = vpop.f32.mrf.mxu3 }
 0x96d   :  { %v6971_v54 = vsel %vm680_vm2, %v6969_v8, 0.0  ;;  %v6947_v41 = vadd.f32 %v8465_v29, %v6946_v42 }
 0x96e   :  { %6972 = vadd.xlane.f32.xlu1 %v6971_v54 }
 0x96f   :  { %v6961_v11 = vadd.f32 %v6960_v43, %v6947_v41 }
 0x971   :  { %v6964_v46 = vmax.f32 %v6961_v11, 0.0 }
 0x973   :  { %v6970_v27 = vmul.f32 %v8466_v1, %v6964_v46 }
 0x975   :  { %v6974_v50 = vsel %vm680_vm2, %v6970_v27, 0.0 }
 0x976   :  { %v6770_v24 = vpop.permute.xlu0 %6769 }
 0x977   :  { %v6796_v37 = vsel %vm6795_vm14, %v6793_v38, %v6770_v24 }
 0x978   :  { %v6799_v22 = vsel %vm6798_vm0, %v6796_v37, -inf }
 0x979   :  { %6800 = vmax.xlane.f32.xlu2 %v6799_v22 }
 0x97e   :  { %v6772_v58 = vpop.permute.xlu1 %6771 }
 0x97f   :  { %v6797_v21 = vsel %vm6795_vm14, %v6794_v53, %v6772_v58 }
 0x980   :  { %v6802_v52 = vsel %vm6798_vm0, %v6797_v21, -inf }
 0x981   :  { %6975 = vadd.xlane.f32.xlu2 %v6974_v50  ;;  %6803 = vmax.xlane.f32.xlu0 %v6802_v52 }
 0x9e1   :  { %v6973_v55 = vpop.xlane.xlu1 %6972 }
 0x9e2   :  { %v6981_v62 = vadd.f32 %v8467_v61, %v6973_v55 }
 0x9e4   :  { %8468 = vtanh.f32 %v6981_v62 }
 0x9ea   :  { %v8469_v34 = vpop.eup %8468 }
 0x9eb   :  { %6987 = vrot.lane.b32.xlu1 %v8469_v34, %s8760_s23 }
 0x9ec   :  { %v6801_v56 = vpop.xlane.xlu2 %6800 }
 0x9ed   :  { %v6805_v20 = vsub.f32 %v6796_v37, %v6801_v56 }
 0x9ef   :  { %v6807_v10 = vmul.f32 1.442695, %v6805_v20 }
 0x9f1   :  { %8470 = vpow2.f32 %v6807_v10 }
 0x9f4   :  { %v6804_v47 = vpop.xlane.xlu0 %6803  ;;  %v6976_v57 = vpop.xlane.xlu2 %6975 }
 0x9f5   :  { %v6806_v25 = vsub.f32 %v6797_v21, %v6804_v47  ;;  %v6982_v28 = vadd.f32 %v8467_v61, %v6976_v57 }
 0x9f7   :  { %v8471_v17 = vpop.eup %8470  ;;  %v6809_v51 = vmul.f32 1.442695, %v6806_v25 }
 0x9f8   :  { %v6811_v4 = vsel %vm6798_vm0, %v8471_v17, 0.0 }
 0x9f9   :  { %8472 = vpow2.f32 %v6809_v51  ;;  %6812 = vadd.xlane.f32.xlu2 %v6811_v4 }
 0x9fa   :  { %8474 = vtanh.f32 %v6982_v28 }
 0x9ff   :  { %v8473_v16 = vpop.eup %8472 }
 0xa00   :  { %v6814_v23 = vsel %vm6798_vm0, %v8473_v16, 0.0  ;;  %v8475_v59 = vpop.eup %8474 }
 0xa01   :  { %6815 = vadd.xlane.f32.xlu0 %v6814_v23 }
 0xa11   :  { %6989 = vrot.lane.b32.xlu2 %v8475_v59, %s8760_s23 }
 0xa5d   :  { %v6988_v19 = vpop.permute.xlu1 %6987 }
 0xa6c   :  { %v6813_v63 = vpop.xlane.xlu2 %6812 }
 0xa6d   :  { %8476 = vlog2.f32 %v6813_v63 }
 0xa73   :  { %v8477_v13 = vpop.eup %8476 }
 0xa74   :  { %v6818_v29 = vmul.f32 0.6931472, %v8477_v13  ;;  %v6816_v40 = vpop.xlane.xlu0 %6815  ;;  %v6990_v36 = vpop.permute.xlu2 %6989 }
 0xa75   :  { %8478 = vlog2.f32 %v6816_v40 }
 0xa76   :  { %v6821_v2 = vsub.f32 %v6805_v20, %v6818_v29 }
 0xa78   :  { %v6993_v6 = vsel %vm6798_vm0, %v6821_v2, %v6988_v19 }
 0xa79   :  { %v6996_v35 = vsel %vm6995_vm1, %v6993_v6, 0.0 }
 0xa7a   :  { %6998 = vst [vmem:[%s10621_s25] sm:$0xff] %v6996_v35 }
 0xa7b   :  { %v8479_v12 = vpop.eup %8478 }
 0xa7c   :  { %v6820_v3 = vmul.f32 0.6931472, %v8479_v12 }
 0xa7e   :  { %v6822_v1 = vsub.f32 %v6806_v25, %v6820_v3 }
 0xa80   :  { %v6994_v0 = vsel %vm6798_vm0, %v6822_v1, %v6990_v36 }
 0xa81   :  { %v6997_v8 = vsel %vm6995_vm1, %v6994_v0, 0.0 }
 0xa82   :  { %6999 = vst [vmem:[%s10621_s25 + $0x8] sm:$0xff] %v6997_v8 }
 0xa83   :  { %7004 = vsyncpa [#allocation4], 1 }
 0xa84   :  { %7005 = vsyncpa [#allocation6], 1 }
 0xa85   :  { %7006 = vsyncpa [#allocation9], 1 }
 0xa86   :  { %7007 = vsyncpa [#allocation12], 1 }
 0xa87   :  { %7008 = vsyncpa [#allocation15], 1 }
 0xa88   :  { %7009 = vsyncpa [#allocation18], 1 }

</bundles_post_ra>
